<compile_context>
chip_gen: v5e
topology: v5e:2x2
jax: 0.10.0
libtpu: 0.0.40
codegen_flags: <defaults>
</compile_context>

<pallas_src>
import functools

import numpy as np
import jax
import jax.numpy as jnp
from jax.experimental import pallas as pl
from jax.experimental.pallas import tpu as pltpu

EPS = 1e-5
LANES = 128
NCORES = 2   # leading "parallel" grid axis (2 TCs on v7x; harmless serial loop on v5e/v6e)


def _round_up(x, m):
    return ((x + m - 1) // m) * m


# --------------------------- in-kernel helpers -------------------------------

def _bn_scale_shift(stats_ref, g_ref, be_ref, inv_count):
    """Per-channel affine (scale, shift) from accumulated (sum, sum_sq)."""
    mean = stats_ref[0:1, :] * inv_count
    var = jnp.maximum(stats_ref[1:2, :] * inv_count - mean * mean, 0.0)
    scale = g_ref[...] * jax.lax.rsqrt(var + EPS)
    shift = be_ref[...] - mean * scale
    return scale, shift


# ------------------------------ Pallas kernels --------------------------------

def _conv1_stats_kernel(x_ref, w1_ref, s1_ref):
    """Phase 1: bn1 batch statistics of conv1 output (sum, sum of squares)."""
    @pl.when(pl.program_id(1) == 0)
    def _():
        s1_ref[...] = jnp.zeros_like(s1_ref)

    y = jnp.dot(x_ref[...], w1_ref[...], preferred_element_type=jnp.float32)
    s1_ref[...] += jnp.concatenate(
        [jnp.sum(y, axis=0, keepdims=True),
         jnp.sum(y * y, axis=0, keepdims=True)], axis=0)


def _mid_kernel(x_ref, w1_ref, w2_ref, wd_ref, s1_ref, g1_ref, be1_ref, m_ref,
                y2_ref, dr_ref, s2_ref, sd_ref,
                *, tm, tme, steps, offsets, inv_l):
    """conv1(recompute)+bn1+relu -> conv2 (3x3) and identity-downsample conv
    (3x3), plus bn2 / bnD statistics accumulation (per core)."""
    c = pl.program_id(0)
    i = pl.program_id(1)

    @pl.when(i == 0)
    def _():
        s2_ref[...] = jnp.zeros_like(s2_ref)
        sd_ref[...] = jnp.zeros_like(sd_ref)

    r0 = pl.multiple_of((c * steps + i) * tm, tm)

    # bn1 affine from batch stats (conv1 bias omitted: cancels under batch-mean).
    sc1, sh1 = _bn_scale_shift(s1_ref, g1_ref, be1_ref, inv_l)

    # Recompute conv1 (1x1 == matmul) on the halo-extended row window (bf16 MXU).
    xe = x_ref[pl.ds(r0, tme), :]                                   # (tme, cp) bf16
    y1 = jnp.dot(xe, w1_ref[...], preferred_element_type=jnp.float32)
    y1n = jnp.maximum(y1 * sc1 + sh1, 0.0).astype(jnp.bfloat16)     # cast once

    # 3x3 VALID convs as ONE K = 9*Cp MXU contraction each: 9 shifted row
    # windows concatenated along lanes, built directly in bf16 (no f32 slabs,
    # no HBM im2col, no 9-matmul accumulation loop).
    slab_y = jnp.concatenate([y1n[d:d + tm, :] for d in offsets], axis=1)
    slab_x = jnp.concatenate([xe[d:d + tm, :] for d in offsets], axis=1)
    y2 = jnp.dot(slab_y, w2_ref[...], preferred_element_type=jnp.float32)
    dr = jnp.dot(slab_x, wd_ref[...], preferred_element_type=jnp.float32)

    # bf16 HBM intermediates (halved write/read traffic).  Statistics are taken
    # over the stored (quantized) values so bn2/bnD exactly describe what the
    # consumer kernels read; accumulation stays in f32.
    y2q = y2.astype(jnp.bfloat16)
    drq = dr.astype(jnp.bfloat16)
    y2_ref[...] = y2q
    dr_ref[...] = drq

    m = m_ref[...]                                                  # (tm, 1) validity
    y2f = y2q.astype(jnp.float32)
    drf = drq.astype(jnp.float32)
    y2m = y2f * m
    drm = drf * m
    s2_ref[...] += jnp.concatenate(
        [jnp.sum(y2m, axis=0, keepdims=True),
         jnp.sum(y2m * y2f, axis=0, keepdims=True)], axis=0)
    sd_ref[...] += jnp.concatenate(
        [jnp.sum(drm, axis=0, keepdims=True),
         jnp.sum(drm * drf, axis=0, keepdims=True)], axis=0)


def _conv3_kernel(y2_ref, w3_ref, s2_ref, g2_ref, be2_ref, m_ref,
                  y3_ref, s3_ref, *, inv_m2):
    """bn2+relu -> conv3 (1x1), emitting y3 (bf16) and bn3 statistics."""
    @pl.when(pl.program_id(1) == 0)
    def _():
        s3_ref[...] = jnp.zeros_like(s3_ref)

    sc2, sh2 = _bn_scale_shift(s2_ref, g2_ref, be2_ref, inv_m2)
    y2n = jnp.maximum(y2_ref[...].astype(jnp.float32) * sc2 + sh2, 0.0)
    y3 = jnp.dot(y2n.astype(jnp.bfloat16), w3_ref[...],
                 preferred_element_type=jnp.float32)

    y3q = y3.astype(jnp.bfloat16)
    y3_ref[...] = y3q

    m = m_ref[...]
    y3f = y3q.astype(jnp.float32)
    y3m = y3f * m
    s3_ref[...] += jnp.concatenate(
        [jnp.sum(y3m, axis=0, keepdims=True),
         jnp.sum(y3m * y3f, axis=0, keepdims=True)], axis=0)


def _final_kernel(y3_ref, dr_ref, s3_ref, g3_ref, be3_ref,
                  sd_ref, gd_ref, bed_ref, o_ref, *, inv_m2):
    """Epilogue: bn3+relu ; bnD affine on downsample ; add ; final relu."""
    sc3, sh3 = _bn_scale_shift(s3_ref, g3_ref, be3_ref, inv_m2)
    scd, shd = _bn_scale_shift(sd_ref, gd_ref, bed_ref, inv_m2)
    y3n = jnp.maximum(y3_ref[...].astype(jnp.float32) * sc3 + sh3, 0.0)
    dn = dr_ref[...].astype(jnp.float32) * scd + shd
    o_ref[...] = jnp.maximum(y3n + dn, 0.0)


# --------------------------------- wrapper ------------------------------------

def _cparams(sem, est_bytes):
    limit = int(min(max(3 * est_bytes + (8 << 20), 32 << 20), 64 << 20))
    return pltpu.CompilerParams(dimension_semantics=sem, vmem_limit_bytes=limit)


def block_forward(x_nchw, params, *, tm=256):
    n, c_in, h, w = x_nchw.shape
    assert h >= 3 and w >= 3
    assert tm % 8 == 0
    c_mid = params["w1"].shape[1]
    c_exp = params["w3"].shape[1]
    cp = _round_up(max(c_in, c_mid, c_exp, LANES), LANES)

    ho, wo = h - 2, w - 2
    hw = h * w
    l_pix = n * hw                      # pixels seen by conv1 / bn1
    m2 = n * ho * wo                    # pixels seen by bn2 / bn3 / bnD
    lt = _round_up(l_pix, NCORES * tm)
    steps = lt // (NCORES * tm)
    halo = _round_up(2 * w + 2, 8)      # 3x3 halo in flattened rows
    tme = tm + halo
    lbuf = lt + halo
    offsets = tuple(ky * w + kx for ky in range(3) for kx in range(3))

    f32, bf16 = jnp.float32, jnp.bfloat16

    # ---- layout plumbing (XLA glue): NCHW -> NHWC, channel pad to 128 lanes,
    #      flatten pixels to rows, zero-pad rows for tiling + halo ------------
    x_nhwc = jnp.transpose(x_nchw, (0, 2, 3, 1)).astype(f32)
    xf = jnp.zeros((lbuf, cp), f32).at[:l_pix, :c_in].set(
        x_nhwc.reshape(l_pix, c_in)).astype(bf16)

    def pad2(a, rows, cols, dtype):
        return jnp.zeros((rows, cols), f32).at[:a.shape[0], :a.shape[1]].set(
            a).astype(dtype)

    w1p = pad2(params["w1"], cp, cp, bf16)
    w3p = pad2(params["w3"], cp, cp, bf16)
    w2p = jnp.zeros((9, cp, cp), f32).at[:, :c_mid, :c_mid].set(
        params["w2"]).reshape(9 * cp, cp).astype(bf16)
    wdp = jnp.zeros((9, cp, cp), f32).at[:, :c_in, :c_exp].set(
        params["wd"]).reshape(9 * cp, cp).astype(bf16)

    g1 = pad2(params["g1"], 1, cp, f32); be1 = pad2(params["be1"], 1, cp, f32)
    g2 = pad2(params["g2"], 1, cp, f32); be2 = pad2(params["be2"], 1, cp, f32)
    g3 = pad2(params["g3"], 1, cp, f32); be3 = pad2(params["be3"], 1, cp, f32)
    gd = pad2(params["gd"], 1, cp, f32); bed = pad2(params["bed"], 1, cp, f32)

    # Exact int32 row-validity mask (flat row r is a valid 3x3-VALID output
    # pixel iff r < N*H*W, (r mod H*W) < (H-2)*W and (r mod W) < W-2).
    r = jnp.arange(lt, dtype=jnp.int32)
    p = r % hw
    mask = (((r < l_pix) & (p < ho * w) & ((p % w) < wo))
            .astype(f32).reshape(lt, 1))

    # ---- specs -----------------------------------------------------------------
    def row2(cols):                       # row tile on the (core, step) grid
        return pl.BlockSpec((tm, cols), lambda c, i: (c * steps + i, 0))

    def res2(shape):                      # VMEM-resident operand on that grid
        return pl.BlockSpec(shape, lambda c, i: (0,) * len(shape))

    stat_out_spec = pl.BlockSpec((None, 2, cp), lambda c, i: (c, 0, 0))
    stat_out_shape = jax.ShapeDtypeStruct((NCORES, 2, cp), f32)
    grid2 = (NCORES, steps)

    w_bytes = (cp * cp + 2 * 9 * cp * cp) * 2
    k1_est = 4 * tm * cp * 2 + cp * cp * 2
    k2_est = (lbuf * cp * 2 + w_bytes + 4 * tm * cp * 2
              + 2 * tm * 9 * cp * 2 + tme * cp * 6)
    k3_est = 8 * tm * cp * 2 + cp * cp * 2 + 2 * tm * cp * 4
    k4_est = 8 * tm * cp * 4

    # ---- kernel 1: bn1 batch statistics ---------------------------------------
    stats1 = pl.pallas_call(
        _conv1_stats_kernel,
        grid=grid2,
        in_specs=[row2(cp), res2((cp, cp))],
        out_specs=stat_out_spec,
        out_shape=stat_out_shape,
        compiler_params=_cparams(("parallel", "arbitrary"), k1_est),
    )(xf, w1p).sum(axis=0)

    # ---- kernel 2: fused conv1+bn1+relu -> conv2 & downsample conv + stats ----
    k2 = functools.partial(_mid_kernel, tm=tm, tme=tme, steps=steps,
                           offsets=offsets, inv_l=1.0 / l_pix)
    y2raw, draw, stats2_pc, statsd_pc = pl.pallas_call(
        k2,
        grid=grid2,
        in_specs=[res2((lbuf, cp)), res2((cp, cp)),
                  res2((9 * cp, cp)), res2((9 * cp, cp)),
                  res2((2, cp)), res2((1, cp)), res2((1, cp)),
                  row2(1)],
        out_specs=[row2(cp), row2(cp), stat_out_spec, stat_out_spec],
        out_shape=[jax.ShapeDtypeStruct((lt, cp), bf16),
                   jax.ShapeDtypeStruct((lt, cp), bf16),
                   stat_out_shape, stat_out_shape],
        compiler_params=_cparams(("parallel", "arbitrary"), k2_est),
    )(xf, w1p, w2p, wdp, stats1, g1, be1, mask)
    stats2 = stats2_pc.sum(axis=0)
    statsd = statsd_pc.sum(axis=0)

    # ---- kernel 3: bn2+relu -> conv3 (emits y3 bf16) + bn3 statistics ----------
    k3 = functools.partial(_conv3_kernel, inv_m2=1.0 / m2)
    y3raw, stats3_pc = pl.pallas_call(
        k3,
        grid=grid2,
        in_specs=[row2(cp), res2((cp, cp)), res2((2, cp)),
                  res2((1, cp)), res2((1, cp)), row2(1)],
        out_specs=[row2(cp), stat_out_spec],
        out_shape=[jax.ShapeDtypeStruct((lt, cp), bf16), stat_out_shape],
        compiler_params=_cparams(("parallel", "arbitrary"), k3_est),
    )(y2raw, w3p, stats2, g2, be2, mask)
    stats3 = stats3_pc.sum(axis=0)

    # ---- kernel 4: epilogue: bn3+relu ; bnD ; add ; relu -----------------------
    row1 = pl.BlockSpec((tm, cp), lambda i: (i, 0))

    def res1(shape):
        return pl.BlockSpec(shape, lambda i: (0,) * len(shape))

    k4 = functools.partial(_final_kernel, inv_m2=1.0 / m2)
    out_ext = pl.pallas_call(
        k4,
        grid=(lt // tm,),
        in_specs=[row1, row1,
                  res1((2, cp)), res1((1, cp)), res1((1, cp)),
                  res1((2, cp)), res1((1, cp)), res1((1, cp))],
        out_specs=row1,
        out_shape=jax.ShapeDtypeStruct((lt, cp), f32),
        compiler_params=_cparams(("parallel",), k4_est),
    )(y3raw, draw, stats3, g3, be3, statsd, gd, bed)

    # ---- layout plumbing: drop invalid rows / padded lanes, back to NCHW ------
    out = out_ext[:l_pix].reshape(n, h, w, cp)[:, :ho, :wo, :c_exp]
    return jnp.transpose(out, (0, 3, 1, 2))


# --------------------------- parameters & reference ---------------------------

def init_params(key, in_channels, out_channels, expansion=4):
    assert in_channels == out_channels  # required by the reference __init__ wiring
    c_in, c_mid, c_exp = in_channels, out_channels, out_channels * expansion
    ks = jax.random.split(key, 16)

    def nrm(k, shape, scale=0.1):
        return scale * jax.random.normal(k, shape, jnp.float32)

    return {
        # conv weights stored as (Cin, Cout) for 1x1 and (9, Cin, Cout) for 3x3
        "w1": nrm(ks[0], (c_in, c_mid)),
        "b1": nrm(ks[1], (1, c_mid)),        # consumed only by the reference:
        "g1": 1.0 + nrm(ks[2], (1, c_mid)),  # conv bias cancels under batch BN
        "be1": nrm(ks[3], (1, c_mid)),
        "w2": nrm(ks[4], (9, c_mid, c_mid)),
        "b2": nrm(ks[5], (1, c_mid)),
        "g2": 1.0 + nrm(ks[6], (1, c_mid)),
        "be2": nrm(ks[7], (1, c_mid)),
        "w3": nrm(ks[8], (c_mid, c_exp)),
        "b3": nrm(ks[9], (1, c_exp)),
        "g3": 1.0 + nrm(ks[10], (1, c_exp)),
        "be3": nrm(ks[11], (1, c_exp)),
        "wd": nrm(ks[12], (9, c_in, c_exp)),
        "bd": nrm(ks[13], (1, c_exp)),
        "gd": 1.0 + nrm(ks[14], (1, c_exp)),
        "bed": nrm(ks[15], (1, c_exp)),
    }


def block_reference(x_nchw, params):
    # Pure-JAX reference (lax.conv).  Matmul inputs are quantized to bf16 and
    # the conv2/conv3/convD outputs are quantized to bf16 to mirror the
    # kernel's bf16 MXU operands and bf16 HBM intermediates; bias-add, BN and
    # ReLU stay in f32.  Conv biases are INCLUDED here (the kernel drops them),
    # so the assert also validates bias-cancellation under training-mode BN.
    f32, bf16 = jnp.float32, jnp.bfloat16
    x = jnp.transpose(x_nchw, (0, 2, 3, 1)).astype(f32)

    def conv(z, w_hwio, b, quantize):
        y = jax.lax.conv_general_dilated(
            z.astype(bf16), w_hwio.astype(bf16), window_strides=(1, 1),
            padding="VALID", dimension_numbers=("NHWC", "HWIO", "NHWC"),
            preferred_element_type=f32)
        if quantize:   # mirror the kernel's bf16 HBM intermediate storage
            y = y.astype(bf16).astype(f32)
        return y + b.reshape(1, 1, 1, -1)

    def bn(y, g, be):
        mean = jnp.mean(y, axis=(0, 1, 2), keepdims=True)
        var = jnp.mean((y - mean) ** 2, axis=(0, 1, 2), keepdims=True)
        return (g.reshape(1, 1, 1, -1) * ((y - mean) * jax.lax.rsqrt(var + EPS))
                + be.reshape(1, 1, 1, -1))

    c_in, c_mid = params["w1"].shape
    c_exp = params["w3"].shape[1]
    w1 = params["w1"].reshape(1, 1, c_in, c_mid)
    w2 = params["w2"].reshape(3, 3, c_mid, c_mid)
    w3 = params["w3"].reshape(1, 1, c_mid, c_exp)
    wd = params["wd"].reshape(3, 3, c_in, c_exp)

    y = jax.nn.relu(bn(conv(x, w1, params["b1"], False),
                       params["g1"], params["be1"]))
    y = jax.nn.relu(bn(conv(y, w2, params["b2"], True),
                       params["g2"], params["be2"]))
    y = jax.nn.relu(bn(conv(y, w3, params["b3"], True),
                       params["g3"], params["be3"]))
    idd = bn(conv(x, wd, params["bd"], True), params["gd"], params["bed"])
    out = jax.nn.relu(y + idd)
    return jnp.transpose(out, (0, 3, 1, 2))


# ----------------------------------- main --------------------------------------

if __name__ == "__main__":
    key = jax.random.PRNGKey(0)
    k_x, k_p = jax.random.split(key)

    N, C, H, W = 2, 4, 16, 16  # in_channels == out_channels == 4, expansion 4
    x = jax.random.normal(k_x, (N, C, H, W), jnp.float32)
    params = init_params(k_p, in_channels=C, out_channels=C)

    fwd = jax.jit(block_forward)
    out = jax.block_until_ready(fwd(x, params))
    ref = jax.block_until_ready(block_reference(x, params))

    assert out.shape == (N, 4 * C, H - 2, W - 2), out.shape
    # Tolerance scale is set by the bf16 HBM intermediates (a perf-review item):
    # rare one-ulp rounding divergences at the quantization points dominate.
    np.testing.assert_allclose(np.asarray(out), np.asarray(ref),
                               rtol=1e-2, atol=2e-2)
    print("KERNEL_OK")
</pallas_src>

<mosaic_0001>
module attributes {stable_mosaic.version = 11 : i64} {
  func.func @_conv1_stats_kernel(%arg0: i32, %arg1: i32, %arg2: memref<256x128xbf16, #tpu.memory_space<vmem>>, %arg3: memref<128x128xbf16, #tpu.memory_space<vmem>>, %arg4: memref<1x2x128xf32, #tpu.memory_space<vmem>>) attributes {dimension_semantics = [#tpu.dimension_semantics<parallel>, #tpu.dimension_semantics<arbitrary>], iteration_bounds = array<i64: 2, 1>, scalar_prefetch = 0 : i64, scratch_operands = 0 : i64, tpu.core_type = #tpu.core_type<tc>, window_params = [{transform_indices = @transform_0, window_bounds = array<i64: 256, 128>}, {pipeline_mode = #tpu.pipeline_mode<synchronous>, transform_indices = @transform_1, window_bounds = array<i64: 128, 128>}, {transform_indices = @transform_2, window_bounds = array<i64: 1, 2, 128>}]} {
    %c0_i32 = arith.constant 0 : i32
    %0 = arith.cmpi eq, %arg1, %c0_i32 : i32
    %1 = arith.extui %0 : i1 to i32
    %c0_i32_0 = arith.constant 0 : i32
    %2 = arith.cmpi ne, %1, %c0_i32_0 : i32
    scf.if %2 {
      %cst_12 = arith.constant 0.000000e+00 : f32
      %18 = vector.broadcast %cst_12 : f32 to vector<2x128xf32>
      %c0_13 = arith.constant 0 : index
      %c0_14 = arith.constant 0 : index
      %c0_15 = arith.constant 0 : index
      %19 = vector.load %arg4[%c0_13, %c0_14, %c0_15] : memref<1x2x128xf32, #tpu.memory_space<vmem>>, vector<1x2x128xf32>
      %20 = vector.shape_cast %19 : vector<1x2x128xf32> to vector<2x128xf32>
      %21 = vector.shape_cast %18 : vector<2x128xf32> to vector<1x2x128xf32>
      tpu.vector_store %arg4[%c0_13, %c0_14, %c0_15], %21 {strides = array<i32>} : memref<1x2x128xf32, #tpu.memory_space<vmem>>, vector<1x2x128xf32>,
    } else {
    }
    %c0 = arith.constant 0 : index
    %c0_1 = arith.constant 0 : index
    %3 = vector.load %arg2[%c0, %c0_1] : memref<256x128xbf16, #tpu.memory_space<vmem>>, vector<256x128xbf16>
    %c0_2 = arith.constant 0 : index
    %c0_3 = arith.constant 0 : index
    %4 = vector.load %arg3[%c0_2, %c0_3] : memref<128x128xbf16, #tpu.memory_space<vmem>>, vector<128x128xbf16>
    %cst = arith.constant dense<0.000000e+00> : vector<256x128xf32>
    %5 = tpu.matmul %3, %4, %cst {dimension_numbers = #tpu.dot_dimension_numbers<[1], [0], [0], [1], [0, 0, 1, 1], [], []>} : vector<256x128xbf16>, vector<128x128xbf16>, vector<256x128xf32> -> vector<256x128xf32>
    %c0_4 = arith.constant 0 : index
    %c0_5 = arith.constant 0 : index
    %c0_6 = arith.constant 0 : index
    %6 = vector.load %arg4[%c0_4, %c0_5, %c0_6] : memref<1x2x128xf32, #tpu.memory_space<vmem>>, vector<1x2x128xf32>
    %7 = vector.shape_cast %6 : vector<1x2x128xf32> to vector<2x128xf32>
    %cst_7 = arith.constant dense<0.000000e+00> : vector<128xf32>
    %8 = vector.multi_reduction <add>, %5, %cst_7 [0] : vector<256x128xf32> to vector<128xf32>
    %9 = vector.shape_cast %8 : vector<128xf32> to vector<1x128xf32>
    %10 = arith.mulf %5, %5 : vector<256x128xf32>
    %cst_8 = arith.constant dense<0.000000e+00> : vector<128xf32>
    %11 = vector.multi_reduction <add>, %10, %cst_8 [0] : vector<256x128xf32> to vector<128xf32>
    %12 = vector.shape_cast %11 : vector<128xf32> to vector<1x128xf32>
    %13 = tpu.concatenate %9, %12 in 0 : vector<1x128xf32>, vector<1x128xf32> -> vector<2x128xf32>
    %14 = arith.addf %7, %13 : vector<2x128xf32>
    %c0_9 = arith.constant 0 : index
    %c0_10 = arith.constant 0 : index
    %c0_11 = arith.constant 0 : index
    %15 = vector.load %arg4[%c0_9, %c0_10, %c0_11] : memref<1x2x128xf32, #tpu.memory_space<vmem>>, vector<1x2x128xf32>
    %16 = vector.shape_cast %15 : vector<1x2x128xf32> to vector<2x128xf32>
    %17 = vector.shape_cast %14 : vector<2x128xf32> to vector<1x2x128xf32>
    tpu.vector_store %arg4[%c0_9, %c0_10, %c0_11], %17 {strides = array<i32>} : memref<1x2x128xf32, #tpu.memory_space<vmem>>, vector<1x2x128xf32>,
    return
  }
  func.func @transform_0(%arg0: i32, %arg1: i32) -> (i32, i32) {
    %c1_i32 = arith.constant 1 : i32
    %0 = arith.muli %arg0, %c1_i32 : i32
    %1 = arith.addi %0, %arg1 : i32
    %c0_i32 = arith.constant 0 : i32
    %c0_i32_0 = arith.constant 0 : i32
    return %1, %c0_i32 : i32, i32
  }
  func.func @transform_1(%arg0: i32, %arg1: i32) -> (i32, i32) {
    %c0_i32 = arith.constant 0 : i32
    %c0_i32_0 = arith.constant 0 : i32
    %c0_i32_1 = arith.constant 0 : i32
    return %c0_i32, %c0_i32_0 : i32, i32
  }
  func.func @transform_2(%arg0: i32, %arg1: i32) -> (i32, i32, i32) {
    %c0_i32 = arith.constant 0 : i32
    %c0_i32_0 = arith.constant 0 : i32
    %c0_i32_1 = arith.constant 0 : i32
    return %arg0, %c0_i32, %c0_i32_0 : i32, i32, i32
  }
}

module attributes {stable_mosaic.version = 11 : i64} {
  func.func @_conv3_kernel(%arg0: i32, %arg1: i32, %arg2: memref<256x128xbf16, #tpu.memory_space<vmem>>, %arg3: memref<128x128xbf16, #tpu.memory_space<vmem>>, %arg4: memref<2x128xf32, #tpu.memory_space<vmem>>, %arg5: memref<1x128xf32, #tpu.memory_space<vmem>>, %arg6: memref<1x128xf32, #tpu.memory_space<vmem>>, %arg7: memref<256x1xf32, #tpu.memory_space<vmem>>, %arg8: memref<256x128xbf16, #tpu.memory_space<vmem>>, %arg9: memref<1x2x128xf32, #tpu.memory_space<vmem>>) attributes {dimension_semantics = [#tpu.dimension_semantics<parallel>, #tpu.dimension_semantics<arbitrary>], iteration_bounds = array<i64: 2, 1>, scalar_prefetch = 0 : i64, scratch_operands = 0 : i64, tpu.core_type = #tpu.core_type<tc>, window_params = [{transform_indices = @transform_0, window_bounds = array<i64: 256, 128>}, {pipeline_mode = #tpu.pipeline_mode<synchronous>, transform_indices = @transform_1, window_bounds = array<i64: 128, 128>}, {pipeline_mode = #tpu.pipeline_mode<synchronous>, transform_indices = @transform_2, window_bounds = array<i64: 2, 128>}, {pipeline_mode = #tpu.pipeline_mode<synchronous>, transform_indices = @transform_3, window_bounds = array<i64: 1, 128>}, {pipeline_mode = #tpu.pipeline_mode<synchronous>, transform_indices = @transform_4, window_bounds = array<i64: 1, 128>}, {transform_indices = @transform_5, window_bounds = array<i64: 256, 1>}, {transform_indices = @transform_6, window_bounds = array<i64: 256, 128>}, {transform_indices = @transform_7, window_bounds = array<i64: 1, 2, 128>}]} {
    %c0_i32 = arith.constant 0 : i32
    %0 = arith.cmpi eq, %arg1, %c0_i32 : i32
    %1 = arith.extui %0 : i1 to i32
    %c0_i32_0 = arith.constant 0 : i32
    %2 = arith.cmpi ne, %1, %c0_i32_0 : i32
    scf.if %2 {
      %cst_28 = arith.constant 0.000000e+00 : f32
      %50 = vector.broadcast %cst_28 : f32 to vector<2x128xf32>
      %c0_29 = arith.constant 0 : index
      %c0_30 = arith.constant 0 : index
      %c0_31 = arith.constant 0 : index
      %51 = vector.load %arg9[%c0_29, %c0_30, %c0_31] : memref<1x2x128xf32, #tpu.memory_space<vmem>>, vector<1x2x128xf32>
      %52 = vector.shape_cast %51 : vector<1x2x128xf32> to vector<2x128xf32>
      %53 = vector.shape_cast %50 : vector<2x128xf32> to vector<1x2x128xf32>
      tpu.vector_store %arg9[%c0_29, %c0_30, %c0_31], %53 {strides = array<i32>} : memref<1x2x128xf32, #tpu.memory_space<vmem>>, vector<1x2x128xf32>,
    } else {
    }
    %c0 = arith.constant 0 : index
    %c0_1 = arith.constant 0 : index
    %3 = vector.load %arg4[%c0, %c0_1] : memref<2x128xf32, #tpu.memory_space<vmem>>, vector<1x128xf32>
    %cst = arith.constant 0.00255102036 : f32
    %4 = vector.broadcast %cst : f32 to vector<1x128xf32>
    %5 = arith.mulf %3, %4 : vector<1x128xf32>
    %c1 = arith.constant 1 : index
    %c0_2 = arith.constant 0 : index
    %6 = vector.load %arg4[%c1, %c0_2] : memref<2x128xf32, #tpu.memory_space<vmem>>, vector<1x128xf32>
    %cst_3 = arith.constant 0.00255102036 : f32
    %7 = vector.broadcast %cst_3 : f32 to vector<1x128xf32>
    %8 = arith.mulf %6, %7 : vector<1x128xf32>
    %9 = arith.mulf %5, %5 : vector<1x128xf32>
    %10 = arith.subf %8, %9 : vector<1x128xf32>
    %cst_4 = arith.constant 0.000000e+00 : f32
    %11 = vector.broadcast %cst_4 : f32 to vector<1x128xf32>
    %12 = arith.maximumf %10, %11 : vector<1x128xf32>
    %c0_5 = arith.constant 0 : index
    %c0_6 = arith.constant 0 : index
    %13 = vector.load %arg5[%c0_5, %c0_6] : memref<1x128xf32, #tpu.memory_space<vmem>>, vector<1x128xf32>
    %cst_7 = arith.constant 9.99999974E-6 : f32
    %14 = vector.broadcast %cst_7 : f32 to vector<1x128xf32>
    %15 = arith.addf %12, %14 : vector<1x128xf32>
    %16 = math.rsqrt %15 : vector<1x128xf32>
    %17 = arith.mulf %13, %16 : vector<1x128xf32>
    %c0_8 = arith.constant 0 : index
    %c0_9 = arith.constant 0 : index
    %18 = vector.load %arg6[%c0_8, %c0_9] : memref<1x128xf32, #tpu.memory_space<vmem>>, vector<1x128xf32>
    %19 = arith.mulf %5, %17 : vector<1x128xf32>
    %20 = arith.subf %18, %19 : vector<1x128xf32>
    %c0_10 = arith.constant 0 : index
    %c0_11 = arith.constant 0 : index
    %21 = vector.load %arg2[%c0_10, %c0_11] : memref<256x128xbf16, #tpu.memory_space<vmem>>, vector<256x128xbf16>
    %22 = arith.extf %21 : vector<256x128xbf16> to vector<256x128xf32>
    %23 = vector.broadcast %17 : vector<1x128xf32> to vector<256x128xf32>
    %24 = arith.mulf %22, %23 : vector<256x128xf32>
    %25 = vector.broadcast %20 : vector<1x128xf32> to vector<256x128xf32>
    %26 = arith.addf %24, %25 : vector<256x128xf32>
    %cst_12 = arith.constant 0.000000e+00 : f32
    %27 = vector.broadcast %cst_12 : f32 to vector<256x128xf32>
    %28 = arith.maximumf %26, %27 : vector<256x128xf32>
    %29 = arith.truncf %28 : vector<256x128xf32> to vector<256x128xbf16>
    %c0_13 = arith.constant 0 : index
    %c0_14 = arith.constant 0 : index
    %30 = vector.load %arg3[%c0_13, %c0_14] : memref<128x128xbf16, #tpu.memory_space<vmem>>, vector<128x128xbf16>
    %cst_15 = arith.constant dense<0.000000e+00> : vector<256x128xf32>
    %31 = tpu.matmul %29, %30, %cst_15 {dimension_numbers = #tpu.dot_dimension_numbers<[1], [0], [0], [1], [0, 0, 1, 1], [], []>} : vector<256x128xbf16>, vector<128x128xbf16>, vector<256x128xf32> -> vector<256x128xf32>
    %32 = arith.truncf %31 : vector<256x128xf32> to vector<256x128xbf16>
    %c0_16 = arith.constant 0 : index
    %c0_17 = arith.constant 0 : index
    %33 = vector.load %arg8[%c0_16, %c0_17] : memref<256x128xbf16, #tpu.memory_space<vmem>>, vector<256x128xbf16>
    tpu.vector_store %arg8[%c0_16, %c0_17], %32 {strides = array<i32>} : memref<256x128xbf16, #tpu.memory_space<vmem>>, vector<256x128xbf16>,
    %c0_18 = arith.constant 0 : index
    %c0_19 = arith.constant 0 : index
    %34 = vector.load %arg7[%c0_18, %c0_19] : memref<256x1xf32, #tpu.memory_space<vmem>>, vector<256x1xf32>
    %35 = arith.extf %32 : vector<256x128xbf16> to vector<256x128xf32>
    %36 = vector.broadcast %34 : vector<256x1xf32> to vector<256x128xf32>
    %37 = arith.mulf %35, %36 : vector<256x128xf32>
    %c0_20 = arith.constant 0 : index
    %c0_21 = arith.constant 0 : index
    %c0_22 = arith.constant 0 : index
    %38 = vector.load %arg9[%c0_20, %c0_21, %c0_22] : memref<1x2x128xf32, #tpu.memory_space<vmem>>, vector<1x2x128xf32>
    %39 = vector.shape_cast %38 : vector<1x2x128xf32> to vector<2x128xf32>
    %cst_23 = arith.constant dense<0.000000e+00> : vector<128xf32>
    %40 = vector.multi_reduction <add>, %37, %cst_23 [0] : vector<256x128xf32> to vector<128xf32>
    %41 = vector.shape_cast %40 : vector<128xf32> to vector<1x128xf32>
    %42 = arith.mulf %37, %35 : vector<256x128xf32>
    %cst_24 = arith.constant dense<0.000000e+00> : vector<128xf32>
    %43 = vector.multi_reduction <add>, %42, %cst_24 [0] : vector<256x128xf32> to vector<128xf32>
    %44 = vector.shape_cast %43 : vector<128xf32> to vector<1x128xf32>
    %45 = tpu.concatenate %41, %44 in 0 : vector<1x128xf32>, vector<1x128xf32> -> vector<2x128xf32>
    %46 = arith.addf %39, %45 : vector<2x128xf32>
    %c0_25 = arith.constant 0 : index
    %c0_26 = arith.constant 0 : index
    %c0_27 = arith.constant 0 : index
    %47 = vector.load %arg9[%c0_25, %c0_26, %c0_27] : memref<1x2x128xf32, #tpu.memory_space<vmem>>, vector<1x2x128xf32>
    %48 = vector.shape_cast %47 : vector<1x2x128xf32> to vector<2x128xf32>
    %49 = vector.shape_cast %46 : vector<2x128xf32> to vector<1x2x128xf32>
    tpu.vector_store %arg9[%c0_25, %c0_26, %c0_27], %49 {strides = array<i32>} : memref<1x2x128xf32, #tpu.memory_space<vmem>>, vector<1x2x128xf32>,
    return
  }
  func.func @transform_0(%arg0: i32, %arg1: i32) -> (i32, i32) {
    %c1_i32 = arith.constant 1 : i32
    %0 = arith.muli %arg0, %c1_i32 : i32
    %1 = arith.addi %0, %arg1 : i32
    %c0_i32 = arith.constant 0 : i32
    %c0_i32_0 = arith.constant 0 : i32
    return %1, %c0_i32 : i32, i32
  }
  func.func @transform_1(%arg0: i32, %arg1: i32) -> (i32, i32) {
    %c0_i32 = arith.constant 0 : i32
    %c0_i32_0 = arith.constant 0 : i32
    %c0_i32_1 = arith.constant 0 : i32
    return %c0_i32, %c0_i32_0 : i32, i32
  }
  func.func @transform_2(%arg0: i32, %arg1: i32) -> (i32, i32) {
    %c0_i32 = arith.constant 0 : i32
    %c0_i32_0 = arith.constant 0 : i32
    %c0_i32_1 = arith.constant 0 : i32
    return %c0_i32, %c0_i32_0 : i32, i32
  }
  func.func @transform_3(%arg0: i32, %arg1: i32) -> (i32, i32) {
    %c0_i32 = arith.constant 0 : i32
    %c0_i32_0 = arith.constant 0 : i32
    %c0_i32_1 = arith.constant 0 : i32
    return %c0_i32, %c0_i32_0 : i32, i32
  }
  func.func @transform_4(%arg0: i32, %arg1: i32) -> (i32, i32) {
    %c0_i32 = arith.constant 0 : i32
    %c0_i32_0 = arith.constant 0 : i32
    %c0_i32_1 = arith.constant 0 : i32
    return %c0_i32, %c0_i32_0 : i32, i32
  }
  func.func @transform_5(%arg0: i32, %arg1: i32) -> (i32, i32) {
    %c1_i32 = arith.constant 1 : i32
    %0 = arith.muli %arg0, %c1_i32 : i32
    %1 = arith.addi %0, %arg1 : i32
    %c0_i32 = arith.constant 0 : i32
    %c0_i32_0 = arith.constant 0 : i32
    return %1, %c0_i32 : i32, i32
  }
  func.func @transform_6(%arg0: i32, %arg1: i32) -> (i32, i32) {
    %c1_i32 = arith.constant 1 : i32
    %0 = arith.muli %arg0, %c1_i32 : i32
    %1 = arith.addi %0, %arg1 : i32
    %c0_i32 = arith.constant 0 : i32
    %c0_i32_0 = arith.constant 0 : i32
    return %1, %c0_i32 : i32, i32
  }
  func.func @transform_7(%arg0: i32, %arg1: i32) -> (i32, i32, i32) {
    %c0_i32 = arith.constant 0 : i32
    %c0_i32_0 = arith.constant 0 : i32
    %c0_i32_1 = arith.constant 0 : i32
    return %arg0, %c0_i32, %c0_i32_0 : i32, i32, i32
  }
}

module attributes {stable_mosaic.version = 11 : i64} {
  func.func @_mid_kernel(%arg0: i32, %arg1: i32, %arg2: memref<552x128xbf16, #tpu.memory_space<vmem>>, %arg3: memref<128x128xbf16, #tpu.memory_space<vmem>>, %arg4: memref<1152x128xbf16, #tpu.memory_space<vmem>>, %arg5: memref<1152x128xbf16, #tpu.memory_space<vmem>>, %arg6: memref<2x128xf32, #tpu.memory_space<vmem>>, %arg7: memref<1x128xf32, #tpu.memory_space<vmem>>, %arg8: memref<1x128xf32, #tpu.memory_space<vmem>>, %arg9: memref<256x1xf32, #tpu.memory_space<vmem>>, %arg10: memref<256x128xbf16, #tpu.memory_space<vmem>>, %arg11: memref<256x128xbf16, #tpu.memory_space<vmem>>, %arg12: memref<1x2x128xf32, #tpu.memory_space<vmem>>, %arg13: memref<1x2x128xf32, #tpu.memory_space<vmem>>) attributes {dimension_semantics = [#tpu.dimension_semantics<parallel>, #tpu.dimension_semantics<arbitrary>], iteration_bounds = array<i64: 2, 1>, scalar_prefetch = 0 : i64, scratch_operands = 0 : i64, tpu.core_type = #tpu.core_type<tc>, window_params = [{pipeline_mode = #tpu.pipeline_mode<synchronous>, transform_indices = @transform_0, window_bounds = array<i64: 552, 128>}, {pipeline_mode = #tpu.pipeline_mode<synchronous>, transform_indices = @transform_1, window_bounds = array<i64: 128, 128>}, {pipeline_mode = #tpu.pipeline_mode<synchronous>, transform_indices = @transform_2, window_bounds = array<i64: 1152, 128>}, {pipeline_mode = #tpu.pipeline_mode<synchronous>, transform_indices = @transform_3, window_bounds = array<i64: 1152, 128>}, {pipeline_mode = #tpu.pipeline_mode<synchronous>, transform_indices = @transform_4, window_bounds = array<i64: 2, 128>}, {pipeline_mode = #tpu.pipeline_mode<synchronous>, transform_indices = @transform_5, window_bounds = array<i64: 1, 128>}, {pipeline_mode = #tpu.pipeline_mode<synchronous>, transform_indices = @transform_6, window_bounds = array<i64: 1, 128>}, {transform_indices = @transform_7, window_bounds = array<i64: 256, 1>}, {transform_indices = @transform_8, window_bounds = array<i64: 256, 128>}, {transform_indices = @transform_9, window_bounds = array<i64: 256, 128>}, {transform_indices = @transform_10, window_bounds = array<i64: 1, 2, 128>}, {transform_indices = @transform_11, window_bounds = array<i64: 1, 2, 128>}]} {
    %c0_i32 = arith.constant 0 : i32
    %0 = arith.cmpi eq, %arg1, %c0_i32 : i32
    %1 = arith.extui %0 : i1 to i32
    %c0_i32_0 = arith.constant 0 : i32
    %2 = arith.cmpi ne, %1, %c0_i32_0 : i32
    scf.if %2 {
      %cst_43 = arith.constant 0.000000e+00 : f32
      %95 = vector.broadcast %cst_43 : f32 to vector<2x128xf32>
      %c0_44 = arith.constant 0 : index
      %c0_45 = arith.constant 0 : index
      %c0_46 = arith.constant 0 : index
      %96 = vector.load %arg12[%c0_44, %c0_45, %c0_46] : memref<1x2x128xf32, #tpu.memory_space<vmem>>, vector<1x2x128xf32>
      %97 = vector.shape_cast %96 : vector<1x2x128xf32> to vector<2x128xf32>
      %98 = vector.shape_cast %95 : vector<2x128xf32> to vector<1x2x128xf32>
      tpu.vector_store %arg12[%c0_44, %c0_45, %c0_46], %98 {strides = array<i32>} : memref<1x2x128xf32, #tpu.memory_space<vmem>>, vector<1x2x128xf32>,
      %cst_47 = arith.constant 0.000000e+00 : f32
      %99 = vector.broadcast %cst_47 : f32 to vector<2x128xf32>
      %c0_48 = arith.constant 0 : index
      %c0_49 = arith.constant 0 : index
      %c0_50 = arith.constant 0 : index
      %100 = vector.load %arg13[%c0_48, %c0_49, %c0_50] : memref<1x2x128xf32, #tpu.memory_space<vmem>>, vector<1x2x128xf32>
      %101 = vector.shape_cast %100 : vector<1x2x128xf32> to vector<2x128xf32>
      %102 = vector.shape_cast %99 : vector<2x128xf32> to vector<1x2x128xf32>
      tpu.vector_store %arg13[%c0_48, %c0_49, %c0_50], %102 {strides = array<i32>} : memref<1x2x128xf32, #tpu.memory_space<vmem>>, vector<1x2x128xf32>,
    } else {
    }
    %c1_i32 = arith.constant 1 : i32
    %3 = arith.muli %arg0, %c1_i32 : i32
    %4 = arith.addi %3, %arg1 : i32
    %c256_i32 = arith.constant 256 : i32
    %5 = arith.muli %4, %c256_i32 : i32
    %6 = tpu.assume_multiple %5, 256 : i32
    %c0 = arith.constant 0 : index
    %c0_1 = arith.constant 0 : index
    %7 = vector.load %arg6[%c0, %c0_1] : memref<2x128xf32, #tpu.memory_space<vmem>>, vector<1x128xf32>
    %cst = arith.constant 0.001953125 : f32
    %8 = vector.broadcast %cst : f32 to vector<1x128xf32>
    %9 = arith.mulf %7, %8 : vector<1x128xf32>
    %c1 = arith.constant 1 : index
    %c0_2 = arith.constant 0 : index
    %10 = vector.load %arg6[%c1, %c0_2] : memref<2x128xf32, #tpu.memory_space<vmem>>, vector<1x128xf32>
    %cst_3 = arith.constant 0.001953125 : f32
    %11 = vector.broadcast %cst_3 : f32 to vector<1x128xf32>
    %12 = arith.mulf %10, %11 : vector<1x128xf32>
    %13 = arith.mulf %9, %9 : vector<1x128xf32>
    %14 = arith.subf %12, %13 : vector<1x128xf32>
    %cst_4 = arith.constant 0.000000e+00 : f32
    %15 = vector.broadcast %cst_4 : f32 to vector<1x128xf32>
    %16 = arith.maximumf %14, %15 : vector<1x128xf32>
    %c0_5 = arith.constant 0 : index
    %c0_6 = arith.constant 0 : index
    %17 = vector.load %arg7[%c0_5, %c0_6] : memref<1x128xf32, #tpu.memory_space<vmem>>, vector<1x128xf32>
    %cst_7 = arith.constant 9.99999974E-6 : f32
    %18 = vector.broadcast %cst_7 : f32 to vector<1x128xf32>
    %19 = arith.addf %16, %18 : vector<1x128xf32>
    %20 = math.rsqrt %19 : vector<1x128xf32>
    %21 = arith.mulf %17, %20 : vector<1x128xf32>
    %c0_8 = arith.constant 0 : index
    %c0_9 = arith.constant 0 : index
    %22 = vector.load %arg8[%c0_8, %c0_9] : memref<1x128xf32, #tpu.memory_space<vmem>>, vector<1x128xf32>
    %23 = arith.mulf %9, %21 : vector<1x128xf32>
    %24 = arith.subf %22, %23 : vector<1x128xf32>
    %25 = arith.index_cast %6 : i32 to index
    %c0_10 = arith.constant 0 : index
    %26 = vector.load %arg2[%25, %c0_10] : memref<552x128xbf16, #tpu.memory_space<vmem>>, vector<296x128xbf16>
    %c0_11 = arith.constant 0 : index
    %c0_12 = arith.constant 0 : index
    %27 = vector.load %arg3[%c0_11, %c0_12] : memref<128x128xbf16, #tpu.memory_space<vmem>>, vector<128x128xbf16>
    %cst_13 = arith.constant dense<0.000000e+00> : vector<296x128xf32>
    %28 = tpu.matmul %26, %27, %cst_13 {dimension_numbers = #tpu.dot_dimension_numbers<[1], [0], [0], [1], [0, 0, 1, 1], [], []>} : vector<296x128xbf16>, vector<128x128xbf16>, vector<296x128xf32> -> vector<296x128xf32>
    %29 = vector.broadcast %21 : vector<1x128xf32> to vector<296x128xf32>
    %30 = arith.mulf %28, %29 : vector<296x128xf32>
    %31 = vector.broadcast %24 : vector<1x128xf32> to vector<296x128xf32>
    %32 = arith.addf %30, %31 : vector<296x128xf32>
    %cst_14 = arith.constant 0.000000e+00 : f32
    %33 = vector.broadcast %cst_14 : f32 to vector<296x128xf32>
    %34 = arith.maximumf %32, %33 : vector<296x128xf32>
    %35 = arith.truncf %34 : vector<296x128xf32> to vector<296x128xbf16>
    %36 = vector.extract_strided_slice %35 {offsets = [0, 0], sizes = [256, 128], strides = [1, 1]} : vector<296x128xbf16> to vector<256x128xbf16>
    %37 = vector.extract_strided_slice %35 {offsets = [1, 0], sizes = [256, 128], strides = [1, 1]} : vector<296x128xbf16> to vector<256x128xbf16>
    %38 = vector.extract_strided_slice %35 {offsets = [2, 0], sizes = [256, 128], strides = [1, 1]} : vector<296x128xbf16> to vector<256x128xbf16>
    %39 = vector.extract_strided_slice %35 {offsets = [16, 0], sizes = [256, 128], strides = [1, 1]} : vector<296x128xbf16> to vector<256x128xbf16>
    %40 = vector.extract_strided_slice %35 {offsets = [17, 0], sizes = [256, 128], strides = [1, 1]} : vector<296x128xbf16> to vector<256x128xbf16>
    %41 = vector.extract_strided_slice %35 {offsets = [18, 0], sizes = [256, 128], strides = [1, 1]} : vector<296x128xbf16> to vector<256x128xbf16>
    %42 = vector.extract_strided_slice %35 {offsets = [32, 0], sizes = [256, 128], strides = [1, 1]} : vector<296x128xbf16> to vector<256x128xbf16>
    %43 = vector.extract_strided_slice %35 {offsets = [33, 0], sizes = [256, 128], strides = [1, 1]} : vector<296x128xbf16> to vector<256x128xbf16>
    %44 = vector.extract_strided_slice %35 {offsets = [34, 0], sizes = [256, 128], strides = [1, 1]} : vector<296x128xbf16> to vector<256x128xbf16>
    %45 = tpu.concatenate %36, %37, %38, %39, %40, %41, %42, %43, %44 in 1 : vector<256x128xbf16>, vector<256x128xbf16>, vector<256x128xbf16>, vector<256x128xbf16>, vector<256x128xbf16>, vector<256x128xbf16>, vector<256x128xbf16>, vector<256x128xbf16>, vector<256x128xbf16> -> vector<256x1152xbf16>
    %46 = vector.extract_strided_slice %26 {offsets = [0, 0], sizes = [256, 128], strides = [1, 1]} : vector<296x128xbf16> to vector<256x128xbf16>
    %47 = vector.extract_strided_slice %26 {offsets = [1, 0], sizes = [256, 128], strides = [1, 1]} : vector<296x128xbf16> to vector<256x128xbf16>
    %48 = vector.extract_strided_slice %26 {offsets = [2, 0], sizes = [256, 128], strides = [1, 1]} : vector<296x128xbf16> to vector<256x128xbf16>
    %49 = vector.extract_strided_slice %26 {offsets = [16, 0], sizes = [256, 128], strides = [1, 1]} : vector<296x128xbf16> to vector<256x128xbf16>
    %50 = vector.extract_strided_slice %26 {offsets = [17, 0], sizes = [256, 128], strides = [1, 1]} : vector<296x128xbf16> to vector<256x128xbf16>
    %51 = vector.extract_strided_slice %26 {offsets = [18, 0], sizes = [256, 128], strides = [1, 1]} : vector<296x128xbf16> to vector<256x128xbf16>
    %52 = vector.extract_strided_slice %26 {offsets = [32, 0], sizes = [256, 128], strides = [1, 1]} : vector<296x128xbf16> to vector<256x128xbf16>
    %53 = vector.extract_strided_slice %26 {offsets = [33, 0], sizes = [256, 128], strides = [1, 1]} : vector<296x128xbf16> to vector<256x128xbf16>
    %54 = vector.extract_strided_slice %26 {offsets = [34, 0], sizes = [256, 128], strides = [1, 1]} : vector<296x128xbf16> to vector<256x128xbf16>
    %55 = tpu.concatenate %46, %47, %48, %49, %50, %51, %52, %53, %54 in 1 : vector<256x128xbf16>, vector<256x128xbf16>, vector<256x128xbf16>, vector<256x128xbf16>, vector<256x128xbf16>, vector<256x128xbf16>, vector<256x128xbf16>, vector<256x128xbf16>, vector<256x128xbf16> -> vector<256x1152xbf16>
    %c0_15 = arith.constant 0 : index
    %c0_16 = arith.constant 0 : index
    %56 = vector.load %arg4[%c0_15, %c0_16] : memref<1152x128xbf16, #tpu.memory_space<vmem>>, vector<1152x128xbf16>
    %cst_17 = arith.constant dense<0.000000e+00> : vector<256x128xf32>
    %57 = tpu.matmul %45, %56, %cst_17 {dimension_numbers = #tpu.dot_dimension_numbers<[1], [0], [0], [1], [0, 0, 1, 1], [], []>} : vector<256x1152xbf16>, vector<1152x128xbf16>, vector<256x128xf32> -> vector<256x128xf32>
    %c0_18 = arith.constant 0 : index
    %c0_19 = arith.constant 0 : index
    %58 = vector.load %arg5[%c0_18, %c0_19] : memref<1152x128xbf16, #tpu.memory_space<vmem>>, vector<1152x128xbf16>
    %cst_20 = arith.constant dense<0.000000e+00> : vector<256x128xf32>
    %59 = tpu.matmul %55, %58, %cst_20 {dimension_numbers = #tpu.dot_dimension_numbers<[1], [0], [0], [1], [0, 0, 1, 1], [], []>} : vector<256x1152xbf16>, vector<1152x128xbf16>, vector<256x128xf32> -> vector<256x128xf32>
    %60 = arith.truncf %57 : vector<256x128xf32> to vector<256x128xbf16>
    %61 = arith.truncf %59 : vector<256x128xf32> to vector<256x128xbf16>
    %c0_21 = arith.constant 0 : index
    %c0_22 = arith.constant 0 : index
    %62 = vector.load %arg10[%c0_21, %c0_22] : memref<256x128xbf16, #tpu.memory_space<vmem>>, vector<256x128xbf16>
    tpu.vector_store %arg10[%c0_21, %c0_22], %60 {strides = array<i32>} : memref<256x128xbf16, #tpu.memory_space<vmem>>, vector<256x128xbf16>,
    %c0_23 = arith.constant 0 : index
    %c0_24 = arith.constant 0 : index
    %63 = vector.load %arg11[%c0_23, %c0_24] : memref<256x128xbf16, #tpu.memory_space<vmem>>, vector<256x128xbf16>
    tpu.vector_store %arg11[%c0_23, %c0_24], %61 {strides = array<i32>} : memref<256x128xbf16, #tpu.memory_space<vmem>>, vector<256x128xbf16>,
    %c0_25 = arith.constant 0 : index
    %c0_26 = arith.constant 0 : index
    %64 = vector.load %arg9[%c0_25, %c0_26] : memref<256x1xf32, #tpu.memory_space<vmem>>, vector<256x1xf32>
    %65 = arith.extf %60 : vector<256x128xbf16> to vector<256x128xf32>
    %66 = arith.extf %61 : vector<256x128xbf16> to vector<256x128xf32>
    %67 = vector.broadcast %64 : vector<256x1xf32> to vector<256x128xf32>
    %68 = arith.mulf %65, %67 : vector<256x128xf32>
    %69 = vector.broadcast %64 : vector<256x1xf32> to vector<256x128xf32>
    %70 = arith.mulf %66, %69 : vector<256x128xf32>
    %c0_27 = arith.constant 0 : index
    %c0_28 = arith.constant 0 : index
    %c0_29 = arith.constant 0 : index
    %71 = vector.load %arg12[%c0_27, %c0_28, %c0_29] : memref<1x2x128xf32, #tpu.memory_space<vmem>>, vector<1x2x128xf32>
    %72 = vector.shape_cast %71 : vector<1x2x128xf32> to vector<2x128xf32>
    %cst_30 = arith.constant dense<0.000000e+00> : vector<128xf32>
    %73 = vector.multi_reduction <add>, %68, %cst_30 [0] : vector<256x128xf32> to vector<128xf32>
    %74 = vector.shape_cast %73 : vector<128xf32> to vector<1x128xf32>
    %75 = arith.mulf %68, %65 : vector<256x128xf32>
    %cst_31 = arith.constant dense<0.000000e+00> : vector<128xf32>
    %76 = vector.multi_reduction <add>, %75, %cst_31 [0] : vector<256x128xf32> to vector<128xf32>
    %77 = vector.shape_cast %76 : vector<128xf32> to vector<1x128xf32>
    %78 = tpu.concatenate %74, %77 in 0 : vector<1x128xf32>, vector<1x128xf32> -> vector<2x128xf32>
    %79 = arith.addf %72, %78 : vector<2x128xf32>
    %c0_32 = arith.constant 0 : index
    %c0_33 = arith.constant 0 : index
    %c0_34 = arith.constant 0 : index
    %80 = vector.load %arg12[%c0_32, %c0_33, %c0_34] : memref<1x2x128xf32, #tpu.memory_space<vmem>>, vector<1x2x128xf32>
    %81 = vector.shape_cast %80 : vector<1x2x128xf32> to vector<2x128xf32>
    %82 = vector.shape_cast %79 : vector<2x128xf32> to vector<1x2x128xf32>
    tpu.vector_store %arg12[%c0_32, %c0_33, %c0_34], %82 {strides = array<i32>} : memref<1x2x128xf32, #tpu.memory_space<vmem>>, vector<1x2x128xf32>,
    %c0_35 = arith.constant 0 : index
    %c0_36 = arith.constant 0 : index
    %c0_37 = arith.constant 0 : index
    %83 = vector.load %arg13[%c0_35, %c0_36, %c0_37] : memref<1x2x128xf32, #tpu.memory_space<vmem>>, vector<1x2x128xf32>
    %84 = vector.shape_cast %83 : vector<1x2x128xf32> to vector<2x128xf32>
    %cst_38 = arith.constant dense<0.000000e+00> : vector<128xf32>
    %85 = vector.multi_reduction <add>, %70, %cst_38 [0] : vector<256x128xf32> to vector<128xf32>
    %86 = vector.shape_cast %85 : vector<128xf32> to vector<1x128xf32>
    %87 = arith.mulf %70, %66 : vector<256x128xf32>
    %cst_39 = arith.constant dense<0.000000e+00> : vector<128xf32>
    %88 = vector.multi_reduction <add>, %87, %cst_39 [0] : vector<256x128xf32> to vector<128xf32>
    %89 = vector.shape_cast %88 : vector<128xf32> to vector<1x128xf32>
    %90 = tpu.concatenate %86, %89 in 0 : vector<1x128xf32>, vector<1x128xf32> -> vector<2x128xf32>
    %91 = arith.addf %84, %90 : vector<2x128xf32>
    %c0_40 = arith.constant 0 : index
    %c0_41 = arith.constant 0 : index
    %c0_42 = arith.constant 0 : index
    %92 = vector.load %arg13[%c0_40, %c0_41, %c0_42] : memref<1x2x128xf32, #tpu.memory_space<vmem>>, vector<1x2x128xf32>
    %93 = vector.shape_cast %92 : vector<1x2x128xf32> to vector<2x128xf32>
    %94 = vector.shape_cast %91 : vector<2x128xf32> to vector<1x2x128xf32>
    tpu.vector_store %arg13[%c0_40, %c0_41, %c0_42], %94 {strides = array<i32>} : memref<1x2x128xf32, #tpu.memory_space<vmem>>, vector<1x2x128xf32>,
    return
  }
  func.func @transform_0(%arg0: i32, %arg1: i32) -> (i32, i32) {
    %c0_i32 = arith.constant 0 : i32
    %c0_i32_0 = arith.constant 0 : i32
    %c0_i32_1 = arith.constant 0 : i32
    return %c0_i32, %c0_i32_0 : i32, i32
  }
  func.func @transform_1(%arg0: i32, %arg1: i32) -> (i32, i32) {
    %c0_i32 = arith.constant 0 : i32
    %c0_i32_0 = arith.constant 0 : i32
    %c0_i32_1 = arith.constant 0 : i32
    return %c0_i32, %c0_i32_0 : i32, i32
  }
  func.func @transform_2(%arg0: i32, %arg1: i32) -> (i32, i32) {
    %c0_i32 = arith.constant 0 : i32
    %c0_i32_0 = arith.constant 0 : i32
    %c0_i32_1 = arith.constant 0 : i32
    return %c0_i32, %c0_i32_0 : i32, i32
  }
  func.func @transform_3(%arg0: i32, %arg1: i32) -> (i32, i32) {
    %c0_i32 = arith.constant 0 : i32
    %c0_i32_0 = arith.constant 0 : i32
    %c0_i32_1 = arith.constant 0 : i32
    return %c0_i32, %c0_i32_0 : i32, i32
  }
  func.func @transform_4(%arg0: i32, %arg1: i32) -> (i32, i32) {
    %c0_i32 = arith.constant 0 : i32
    %c0_i32_0 = arith.constant 0 : i32
    %c0_i32_1 = arith.constant 0 : i32
    return %c0_i32, %c0_i32_0 : i32, i32
  }
  func.func @transform_5(%arg0: i32, %arg1: i32) -> (i32, i32) {
    %c0_i32 = arith.constant 0 : i32
    %c0_i32_0 = arith.constant 0 : i32
    %c0_i32_1 = arith.constant 0 : i32
    return %c0_i32, %c0_i32_0 : i32, i32
  }
  func.func @transform_6(%arg0: i32, %arg1: i32) -> (i32, i32) {
    %c0_i32 = arith.constant 0 : i32
    %c0_i32_0 = arith.constant 0 : i32
    %c0_i32_1 = arith.constant 0 : i32
    return %c0_i32, %c0_i32_0 : i32, i32
  }
  func.func @transform_7(%arg0: i32, %arg1: i32) -> (i32, i32) {
    %c1_i32 = arith.constant 1 : i32
    %0 = arith.muli %arg0, %c1_i32 : i32
    %1 = arith.addi %0, %arg1 : i32
    %c0_i32 = arith.constant 0 : i32
    %c0_i32_0 = arith.constant 0 : i32
    return %1, %c0_i32 : i32, i32
  }
  func.func @transform_8(%arg0: i32, %arg1: i32) -> (i32, i32) {
    %c1_i32 = arith.constant 1 : i32
    %0 = arith.muli %arg0, %c1_i32 : i32
    %1 = arith.addi %0, %arg1 : i32
    %c0_i32 = arith.constant 0 : i32
    %c0_i32_0 = arith.constant 0 : i32
    return %1, %c0_i32 : i32, i32
  }
  func.func @transform_9(%arg0: i32, %arg1: i32) -> (i32, i32) {
    %c1_i32 = arith.constant 1 : i32
    %0 = arith.muli %arg0, %c1_i32 : i32
    %1 = arith.addi %0, %arg1 : i32
    %c0_i32 = arith.constant 0 : i32
    %c0_i32_0 = arith.constant 0 : i32
    return %1, %c0_i32 : i32, i32
  }
  func.func @transform_10(%arg0: i32, %arg1: i32) -> (i32, i32, i32) {
    %c0_i32 = arith.constant 0 : i32
    %c0_i32_0 = arith.constant 0 : i32
    %c0_i32_1 = arith.constant 0 : i32
    return %arg0, %c0_i32, %c0_i32_0 : i32, i32, i32
  }
  func.func @transform_11(%arg0: i32, %arg1: i32) -> (i32, i32, i32) {
    %c0_i32 = arith.constant 0 : i32
    %c0_i32_0 = arith.constant 0 : i32
    %c0_i32_1 = arith.constant 0 : i32
    return %arg0, %c0_i32, %c0_i32_0 : i32, i32, i32
  }
}

module attributes {stable_mosaic.version = 11 : i64} {
  func.func @_final_kernel(%arg0: i32, %arg1: memref<256x128xbf16, #tpu.memory_space<vmem>>, %arg2: memref<256x128xbf16, #tpu.memory_space<vmem>>, %arg3: memref<2x128xf32, #tpu.memory_space<vmem>>, %arg4: memref<1x128xf32, #tpu.memory_space<vmem>>, %arg5: memref<1x128xf32, #tpu.memory_space<vmem>>, %arg6: memref<2x128xf32, #tpu.memory_space<vmem>>, %arg7: memref<1x128xf32, #tpu.memory_space<vmem>>, %arg8: memref<1x128xf32, #tpu.memory_space<vmem>>, %arg9: memref<256x128xf32, #tpu.memory_space<vmem>>) attributes {dimension_semantics = [#tpu.dimension_semantics<parallel>], iteration_bounds = array<i64: 2>, scalar_prefetch = 0 : i64, scratch_operands = 0 : i64, tpu.core_type = #tpu.core_type<tc>, window_params = [{transform_indices = @transform_0, window_bounds = array<i64: 256, 128>}, {transform_indices = @transform_1, window_bounds = array<i64: 256, 128>}, {pipeline_mode = #tpu.pipeline_mode<synchronous>, transform_indices = @transform_2, window_bounds = array<i64: 2, 128>}, {pipeline_mode = #tpu.pipeline_mode<synchronous>, transform_indices = @transform_3, window_bounds = array<i64: 1, 128>}, {pipeline_mode = #tpu.pipeline_mode<synchronous>, transform_indices = @transform_4, window_bounds = array<i64: 1, 128>}, {pipeline_mode = #tpu.pipeline_mode<synchronous>, transform_indices = @transform_5, window_bounds = array<i64: 2, 128>}, {pipeline_mode = #tpu.pipeline_mode<synchronous>, transform_indices = @transform_6, window_bounds = array<i64: 1, 128>}, {pipeline_mode = #tpu.pipeline_mode<synchronous>, transform_indices = @transform_7, window_bounds = array<i64: 1, 128>}, {transform_indices = @transform_8, window_bounds = array<i64: 256, 128>}]} {
    %c0 = arith.constant 0 : index
    %c0_0 = arith.constant 0 : index
    %0 = vector.load %arg3[%c0, %c0_0] : memref<2x128xf32, #tpu.memory_space<vmem>>, vector<1x128xf32>
    %cst = arith.constant 0.00255102036 : f32
    %1 = vector.broadcast %cst : f32 to vector<1x128xf32>
    %2 = arith.mulf %0, %1 : vector<1x128xf32>
    %c1 = arith.constant 1 : index
    %c0_1 = arith.constant 0 : index
    %3 = vector.load %arg3[%c1, %c0_1] : memref<2x128xf32, #tpu.memory_space<vmem>>, vector<1x128xf32>
    %cst_2 = arith.constant 0.00255102036 : f32
    %4 = vector.broadcast %cst_2 : f32 to vector<1x128xf32>
    %5 = arith.mulf %3, %4 : vector<1x128xf32>
    %6 = arith.mulf %2, %2 : vector<1x128xf32>
    %7 = arith.subf %5, %6 : vector<1x128xf32>
    %cst_3 = arith.constant 0.000000e+00 : f32
    %8 = vector.broadcast %cst_3 : f32 to vector<1x128xf32>
    %9 = arith.maximumf %7, %8 : vector<1x128xf32>
    %c0_4 = arith.constant 0 : index
    %c0_5 = arith.constant 0 : index
    %10 = vector.load %arg4[%c0_4, %c0_5] : memref<1x128xf32, #tpu.memory_space<vmem>>, vector<1x128xf32>
    %cst_6 = arith.constant 9.99999974E-6 : f32
    %11 = vector.broadcast %cst_6 : f32 to vector<1x128xf32>
    %12 = arith.addf %9, %11 : vector<1x128xf32>
    %13 = math.rsqrt %12 : vector<1x128xf32>
    %14 = arith.mulf %10, %13 : vector<1x128xf32>
    %c0_7 = arith.constant 0 : index
    %c0_8 = arith.constant 0 : index
    %15 = vector.load %arg5[%c0_7, %c0_8] : memref<1x128xf32, #tpu.memory_space<vmem>>, vector<1x128xf32>
    %16 = arith.mulf %2, %14 : vector<1x128xf32>
    %17 = arith.subf %15, %16 : vector<1x128xf32>
    %c0_9 = arith.constant 0 : index
    %c0_10 = arith.constant 0 : index
    %18 = vector.load %arg6[%c0_9, %c0_10] : memref<2x128xf32, #tpu.memory_space<vmem>>, vector<1x128xf32>
    %cst_11 = arith.constant 0.00255102036 : f32
    %19 = vector.broadcast %cst_11 : f32 to vector<1x128xf32>
    %20 = arith.mulf %18, %19 : vector<1x128xf32>
    %c1_12 = arith.constant 1 : index
    %c0_13 = arith.constant 0 : index
    %21 = vector.load %arg6[%c1_12, %c0_13] : memref<2x128xf32, #tpu.memory_space<vmem>>, vector<1x128xf32>
    %cst_14 = arith.constant 0.00255102036 : f32
    %22 = vector.broadcast %cst_14 : f32 to vector<1x128xf32>
    %23 = arith.mulf %21, %22 : vector<1x128xf32>
    %24 = arith.mulf %20, %20 : vector<1x128xf32>
    %25 = arith.subf %23, %24 : vector<1x128xf32>
    %cst_15 = arith.constant 0.000000e+00 : f32
    %26 = vector.broadcast %cst_15 : f32 to vector<1x128xf32>
    %27 = arith.maximumf %25, %26 : vector<1x128xf32>
    %c0_16 = arith.constant 0 : index
    %c0_17 = arith.constant 0 : index
    %28 = vector.load %arg7[%c0_16, %c0_17] : memref<1x128xf32, #tpu.memory_space<vmem>>, vector<1x128xf32>
    %cst_18 = arith.constant 9.99999974E-6 : f32
    %29 = vector.broadcast %cst_18 : f32 to vector<1x128xf32>
    %30 = arith.addf %27, %29 : vector<1x128xf32>
    %31 = math.rsqrt %30 : vector<1x128xf32>
    %32 = arith.mulf %28, %31 : vector<1x128xf32>
    %c0_19 = arith.constant 0 : index
    %c0_20 = arith.constant 0 : index
    %33 = vector.load %arg8[%c0_19, %c0_20] : memref<1x128xf32, #tpu.memory_space<vmem>>, vector<1x128xf32>
    %34 = arith.mulf %20, %32 : vector<1x128xf32>
    %35 = arith.subf %33, %34 : vector<1x128xf32>
    %c0_21 = arith.constant 0 : index
    %c0_22 = arith.constant 0 : index
    %36 = vector.load %arg1[%c0_21, %c0_22] : memref<256x128xbf16, #tpu.memory_space<vmem>>, vector<256x128xbf16>
    %37 = arith.extf %36 : vector<256x128xbf16> to vector<256x128xf32>
    %38 = vector.broadcast %14 : vector<1x128xf32> to vector<256x128xf32>
    %39 = arith.mulf %37, %38 : vector<256x128xf32>
    %40 = vector.broadcast %17 : vector<1x128xf32> to vector<256x128xf32>
    %41 = arith.addf %39, %40 : vector<256x128xf32>
    %cst_23 = arith.constant 0.000000e+00 : f32
    %42 = vector.broadcast %cst_23 : f32 to vector<256x128xf32>
    %43 = arith.maximumf %41, %42 : vector<256x128xf32>
    %c0_24 = arith.constant 0 : index
    %c0_25 = arith.constant 0 : index
    %44 = vector.load %arg2[%c0_24, %c0_25] : memref<256x128xbf16, #tpu.memory_space<vmem>>, vector<256x128xbf16>
    %45 = arith.extf %44 : vector<256x128xbf16> to vector<256x128xf32>
    %46 = vector.broadcast %32 : vector<1x128xf32> to vector<256x128xf32>
    %47 = arith.mulf %45, %46 : vector<256x128xf32>
    %48 = vector.broadcast %35 : vector<1x128xf32> to vector<256x128xf32>
    %49 = arith.addf %47, %48 : vector<256x128xf32>
    %50 = arith.addf %43, %49 : vector<256x128xf32>
    %cst_26 = arith.constant 0.000000e+00 : f32
    %51 = vector.broadcast %cst_26 : f32 to vector<256x128xf32>
    %52 = arith.maximumf %50, %51 : vector<256x128xf32>
    %c0_27 = arith.constant 0 : index
    %c0_28 = arith.constant 0 : index
    %53 = vector.load %arg9[%c0_27, %c0_28] : memref<256x128xf32, #tpu.memory_space<vmem>>, vector<256x128xf32>
    tpu.vector_store %arg9[%c0_27, %c0_28], %52 {strides = array<i32>} : memref<256x128xf32, #tpu.memory_space<vmem>>, vector<256x128xf32>,
    return
  }
  func.func @transform_0(%arg0: i32) -> (i32, i32) {
    %c0_i32 = arith.constant 0 : i32
    %c0_i32_0 = arith.constant 0 : i32
    return %arg0, %c0_i32 : i32, i32
  }
  func.func @transform_1(%arg0: i32) -> (i32, i32) {
    %c0_i32 = arith.constant 0 : i32
    %c0_i32_0 = arith.constant 0 : i32
    return %arg0, %c0_i32 : i32, i32
  }
  func.func @transform_2(%arg0: i32) -> (i32, i32) {
    %c0_i32 = arith.constant 0 : i32
    %c0_i32_0 = arith.constant 0 : i32
    %c0_i32_1 = arith.constant 0 : i32
    return %c0_i32, %c0_i32_0 : i32, i32
  }
  func.func @transform_3(%arg0: i32) -> (i32, i32) {
    %c0_i32 = arith.constant 0 : i32
    %c0_i32_0 = arith.constant 0 : i32
    %c0_i32_1 = arith.constant 0 : i32
    return %c0_i32, %c0_i32_0 : i32, i32
  }
  func.func @transform_4(%arg0: i32) -> (i32, i32) {
    %c0_i32 = arith.constant 0 : i32
    %c0_i32_0 = arith.constant 0 : i32
    %c0_i32_1 = arith.constant 0 : i32
    return %c0_i32, %c0_i32_0 : i32, i32
  }
  func.func @transform_5(%arg0: i32) -> (i32, i32) {
    %c0_i32 = arith.constant 0 : i32
    %c0_i32_0 = arith.constant 0 : i32
    %c0_i32_1 = arith.constant 0 : i32
    return %c0_i32, %c0_i32_0 : i32, i32
  }
  func.func @transform_6(%arg0: i32) -> (i32, i32) {
    %c0_i32 = arith.constant 0 : i32
    %c0_i32_0 = arith.constant 0 : i32
    %c0_i32_1 = arith.constant 0 : i32
    return %c0_i32, %c0_i32_0 : i32, i32
  }
  func.func @transform_7(%arg0: i32) -> (i32, i32) {
    %c0_i32 = arith.constant 0 : i32
    %c0_i32_0 = arith.constant 0 : i32
    %c0_i32_1 = arith.constant 0 : i32
    return %c0_i32, %c0_i32_0 : i32, i32
  }
  func.func @transform_8(%arg0: i32) -> (i32, i32) {
    %c0_i32 = arith.constant 0 : i32
    %c0_i32_0 = arith.constant 0 : i32
    return %arg0, %c0_i32 : i32, i32
  }
}

</mosaic_0001>

<bundles_post_ra>
// kernel: block_forward.4
= control target key start
LH: loop header
LB: loop body
LE: loop exit
PB: predicated region body
PF: predicated region fallthrough
CT: control target
= control target key end

     0   :  { %s860_s9 = smov 0   ;;  %s862_s10 = smov 0   ;;  %s985_s0 = inlined_call_operand.vmem [shape: bf16[552,128], index: 0, kind: input, shape index: {}]   ;;  %s986_s1 = inlined_call_operand.vmem [shape: bf16[128,128], index: 1, kind: input, shape index: {}]   ;;  %s987_s2 = inlined_call_operand.vmem [shape: f32[2,2,128], index: 2, kind: output, shape index: {}]  }
   0x1   :  { %s864_s11 = smov 0  }
   0x2 LB: > { %s24_s12 = sadd.s32 1, %s838_s10  ;;  %p645_p0 = scmp.ge.s32.totalorder %s842_s11, 1  ;;  %s842_s11 = sphi %s864_s11, %s12_s11   ;;  %s838_s10 = sphi %s862_s10, %s989_s10   ;;  %s834_s9 = sphi %s860_s9, %s988_s9  }
   0x3   : > { %p26_p1 = scmp.ge.s32.totalorder %s24_s12, 2  ;;  %p137_p2 = scmp.lt.s32.totalorder %s842_s11, 3 }
   0x5   : > { %s991_s12 = smov (%p26_p1, %s24_s12), 0  ;;  %p138_p3 = pnand %p645_p0, %p137_p2 }
   0x6   : > { %s646_s21 = sshll.u32 (!%p138_p3), %s834_s9, 5  ;;  %p179_p5 = scmp.lt.s32.totalorder (!%p138_p3), %s834_s9, 1 }
   0x7   : > { %141 = sbr.rel (%p138_p3) target bundleno = 294 (0x126), region = 28  ;;  %p169_p4 = scmp.lt.s32.totalorder (!%p138_p3), %s646_s21, 68 }
   0xc   : > { %v770_v0 = vld [vmem:[%s986_s1 + $0x38] sm:$0xff]  ;;  %v769_v1 = vld [vmem:[%s986_s1 + $0x30] sm:$0xff]  ;;  %v768_v2 = vld [vmem:[%s986_s1 + $0x28] sm:$0xff]  ;;  %s993_s21 = smov (!%p169_p4, %s646_s21), 68  ;;  %s995_s9 = smov (!%p179_p5, %s834_s9), 1  ;;  %vm576_vm0 = vcmask 1040384  }
   0xd   : > { %380 = vmatpush.bf16.msra.mxu0 %v770_v0  ;;  %771 = vmatpush.bf16.msra.mxu1 %v770_v0  ;;  %v767_v3 = vld [vmem:[%s986_s1 + $0x20] sm:$0xff]  ;;  %v766_v4 = vld [vmem:[%s986_s1 + $0x18] sm:$0xff]  ;;  %v765_v5 = vld [vmem:[%s986_s1 + $0x10] sm:$0xff]  ;;  %s647_s28 = sshll.u32 %s993_s21, 2  ;;  %s648_s6 = sshll.u32 %s995_s9, 1 }
   0xe   : > { %772 = vmatpush.bf16.msra.mxu2 %v770_v0  ;;  %773 = vmatpush.bf16.msra.mxu3 %v770_v0  ;;  %v764_v6 = vld [vmem:[%s986_s1 + $0x8] sm:$0xff]  ;;  %v763_v7 = vld [vmem:[%s986_s1] sm:$0xff]  ;;  %s908_s5 = scalar_lea.vmem %s985_s0, %s647_s28  ;;  %s947_s13 = scalar_lea.vmem %s987_s2, %s648_s6 }
   0xf   : > { %v747_v8 = vld [vmem:[%s908_s5] sm:$0xff]  ;;  %v748_v12 = vld [vmem:[%s908_s5 + $0x8] sm:$0xff]  ;;  %v749_v16 = vld [vmem:[%s908_s5 + $0x10] sm:$0xff] }
  0x10   : > { %v751_v9 = vld [vmem:[%s908_s5 + $0x20] sm:$0xff]  ;;  %v752_v13 = vld [vmem:[%s908_s5 + $0x28] sm:$0xff]  ;;  %v753_v17 = vld [vmem:[%s908_s5 + $0x30] sm:$0xff] }
  0x11   : > { %381 = vmatpush.bf16.msra.mxu0 %v769_v1  ;;  %774 = vmatpush.bf16.msra.mxu1 %v769_v1  ;;  %v755_v10 = vld [vmem:[%s908_s5 + $0x40] sm:$0xff]  ;;  %v756_v14 = vld [vmem:[%s908_s5 + $0x48] sm:$0xff]  ;;  %v757_v18 = vld [vmem:[%s908_s5 + $0x50] sm:$0xff] }
  0x12   : > { %775 = vmatpush.bf16.msra.mxu2 %v769_v1  ;;  %776 = vmatpush.bf16.msra.mxu3 %v769_v1  ;;  %v759_v11 = vld [vmem:[%s908_s5 + $0x60] sm:$0xff]  ;;  %v760_v15 = vld [vmem:[%s908_s5 + $0x68] sm:$0xff]  ;;  %v761_v19 = vld [vmem:[%s908_s5 + $0x70] sm:$0xff] }
  0x13   : > { %v750_v20 = vld [vmem:[%s908_s5 + $0x18] sm:$0xff] }
  0x14   : > { %v754_v21 = vld [vmem:[%s908_s5 + $0x38] sm:$0xff] }
  0x15   : > { %382 = vmatpush.bf16.msra.mxu0 %v768_v2  ;;  %777 = vmatpush.bf16.msra.mxu1 %v768_v2  ;;  %v758_v22 = vld [vmem:[%s908_s5 + $0x58] sm:$0xff] }
  0x16   : > { %778 = vmatpush.bf16.msra.mxu2 %v768_v2  ;;  %779 = vmatpush.bf16.msra.mxu3 %v768_v2  ;;  %v762_v23 = vld [vmem:[%s908_s5 + $0x78] sm:$0xff] }
  0x19   : > { %383 = vmatpush.bf16.msra.mxu0 %v767_v3  ;;  %780 = vmatpush.bf16.msra.mxu1 %v767_v3 }
  0x1a   : > { %781 = vmatpush.bf16.msra.mxu2 %v767_v3  ;;  %782 = vmatpush.bf16.msra.mxu3 %v767_v3 }
  0x1d   : > { %384 = vmatpush.bf16.msra.mxu0 %v766_v4  ;;  %783 = vmatpush.bf16.msra.mxu1 %v766_v4 }
  0x1e   : > { %784 = vmatpush.bf16.msra.mxu2 %v766_v4  ;;  %785 = vmatpush.bf16.msra.mxu3 %v766_v4 }
  0x21   : > { %385 = vmatpush.bf16.msra.mxu0 %v765_v5  ;;  %786 = vmatpush.bf16.msra.mxu1 %v765_v5 }
  0x22   : > { %787 = vmatpush.bf16.msra.mxu2 %v765_v5  ;;  %788 = vmatpush.bf16.msra.mxu3 %v765_v5 }
  0x25   : > { %386 = vmatpush.bf16.msra.mxu0 %v764_v6  ;;  %789 = vmatpush.bf16.msra.mxu1 %v764_v6 }
  0x26   : > { %790 = vmatpush.bf16.msra.mxu2 %v764_v6  ;;  %791 = vmatpush.bf16.msra.mxu3 %v764_v6 }
  0x29   : > { %387 = vmatpush.bf16.msra.mxu0 %v763_v7  ;;  %792 = vmatpush.bf16.msra.mxu1 %v763_v7 }
  0x2a   : > { %793 = vmatpush.bf16.msra.mxu2 %v763_v7  ;;  %794 = vmatpush.bf16.msra.mxu3 %v763_v7 }
  0x2c   : > { %388 = vmatmul.bf16.vlgmr.msra.gmra.mxu0 %v747_v8  ;;  %408 = vmatmul.bf16.vlgmr.msra.gmra.mxu1 %v751_v9 }
  0x2d   : > { %428 = vmatmul.bf16.vlgmr.msra.gmra.mxu2 %v755_v10  ;;  %448 = vmatmul.bf16.vlgmr.msra.gmra.mxu3 %v759_v11 }
  0x3c   : > { %393 = vmatmul.bf16.gmra.mxu0 %v748_v12  ;;  %413 = vmatmul.bf16.gmra.mxu1 %v752_v13 }
  0x3d   : > { %433 = vmatmul.bf16.gmra.mxu2 %v756_v14  ;;  %453 = vmatmul.bf16.gmra.mxu3 %v760_v15 }
  0x4c   : > { %398 = vmatmul.bf16.gmra.mxu0 %v749_v16  ;;  %418 = vmatmul.bf16.gmra.mxu1 %v753_v17 }
  0x4d   : > { %438 = vmatmul.bf16.gmra.mxu2 %v757_v18  ;;  %458 = vmatmul.bf16.gmra.mxu3 %v761_v19 }
  0x5c   : > { %403 = vmatmul.bf16.gmra.mxu0 %v750_v20  ;;  %423 = vmatmul.bf16.gmra.mxu1 %v754_v21 }
  0x5d   : > { %443 = vmatmul.bf16.gmra.mxu2 %v758_v22  ;;  %463 = vmatmul.bf16.gmra.mxu3 %v762_v23 }
  0xa9   : > { %v389_v24 = vpop.f32.mrf.mxu0  ;;  %v409_v25 = vpop.f32.mrf.mxu1 }
  0xaa   : > { %v507_v41 = vmul.f32 %v389_v24, %v389_v24  ;;  %v515_v3 = vmul.f32 %v409_v25, %v409_v25 }
  0xb0   : > { %v926_v29 = vpop.f32.mrf.mxu2  ;;  %v930_v35 = vpop.f32.mrf.mxu3 }
  0xb1   : > { %v391_v26 = vpop.f32.mrf.mxu0  ;;  %v411_v27 = vpop.f32.mrf.mxu1 }
  0xb2   : > { %v508_v40 = vmul.f32 %v391_v26, %v391_v26  ;;  %v470_v42 = vadd.f32 %v391_v26, %v389_v24  ;;  %v516_v7 = vmul.f32 %v411_v27, %v411_v27 }
  0xb4   : > { %v539_v45 = vadd.f32 %v508_v40, %v507_v41 }
  0xb8   : > { %v928_v32 = vpop.f32.mrf.mxu2  ;;  %v934_v39 = vpop.f32.mrf.mxu3 }
  0xb9   : > { %v394_v28 = vpop.f32.mrf.mxu0  ;;  %v414_v30 = vpop.f32.mrf.mxu1 }
  0xba   : > { %v509_v43 = vmul.f32 %v394_v28, %v394_v28  ;;  %v471_v46 = vadd.f32 %v470_v42, %v394_v28  ;;  %v517_v11 = vmul.f32 %v414_v30, %v414_v30  ;;  %v524_v42 = vmul.f32 %v928_v32, %v928_v32 }
  0xbc   : > { %v540_v49 = vadd.f32 %v539_v45, %v509_v43 }
  0xc0   : > { %v932_v36 = vpop.f32.mrf.mxu2  ;;  %v938_v56 = vpop.f32.mrf.mxu3 }
  0xc1   : > { %v396_v31 = vpop.f32.mrf.mxu0  ;;  %v416_v33 = vpop.f32.mrf.mxu1 }
  0xc2   : > { %v510_v47 = vmul.f32 %v396_v31, %v396_v31  ;;  %v472_v50 = vadd.f32 %v471_v46, %v396_v31  ;;  %v518_v14 = vmul.f32 %v416_v33, %v416_v33  ;;  %v525_v46 = vmul.f32 %v932_v36, %v932_v36 }
  0xc4   : > { %v541_v53 = vadd.f32 %v540_v49, %v510_v47 }
  0xc8   : > { %v936_v44 = vpop.f32.mrf.mxu2  ;;  %v941_v10 = vpop.f32.mrf.mxu3 }
  0xc9   : > { %v399_v34 = vpop.f32.mrf.mxu0  ;;  %v419_v38 = vpop.f32.mrf.mxu1  ;;  %v526_v49 = vmul.f32 %v936_v44, %v936_v44 }
  0xca   : > { %v511_v51 = vmul.f32 %v399_v34, %v399_v34  ;;  %v473_v54 = vadd.f32 %v472_v50, %v399_v34  ;;  %v519_v18 = vmul.f32 %v419_v38, %v419_v38  ;;  %v844_v34 = vmov 0.0  }
  0xcb   : > { %187 = vst [vmem:[%s947_s13] sm:$0x3] %v844_v34 }
  0xcc   : > { %v542_v57 = vadd.f32 %v541_v53, %v511_v51 }
  0xd0   : > { %v439_v63 = vpop.f32.mrf.mxu2  ;;  %v459_v28 = vpop.f32.mrf.mxu3 }
  0xd1   : > { %v401_v37 = vpop.f32.mrf.mxu0  ;;  %v421_v52 = vpop.f32.mrf.mxu1 }
  0xd2   : > { %v512_v55 = vmul.f32 %v401_v37, %v401_v37  ;;  %v474_v58 = vadd.f32 %v473_v54, %v401_v37  ;;  %v520_v21 = vmul.f32 %v421_v52, %v421_v52  ;;  %v523_v37 = vmul.f32 %v926_v29, %v926_v29 }
  0xd4   : > { %v543_v60 = vadd.f32 %v542_v57, %v512_v55 }
  0xd8   : > { %v441_v17 = vpop.f32.mrf.mxu2  ;;  %v461_v51 = vpop.f32.mrf.mxu3 }
  0xd9   : > { %v404_v48 = vpop.f32.mrf.mxu0  ;;  %v424_v6 = vpop.f32.mrf.mxu1  ;;  %v528_v57 = vmul.f32 %v441_v17, %v441_v17 }
  0xda   : > { %v513_v59 = vmul.f32 %v404_v48, %v404_v48  ;;  %v475_v61 = vadd.f32 %v474_v58, %v404_v48  ;;  %v521_v26 = vmul.f32 %v424_v6, %v424_v6 }
  0xdc   : > { %v544_v0 = vadd.f32 %v543_v60, %v513_v59 }
  0xe0   : > { %v444_v41 = vpop.f32.mrf.mxu2 }
  0xe1   : > { %v406_v62 = vpop.f32.mrf.mxu0  ;;  %v426_v24 = vpop.f32.mrf.mxu1 }
  0xe2   : > { %v476_v1 = vadd.f32 %v475_v61, %v406_v62  ;;  %v514_v2 = vmul.f32 %v406_v62, %v406_v62  ;;  %v529_v61 = vmul.f32 %v444_v41, %v444_v41 }
  0xe4   : > { %v477_v4 = vadd.f32 %v476_v1, %v409_v25  ;;  %v545_v5 = vadd.f32 %v544_v0, %v514_v2  ;;  %v531_v1 = vmul.f32 %v930_v35, %v930_v35 }
  0xe6   : > { %v478_v8 = vadd.f32 %v477_v4, %v411_v27  ;;  %v546_v9 = vadd.f32 %v545_v5, %v515_v3  ;;  %v464_v3 = vpop.f32.mrf.mxu3 }
  0xe8   : > { %v479_v12 = vadd.f32 %v478_v8, %v414_v30  ;;  %v547_v13 = vadd.f32 %v546_v9, %v516_v7  ;;  %v446_v58 = vpop.f32.mrf.mxu2  ;;  %v534_v9 = vmul.f32 %v941_v10, %v941_v10 }
  0xe9   : > { %v530_v0 = vmul.f32 %v446_v58, %v446_v58 }
  0xea   : > { %v548_v15 = vadd.f32 %v547_v13, %v517_v11  ;;  %v480_v16 = vadd.f32 %v479_v12, %v416_v33  ;;  %v522_v33 = vmul.f32 %v426_v24, %v426_v24  ;;  %v535_v12 = vmul.f32 %v459_v28, %v459_v28 }
  0xec   : > { %v481_v19 = vadd.f32 %v480_v16, %v419_v38  ;;  %v549_v20 = vadd.f32 %v548_v15, %v518_v14  ;;  %v536_v16 = vmul.f32 %v461_v51, %v461_v51 }
  0xee   : > { %v482_v22 = vadd.f32 %v481_v19, %v421_v52  ;;  %v550_v23 = vadd.f32 %v549_v20, %v519_v18  ;;  %v527_v52 = vmul.f32 %v439_v63, %v439_v63  ;;  %v537_v20 = vmul.f32 %v464_v3, %v464_v3 }
  0xf0   : > { %v483_v25 = vadd.f32 %v482_v22, %v424_v6  ;;  %v551_v27 = vadd.f32 %v550_v23, %v520_v21  ;;  %v533_v6 = vmul.f32 %v938_v56, %v938_v56 }
  0xf2   : > { %v552_v30 = vadd.f32 %v551_v27, %v521_v26  ;;  %v484_v31 = vadd.f32 %v483_v25, %v426_v24 }
  0xf4   : > { %v485_v38 = vadd.f32 %v484_v31, %v926_v29  ;;  %v553_v40 = vadd.f32 %v552_v30, %v522_v33 }
  0xf6   : > { %v486_v43 = vadd.f32 %v485_v38, %v928_v32  ;;  %v554_v45 = vadd.f32 %v553_v40, %v523_v37  ;;  %v469_v37 = vld [vmem:[%s947_s13] sm:$0x3] }
  0xf8   : > { %v487_v47 = vadd.f32 %v486_v43, %v932_v36  ;;  %v555_v48 = vadd.f32 %v554_v45, %v524_v42 }
  0xfa   : > { %v556_v50 = vadd.f32 %v555_v48, %v525_v46  ;;  %v488_v29 = vadd.f32 %v487_v47, %v936_v44 }
  0xfc   : > { %v489_v53 = vadd.f32 %v488_v29, %v439_v63  ;;  %v557_v54 = vadd.f32 %v556_v50, %v526_v49  ;;  %v532_v63 = vmul.f32 %v934_v39, %v934_v39 }
  0xfe   : > { %v490_v55 = vadd.f32 %v489_v53, %v441_v17  ;;  %v558_v32 = vadd.f32 %v557_v54, %v527_v52 }
 0x100   : > { %v559_v59 = vadd.f32 %v558_v32, %v528_v57  ;;  %v491_v60 = vadd.f32 %v490_v55, %v444_v41 }
 0x102   : > { %v560_v62 = vadd.f32 %v559_v59, %v529_v61  ;;  %v492_v36 = vadd.f32 %v491_v60, %v446_v58 }
 0x104   : > { %v493_v2 = vadd.f32 %v492_v36, %v930_v35  ;;  %v561_v44 = vadd.f32 %v560_v62, %v530_v0 }
 0x106   : > { %v494_v4 = vadd.f32 %v493_v2, %v934_v39  ;;  %v562_v5 = vadd.f32 %v561_v44, %v531_v1  ;;  %v466_v39 = vpop.f32.mrf.mxu3 }
 0x107   : > { %v538_v22 = vmul.f32 %v466_v39, %v466_v39 }
 0x108   : > { %v495_v7 = vadd.f32 %v494_v4, %v938_v56  ;;  %v563_v8 = vadd.f32 %v562_v5, %v532_v63 }
 0x10a   : > { %v564_v11 = vadd.f32 %v563_v8, %v533_v6  ;;  %v496_v35 = vadd.f32 %v495_v7, %v941_v10 }
 0x10c   : > { %v497_v13 = vadd.f32 %v496_v35, %v459_v28  ;;  %v565_v14 = vadd.f32 %v564_v11, %v534_v9 }
 0x10e   : > { %v498_v15 = vadd.f32 %v497_v13, %v461_v51  ;;  %v566_v17 = vadd.f32 %v565_v14, %v535_v12 }
 0x110   : > { %v567_v18 = vadd.f32 %v566_v17, %v536_v16  ;;  %v499_v19 = vadd.f32 %v498_v15, %v464_v3 }
 0x112   : > { %v568_v21 = vadd.f32 %v567_v18, %v537_v20  ;;  %v500_v56 = vadd.f32 %v499_v19, %v466_v39 }
 0x114   : > { %v501_v23 = vrot.slane %v500_v56, 4  ;;  %v569_v24 = vadd.f32 %v568_v21, %v538_v22 }
 0x116   : > { %v502_v25 = vadd.f32 %v501_v23, %v500_v56  ;;  %v570_v26 = vrot.slane %v569_v24, 4 }
 0x118   : > { %v503_v10 = vrot.slane %v502_v25, 2  ;;  %v571_v27 = vadd.f32 %v570_v26, %v569_v24 }
 0x11a   : > { %v504_v28 = vadd.f32 %v503_v10, %v502_v25  ;;  %v572_v30 = vrot.slane %v571_v27, 2 }
 0x11c   : > { %v505_v31 = vrot.slane %v504_v28, 1  ;;  %v573_v33 = vadd.f32 %v572_v30, %v571_v27 }
 0x11e   : > { %v574_v34 = vrot.slane %v573_v33, 1  ;;  %v506_v38 = vadd.f32 %v505_v31, %v504_v28 }
 0x120   : > { %v575_v40 = vadd.f32 %v574_v34, %v573_v33 }
 0x122   : > { %v577_v41 = vsel %vm576_vm0, %v506_v38, %v575_v40 }
 0x123   : > { %v578_v42 = vadd.f32 %v577_v41, %v469_v37 }
 0x125   : > { %579 = vst [vmem:[%s947_s13] sm:$0x3] %v578_v42 }
 0x126 PF: > { %s12_s11 = sadd.s32 1, %s842_s11   ;;  %s988_s9 = smov %s838_s10 }
 0x127   : > { %p9_p6 = scmp.ge.s32.totalorder %s12_s11, 4   ;;  %s989_s10 = smov %s991_s12 }
 0x129   :  { %11 = sbr.rel (!%p9_p6) target bundleno = 2 (0x2), region = 62 }

// kernel: block_forward.6
= control target key start
LH: loop header
LB: loop body
LE: loop exit
PB: predicated region body
PF: predicated region fallthrough
CT: control target
= control target key end

     0   :  { %s1600_s24 = smov 0   ;;  %s1602_s25 = smov 0   ;;  %s2004_s0 = inlined_call_operand.vmem [shape: bf16[512,128], index: 0, kind: input, shape index: {}]   ;;  %s2005_s1 = inlined_call_operand.vmem [shape: bf16[128,128], index: 1, kind: input, shape index: {}]   ;;  %s2006_s2 = inlined_call_operand.vmem [shape: f32[2,128], index: 2, kind: input, shape index: {}]   ;;  %s2007_s3 = inlined_call_operand.vmem [shape: f32[1,128], index: 3, kind: input, shape index: {}]   ;;  %s2008_s4 = inlined_call_operand.vmem [shape: f32[1,128], index: 4, kind: input, shape index: {}]   ;;  %s2009_s5 = inlined_call_operand.vmem [shape: f32[512,1], index: 5, kind: input, shape index: {}]   ;;  %s2010_s6 = inlined_call_operand.vmem [shape: bf16[512,128], index: 6, kind: output, shape index: {0}]   ;;  %s2011_s7 = inlined_call_operand.vmem [shape: f32[2,2,128], index: 7, kind: output, shape index: {1}]  }
   0x1   :  { %s1604_s26 = smov 0  }
   0x2 LB: > { %s30_s27 = sadd.s32 1, %s1552_s25  ;;  %p1255_p0 = scmp.ge.s32.totalorder %s1556_s26, 1  ;;  %s1556_s26 = sphi %s1604_s26, %s18_s26   ;;  %s1552_s25 = sphi %s1602_s25, %s2013_s25   ;;  %s1548_s24 = sphi %s1600_s24, %s2012_s24  }
   0x3   : > { %p32_p1 = scmp.ge.s32.totalorder %s30_s27, 2  ;;  %p274_p2 = scmp.lt.s32.totalorder %s1556_s26, 3 }
   0x5   : > { %s2015_s27 = smov (%p32_p1, %s30_s27), 0  ;;  %p275_p3 = pnand %p1255_p0, %p274_p2 }
   0x6   : > { %s1256_s28 = sshll.u32 (!%p275_p3), %s1548_s24, 5  ;;  %p342_p5 = scmp.lt.s32.totalorder (!%p275_p3), %s1548_s24, 1 }
   0x7   : > { %278 = sbr.rel (%p275_p3) target bundleno = 311 (0x137), region = 44  ;;  %p320_p4 = scmp.lt.s32.totalorder (!%p275_p3), %s1256_s28, 63 }
   0xc   : > { %v1304_v0 = vld [vmem:[%s2005_s1 + $0x38] sm:$0xff]  ;;  %v1558_v1 = vmov 0   ;;  %v1303_v2 = vld [vmem:[%s2005_s1 + $0x30] sm:$0xff]  ;;  %v351_v3 = vld [vmem:[%s2006_s2] sm:$0x1]  ;;  %s2017_s28 = smov (!%p320_p4, %s1256_s28), 63 }
   0xd   : > { %1530 = vset.pattern.permute.xlu1 %v1558_v1  ;;  %1529 = vset.pattern.permute.xlu0 %v1558_v1  ;;  %v1632_v4 = vmul.f32 0.0025510204, %v351_v3  ;;  %v353_v5 = vld [vmem:[%s2006_s2 + $0x1] sm:$0x1]  ;;  %s1259_s14 = sshll.u32 %s2017_s28, 3  ;;  %v1302_v8 = vld [vmem:[%s2005_s1 + $0x28] sm:$0xff] }
   0xe   : > { %620 = vmatpush.bf16.msra.mxu0 %v1304_v0  ;;  %1479 = vmatpush.bf16.msra.mxu1 %v1304_v0  ;;  %v354_v6 = vmul.f32 0.0025510204, %v353_v5  ;;  %s1643_s17 = scalar_lea.vmem %s2009_s5, %s1259_s14  ;;  %v1301_v14 = vld [vmem:[%s2005_s1 + $0x20] sm:$0xff]  ;;  %v1300_v18 = vld [vmem:[%s2005_s1 + $0x18] sm:$0xff]  ;;  %v1299_v20 = vld [vmem:[%s2005_s1 + $0x10] sm:$0xff]  ;;  %s1257_s10 = sshll.u32 %s2017_s28, 2 }
   0xf   : > { %1480 = vmatpush.bf16.msra.mxu2 %v1304_v0  ;;  %1481 = vmatpush.bf16.msra.mxu3 %v1304_v0  ;;  %v355_v7 = vmul.f32 %v1632_v4, %v1632_v4  ;;  %v775_v9 = vld [vmem:[%s1643_s17 + $0x10] sm:$0xff]  ;;  %v773_v10 = vld [vmem:[%s1643_s17] sm:$0xff]  ;;  %v776_v16 = vld [vmem:[%s1643_s17 + $0x18] sm:$0xff]  ;;  %s1674_s13 = scalar_lea.vmem %s2004_s0, %s1257_s10  ;;  %s1807_s22 = scalar_lea.vmem %s2010_s6, %s1257_s10  ;;  %vm1136_vm3 = vcmask 1040384  }
  0x10   : > { %1531 = vset.pattern.permute.xlu2 %v1558_v1  ;;  %849 = vperm.xlu1 %1530, %v775_v9   ;;  %v777_v12 = vld [vmem:[%s1643_s17 + $0x20] sm:$0xff]  ;;  %v774_v17 = vld [vmem:[%s1643_s17 + $0x8] sm:$0xff]  ;;  %v780_v23 = vld [vmem:[%s1643_s17 + $0x38] sm:$0xff]  ;;  %s2019_s24 = smov (!%p342_p5, %s1548_s24), 1 }
  0x11   : > { %v356_v11 = vsub.f32 %v354_v6, %v355_v7  ;;  %839 = vperm.xlu0 %1529, %v773_v10   ;;  %859 = vperm.xlu2 %1531, %v777_v12   ;;  %v778_v19 = vld [vmem:[%s1643_s17 + $0x28] sm:$0xff]  ;;  %v779_v24 = vld [vmem:[%s1643_s17 + $0x30] sm:$0xff]  ;;  %v781_v28 = vld [vmem:[%s1643_s17 + $0x40] sm:$0xff]  ;;  %s1262_s28 = sshll.u32 %s2019_s24, 1 }
  0x12   : > { %621 = vmatpush.bf16.msra.mxu0 %v1303_v2  ;;  %1482 = vmatpush.bf16.msra.mxu1 %v1303_v2  ;;  %v1298_v25 = vld [vmem:[%s2005_s1 + $0x8] sm:$0xff]  ;;  %v1297_v29 = vld [vmem:[%s2005_s1] sm:$0xff]  ;;  %v783_v32 = vld [vmem:[%s1643_s17 + $0x50] sm:$0xff]  ;;  %s1954_s29 = scalar_lea.vmem %s2011_s7, %s1262_s28 }
  0x13   : > { %1483 = vmatpush.bf16.msra.mxu2 %v1303_v2  ;;  %1484 = vmatpush.bf16.msra.mxu3 %v1303_v2  ;;  %v357_v13 = vmax.f32 %v356_v11, 0.0  ;;  %v358_v31 = vld [vmem:[%s2007_s3] sm:$0x1]  ;;  %v782_v36 = vld [vmem:[%s1643_s17 + $0x48] sm:$0xff]  ;;  %v784_v51 = vld [vmem:[%s1643_s17 + $0x58] sm:$0xff] }
  0x14   : > { %v1306_v34 = vld [vmem:[%s1674_s13] sm:$0xff]   ;;  %v1449_v53 = vld [vmem:[%s1674_s13 + $0x8] sm:$0xff]  }
  0x15   : > { %v359_v15 = vadd.f32 1e-05, %v357_v13  ;;  %v1452_v35 = vld [vmem:[%s1674_s13 + $0x20] sm:$0xff]   ;;  %v1307_v41 = vunpack.c.l.bf16 %v1306_v34  ;;  %v1308_v42 = vunpack.c.h.bf16 %v1306_v34  ;;  %v1453_v58 = vld [vmem:[%s1674_s13 + $0x28] sm:$0xff]   ;;  %v1311_v3 = vunpack.c.l.bf16 %v1449_v53 }
  0x16   : > { %622 = vmatpush.bf16.msra.mxu0 %v1302_v8  ;;  %1485 = vmatpush.bf16.msra.mxu1 %v1302_v8  ;;  %v1456_v37 = vld [vmem:[%s1674_s13 + $0x40] sm:$0xff]   ;;  %v1323_v43 = vunpack.c.l.bf16 %v1452_v35  ;;  %v1324_v45 = vunpack.c.h.bf16 %v1452_v35  ;;  %v1457_v59 = vld [vmem:[%s1674_s13 + $0x48] sm:$0xff]   ;;  %v1327_v6 = vunpack.c.l.bf16 %v1453_v58  ;;  %v1328_v7 = vunpack.c.h.bf16 %v1453_v58 }
  0x17   : > { %1486 = vmatpush.bf16.msra.mxu2 %v1302_v8  ;;  %1487 = vmatpush.bf16.msra.mxu3 %v1302_v8  ;;  %1532 = vrsqrt.f32 %v359_v15  ;;  %vm366_vm0 = vweird.f32 %v359_v15  ;;  %v1460_v38 = vld [vmem:[%s1674_s13 + $0x60] sm:$0xff]   ;;  %v1339_v46 = vunpack.c.l.bf16 %v1456_v37  ;;  %v1340_v47 = vunpack.c.h.bf16 %v1456_v37  ;;  %v786_v0 = vld [vmem:[%s1643_s17 + $0x68] sm:$0xff] }
  0x18   : > { %854 = vperm.xlu1 %1530, %v776_v16   ;;  %v371_v44 = vld [vmem:[%s2008_s4] sm:$0x1]  ;;  %v1355_v48 = vunpack.c.l.bf16 %v1460_v38  ;;  %v1356_v52 = vunpack.c.h.bf16 %v1460_v38  ;;  %v1343_v8 = vunpack.c.l.bf16 %v1457_v59  ;;  %v1344_v16 = vunpack.c.h.bf16 %v1457_v59 }
  0x19   : > { %844 = vperm.xlu0 %1529, %v774_v17   ;;  %864 = vperm.xlu2 %1531, %v778_v19   ;;  %v785_v1 = vld [vmem:[%s1643_s17 + $0x60] sm:$0xff]  ;;  %v1461_v17 = vld [vmem:[%s1674_s13 + $0x68] sm:$0xff]  }
  0x1a   : > { %623 = vmatpush.bf16.msra.mxu0 %v1301_v14  ;;  %1488 = vmatpush.bf16.msra.mxu1 %v1301_v14  ;;  %v789_v34 = vld [vmem:[%s1643_s17 + $0x80] sm:$0xff] }
  0x1b   : > { %1489 = vmatpush.bf16.msra.mxu2 %v1301_v14  ;;  %1490 = vmatpush.bf16.msra.mxu3 %v1301_v14 }
  0x1d   : > { %v1533_v21 = vpop.eup %1532 }
  0x1e   : > { %624 = vmatpush.bf16.msra.mxu0 %v1300_v18  ;;  %1491 = vmatpush.bf16.msra.mxu1 %v1300_v18  ;;  %v361_v22 = vmul.f32 %v1533_v21, %v359_v15  ;;  %vm367_vm1 = vweird.f32 %v1533_v21 }
  0x1f   : > { %1492 = vmatpush.bf16.msra.mxu2 %v1300_v18  ;;  %1493 = vmatpush.bf16.msra.mxu3 %v1300_v18  ;;  %vm368_vm2 = vmor %vm366_vm0, %vm367_vm1 }
  0x20   : > { %v362_v26 = vmul.f32 %v1533_v21, %v361_v22  ;;  %874 = vperm.xlu1 %1530, %v780_v23   ;;  %v787_v22 = vld [vmem:[%s1643_s17 + $0x70] sm:$0xff] }
  0x21   : > { %869 = vperm.xlu0 %1529, %v779_v24   ;;  %879 = vperm.xlu2 %1531, %v781_v28  }
  0x22   : > { %625 = vmatpush.bf16.msra.mxu0 %v1299_v20  ;;  %1494 = vmatpush.bf16.msra.mxu1 %v1299_v20  ;;  %v363_v27 = vmul.f32 0.5, %v362_v26 }
  0x23   : > { %1495 = vmatpush.bf16.msra.mxu2 %v1299_v20  ;;  %1496 = vmatpush.bf16.msra.mxu3 %v1299_v20 }
  0x24   : > { %v364_v30 = vsub.f32 1.5, %v363_v27 }
  0x26   : > { %626 = vmatpush.bf16.msra.mxu0 %v1298_v25  ;;  %1497 = vmatpush.bf16.msra.mxu1 %v1298_v25  ;;  %v365_v33 = vmul.f32 %v1533_v21, %v364_v30 }
  0x27   : > { %1498 = vmatpush.bf16.msra.mxu2 %v1298_v25  ;;  %1499 = vmatpush.bf16.msra.mxu3 %v1298_v25 }
  0x28   : > { %v369_v39 = vsel %vm368_vm2, %v1533_v21, %v365_v33  ;;  %889 = vperm.xlu1 %1530, %v783_v32   ;;  %v1360_v33 = vunpack.c.h.bf16 %v1461_v17 }
  0x29   : > { %v370_v40 = vmul.f32 %v369_v39, %v358_v31  ;;  %884 = vperm.xlu0 %1529, %v782_v36   ;;  %894 = vperm.xlu2 %1531, %v784_v51   ;;  %v788_v39 = vld [vmem:[%s1643_s17 + $0x78] sm:$0xff] }
  0x2a   : > { %627 = vmatpush.bf16.msra.mxu0 %v1297_v29  ;;  %1500 = vmatpush.bf16.msra.mxu1 %v1297_v29 }
  0x2b   : > { %1501 = vmatpush.bf16.msra.mxu2 %v1297_v29  ;;  %1502 = vmatpush.bf16.msra.mxu3 %v1297_v29  ;;  %v372_v49 = vmul.f32 %v370_v40, %v1632_v4  ;;  %v1693_v50 = vperm.slane %v370_v40, 0  ;;  %v1312_v4 = vunpack.c.h.bf16 %v1449_v53  ;;  %v1359_v29 = vunpack.c.l.bf16 %v1461_v17 }
  0x2d   : > { %v373_v54 = vsub.f32 %v371_v44, %v372_v49  ;;  %v441_v55 = vmul.f32 %v1307_v41, %v1693_v50  ;;  %v442_v56 = vmul.f32 %v1308_v42, %v1693_v50  ;;  %v449_v57 = vmul.f32 %v1323_v43, %v1693_v50 }
  0x2e   : > { %v450_v60 = vmul.f32 %v1324_v45, %v1693_v50  ;;  %v457_v61 = vmul.f32 %v1339_v46, %v1693_v50  ;;  %v458_v62 = vmul.f32 %v1340_v47, %v1693_v50  ;;  %v465_v63 = vmul.f32 %v1355_v48, %v1693_v50  ;;  %v790_v48 = vld [vmem:[%s1643_s17 + $0x88] sm:$0xff] }
  0x2f   : > { %v1708_v2 = vperm.slane %v373_v54, 0  ;;  %v466_v5 = vmul.f32 %v1356_v52, %v1693_v50  ;;  %v443_v32 = vmul.f32 %v1311_v3, %v1693_v50  ;;  %v444_v35 = vmul.f32 %v1312_v4, %v1693_v50  ;;  %v1450_v54 = vld [vmem:[%s1674_s13 + $0x10] sm:$0xff]  }
  0x30   : > { %904 = vperm.xlu1 %1530, %v786_v0   ;;  %v451_v36 = vmul.f32 %v1327_v6, %v1693_v50  ;;  %v452_v37 = vmul.f32 %v1328_v7, %v1693_v50  ;;  %v459_v40 = vmul.f32 %v1343_v8, %v1693_v50  ;;  %v460_v41 = vmul.f32 %v1344_v16, %v1693_v50 }
  0x31   : > { %v476_v9 = vadd.f32 %v1708_v2, %v441_v55  ;;  %v477_v10 = vadd.f32 %v1708_v2, %v442_v56  ;;  %v484_v11 = vadd.f32 %v1708_v2, %v449_v57  ;;  %v485_v12 = vadd.f32 %v1708_v2, %v450_v60  ;;  %899 = vperm.xlu0 %1529, %v785_v1   ;;  %v792_v55 = vld [vmem:[%s1643_s17 + $0x98] sm:$0xff]  ;;  %v791_v60 = vld [vmem:[%s1643_s17 + $0x90] sm:$0xff] }
  0x32   : > { %v492_v13 = vadd.f32 %v1708_v2, %v457_v61  ;;  %v493_v14 = vadd.f32 %v1708_v2, %v458_v62  ;;  %v500_v15 = vadd.f32 %v1708_v2, %v465_v63  ;;  %v501_v25 = vadd.f32 %v1708_v2, %v466_v5  ;;  %909 = vperm.xlu2 %1531, %v787_v22   ;;  %v1454_v63 = vld [vmem:[%s1674_s13 + $0x30] sm:$0xff]  }
  0x33   : > { %v508_v18 = vmax.f32 %v476_v9, 0.0  ;;  %v509_v19 = vmax.f32 %v477_v10, 0.0  ;;  %v516_v20 = vmax.f32 %v484_v11, 0.0  ;;  %v517_v21 = vmax.f32 %v485_v12, 0.0  ;;  %v1458_v1 = vld [vmem:[%s1674_s13 + $0x50] sm:$0xff]   ;;  %v793_v11 = vld [vmem:[%s1643_s17 + $0xa0] sm:$0xff] }
  0x34   : > { %v524_v23 = vmax.f32 %v492_v13, 0.0  ;;  %v525_v24 = vmax.f32 %v493_v14, 0.0  ;;  %v532_v26 = vmax.f32 %v500_v15, 0.0  ;;  %v533_v31 = vmax.f32 %v501_v25, 0.0  ;;  %v1462_v10 = vld [vmem:[%s1674_s13 + $0x70] sm:$0xff]  }
  0x35   : > { %v540_v27 = vpack.c.bf16 %v509_v19, %v508_v18  ;;  %v544_v28 = vpack.c.bf16 %v517_v21, %v516_v20  ;;  %v467_v42 = vmul.f32 %v1359_v29, %v1693_v50  ;;  %v468_v43 = vmul.f32 %v1360_v33, %v1693_v50  ;;  %v795_v20 = vld [vmem:[%s1643_s17 + $0xb0] sm:$0xff] }
  0x36   : > { %v548_v30 = vpack.c.bf16 %v525_v24, %v524_v23  ;;  %v552_v38 = vpack.c.bf16 %v533_v31, %v532_v26  ;;  %v478_v44 = vadd.f32 %v1708_v2, %v443_v32  ;;  %v479_v45 = vadd.f32 %v1708_v2, %v444_v35  ;;  %v794_v23 = vld [vmem:[%s1643_s17 + $0xa8] sm:$0xff]  ;;  %v796_v32 = vld [vmem:[%s1643_s17 + $0xb8] sm:$0xff] }
  0x37   : > { %628 = vmatmul.bf16.vlgmr.msra.gmra.mxu0 %v540_v27  ;;  %648 = vmatmul.bf16.vlgmr.msra.gmra.mxu1 %v544_v28  ;;  %v486_v46 = vadd.f32 %v1708_v2, %v451_v36  ;;  %v487_v47 = vadd.f32 %v1708_v2, %v452_v37  ;;  %v494_v49 = vadd.f32 %v1708_v2, %v459_v40  ;;  %v1315_v0 = vunpack.c.l.bf16 %v1450_v54 }
  0x38   : > { %668 = vmatmul.bf16.vlgmr.msra.gmra.mxu2 %v548_v30  ;;  %688 = vmatmul.bf16.vlgmr.msra.gmra.mxu3 %v552_v38  ;;  %v495_v51 = vadd.f32 %v1708_v2, %v460_v41  ;;  %v502_v52 = vadd.f32 %v1708_v2, %v467_v42  ;;  %v503_v53 = vadd.f32 %v1708_v2, %v468_v43  ;;  %v510_v56 = vmax.f32 %v478_v44, 0.0  ;;  %v1451_v42 = vld [vmem:[%s1674_s13 + $0x18] sm:$0xff]   ;;  %v797_v43 = vld [vmem:[%s1643_s17 + $0xc0] sm:$0xff] }
  0x39   : > { %919 = vperm.xlu1 %1530, %v789_v34   ;;  %914 = vperm.xlu0 %1529, %v788_v39   ;;  %v511_v57 = vmax.f32 %v479_v45, 0.0  ;;  %v518_v58 = vmax.f32 %v486_v46, 0.0  ;;  %v519_v59 = vmax.f32 %v487_v47, 0.0  ;;  %v526_v61 = vmax.f32 %v494_v49, 0.0  ;;  %v798_v39 = vld [vmem:[%s1643_s17 + $0xc8] sm:$0xff]  ;;  %v1455_v46 = vld [vmem:[%s1674_s13 + $0x38] sm:$0xff]  }
  0x3a   : > { %924 = vperm.xlu2 %1531, %v790_v48   ;;  %v527_v62 = vmax.f32 %v495_v51, 0.0  ;;  %v534_v3 = vmax.f32 %v502_v52, 0.0  ;;  %v535_v4 = vmax.f32 %v503_v53, 0.0  ;;  %v1316_v5 = vunpack.c.h.bf16 %v1450_v54  ;;  %v1459_v47 = vld [vmem:[%s1674_s13 + $0x58] sm:$0xff]  }
  0x3b   : > { %v541_v6 = vpack.c.bf16 %v511_v57, %v510_v56  ;;  %v545_v7 = vpack.c.bf16 %v519_v59, %v518_v58  ;;  %v1331_v8 = vunpack.c.l.bf16 %v1454_v63  ;;  %v1332_v9 = vunpack.c.h.bf16 %v1454_v63  ;;  %v1463_v57 = vld [vmem:[%s1674_s13 + $0x78] sm:$0xff]   ;;  %v799_v58 = vld [vmem:[%s1643_s17 + $0xd0] sm:$0xff] }
  0x3c   : > { %v549_v12 = vpack.c.bf16 %v527_v62, %v526_v61  ;;  %v1347_v13 = vunpack.c.l.bf16 %v1458_v1  ;;  %v1348_v14 = vunpack.c.h.bf16 %v1458_v1  ;;  %v445_v15 = vmul.f32 %v1315_v0, %v1693_v50 }
  0x3d   : > { %v553_v16 = vpack.c.bf16 %v535_v4, %v534_v3  ;;  %v446_v17 = vmul.f32 %v1316_v5, %v1693_v50  ;;  %v1363_v18 = vunpack.c.l.bf16 %v1462_v10  ;;  %v1364_v19 = vunpack.c.h.bf16 %v1462_v10  ;;  %v801_v3 = vld [vmem:[%s1643_s17 + $0xe0] sm:$0xff] }
  0x3e   : > { %v453_v21 = vmul.f32 %v1331_v8, %v1693_v50  ;;  %v454_v22 = vmul.f32 %v1332_v9, %v1693_v50  ;;  %v461_v24 = vmul.f32 %v1347_v13, %v1693_v50  ;;  %v462_v25 = vmul.f32 %v1348_v14, %v1693_v50 }
  0x3f   : > { %v480_v26 = vadd.f32 %v1708_v2, %v445_v15  ;;  %v481_v27 = vadd.f32 %v1708_v2, %v446_v17  ;;  %v469_v28 = vmul.f32 %v1363_v18, %v1693_v50  ;;  %v470_v29 = vmul.f32 %v1364_v19, %v1693_v50 }
  0x40   : > { %v488_v30 = vadd.f32 %v1708_v2, %v453_v21  ;;  %v489_v31 = vadd.f32 %v1708_v2, %v454_v22  ;;  %v496_v33 = vadd.f32 %v1708_v2, %v461_v24  ;;  %v497_v34 = vadd.f32 %v1708_v2, %v462_v25  ;;  %v803_v25 = vld [vmem:[%s1643_s17 + $0xf0] sm:$0xff] }
  0x41   : > { %934 = vperm.xlu1 %1530, %v792_v55   ;;  %929 = vperm.xlu0 %1529, %v791_v60   ;;  %v512_v35 = vmax.f32 %v480_v26, 0.0  ;;  %v513_v36 = vmax.f32 %v481_v27, 0.0  ;;  %v504_v37 = vadd.f32 %v1708_v2, %v469_v28  ;;  %v505_v38 = vadd.f32 %v1708_v2, %v470_v29 }
  0x42   : > { %939 = vperm.xlu2 %1531, %v793_v11   ;;  %v520_v40 = vmax.f32 %v488_v30, 0.0  ;;  %v521_v41 = vmax.f32 %v489_v31, 0.0  ;;  %v528_v44 = vmax.f32 %v496_v33, 0.0  ;;  %v529_v45 = vmax.f32 %v497_v34, 0.0 }
  0x43   : > { %v542_v48 = vpack.c.bf16 %v513_v36, %v512_v35  ;;  %v536_v49 = vmax.f32 %v504_v37, 0.0  ;;  %v537_v51 = vmax.f32 %v505_v38, 0.0  ;;  %v1319_v52 = vunpack.c.l.bf16 %v1451_v42 }
  0x44   : > { %v546_v53 = vpack.c.bf16 %v521_v41, %v520_v40  ;;  %v1320_v54 = vunpack.c.h.bf16 %v1451_v42  ;;  %v1335_v55 = vunpack.c.l.bf16 %v1455_v46  ;;  %v1336_v56 = vunpack.c.h.bf16 %v1455_v46 }
  0x45   : > { %v550_v59 = vpack.c.bf16 %v529_v45, %v528_v44  ;;  %v1351_v60 = vunpack.c.l.bf16 %v1459_v47  ;;  %v1352_v61 = vunpack.c.h.bf16 %v1459_v47  ;;  %v554_v62 = vpack.c.bf16 %v537_v51, %v536_v49 }
  0x46   : > { %v447_v63 = vmul.f32 %v1319_v52, %v1693_v50  ;;  %v1367_v0 = vunpack.c.l.bf16 %v1463_v57  ;;  %v1368_v1 = vunpack.c.h.bf16 %v1463_v57  ;;  %v448_v4 = vmul.f32 %v1320_v54, %v1693_v50 }
  0x47   : > { %633 = vmatmul.bf16.gmra.mxu0 %v541_v6  ;;  %653 = vmatmul.bf16.gmra.mxu1 %v545_v7  ;;  %v455_v5 = vmul.f32 %v1335_v55, %v1693_v50  ;;  %v456_v6 = vmul.f32 %v1336_v56, %v1693_v50  ;;  %v800_v7 = vld [vmem:[%s1643_s17 + $0xd8] sm:$0xff]  ;;  %v463_v8 = vmul.f32 %v1351_v60, %v1693_v50 }
  0x48   : > { %673 = vmatmul.bf16.gmra.mxu2 %v549_v12  ;;  %693 = vmatmul.bf16.gmra.mxu3 %v553_v16  ;;  %v464_v9 = vmul.f32 %v1352_v61, %v1693_v50  ;;  %v471_v10 = vmul.f32 %v1367_v0, %v1693_v50  ;;  %v472_v11 = vmul.f32 %v1368_v1, %v1693_v50  ;;  %v802_v16 = vld [vmem:[%s1643_s17 + $0xe8] sm:$0xff]  ;;  %v804_v50 = vld [vmem:[%s1643_s17 + $0xf8] sm:$0xff] }
  0x49   : > { %949 = vperm.xlu1 %1530, %v795_v20   ;;  %944 = vperm.xlu0 %1529, %v794_v23   ;;  %v482_v12 = vadd.f32 %v1708_v2, %v447_v63  ;;  %v483_v13 = vadd.f32 %v1708_v2, %v448_v4  ;;  %v490_v14 = vadd.f32 %v1708_v2, %v455_v5 }
  0x4a   : > { %954 = vperm.xlu2 %1531, %v796_v32   ;;  %v491_v15 = vadd.f32 %v1708_v2, %v456_v6  ;;  %v498_v17 = vadd.f32 %v1708_v2, %v463_v8  ;;  %v499_v18 = vadd.f32 %v1708_v2, %v464_v9  ;;  %v506_v19 = vadd.f32 %v1708_v2, %v471_v10 }
  0x4b   : > { %v507_v20 = vadd.f32 %v1708_v2, %v472_v11  ;;  %v514_v21 = vmax.f32 %v482_v12, 0.0  ;;  %v515_v22 = vmax.f32 %v483_v13, 0.0  ;;  %v522_v23 = vmax.f32 %v490_v14, 0.0 }
  0x4c   : > { %v523_v24 = vmax.f32 %v491_v15, 0.0  ;;  %v530_v26 = vmax.f32 %v498_v17, 0.0  ;;  %v531_v27 = vmax.f32 %v499_v18, 0.0  ;;  %v538_v28 = vmax.f32 %v506_v19, 0.0 }
  0x4d   : > { %v539_v29 = vmax.f32 %v507_v20, 0.0  ;;  %v543_v30 = vpack.c.bf16 %v515_v22, %v514_v21 }
  0x4e   : > { %v547_v31 = vpack.c.bf16 %v523_v24, %v522_v23  ;;  %v551_v32 = vpack.c.bf16 %v531_v27, %v530_v26 }
  0x4f   : > { %v555_v33 = vpack.c.bf16 %v539_v29, %v538_v28 }
  0x51   : > { %964 = vperm.xlu1 %1530, %v798_v39   ;;  %959 = vperm.xlu0 %1529, %v797_v43  }
  0x52   : > { %969 = vperm.xlu2 %1531, %v799_v58  }
  0x57   : > { %638 = vmatmul.bf16.gmra.mxu0 %v542_v48  ;;  %658 = vmatmul.bf16.gmra.mxu1 %v546_v53 }
  0x58   : > { %678 = vmatmul.bf16.gmra.mxu2 %v550_v59  ;;  %698 = vmatmul.bf16.gmra.mxu3 %v554_v62 }
  0x59   : > { %979 = vperm.xlu1 %1530, %v801_v3   ;;  %974 = vperm.xlu0 %1529, %v800_v7  }
  0x5a   : > { %984 = vperm.xlu2 %1531, %v802_v16  }
  0x61   : > { %994 = vperm.xlu1 %1530, %v804_v50   ;;  %989 = vperm.xlu0 %1529, %v803_v25  }
  0x67   : > { %643 = vmatmul.bf16.gmra.mxu0 %v543_v30  ;;  %663 = vmatmul.bf16.gmra.mxu1 %v547_v31 }
  0x68   : > { %683 = vmatmul.bf16.gmra.mxu2 %v551_v32  ;;  %703 = vmatmul.bf16.gmra.mxu3 %v555_v33 }
  0x6b   : > { %v1815_v43 = vpop.permute.xlu2 %859 }
  0x73   : > { %v1831_v53 = vpop.permute.xlu2 %864 }
  0x7b   : > { %v1847_v62 = vpop.permute.xlu2 %879 }
  0x82   : > { %v1798_v36 = vpop.permute.xlu1 %849 }
  0x83   : > { %v1796_v35 = vpop.permute.xlu0 %839  ;;  %v1871_v18 = vpop.permute.xlu2 %894 }
  0x8a   : > { %v855_v45 = vpop.permute.xlu1 %854 }
  0x8b   : > { %v845_v44 = vpop.permute.xlu0 %844 }
  0x92   : > { %v1841_v60 = vpop.permute.xlu1 %874 }
  0x93   : > { %v1833_v54 = vpop.permute.xlu0 %869 }
  0x9a   : > { %v1862_v7 = vpop.permute.xlu1 %889 }
  0x9b   : > { %v1857_v5 = vpop.permute.xlu0 %884 }
  0xa2   : > { %v1879_v26 = vpop.permute.xlu1 %904 }
  0xa3   : > { %v1876_v22 = vpop.permute.xlu0 %899 }
  0xb4   : > { %v629_v2 = vpop.f32.mrf.mxu0  ;;  %v1794_v34 = vpop.f32.mrf.mxu1 }
  0xb5   : > { %v709_v9 = vpack.c.bf16 %v629_v2, %v629_v2 }
  0xb7   : > { %v805_v19 = vunpack.c.l.bf16 %v709_v9 }
  0xb9   : > { %v997_v27 = vmul.f32 %v1796_v35, %v805_v19 }
  0xbb   : > { %v1800_v37 = vpop.f32.mrf.mxu2  ;;  %v1811_v40 = vpop.f32.mrf.mxu3 }
  0xbc   : > { %v631_v38 = vpop.f32.mrf.mxu0  ;;  %v1809_v39 = vpop.f32.mrf.mxu1 }
  0xbd   : > { %v1372_v41 = vpack.c.bf16 %v631_v38, %v629_v2  ;;  %v1392_v42 = vpack.c.bf16 %v1809_v39, %v1794_v34  ;;  %v710_v8 = vpack.c.bf16 %v631_v38, %v631_v38  ;;  %v718_v9 = vpack.c.bf16 %v1809_v39, %v1809_v39 }
  0xbf   : > { %1373 = vst [vmem:[%s1807_s22] sm:$0xff] %v1372_v41   ;;  %v806_v12 = vunpack.c.l.bf16 %v710_v8  ;;  %v1901_v8 = vpop.permute.xlu0 %914 }
  0xc0   : > { %1467 = vst [vmem:[%s1807_s22 + $0x20] sm:$0xff] %v1392_v42  }
  0xc1   : > { %v998_v23 = vmul.f32 %v845_v44, %v806_v12 }
  0xc3   : > { %v1819_v46 = vpop.f32.mrf.mxu2  ;;  %v1825_v51 = vpop.f32.mrf.mxu3  ;;  %v1068_v31 = vmul.f32 %v998_v23, %v806_v12 }
  0xc4   : > { %v1412_v47 = vpack.c.bf16 %v1819_v46, %v1800_v37  ;;  %v634_v48 = vpop.f32.mrf.mxu0  ;;  %v1823_v49 = vpop.f32.mrf.mxu1  ;;  %v1432_v52 = vpack.c.bf16 %v1825_v51, %v1811_v40 }
  0xc5   : > { %v711_v10 = vpack.c.bf16 %v634_v48, %v634_v48 }
  0xc6   : > { %1471 = vst [vmem:[%s1807_s22 + $0x40] sm:$0xff] %v1412_v47   ;;  %v1067_v47 = vmul.f32 %v997_v27, %v805_v19  ;;  %v719_v19 = vpack.c.bf16 %v1823_v49, %v1823_v49 }
  0xc7   : > { %1475 = vst [vmem:[%s1807_s22 + $0x60] sm:$0xff] %v1432_v52   ;;  %v807_v20 = vunpack.c.l.bf16 %v711_v10 }
  0xc9   : > { %v999_v28 = vmul.f32 %v1798_v36, %v807_v20 }
  0xcb   : > { %v1835_v55 = vpop.f32.mrf.mxu2  ;;  %v1839_v58 = vpop.f32.mrf.mxu3  ;;  %v1069_v35 = vmul.f32 %v999_v28, %v807_v20 }
  0xcc   : > { %v636_v56 = vpop.f32.mrf.mxu0  ;;  %v1837_v57 = vpop.f32.mrf.mxu1 }
  0xcd   : > { %v1377_v59 = vpack.c.bf16 %v636_v56, %v634_v48  ;;  %v1397_v61 = vpack.c.bf16 %v1837_v57, %v1823_v49  ;;  %v712_v13 = vpack.c.bf16 %v636_v56, %v636_v56  ;;  %v1030_v48 = vadd.f32 %v998_v23, %v997_v27  ;;  %v1895_v56 = vpop.permute.xlu2 %909 }
  0xce   : > { %v720_v27 = vpack.c.bf16 %v1837_v57, %v1837_v57 }
  0xcf   : > { %1464 = vst [vmem:[%s1807_s22 + $0x8] sm:$0xff] %v1377_v59   ;;  %v808_v24 = vunpack.c.l.bf16 %v712_v13  ;;  %v717_v59 = vpack.c.bf16 %v1794_v34, %v1794_v34  ;;  %v1908_v34 = vpop.permute.xlu1 %919 }
  0xd0   : > { %1468 = vst [vmem:[%s1807_s22 + $0x28] sm:$0xff] %v1397_v61   ;;  %v1099_v61 = vadd.f32 %v1068_v31, %v1067_v47 }
  0xd1   : > { %v1000_v32 = vmul.f32 %v855_v45, %v808_v24 }
  0xd2   : > { %v1100_v10 = vadd.f32 %v1099_v61, %v1069_v35 }
  0xd3   : > { %v1849_v63 = vpop.f32.mrf.mxu2  ;;  %v1855_v4 = vpop.f32.mrf.mxu3 }
  0xd4   : > { %v1417_v0 = vpack.c.bf16 %v1849_v63, %v1835_v55  ;;  %v639_v1 = vpop.f32.mrf.mxu0  ;;  %v1853_v3 = vpop.f32.mrf.mxu1  ;;  %v1437_v6 = vpack.c.bf16 %v1855_v4, %v1839_v58 }
  0xd5   : > { %v713_v21 = vpack.c.bf16 %v639_v1, %v639_v1  ;;  %v1924_v35 = vpop.permute.xlu2 %924 }
  0xd6   : > { %1472 = vst [vmem:[%s1807_s22 + $0x48] sm:$0xff] %v1417_v0   ;;  %v1070_v0 = vmul.f32 %v1000_v32, %v808_v24 }
  0xd7   : > { %1476 = vst [vmem:[%s1807_s22 + $0x68] sm:$0xff] %v1437_v6   ;;  %v809_v29 = vunpack.c.l.bf16 %v713_v21 }
  0xd9   : > { %v1001_v45 = vmul.f32 %v1815_v43, %v809_v29 }
  0xdb   : > { %v1865_v11 = vpop.f32.mrf.mxu2  ;;  %v1869_v16 = vpop.f32.mrf.mxu3  ;;  %v1071_v43 = vmul.f32 %v1001_v45, %v809_v29 }
  0xdc   : > { %v641_v14 = vpop.f32.mrf.mxu0  ;;  %v1867_v15 = vpop.f32.mrf.mxu1 }
  0xdd   : > { %v1382_v17 = vpack.c.bf16 %v641_v14, %v639_v1  ;;  %v1402_v50 = vpack.c.bf16 %v1867_v15, %v1853_v3  ;;  %v714_v25 = vpack.c.bf16 %v641_v14, %v641_v14  ;;  %v1031_v1 = vadd.f32 %v1030_v48, %v999_v28 }
  0xde   : > { %v722_v48 = vpack.c.bf16 %v1867_v15, %v1867_v15 }
  0xdf   : > { %1465 = vst [vmem:[%s1807_s22 + $0x10] sm:$0xff] %v1382_v17   ;;  %v810_v41 = vunpack.c.l.bf16 %v714_v25  ;;  %v1032_v12 = vadd.f32 %v1031_v1, %v1000_v32  ;;  %v813_v17 = vunpack.c.l.bf16 %v717_v59  ;;  %v814_v25 = vunpack.c.l.bf16 %v718_v9 }
  0xe0   : > { %1469 = vst [vmem:[%s1807_s22 + $0x30] sm:$0xff] %v1402_v50  }
  0xe1   : > { %v1002_v6 = vmul.f32 %v1831_v53, %v810_v41  ;;  %v1101_v53 = vadd.f32 %v1100_v10, %v1070_v0  ;;  %v1033_v50 = vadd.f32 %v1032_v12, %v1001_v45  ;;  %v935_v10 = vpop.permute.xlu1 %934 }
  0xe3   : > { %v1883_v30 = vpop.f32.mrf.mxu2  ;;  %v1889_v42 = vpop.f32.mrf.mxu3  ;;  %v1072_v21 = vmul.f32 %v1002_v6, %v810_v41  ;;  %v1102_v49 = vadd.f32 %v1101_v53, %v1071_v43  ;;  %v1034_v29 = vadd.f32 %v1033_v50, %v1002_v6  ;;  %v815_v41 = vunpack.c.l.bf16 %v719_v19 }
  0xe4   : > { %v1422_v33 = vpack.c.bf16 %v1883_v30, %v1865_v11  ;;  %v644_v2 = vpop.f32.mrf.mxu0  ;;  %v1887_v38 = vpop.f32.mrf.mxu1  ;;  %v1442_v36 = vpack.c.bf16 %v1889_v42, %v1869_v16  ;;  %v818_v43 = vunpack.c.l.bf16 %v722_v48 }
  0xe5   : > { %v715_v44 = vpack.c.bf16 %v644_v2, %v644_v2  ;;  %v1007_v0 = vmul.f32 %v1862_v7, %v815_v41  ;;  %v723_v6 = vpack.c.bf16 %v1887_v38, %v1887_v38 }
  0xe6   : > { %1473 = vst [vmem:[%s1807_s22 + $0x50] sm:$0xff] %v1422_v33   ;;  %v1005_v33 = vmul.f32 %v1847_v62, %v813_v17  ;;  %v1006_v62 = vmul.f32 %v1857_v5, %v814_v25 }
  0xe7   : > { %v811_v52 = vunpack.c.l.bf16 %v715_v44  ;;  %1477 = vst [vmem:[%s1807_s22 + $0x70] sm:$0xff] %v1442_v36   ;;  %v1103_v44 = vadd.f32 %v1102_v49, %v1072_v21  ;;  %v816_v36 = vunpack.c.l.bf16 %v720_v27  ;;  %v1077_v50 = vmul.f32 %v1007_v0, %v815_v41 }
  0xe8   : > { %v1075_v61 = vmul.f32 %v1005_v33, %v813_v17 }
  0xe9   : > { %v1003_v13 = vmul.f32 %v1833_v54, %v811_v52  ;;  %v1008_v12 = vmul.f32 %v1871_v18, %v816_v36  ;;  %v819_v18 = vunpack.c.l.bf16 %v723_v6 }
  0xeb   : > { %v1906_v14 = vpop.f32.mrf.mxu2  ;;  %v1912_v39 = vpop.f32.mrf.mxu3  ;;  %v1073_v31 = vmul.f32 %v1003_v13, %v811_v52  ;;  %v1035_v47 = vadd.f32 %v1034_v29, %v1003_v13  ;;  %v1076_v13 = vmul.f32 %v1006_v62, %v814_v25  ;;  %v1078_v25 = vmul.f32 %v1008_v12, %v816_v36 }
  0xec   : > { %v646_v20 = vpop.f32.mrf.mxu0  ;;  %v666_v54 = vpop.f32.mrf.mxu1  ;;  %v1011_v41 = vmul.f32 %v1895_v56, %v819_v18 }
  0xed   : > { %v716_v23 = vpack.c.bf16 %v646_v20, %v646_v20  ;;  %v1387_v24 = vpack.c.bf16 %v646_v20, %v644_v2  ;;  %v1407_v28 = vpack.c.bf16 %v666_v54, %v1887_v38  ;;  %v721_v2 = vpack.c.bf16 %v1853_v3, %v1853_v3  ;;  %v940_v29 = vpop.permute.xlu2 %939 }
  0xee   : > { %v1104_v45 = vadd.f32 %v1103_v44, %v1073_v31  ;;  %v724_v7 = vpack.c.bf16 %v666_v54, %v666_v54  ;;  %v725_v20 = vpack.c.bf16 %v1800_v37, %v1800_v37  ;;  %v726_v54 = vpack.c.bf16 %v1819_v46, %v1819_v46 }
  0xef   : > { %1466 = vst [vmem:[%s1807_s22 + $0x18] sm:$0xff] %v1387_v24   ;;  %v812_v32 = vunpack.c.l.bf16 %v716_v23  ;;  %v817_v15 = vunpack.c.l.bf16 %v721_v2  ;;  %v1010_v37 = vmul.f32 %v1879_v26, %v818_v43  ;;  %v727_v31 = vpack.c.bf16 %v1835_v55, %v1835_v55  ;;  %v950_v55 = vpop.permute.xlu1 %949 }
  0xf0   : > { %1470 = vst [vmem:[%s1807_s22 + $0x38] sm:$0xff] %v1407_v28   ;;  %v820_v28 = vunpack.c.l.bf16 %v724_v7  ;;  %v728_v26 = vpack.c.bf16 %v1849_v63, %v1849_v63  ;;  %v1081_v56 = vmul.f32 %v1011_v41, %v819_v18  ;;  %v730_v63 = vpack.c.bf16 %v1883_v30, %v1883_v30 }
  0xf1   : > { %v1004_v57 = vmul.f32 %v1841_v60, %v812_v32  ;;  %v930_v60 = vpop.permute.xlu0 %929  ;;  %v1009_v21 = vmul.f32 %v1876_v22, %v817_v15  ;;  %v821_v22 = vunpack.c.l.bf16 %v725_v20 }
  0xf2   : > { %v1012_v36 = vmul.f32 %v1901_v8, %v820_v28  ;;  %v826_v20 = vunpack.c.l.bf16 %v730_v63 }
  0xf3   : > { %v1036_v52 = vadd.f32 %v1035_v47, %v1004_v57  ;;  %v1074_v3 = vmul.f32 %v1004_v57, %v812_v32  ;;  %v1934_v59 = vpop.f32.mrf.mxu2  ;;  %v1944_v53 = vpop.f32.mrf.mxu3  ;;  %v1559_v32 = vmov 0.0   ;;  %v822_v47 = vunpack.c.l.bf16 %v726_v54 }
  0xf4   : > { %v1427_v1 = vpack.c.bf16 %v1934_v59, %v1906_v14  ;;  %v1447_v38 = vpack.c.bf16 %v1944_v53, %v1912_v39  ;;  %350 = vst [vmem:[%s1954_s29] sm:$0x3] %v1559_v32  ;;  %v1080_v57 = vmul.f32 %v1010_v37, %v818_v43  ;;  %v1082_v8 = vmul.f32 %v1012_v36, %v820_v28 }
  0xf5   : > { %v1037_v9 = vadd.f32 %v1036_v52, %v1005_v33  ;;  %v1105_v5 = vadd.f32 %v1104_v45, %v1074_v3  ;;  %v1079_v33 = vmul.f32 %v1009_v21, %v817_v15  ;;  %v1013_v45 = vmul.f32 %v1908_v34, %v821_v22 }
  0xf6   : > { %1474 = vst [vmem:[%s1807_s22 + $0x58] sm:$0xff] %v1427_v1   ;;  %v823_v52 = vunpack.c.l.bf16 %v727_v31  ;;  %v729_v3 = vpack.c.bf16 %v1865_v11, %v1865_v11  ;;  %v1014_v1 = vmul.f32 %v1924_v35, %v822_v47  ;;  %v824_v15 = vunpack.c.l.bf16 %v728_v26 }
  0xf7   : > { %v1038_v17 = vadd.f32 %v1037_v9, %v1006_v62  ;;  %v1106_v19 = vadd.f32 %v1105_v5, %v1075_v61  ;;  %1478 = vst [vmem:[%s1807_s22 + $0x78] sm:$0xff] %v1447_v38   ;;  %v1083_v5 = vmul.f32 %v1013_v45, %v821_v22  ;;  %v731_v43 = vpack.c.bf16 %v1906_v14, %v1906_v14 }
  0xf8   : > { %v825_v34 = vunpack.c.l.bf16 %v729_v3  ;;  %v1016_v7 = vmul.f32 %v935_v10, %v824_v15  ;;  %v732_v30 = vpack.c.bf16 %v1934_v59, %v1934_v59  ;;  %v733_v38 = vpack.c.bf16 %v1811_v40, %v1811_v40 }
  0xf9   : > { %v1039_v23 = vadd.f32 %v1038_v17, %v1007_v0  ;;  %v1107_v24 = vadd.f32 %v1106_v19, %v1076_v13  ;;  %v945_v46 = vpop.permute.xlu0 %944  ;;  %v1084_v17 = vmul.f32 %v1014_v1, %v822_v47  ;;  %v955_v19 = vpop.permute.xlu2 %954  ;;  %v734_v54 = vpack.c.bf16 %v1825_v51, %v1825_v51 }
  0xfa   : > { %v1017_v18 = vmul.f32 %v940_v29, %v825_v34  ;;  %v1086_v10 = vmul.f32 %v1016_v7, %v824_v15  ;;  %v828_v28 = vunpack.c.l.bf16 %v732_v30  ;;  %v829_v22 = vunpack.c.l.bf16 %v733_v38 }
  0xfb   : > { %v1108_v27 = vadd.f32 %v1107_v24, %v1077_v50  ;;  %v1040_v49 = vadd.f32 %v1039_v23, %v1008_v12  ;;  %v1015_v12 = vmul.f32 %v930_v60, %v823_v52  ;;  %v827_v23 = vunpack.c.l.bf16 %v731_v43 }
  0xfc   : > { %v735_v59 = vpack.c.bf16 %v1839_v58, %v1839_v58  ;;  %v1087_v40 = vmul.f32 %v1017_v18, %v825_v34  ;;  %v1020_v51 = vmul.f32 %v955_v19, %v828_v28  ;;  %v738_v3 = vpack.c.bf16 %v1889_v42, %v1889_v42 }
  0xfd   : > { %v1041_v2 = vadd.f32 %v1040_v49, %v1009_v21  ;;  %v1109_v44 = vadd.f32 %v1108_v27, %v1078_v25  ;;  %v1085_v60 = vmul.f32 %v1015_v12, %v823_v52  ;;  %v965_v25 = vpop.permute.xlu1 %964  ;;  %v1019_v31 = vmul.f32 %v950_v55, %v827_v23 }
  0xfe   : > { %v831_v26 = vunpack.c.l.bf16 %v735_v59  ;;  %v740_v42 = vpack.c.bf16 %v1944_v53, %v1944_v53 }
  0xff   : > { %v1042_v48 = vadd.f32 %v1041_v2, %v1010_v37  ;;  %v1110_v62 = vadd.f32 %v1109_v44, %v1079_v33  ;;  %v1018_v37 = vmul.f32 %v945_v46, %v826_v20  ;;  %v830_v33 = vunpack.c.l.bf16 %v734_v54 }
 0x101   : > { %v1043_v61 = vadd.f32 %v1042_v48, %v1011_v41  ;;  %v1111_v0 = vadd.f32 %v1110_v62, %v1080_v57  ;;  %v960_v21 = vpop.permute.xlu0 %959  ;;  %v736_v41 = vpack.c.bf16 %v1855_v4, %v1855_v4  ;;  %v1088_v2 = vmul.f32 %v1018_v37, %v826_v20  ;;  %v970_v57 = vpop.permute.xlu2 %969 }
 0x102   : > { %v1021_v46 = vmul.f32 %v960_v21, %v829_v22  ;;  %v1089_v48 = vmul.f32 %v1019_v31, %v827_v23 }
 0x103   : > { %v1044_v6 = vadd.f32 %v1043_v61, %v1012_v36  ;;  %v1112_v9 = vadd.f32 %v1111_v0, %v1081_v56  ;;  %v737_v36 = vpack.c.bf16 %v1869_v16, %v1869_v16  ;;  %v832_v52 = vunpack.c.l.bf16 %v736_v41 }
 0x104   : > { %v1090_v56 = vmul.f32 %v1020_v51, %v828_v28  ;;  %v1091_v0 = vmul.f32 %v1021_v46, %v829_v22 }
 0x105   : > { %v1045_v13 = vadd.f32 %v1044_v6, %v1013_v45  ;;  %v1113_v11 = vadd.f32 %v1112_v9, %v1082_v8  ;;  %v1022_v45 = vmul.f32 %v965_v25, %v830_v33  ;;  %v980_v15 = vpop.permute.xlu1 %979  ;;  %v833_v63 = vunpack.c.l.bf16 %v737_v36 }
 0x106   : > { %v739_v6 = vpack.c.bf16 %v1912_v39, %v1912_v39  ;;  %v836_v39 = vunpack.c.l.bf16 %v740_v42 }
 0x107   : > { %v1046_v35 = vadd.f32 %v1045_v13, %v1014_v1  ;;  %v1114_v50 = vadd.f32 %v1113_v11, %v1083_v5  ;;  %v1023_v1 = vmul.f32 %v970_v57, %v831_v26  ;;  %v1092_v9 = vmul.f32 %v1022_v45, %v830_v33 }
 0x108   : > { %v1025_v11 = vmul.f32 %v980_v15, %v833_v63 }
 0x109   : > { %v1047_v24 = vadd.f32 %v1046_v35, %v1015_v12  ;;  %v1115_v14 = vadd.f32 %v1114_v50, %v1084_v17  ;;  %v975_v55 = vpop.permute.xlu0 %974  ;;  %v834_v12 = vunpack.c.l.bf16 %v738_v3  ;;  %v1093_v13 = vmul.f32 %v1023_v1, %v831_v26  ;;  %v985_v35 = vpop.permute.xlu2 %984  ;;  %v1029_v26 = vld [vmem:[%s1954_s29] sm:$0x3] }
 0x10a   : > { %v1024_v5 = vmul.f32 %v975_v55, %v832_v52  ;;  %v835_v17 = vunpack.c.l.bf16 %v739_v6 }
 0x10b   : > { %v1116_v27 = vadd.f32 %v1115_v14, %v1085_v60  ;;  %v1048_v49 = vadd.f32 %v1047_v24, %v1016_v7  ;;  %v1026_v50 = vmul.f32 %v985_v35, %v834_v12  ;;  %v1095_v60 = vmul.f32 %v1025_v11, %v833_v63 }
 0x10c   : > { %v1094_v20 = vmul.f32 %v1024_v5, %v832_v52 }
 0x10d   : > { %v1049_v32 = vadd.f32 %v1048_v49, %v1017_v18  ;;  %v1117_v29 = vadd.f32 %v1116_v27, %v1086_v10  ;;  %v995_v14 = vpop.permute.xlu1 %994  ;;  %v1096_v54 = vmul.f32 %v1026_v50, %v834_v12 }
 0x10e   : > { %v1028_v25 = vmul.f32 %v995_v14, %v836_v39 }
 0x10f   : > { %v1050_v44 = vadd.f32 %v1049_v32, %v1018_v37  ;;  %v1118_v47 = vadd.f32 %v1117_v29, %v1087_v40 }
 0x110   : > { %v1098_v22 = vmul.f32 %v1028_v25, %v836_v39 }
 0x111   : > { %v1051_v58 = vadd.f32 %v1050_v44, %v1019_v31  ;;  %v1119_v62 = vadd.f32 %v1118_v47, %v1088_v2  ;;  %v990_v21 = vpop.permute.xlu0 %989 }
 0x112   : > { %v1027_v18 = vmul.f32 %v990_v21, %v835_v17 }
 0x113   : > { %v1052_v4 = vadd.f32 %v1051_v58, %v1020_v51  ;;  %v1120_v61 = vadd.f32 %v1119_v62, %v1089_v48 }
 0x114   : > { %v1097_v37 = vmul.f32 %v1027_v18, %v835_v17 }
 0x115   : > { %v1053_v16 = vadd.f32 %v1052_v4, %v1021_v46  ;;  %v1121_v8 = vadd.f32 %v1120_v61, %v1090_v56 }
 0x117   : > { %v1054_v34 = vadd.f32 %v1053_v16, %v1022_v45  ;;  %v1122_v43 = vadd.f32 %v1121_v8, %v1091_v0 }
 0x119   : > { %v1055_v19 = vadd.f32 %v1054_v34, %v1023_v1  ;;  %v1123_v7 = vadd.f32 %v1122_v43, %v1092_v9 }
 0x11b   : > { %v1124_v30 = vadd.f32 %v1123_v7, %v1093_v13  ;;  %v1056_v38 = vadd.f32 %v1055_v19, %v1024_v5 }
 0x11d   : > { %v1057_v23 = vadd.f32 %v1056_v38, %v1025_v11  ;;  %v1125_v24 = vadd.f32 %v1124_v30, %v1094_v20 }
 0x11f   : > { %v1058_v53 = vadd.f32 %v1057_v23, %v1026_v50  ;;  %v1126_v10 = vadd.f32 %v1125_v24, %v1095_v60 }
 0x121   : > { %v1059_v27 = vadd.f32 %v1058_v53, %v1027_v18  ;;  %v1127_v28 = vadd.f32 %v1126_v10, %v1096_v54 }
 0x123   : > { %v1060_v49 = vadd.f32 %v1059_v27, %v1028_v25  ;;  %v1128_v59 = vadd.f32 %v1127_v28, %v1097_v37 }
 0x125   : > { %v1061_v40 = vrot.slane %v1060_v49, 4  ;;  %v1129_v31 = vadd.f32 %v1128_v59, %v1098_v22 }
 0x127   : > { %v1062_v32 = vadd.f32 %v1061_v40, %v1060_v49  ;;  %v1130_v29 = vrot.slane %v1129_v31, 4 }
 0x129   : > { %v1063_v33 = vrot.slane %v1062_v32, 2  ;;  %v1131_v41 = vadd.f32 %v1130_v29, %v1129_v31 }
 0x12b   : > { %v1064_v2 = vadd.f32 %v1063_v33, %v1062_v32  ;;  %v1132_v51 = vrot.slane %v1131_v41, 2 }
 0x12d   : > { %v1065_v44 = vrot.slane %v1064_v2, 1  ;;  %v1133_v47 = vadd.f32 %v1132_v51, %v1131_v41 }
 0x12f   : > { %v1134_v46 = vrot.slane %v1133_v47, 1  ;;  %v1066_v57 = vadd.f32 %v1065_v44, %v1064_v2 }
 0x131   : > { %v1135_v36 = vadd.f32 %v1134_v46, %v1133_v47 }
 0x133   : > { %v1137_v48 = vsel %vm1136_vm3, %v1066_v57, %v1135_v36 }
 0x134   : > { %v1138_v58 = vadd.f32 %v1137_v48, %v1029_v26 }
 0x136   : > { %1139 = vst [vmem:[%s1954_s29] sm:$0x3] %v1138_v58 }
 0x137 PF: > { %s18_s26 = sadd.s32 1, %s1556_s26   ;;  %s2012_s24 = smov %s1552_s25 }
 0x138   : > { %p15_p6 = scmp.ge.s32.totalorder %s18_s26, 4   ;;  %s2013_s25 = smov %s2015_s27 }
 0x13a   :  { %17 = sbr.rel (!%p15_p6) target bundleno = 2 (0x2), region = 93 }

// kernel: block_forward.7
= control target key start
LH: loop header
LB: loop body
LE: loop exit
PB: predicated region body
PF: predicated region fallthrough
CT: control target
= control target key end

     0   :  { %s1077_s27 = smov 0   ;;  %s1537_s0 = inlined_call_operand.vmem [shape: bf16[512,128], index: 0, kind: input, shape index: {}]   ;;  %s1538_s1 = inlined_call_operand.vmem [shape: bf16[512,128], index: 1, kind: input, shape index: {}]   ;;  %s1539_s2 = inlined_call_operand.vmem [shape: f32[2,128], index: 2, kind: input, shape index: {}]   ;;  %s1540_s3 = inlined_call_operand.vmem [shape: f32[1,128], index: 3, kind: input, shape index: {}]   ;;  %s1541_s4 = inlined_call_operand.vmem [shape: f32[1,128], index: 4, kind: input, shape index: {}]   ;;  %s1542_s5 = inlined_call_operand.vmem [shape: f32[2,128], index: 5, kind: input, shape index: {}]   ;;  %s1543_s6 = inlined_call_operand.vmem [shape: f32[1,128], index: 6, kind: input, shape index: {}]   ;;  %s1544_s7 = inlined_call_operand.vmem [shape: f32[1,128], index: 7, kind: input, shape index: {}]   ;;  %s1545_s8 = inlined_call_operand.vmem [shape: f32[512,128], index: 8, kind: output, shape index: {}]  }
   0x1 LB: > { %s841_s28 = sadd.s32 4294967295, %s1030_s27   ;;  %p845_p0 = scmp.ge.s32.totalorder %s1030_s27, 1  ;;  %s1030_s27 = sphi %s1077_s27, %s18_s27  }
   0x2   : > { %p274_p1 = scmp.lt.s32.totalorder %s1030_s27, 3 }
   0x4   : > { %p275_p2 = pnand %p845_p0, %p274_p1 }
   0x5   : > { %s846_s29 = sshll.u32 (!%p275_p2), %s841_s28, 5 }
   0x6   : > { %278 = sbr.rel (%p275_p2) target bundleno = 115 (0x73), region = 52  ;;  %p314_p3 = scmp.lt.s32.totalorder (!%p275_p2), %s846_s29, 63 }
   0xb   : > { %v331_v0 = vld [vmem:[%s1539_s2] sm:$0x1]  ;;  %v333_v1 = vld [vmem:[%s1539_s2 + $0x1] sm:$0x1]  ;;  %s1560_s29 = smov (!%p314_p3, %s846_s29), 63 }
   0xc   : > { %v1091_v2 = vmul.f32 0.0025510204, %v331_v0  ;;  %v334_v3 = vmul.f32 0.0025510204, %v333_v1  ;;  %v354_v4 = vld [vmem:[%s1542_s5] sm:$0x1] }
   0xd   : > { %v1098_v6 = vmul.f32 0.0025510204, %v354_v4  ;;  %v356_v7 = vld [vmem:[%s1542_s5 + $0x1] sm:$0x1]  ;;  %s847_s16 = sshll.u32 %s1560_s29, 2  ;;  %s851_s11 = sshll.u32 %s1560_s29, 3 }
   0xe   : > { %v335_v5 = vmul.f32 %v1091_v2, %v1091_v2  ;;  %v357_v8 = vmul.f32 0.0025510204, %v356_v7  ;;  %s1111_s19 = scalar_lea.vmem %s1537_s0, %s847_s16  ;;  %s1116_s22 = scalar_lea.vmem %s1538_s1, %s847_s16  ;;  %v338_v62 = vld [vmem:[%s1540_s3] sm:$0x1] }
   0xf   : > { %v358_v10 = vmul.f32 %v1098_v6, %v1098_v6  ;;  %v1119_v16 = vld [vmem:[%s1111_s19] sm:$0xff]   ;;  %v1125_v18 = vld [vmem:[%s1111_s19 + $0x8] sm:$0xff]   ;;  %v1133_v21 = vld [vmem:[%s1111_s19 + $0x10] sm:$0xff]   ;;  %s1326_s29 = scalar_lea.vmem %s1545_s8, %s851_s11 }
  0x10   : > { %v336_v9 = vsub.f32 %v334_v3, %v335_v5  ;;  %v1122_v17 = vld [vmem:[%s1116_s22] sm:$0xff]   ;;  %v1128_v19 = vld [vmem:[%s1116_s22 + $0x8] sm:$0xff]   ;;  %v856_v23 = vunpack.c.l.bf16 %v1119_v16  ;;  %v857_v25 = vunpack.c.h.bf16 %v1119_v16  ;;  %v1140_v26 = vld [vmem:[%s1116_s22 + $0x10] sm:$0xff]   ;;  %v860_v29 = vunpack.c.l.bf16 %v1125_v18 }
  0x11   : > { %v359_v12 = vsub.f32 %v357_v8, %v358_v10  ;;  %v920_v24 = vunpack.c.l.bf16 %v1122_v17  ;;  %v921_v28 = vunpack.c.h.bf16 %v1122_v17  ;;  %v924_v30 = vunpack.c.l.bf16 %v1128_v19  ;;  %v1149_v32 = vld [vmem:[%s1111_s19 + $0x18] sm:$0xff]   ;;  %v1162_v41 = vld [vmem:[%s1111_s19 + $0x20] sm:$0xff]   ;;  %v1171_v46 = vld [vmem:[%s1111_s19 + $0x28] sm:$0xff]  }
  0x12   : > { %v337_v11 = vmax.f32 %v336_v9, 0.0  ;;  %v861_v31 = vunpack.c.h.bf16 %v1125_v18  ;;  %v925_v35 = vunpack.c.h.bf16 %v1128_v19  ;;  %v864_v36 = vunpack.c.l.bf16 %v1133_v21  ;;  %v1156_v37 = vld [vmem:[%s1116_s22 + $0x18] sm:$0xff]   ;;  %v1168_v45 = vld [vmem:[%s1116_s22 + $0x20] sm:$0xff]   ;;  %v1177_v50 = vld [vmem:[%s1116_s22 + $0x28] sm:$0xff]  }
  0x13   : > { %v360_v14 = vmax.f32 %v359_v12, 0.0  ;;  %v928_v38 = vunpack.c.l.bf16 %v1140_v26  ;;  %v865_v39 = vunpack.c.h.bf16 %v1133_v21  ;;  %v929_v40 = vunpack.c.h.bf16 %v1140_v26  ;;  %v1182_v54 = vld [vmem:[%s1111_s19 + $0x30] sm:$0xff]   ;;  %v1199_v61 = vld [vmem:[%s1111_s19 + $0x38] sm:$0xff]   ;;  %v1211_v5 = vld [vmem:[%s1111_s19 + $0x40] sm:$0xff]  }
  0x14   : > { %v339_v13 = vadd.f32 1e-05, %v337_v11  ;;  %v868_v44 = vunpack.c.l.bf16 %v1149_v32  ;;  %v932_v47 = vunpack.c.l.bf16 %v1156_v37  ;;  %v869_v48 = vunpack.c.h.bf16 %v1149_v32  ;;  %v1185_v55 = vld [vmem:[%s1116_s22 + $0x30] sm:$0xff]   ;;  %v1208_v4 = vld [vmem:[%s1116_s22 + $0x38] sm:$0xff]   ;;  %v1225_v12 = vld [vmem:[%s1111_s19 + $0x48] sm:$0xff]  }
  0x15   : > { %v362_v15 = vadd.f32 1e-05, %v360_v14  ;;  %v933_v49 = vunpack.c.h.bf16 %v1156_v37  ;;  %v872_v53 = vunpack.c.l.bf16 %v1162_v41  ;;  %v936_v57 = vunpack.c.l.bf16 %v1168_v45  ;;  %v361_v14 = vld [vmem:[%s1543_s6] sm:$0x1] }
  0x16   : > { %1020 = vrsqrt.f32 %v339_v13  ;;  %vm346_vm0 = vweird.f32 %v339_v13  ;;  %v873_v58 = vunpack.c.h.bf16 %v1162_v41  ;;  %v876_v59 = vunpack.c.l.bf16 %v1171_v46 }
  0x17   : > { %1022 = vrsqrt.f32 %v362_v15  ;;  %vm369_vm2 = vweird.f32 %v362_v15  ;;  %v877_v60 = vunpack.c.h.bf16 %v1171_v46  ;;  %v937_v1 = vunpack.c.h.bf16 %v1168_v45 }
  0x18   : > { %v940_v3 = vunpack.c.l.bf16 %v1177_v50  ;;  %v941_v8 = vunpack.c.h.bf16 %v1177_v50  ;;  %v880_v9 = vunpack.c.l.bf16 %v1182_v54  ;;  %v944_v10 = vunpack.c.l.bf16 %v1185_v55 }
  0x19   : > { %v881_v11 = vunpack.c.h.bf16 %v1182_v54  ;;  %v1552_v54 = vunpack.c.l.bf16 %v1208_v4 }
  0x1c   : > { %v1130_v20 = vpop.eup %1020 }
  0x1d   : > { %v341_v22 = vmul.f32 %v1130_v20, %v339_v13  ;;  %v1142_v27 = vpop.eup %1022  ;;  %vm347_vm1 = vweird.f32 %v1130_v20 }
  0x1e   : > { %v364_v34 = vmul.f32 %v1142_v27, %v362_v15  ;;  %vm370_vm3 = vweird.f32 %v1142_v27  ;;  %vm1190_vm4 = vmor %vm346_vm0, %vm347_vm1 }
  0x1f   : > { %v342_v33 = vmul.f32 %v1130_v20, %v341_v22  ;;  %vm1216_vm5 = vmor %vm369_vm2, %vm370_vm3 }
  0x20   : > { %v365_v43 = vmul.f32 %v1142_v27, %v364_v34  ;;  %v1237_v34 = vld [vmem:[%s1116_s22 + $0x40] sm:$0xff]  }
  0x21   : > { %v343_v42 = vmul.f32 0.5, %v342_v33  ;;  %v953_v7 = vunpack.c.h.bf16 %v1237_v34 }
  0x22   : > { %v366_v52 = vmul.f32 0.5, %v365_v43  ;;  %v1259_v43 = vld [vmem:[%s1111_s19 + $0x50] sm:$0xff]  }
  0x23   : > { %v344_v51 = vsub.f32 1.5, %v343_v42 }
  0x24   : > { %v367_v0 = vsub.f32 1.5, %v366_v52  ;;  %v351_v52 = vld [vmem:[%s1541_s4] sm:$0x1] }
  0x25   : > { %v345_v63 = vmul.f32 %v1130_v20, %v344_v51 }
  0x26   : > { %v368_v15 = vmul.f32 %v1142_v27, %v367_v0  ;;  %v896_v0 = vunpack.c.l.bf16 %v1259_v43 }
  0x27   : > { %v349_v13 = vsel %vm1190_vm4, %v1130_v20, %v345_v63  ;;  %v949_v63 = vunpack.c.h.bf16 %v1208_v4 }
  0x28   : > { %v350_v42 = vmul.f32 %v349_v13, %v338_v62  ;;  %v372_v56 = vsel %vm1216_vm5, %v1142_v27, %v368_v15  ;;  %v1252_v13 = vld [vmem:[%s1116_s22 + $0x48] sm:$0xff]   ;;  %v374_v27 = vld [vmem:[%s1544_s7] sm:$0x1]  ;;  %v893_v62 = vunpack.c.h.bf16 %v1225_v12 }
  0x29   : > { %v373_v51 = vmul.f32 %v372_v56, %v361_v14 }
  0x2a   : > { %v352_v33 = vmul.f32 %v350_v42, %v1091_v2  ;;  %v1255_v20 = vperm.slane %v350_v42, 0 }
  0x2b   : > { %v375_v14 = vmul.f32 %v373_v51, %v1098_v6  ;;  %v1272_v56 = vperm.slane %v373_v51, 0 }
  0x2c   : > { %v353_v2 = vsub.f32 %v351_v52, %v352_v33  ;;  %v444_v42 = vmul.f32 %v856_v23, %v1255_v20  ;;  %v445_v22 = vmul.f32 %v857_v25, %v1255_v20  ;;  %v446_v15 = vmul.f32 %v860_v29, %v1255_v20 }
  0x2d   : > { %v447_v33 = vmul.f32 %v861_v31, %v1255_v20  ;;  %v448_v6 = vmul.f32 %v864_v36, %v1255_v20  ;;  %v376_v52 = vsub.f32 %v374_v27, %v375_v14  ;;  %v610_v16 = vmul.f32 %v920_v24, %v1272_v56 }
  0x2e   : > { %v1286_v23 = vperm.slane %v353_v2, 0  ;;  %v611_v25 = vmul.f32 %v921_v28, %v1272_v56  ;;  %v612_v18 = vmul.f32 %v924_v30, %v1272_v56  ;;  %v613_v29 = vmul.f32 %v925_v35, %v1272_v56 }
  0x2f   : > { %v614_v31 = vmul.f32 %v928_v38, %v1272_v56  ;;  %v449_v24 = vmul.f32 %v865_v39, %v1255_v20  ;;  %v1307_v17 = vperm.slane %v376_v52, 0  ;;  %v615_v38 = vmul.f32 %v929_v40, %v1272_v56 }
  0x30   : > { %v479_v36 = vadd.f32 %v1286_v23, %v444_v42  ;;  %v480_v28 = vadd.f32 %v1286_v23, %v445_v22  ;;  %v481_v30 = vadd.f32 %v1286_v23, %v446_v15  ;;  %v482_v51 = vadd.f32 %v1286_v23, %v447_v33 }
  0x31   : > { %v483_v19 = vadd.f32 %v1286_v23, %v448_v6  ;;  %v484_v35 = vadd.f32 %v1286_v23, %v449_v24  ;;  %v645_v39 = vadd.f32 %v1307_v17, %v610_v16  ;;  %v646_v2 = vadd.f32 %v1307_v17, %v611_v25 }
  0x32   : > { %v511_v21 = vmax.f32 %v479_v36, 0.0  ;;  %v512_v27 = vmax.f32 %v480_v28, 0.0  ;;  %v513_v22 = vmax.f32 %v481_v30, 0.0  ;;  %v647_v15 = vadd.f32 %v1307_v17, %v612_v18 }
  0x33   : > { %v514_v14 = vmax.f32 %v482_v51, 0.0  ;;  %v648_v42 = vadd.f32 %v1307_v17, %v613_v29  ;;  %v515_v52 = vmax.f32 %v483_v19, 0.0  ;;  %v649_v24 = vadd.f32 %v1307_v17, %v614_v31 }
  0x34   : > { %v677_v33 = vadd.f32 %v645_v39, %v511_v21  ;;  %v678_v6 = vadd.f32 %v646_v2, %v512_v27  ;;  %v679_v26 = vadd.f32 %v647_v15, %v513_v22  ;;  %v516_v16 = vmax.f32 %v484_v35, 0.0 }
  0x35   : > { %v680_v40 = vadd.f32 %v648_v42, %v514_v14  ;;  %v650_v25 = vadd.f32 %v1307_v17, %v615_v38  ;;  %v681_v29 = vadd.f32 %v649_v24, %v515_v52  ;;  %v450_v31 = vmul.f32 %v868_v44, %v1255_v20 }
  0x36   : > { %v709_v18 = vmax.f32 %v677_v33, 0.0  ;;  %v710_v36 = vmax.f32 %v678_v6, 0.0  ;;  %v711_v28 = vmax.f32 %v679_v26, 0.0  ;;  %v616_v19 = vmul.f32 %v932_v47, %v1272_v56 }
  0x37   : > { %v712_v30 = vmax.f32 %v680_v40, 0.0  ;;  %v682_v51 = vadd.f32 %v650_v25, %v516_v16  ;;  %v713_v35 = vmax.f32 %v681_v29, 0.0  ;;  %v485_v38 = vadd.f32 %v1286_v23, %v450_v31 }
  0x38   : > { %741 = vst [vmem:[%s1326_s29] sm:$0xff] %v709_v18  ;;  %v451_v21 = vmul.f32 %v869_v48, %v1255_v20  ;;  %v617_v44 = vmul.f32 %v933_v49, %v1272_v56  ;;  %v651_v27 = vadd.f32 %v1307_v17, %v616_v19  ;;  %v452_v47 = vmul.f32 %v872_v53, %v1255_v20 }
  0x39   : > { %742 = vst [vmem:[%s1326_s29 + $0x8] sm:$0xff] %v710_v36  ;;  %v714_v39 = vmax.f32 %v682_v51, 0.0  ;;  %v618_v2 = vmul.f32 %v936_v57, %v1272_v56  ;;  %v517_v32 = vmax.f32 %v485_v38, 0.0  ;;  %v453_v49 = vmul.f32 %v873_v58, %v1255_v20 }
  0x3a   : > { %743 = vst [vmem:[%s1326_s29 + $0x10] sm:$0xff] %v711_v28  ;;  %v486_v48 = vadd.f32 %v1286_v23, %v451_v21  ;;  %v652_v37 = vadd.f32 %v1307_v17, %v617_v44  ;;  %v487_v22 = vadd.f32 %v1286_v23, %v452_v47  ;;  %v619_v57 = vmul.f32 %v937_v1, %v1272_v56 }
  0x3b   : > { %744 = vst [vmem:[%s1326_s29 + $0x18] sm:$0xff] %v712_v30  ;;  %v653_v53 = vadd.f32 %v1307_v17, %v618_v2  ;;  %v454_v15 = vmul.f32 %v876_v59, %v1255_v20  ;;  %v683_v14 = vadd.f32 %v651_v27, %v517_v32  ;;  %v488_v41 = vadd.f32 %v1286_v23, %v453_v49 }
  0x3c   : > { %745 = vst [vmem:[%s1326_s29 + $0x20] sm:$0xff] %v713_v35  ;;  %v518_v42 = vmax.f32 %v486_v48, 0.0  ;;  %v620_v58 = vmul.f32 %v940_v3, %v1272_v56  ;;  %v519_v33 = vmax.f32 %v487_v22, 0.0  ;;  %v654_v6 = vadd.f32 %v1307_v17, %v619_v57 }
  0x3d   : > { %746 = vst [vmem:[%s1326_s29 + $0x28] sm:$0xff] %v714_v39  ;;  %v489_v45 = vadd.f32 %v1286_v23, %v454_v15  ;;  %v455_v59 = vmul.f32 %v877_v60, %v1255_v20  ;;  %v715_v1 = vmax.f32 %v683_v14, 0.0  ;;  %v520_v24 = vmax.f32 %v488_v41, 0.0 }
  0x3e   : > { %v684_v52 = vadd.f32 %v652_v37, %v518_v42  ;;  %v655_v26 = vadd.f32 %v1307_v17, %v620_v58  ;;  %v685_v40 = vadd.f32 %v653_v53, %v519_v33  ;;  %v621_v25 = vmul.f32 %v941_v8, %v1272_v56 }
  0x3f   : > { %v521_v16 = vmax.f32 %v489_v45, 0.0  ;;  %v490_v3 = vadd.f32 %v1286_v23, %v455_v59  ;;  %747 = vst [vmem:[%s1326_s29 + $0x30] sm:$0xff] %v715_v1  ;;  %v686_v36 = vadd.f32 %v654_v6, %v520_v24  ;;  %v456_v46 = vmul.f32 %v880_v9, %v1255_v20 }
  0x40   : > { %v716_v18 = vmax.f32 %v684_v52, 0.0  ;;  %v622_v60 = vmul.f32 %v944_v10, %v1272_v56  ;;  %v717_v29 = vmax.f32 %v685_v40, 0.0  ;;  %v656_v30 = vadd.f32 %v1307_v17, %v621_v25 }
  0x41   : > { %v687_v31 = vadd.f32 %v655_v26, %v521_v16  ;;  %v522_v28 = vmax.f32 %v490_v3, 0.0  ;;  %v718_v50 = vmax.f32 %v686_v36, 0.0  ;;  %v491_v8 = vadd.f32 %v1286_v23, %v456_v46 }
  0x42   : > { %748 = vst [vmem:[%s1326_s29 + $0x38] sm:$0xff] %v716_v18  ;;  %v657_v51 = vadd.f32 %v1307_v17, %v622_v60  ;;  %v457_v9 = vmul.f32 %v881_v11, %v1255_v20  ;;  %v1550_v10 = vunpack.c.h.bf16 %v1185_v55  ;;  %v1551_v21 = vunpack.c.l.bf16 %v1199_v61 }
  0x43   : > { %749 = vst [vmem:[%s1326_s29 + $0x40] sm:$0xff] %v717_v29  ;;  %v719_v19 = vmax.f32 %v687_v31, 0.0  ;;  %v688_v35 = vadd.f32 %v656_v30, %v522_v28  ;;  %v523_v39 = vmax.f32 %v491_v8, 0.0  ;;  %v624_v11 = vmul.f32 %v1552_v54, %v1272_v56 }
  0x44   : > { %v623_v38 = vmul.f32 %v1550_v10, %v1272_v56  ;;  %v458_v44 = vmul.f32 %v1551_v21, %v1255_v20  ;;  %750 = vst [vmem:[%s1326_s29 + $0x48] sm:$0xff] %v718_v50  ;;  %v492_v27 = vadd.f32 %v1286_v23, %v457_v9  ;;  %v1553_v47 = vunpack.c.h.bf16 %v1199_v61 }
  0x45   : > { %751 = vst [vmem:[%s1326_s29 + $0x50] sm:$0xff] %v719_v19  ;;  %v720_v55 = vmax.f32 %v688_v35, 0.0  ;;  %v625_v37 = vmul.f32 %v949_v63, %v1272_v56  ;;  %v689_v49 = vadd.f32 %v657_v51, %v523_v39  ;;  %v659_v53 = vadd.f32 %v1307_v17, %v624_v11 }
  0x46   : > { %v459_v2 = vmul.f32 %v1553_v47, %v1255_v20  ;;  %v658_v32 = vadd.f32 %v1307_v17, %v623_v38  ;;  %v493_v48 = vadd.f32 %v1286_v23, %v458_v44  ;;  %v524_v22 = vmax.f32 %v492_v27, 0.0  ;;  %v1007_v44 = vld [vmem:[%s1116_s22 + $0x58] sm:$0xff]  }
  0x47   : > { %752 = vst [vmem:[%s1326_s29 + $0x58] sm:$0xff] %v720_v55  ;;  %v660_v15 = vadd.f32 %v1307_v17, %v625_v37  ;;  %v1554_v14 = vunpack.c.l.bf16 %v1211_v5  ;;  %v1555_v41 = vunpack.c.l.bf16 %v1237_v34  ;;  %v721_v63 = vmax.f32 %v689_v49, 0.0 }
  0x48   : > { %v494_v57 = vadd.f32 %v1286_v23, %v459_v2  ;;  %v525_v61 = vmax.f32 %v493_v48, 0.0  ;;  %v690_v58 = vadd.f32 %v658_v32, %v524_v22  ;;  %v1556_v6 = vunpack.c.h.bf16 %v1211_v5 }
  0x49   : > { %v460_v42 = vmul.f32 %v1554_v14, %v1255_v20  ;;  %v626_v4 = vmul.f32 %v1555_v41, %v1272_v56  ;;  %v627_v24 = vmul.f32 %v953_v7, %v1272_v56  ;;  %753 = vst [vmem:[%s1326_s29 + $0x60] sm:$0xff] %v721_v63  ;;  %v1557_v5 = vunpack.c.l.bf16 %v1225_v12  ;;  %v1006_v7 = vld [vmem:[%s1116_s22 + $0x50] sm:$0xff]   ;;  %v993_v41 = vld [vmem:[%s1111_s19 + $0x60] sm:$0xff]  }
  0x4a   : > { %v526_v33 = vmax.f32 %v494_v57, 0.0  ;;  %v461_v45 = vmul.f32 %v1556_v6, %v1255_v20  ;;  %v691_v59 = vadd.f32 %v659_v53, %v525_v61  ;;  %v722_v26 = vmax.f32 %v690_v58, 0.0 }
  0x4b   : > { %v495_v1 = vadd.f32 %v1286_v23, %v460_v42  ;;  %v661_v52 = vadd.f32 %v1307_v17, %v626_v4  ;;  %v462_v3 = vmul.f32 %v1557_v5, %v1255_v20  ;;  %v662_v36 = vadd.f32 %v1307_v17, %v627_v24  ;;  %v1008_v4 = vld [vmem:[%s1116_s22 + $0x60] sm:$0xff]   ;;  %v994_v5 = vld [vmem:[%s1111_s19 + $0x68] sm:$0xff]  }
  0x4c   : > { %v692_v40 = vadd.f32 %v660_v15, %v526_v33  ;;  %v496_v16 = vadd.f32 %v1286_v23, %v461_v45  ;;  %v723_v25 = vmax.f32 %v691_v59, 0.0  ;;  %v1558_v46 = vunpack.c.l.bf16 %v1252_v13  ;;  %754 = vst [vmem:[%s1326_s29 + $0x68] sm:$0xff] %v722_v26 }
  0x4d   : > { %v527_v18 = vmax.f32 %v495_v1, 0.0  ;;  %v497_v31 = vadd.f32 %v1286_v23, %v462_v3  ;;  %v463_v28 = vmul.f32 %v893_v62, %v1255_v20  ;;  %v957_v8 = vunpack.c.h.bf16 %v1252_v13  ;;  %v992_v13 = vld [vmem:[%s1111_s19 + $0x58] sm:$0xff]  }
  0x4e   : > { %v628_v34 = vmul.f32 %v1558_v46, %v1272_v56  ;;  %v724_v60 = vmax.f32 %v692_v40, 0.0  ;;  %v528_v29 = vmax.f32 %v496_v16, 0.0  ;;  %755 = vst [vmem:[%s1326_s29 + $0x70] sm:$0xff] %v723_v25  ;;  %v464_v51 = vmul.f32 %v896_v0, %v1255_v20  ;;  %v1009_v46 = vld [vmem:[%s1116_s22 + $0x68] sm:$0xff]  }
  0x4f   : > { %v693_v30 = vadd.f32 %v661_v52, %v527_v18  ;;  %v529_v19 = vmax.f32 %v497_v31, 0.0  ;;  %v498_v35 = vadd.f32 %v1286_v23, %v463_v28  ;;  %v960_v12 = vunpack.c.l.bf16 %v1006_v7 }
  0x50   : > { %v663_v50 = vadd.f32 %v1307_v17, %v628_v34  ;;  %756 = vst [vmem:[%s1326_s29 + $0x78] sm:$0xff] %v724_v60  ;;  %v694_v9 = vadd.f32 %v662_v36, %v528_v29  ;;  %v629_v10 = vmul.f32 %v957_v8, %v1272_v56  ;;  %v499_v38 = vadd.f32 %v1286_v23, %v464_v51 }
  0x51   : > { %v725_v62 = vmax.f32 %v693_v30, 0.0  ;;  %v897_v21 = vunpack.c.h.bf16 %v1259_v43  ;;  %v530_v0 = vmax.f32 %v498_v35, 0.0  ;;  %v630_v54 = vmul.f32 %v960_v12, %v1272_v56  ;;  %v995_v35 = vld [vmem:[%s1111_s19 + $0x70] sm:$0xff]  }
  0x52   : > { %v726_v39 = vmax.f32 %v694_v9, 0.0  ;;  %v695_v27 = vadd.f32 %v663_v50, %v529_v19  ;;  %v664_v11 = vadd.f32 %v1307_v17, %v629_v10  ;;  %v531_v47 = vmax.f32 %v499_v38, 0.0 }
  0x53   : > { %757 = vst [vmem:[%s1326_s29 + $0x80] sm:$0xff] %v725_v62  ;;  %v465_v2 = vmul.f32 %v897_v21, %v1255_v20  ;;  %v961_v55 = vunpack.c.h.bf16 %v1006_v7  ;;  %v665_v43 = vadd.f32 %v1307_v17, %v630_v54  ;;  %v900_v48 = vunpack.c.l.bf16 %v992_v13  ;;  %v1010_v21 = vld [vmem:[%s1116_s22 + $0x70] sm:$0xff]  }
  0x54   : > { %758 = vst [vmem:[%s1326_s29 + $0x88] sm:$0xff] %v726_v39  ;;  %v727_v32 = vmax.f32 %v695_v27, 0.0  ;;  %v964_v37 = vunpack.c.l.bf16 %v1007_v44  ;;  %v696_v49 = vadd.f32 %v664_v11, %v530_v0  ;;  %v901_v57 = vunpack.c.h.bf16 %v992_v13 }
  0x55   : > { %v500_v22 = vadd.f32 %v1286_v23, %v465_v2  ;;  %v631_v53 = vmul.f32 %v961_v55, %v1272_v56  ;;  %v697_v61 = vadd.f32 %v665_v43, %v531_v47  ;;  %v466_v15 = vmul.f32 %v900_v48, %v1255_v20 }
  0x56   : > { %759 = vst [vmem:[%s1326_s29 + $0x90] sm:$0xff] %v727_v32  ;;  %v632_v14 = vmul.f32 %v964_v37, %v1272_v56  ;;  %v965_v42 = vunpack.c.h.bf16 %v1007_v44  ;;  %v728_v63 = vmax.f32 %v696_v49, 0.0  ;;  %v467_v6 = vmul.f32 %v901_v57, %v1255_v20 }
  0x57   : > { %v532_v58 = vmax.f32 %v500_v22, 0.0  ;;  %v666_v33 = vadd.f32 %v1307_v17, %v631_v53  ;;  %v729_v45 = vmax.f32 %v697_v61, 0.0  ;;  %v501_v59 = vadd.f32 %v1286_v23, %v466_v15 }
  0x58   : > { %v667_v1 = vadd.f32 %v1307_v17, %v632_v14  ;;  %v633_v52 = vmul.f32 %v965_v42, %v1272_v56  ;;  %760 = vst [vmem:[%s1326_s29 + $0x98] sm:$0xff] %v728_v63  ;;  %v502_v26 = vadd.f32 %v1286_v23, %v467_v6  ;;  %v904_v40 = vunpack.c.l.bf16 %v993_v41  ;;  %v996_v14 = vld [vmem:[%s1111_s19 + $0x78] sm:$0xff]  }
  0x59   : > { %v698_v24 = vadd.f32 %v666_v33, %v532_v58  ;;  %v968_v16 = vunpack.c.l.bf16 %v1008_v4  ;;  %761 = vst [vmem:[%s1326_s29 + $0xa0] sm:$0xff] %v729_v45  ;;  %v533_v3 = vmax.f32 %v501_v59, 0.0  ;;  %v905_v18 = vunpack.c.h.bf16 %v993_v41  ;;  %v1011_v42 = vld [vmem:[%s1116_s22 + $0x78] sm:$0xff]  }
  0x5a   : > { %v668_v25 = vadd.f32 %v1307_v17, %v633_v52  ;;  %v969_v36 = vunpack.c.h.bf16 %v1008_v4  ;;  %v534_v7 = vmax.f32 %v502_v26, 0.0  ;;  %v468_v60 = vmul.f32 %v904_v40, %v1255_v20 }
  0x5b   : > { %v730_v34 = vmax.f32 %v698_v24, 0.0  ;;  %v634_v29 = vmul.f32 %v968_v16, %v1272_v56  ;;  %v699_v31 = vadd.f32 %v667_v1, %v533_v3  ;;  %v469_v28 = vmul.f32 %v905_v18, %v1255_v20 }
  0x5c   : > { %v635_v30 = vmul.f32 %v969_v36, %v1272_v56  ;;  %v908_v50 = vunpack.c.l.bf16 %v994_v5  ;;  %v700_v8 = vadd.f32 %v668_v25, %v534_v7  ;;  %v503_v51 = vadd.f32 %v1286_v23, %v468_v60 }
  0x5d   : > { %762 = vst [vmem:[%s1326_s29 + $0xa8] sm:$0xff] %v730_v34  ;;  %v669_v9 = vadd.f32 %v1307_v17, %v634_v29  ;;  %v972_v19 = vunpack.c.l.bf16 %v1009_v46  ;;  %v731_v12 = vmax.f32 %v699_v31, 0.0  ;;  %v504_v62 = vadd.f32 %v1286_v23, %v469_v28 }
  0x5e   : > { %v670_v10 = vadd.f32 %v1307_v17, %v635_v30  ;;  %v470_v38 = vmul.f32 %v908_v50, %v1255_v20  ;;  %v732_v13 = vmax.f32 %v700_v8, 0.0  ;;  %v535_v44 = vmax.f32 %v503_v51, 0.0 }
  0x5f   : > { %v636_v39 = vmul.f32 %v972_v19, %v1272_v56  ;;  %v909_v27 = vunpack.c.h.bf16 %v994_v5  ;;  %763 = vst [vmem:[%s1326_s29 + $0xb0] sm:$0xff] %v731_v12  ;;  %v536_v0 = vmax.f32 %v504_v62, 0.0  ;;  %v973_v11 = vunpack.c.h.bf16 %v1009_v46 }
  0x60   : > { %v505_v54 = vadd.f32 %v1286_v23, %v470_v38  ;;  %v912_v47 = vunpack.c.l.bf16 %v995_v35  ;;  %764 = vst [vmem:[%s1326_s29 + $0xb8] sm:$0xff] %v732_v13  ;;  %v701_v2 = vadd.f32 %v669_v9, %v535_v44  ;;  %v976_v43 = vunpack.c.l.bf16 %v1010_v21 }
  0x61   : > { %v671_v55 = vadd.f32 %v1307_v17, %v636_v39  ;;  %v471_v32 = vmul.f32 %v909_v27, %v1255_v20  ;;  %v702_v48 = vadd.f32 %v670_v10, %v536_v0  ;;  %v637_v49 = vmul.f32 %v973_v11, %v1272_v56 }
  0x62   : > { %v537_v37 = vmax.f32 %v505_v54, 0.0  ;;  %v472_v22 = vmul.f32 %v912_v47, %v1255_v20  ;;  %v733_v53 = vmax.f32 %v701_v2, 0.0  ;;  %v638_v61 = vmul.f32 %v976_v43, %v1272_v56 }
  0x63   : > { %v506_v57 = vadd.f32 %v1286_v23, %v471_v32  ;;  %v913_v15 = vunpack.c.h.bf16 %v995_v35  ;;  %v734_v41 = vmax.f32 %v702_v48, 0.0  ;;  %v672_v63 = vadd.f32 %v1307_v17, %v637_v49 }
  0x64   : > { %v703_v4 = vadd.f32 %v671_v55, %v537_v37  ;;  %v507_v58 = vadd.f32 %v1286_v23, %v472_v22  ;;  %765 = vst [vmem:[%s1326_s29 + $0xc0] sm:$0xff] %v733_v53  ;;  %v673_v6 = vadd.f32 %v1307_v17, %v638_v61  ;;  %v977_v59 = vunpack.c.h.bf16 %v1010_v21 }
  0x65   : > { %v538_v33 = vmax.f32 %v506_v57, 0.0  ;;  %v473_v45 = vmul.f32 %v913_v15, %v1255_v20  ;;  %766 = vst [vmem:[%s1326_s29 + $0xc8] sm:$0xff] %v734_v41  ;;  %v916_v24 = vunpack.c.l.bf16 %v996_v14  ;;  %v980_v26 = vunpack.c.l.bf16 %v1011_v42 }
  0x66   : > { %v735_v1 = vmax.f32 %v703_v4, 0.0  ;;  %v539_v52 = vmax.f32 %v507_v58, 0.0  ;;  %v639_v5 = vmul.f32 %v977_v59, %v1272_v56  ;;  %v917_v3 = vunpack.c.h.bf16 %v996_v14 }
  0x67   : > { %v704_v40 = vadd.f32 %v672_v63, %v538_v33  ;;  %v508_v16 = vadd.f32 %v1286_v23, %v473_v45  ;;  %v474_v18 = vmul.f32 %v916_v24, %v1255_v20  ;;  %v640_v36 = vmul.f32 %v980_v26, %v1272_v56 }
  0x68   : > { %767 = vst [vmem:[%s1326_s29 + $0xd0] sm:$0xff] %v735_v1  ;;  %v705_v25 = vadd.f32 %v673_v6, %v539_v52  ;;  %v981_v46 = vunpack.c.h.bf16 %v1011_v42  ;;  %v674_v60 = vadd.f32 %v1307_v17, %v639_v5  ;;  %v475_v29 = vmul.f32 %v917_v3, %v1255_v20 }
  0x69   : > { %v736_v34 = vmax.f32 %v704_v40, 0.0  ;;  %v540_v7 = vmax.f32 %v508_v16, 0.0  ;;  %v509_v28 = vadd.f32 %v1286_v23, %v474_v18  ;;  %v675_v30 = vadd.f32 %v1307_v17, %v640_v36 }
  0x6a   : > { %v737_v31 = vmax.f32 %v705_v25, 0.0  ;;  %v641_v50 = vmul.f32 %v981_v46, %v1272_v56  ;;  %v510_v51 = vadd.f32 %v1286_v23, %v475_v29 }
  0x6b   : > { %768 = vst [vmem:[%s1326_s29 + $0xd8] sm:$0xff] %v736_v34  ;;  %v706_v8 = vadd.f32 %v674_v60, %v540_v7  ;;  %v541_v9 = vmax.f32 %v509_v28, 0.0 }
  0x6c   : > { %769 = vst [vmem:[%s1326_s29 + $0xe0] sm:$0xff] %v737_v31  ;;  %v676_v19 = vadd.f32 %v1307_v17, %v641_v50  ;;  %v542_v12 = vmax.f32 %v510_v51, 0.0 }
  0x6d   : > { %v738_v35 = vmax.f32 %v706_v8, 0.0  ;;  %v707_v20 = vadd.f32 %v675_v30, %v541_v9 }
  0x6e   : > { %v708_v62 = vadd.f32 %v676_v19, %v542_v12 }
  0x6f   : > { %770 = vst [vmem:[%s1326_s29 + $0xe8] sm:$0xff] %v738_v35  ;;  %v739_v10 = vmax.f32 %v707_v20, 0.0 }
  0x70   : > { %v740_v38 = vmax.f32 %v708_v62, 0.0 }
  0x71   : > { %771 = vst [vmem:[%s1326_s29 + $0xf0] sm:$0xff] %v739_v10 }
  0x72   : > { %772 = vst [vmem:[%s1326_s29 + $0xf8] sm:$0xff] %v740_v38 }
  0x73 PF: > { %s18_s27 = sadd.s32 1, %s1030_s27  }
  0x74   : > { %p15_p4 = scmp.ge.s32.totalorder %s18_s27, 4  }
  0x76   :  { %17 = sbr.rel (!%p15_p4) target bundleno = 1 (0x1), region = 85 }

// kernel: block_forward.5
= control target key start
LH: loop header
LB: loop body
LE: loop exit
PB: predicated region body
PF: predicated region fallthrough
CT: control target
= control target key end

     0   :  { %s6380_s17 = smov 0   ;;  %s6382_s18 = smov 0   ;;  %s8587_s0 = inlined_call_operand.vmem [shape: bf16[552,128], index: 0, kind: input, shape index: {}]   ;;  %s8588_s1 = inlined_call_operand.vmem [shape: bf16[128,128], index: 1, kind: input, shape index: {}]   ;;  %s8589_s2 = inlined_call_operand.vmem [shape: bf16[1152,128], index: 2, kind: input, shape index: {}]   ;;  %s8590_s3 = inlined_call_operand.vmem [shape: bf16[1152,128], index: 3, kind: input, shape index: {}]   ;;  %s8591_s4 = inlined_call_operand.vmem [shape: f32[2,128], index: 4, kind: input, shape index: {}]   ;;  %s8592_s5 = inlined_call_operand.vmem [shape: f32[1,128], index: 5, kind: input, shape index: {}]   ;;  %s8593_s6 = inlined_call_operand.vmem [shape: f32[1,128], index: 6, kind: input, shape index: {}]   ;;  %s8594_s7 = inlined_call_operand.vmem [shape: f32[512,1], index: 7, kind: input, shape index: {}]   ;;  %s8595_s8 = inlined_call_operand.vmem [shape: bf16[512,128], index: 8, kind: output, shape index: {0}]   ;;  %s8596_s9 = inlined_call_operand.vmem [shape: bf16[512,128], index: 9, kind: output, shape index: {1}]   ;;  %s8597_s10 = inlined_call_operand.vmem [shape: f32[2,2,128], index: 10, kind: output, shape index: {2}]   ;;  %s8598_s11 = inlined_call_operand.vmem [shape: f32[2,2,128], index: 11, kind: output, shape index: {3}]  }
   0x1   :  { %s6384_s19 = smov 0  }
   0x2 LB: > { %s34_s20 = sadd.s32 1, %s6312_s18  ;;  %p5149_p0 = scmp.ge.s32.totalorder %s6316_s19, 1  ;;  %s6316_s19 = sphi %s6384_s19, %s22_s19   ;;  %s6312_s18 = sphi %s6382_s18, %s8907_s18   ;;  %s6308_s17 = sphi %s6380_s17, %s8906_s17  }
   0x3   : > { %p36_p1 = scmp.ge.s32.totalorder %s34_s20, 2  ;;  %p365_p2 = scmp.lt.s32.totalorder %s6316_s19, 3 }
   0x5   : > { %s8909_s20 = smov (%p36_p1, %s34_s20), 0  ;;  %p366_p3 = pnand %p5149_p0, %p365_p2 }
   0x7   : > { %369 = sbr.rel (%p366_p3) target bundleno = 1645 (0x66d), region = 52 }
   0xc   : > { %v5857_v0 = vld [vmem:[%s8588_s1 + $0x38] sm:$0xff]  ;;  %v5856_v1 = vld [vmem:[%s8588_s1 + $0x30] sm:$0xff]  ;;  %v5855_v2 = vld [vmem:[%s8588_s1 + $0x28] sm:$0xff]  ;;  %s5158_s12 = sshll.u32 %s6308_s17, 8  ;;  %vm1206_vm3 = vcmask 1046528   ;;  %s5150_s28 = sshll.u32 %s6308_s17, 5 }
   0xd   : > { %701 = vmatpush.bf16.msra.mxu0 %v5857_v0  ;;  %v5854_v3 = vld [vmem:[%s8588_s1 + $0x20] sm:$0xff]  ;;  %v5853_v4 = vld [vmem:[%s8588_s1 + $0x18] sm:$0xff]  ;;  %v5852_v5 = vld [vmem:[%s8588_s1 + $0x10] sm:$0xff]  ;;  %s484_s15 = sshra.s32 %s5158_s12, 3  ;;  %vm1057_vm4 = vsmask.f32 7424 }
   0xe   : > { %v5851_v6 = vld [vmem:[%s8588_s1 + $0x8] sm:$0xff]  ;;  %s5159_s22 = sshll.u32 %s484_s15, 2  ;;  %v5850_v7 = vld [vmem:[%s8588_s1] sm:$0xff]  ;;  %v5865_v41 = vld [vmem:[%s8589_s2 + $0x38] sm:$0xff]  ;;  %p423_p4 = scmp.lt.s32.totalorder %s5150_s28, 63  ;;  %vm4862_vm5 = vcmask 1040384  }
   0xf   : > { %s6428_s27 = scalar_lea.vmem %s8587_s0, %s5159_s22  ;;  %v461_v12 = vld [vmem:[%s8591_s4] sm:$0x1]  ;;  %v463_v15 = vld [vmem:[%s8591_s4 + $0x1] sm:$0x1]  ;;  %6202 = vmatpush.bf16.msra.mxu1 %v5865_v41  ;;  %v5864_v44 = vld [vmem:[%s8589_s2 + $0x30] sm:$0xff]  ;;  %p445_p5 = scmp.lt.s32.totalorder %s6308_s17, 1 }
  0x10   : > { %v5834_v8 = vld [vmem:[%s6428_s27] sm:$0xff]  ;;  %v5835_v9 = vld [vmem:[%s6428_s27 + $0x8] sm:$0xff]  ;;  %v5836_v10 = vld [vmem:[%s6428_s27 + $0x10] sm:$0xff]  ;;  %v462_v14 = vmul.f32 0.001953125, %v461_v12  ;;  %v464_v16 = vmul.f32 0.001953125, %v463_v15  ;;  %s8911_s28 = smov (!%p423_p4, %s5150_s28), 63 }
  0x11   : > { %702 = vmatpush.bf16.msra.mxu0 %v5856_v1  ;;  %v5837_v11 = vld [vmem:[%s6428_s27 + $0x18] sm:$0xff]  ;;  %v5838_v13 = vld [vmem:[%s6428_s27 + $0x20] sm:$0xff]  ;;  %v5839_v20 = vld [vmem:[%s6428_s27 + $0x28] sm:$0xff]  ;;  %s5151_s16 = sshll.u32 %s8911_s28, 3  ;;  %s5153_s15 = sshll.u32 %s8911_s28, 2 }
  0x12   : > { %v465_v17 = vmul.f32 %v462_v14, %v462_v14  ;;  %v5840_v24 = vld [vmem:[%s6428_s27 + $0x30] sm:$0xff]  ;;  %v5841_v29 = vld [vmem:[%s6428_s27 + $0x38] sm:$0xff]  ;;  %v468_v30 = vld [vmem:[%s8592_s5] sm:$0x1]  ;;  %s7307_s23 = scalar_lea.vmem %s8594_s7, %s5151_s16  ;;  %s7504_s22 = scalar_lea.vmem %s8595_s8, %s5153_s15 }
  0x13   : > { %v481_v34 = vld [vmem:[%s8593_s6] sm:$0x1]  ;;  %6203 = vmatpush.bf16.msra.mxu1 %v5864_v44  ;;  %v5863_v48 = vld [vmem:[%s8589_s2 + $0x28] sm:$0xff]  ;;  %v5861_v59 = vld [vmem:[%s8589_s2 + $0x18] sm:$0xff]  ;;  %s8913_s17 = smov (!%p445_p5, %s6308_s17), 1  ;;  %s8445_s13 = scalar_lea.vmem %s8596_s9, %s5153_s15 }
  0x14   : > { %v466_v18 = vsub.f32 %v464_v16, %v465_v17  ;;  %v5842_v37 = vld [vmem:[%s6428_s27 + $0x40] sm:$0xff]  ;;  %v5843_v52 = vld [vmem:[%s6428_s27 + $0x48] sm:$0xff]  ;;  %v6482_v61 = vld [vmem:[%s8589_s2 + $0xb8] sm:$0xff]  ;;  %s5156_s24 = sshll.u32 %s8913_s17, 1 }
  0x15   : > { %703 = vmatpush.bf16.msra.mxu0 %v5855_v2  ;;  %v5862_v54 = vld [vmem:[%s8589_s2 + $0x20] sm:$0xff]  ;;  %v5860_v63 = vld [vmem:[%s8589_s2 + $0x10] sm:$0xff]  ;;  %6218 = vmatpush.bf16.msra.mxu3 %v6482_v61  ;;  %v5873_v2 = vld [vmem:[%s8589_s2 + $0x78] sm:$0xff]  ;;  %s8095_s29 = scalar_lea.vmem %s8597_s10, %s5156_s24  ;;  %s8104_s30 = scalar_lea.vmem %s8598_s11, %s5156_s24 }
  0x16   : > { %v467_v19 = vmax.f32 %v466_v18, 0.0  ;;  %6210 = vmatpush.bf16.msra.mxu2 %v5873_v2  ;;  %v5871_v17 = vld [vmem:[%s8589_s2 + $0x68] sm:$0xff] }
  0x17   : > { %6204 = vmatpush.bf16.msra.mxu1 %v5863_v48 }
  0x18   : > { %v469_v21 = vadd.f32 1e-05, %v467_v19  ;;  %v6524_v19 = vld [vmem:[%s8589_s2 + $0xa0] sm:$0xff] }
  0x19   : > { %704 = vmatpush.bf16.msra.mxu0 %v5854_v3 }
  0x1a   : > { %6255 = vrsqrt.f32 %v469_v21  ;;  %vm476_vm0 = vweird.f32 %v469_v21 }
  0x1b   : > { %6205 = vmatpush.bf16.msra.mxu1 %v5862_v54 }
  0x1d   : > { %705 = vmatpush.bf16.msra.mxu0 %v5853_v4  ;;  %v6496_v4 = vld [vmem:[%s8589_s2 + $0xb0] sm:$0xff] }
  0x1e   : > { %6219 = vmatpush.bf16.msra.mxu3 %v6496_v4 }
  0x1f   : > { %6206 = vmatpush.bf16.msra.mxu1 %v5861_v59 }
  0x20   : > { %v6256_v22 = vpop.eup %6255 }
  0x21   : > { %706 = vmatpush.bf16.msra.mxu0 %v5852_v5  ;;  %v471_v23 = vmul.f32 %v6256_v22, %v469_v21  ;;  %vm477_vm1 = vweird.f32 %v6256_v22  ;;  %v5859_v5 = vld [vmem:[%s8589_s2 + $0x8] sm:$0xff]  ;;  %v5870_v21 = vld [vmem:[%s8589_s2 + $0x60] sm:$0xff] }
  0x22   : > { %vm478_vm2 = vmor %vm476_vm0, %vm477_vm1 }
  0x23   : > { %v472_v25 = vmul.f32 %v6256_v22, %v471_v23  ;;  %6207 = vmatpush.bf16.msra.mxu1 %v5860_v63 }
  0x25   : > { %707 = vmatpush.bf16.msra.mxu0 %v5851_v6  ;;  %v473_v26 = vmul.f32 0.5, %v472_v25 }
  0x27   : > { %v474_v27 = vsub.f32 1.5, %v473_v26  ;;  %6208 = vmatpush.bf16.msra.mxu1 %v5859_v5  ;;  %v5869_v26 = vld [vmem:[%s8589_s2 + $0x58] sm:$0xff] }
  0x29   : > { %708 = vmatpush.bf16.msra.mxu0 %v5850_v7  ;;  %v475_v28 = vmul.f32 %v6256_v22, %v474_v27 }
  0x2b   : > { %v479_v31 = vsel %vm478_vm2, %v6256_v22, %v475_v28  ;;  %v6534_v22 = vld [vmem:[%s8589_s2 + $0x98] sm:$0xff]  ;;  %v6545_v28 = vld [vmem:[%s8589_s2 + $0x90] sm:$0xff] }
  0x2c   : > { %709 = vmatmul.bf16.vlgmr.msra.gmra.mxu0 %v5834_v8  ;;  %v480_v32 = vmul.f32 %v479_v31, %v468_v30  ;;  %v5872_v8 = vld [vmem:[%s8589_s2 + $0x70] sm:$0xff] }
  0x2d   : > { %2129 = vmatpush.bf16.msrb.mxu0 %v5865_v41  ;;  %6211 = vmatpush.bf16.msra.mxu2 %v5872_v8  ;;  %v5868_v31 = vld [vmem:[%s8589_s2 + $0x50] sm:$0xff]  ;;  %v5867_v41 = vld [vmem:[%s8589_s2 + $0x48] sm:$0xff] }
  0x2e   : > { %v482_v33 = vmul.f32 %v480_v32, %v462_v14  ;;  %v6450_v36 = vperm.slane %v480_v32, 0 }
  0x30   : > { %v483_v35 = vsub.f32 %v481_v34, %v482_v33  ;;  %8692 = vst [vmem:[#allocation2_spill] sm:$0xff] %v6450_v36  ;;  %v5845_v33 = vld [vmem:[%s6428_s27 + $0x58] sm:$0xff]  ;;  %v6555_v34 = vld [vmem:[%s8589_s2 + $0x88] sm:$0xff] }
  0x31   : > { %2130 = vmatpush.bf16.msrb.mxu0 %v5864_v44  ;;  %6212 = vmatpush.bf16.msra.mxu2 %v5871_v17 }
  0x32   : > { %v6454_v40 = vperm.slane %v483_v35, 0 }
  0x34   : > { %8693 = vst [vmem:[#allocation3_spill] sm:$0xff] %v6454_v40 }
  0x35   : > { %2131 = vmatpush.bf16.msrb.mxu0 %v5863_v48  ;;  %6213 = vmatpush.bf16.msra.mxu2 %v5870_v21 }
  0x39   : > { %2132 = vmatpush.bf16.msrb.mxu0 %v5862_v54  ;;  %6214 = vmatpush.bf16.msra.mxu2 %v5869_v26 }
  0x3c   : > { %714 = vmatmul.bf16.gmra.mxu0 %v5835_v9 }
  0x3d   : > { %2133 = vmatpush.bf16.msrb.mxu0 %v5861_v59  ;;  %6215 = vmatpush.bf16.msra.mxu2 %v5868_v31 }
  0x41   : > { %2134 = vmatpush.bf16.msrb.mxu0 %v5860_v63  ;;  %6216 = vmatpush.bf16.msra.mxu2 %v5867_v41  ;;  %v5889_v63 = vld [vmem:[%s8589_s2 + $0xf8] sm:$0xff] }
  0x45   : > { %2135 = vmatpush.bf16.msrb.mxu0 %v5859_v5 }
  0x4c   : > { %719 = vmatmul.bf16.gmra.mxu0 %v5836_v10  ;;  %v5844_v10 = vld [vmem:[%s6428_s27 + $0x50] sm:$0xff] }
  0x5c   : > { %724 = vmatmul.bf16.gmra.mxu0 %v5837_v11  ;;  %v6509_v11 = vld [vmem:[%s8589_s2 + $0xa8] sm:$0xff] }
  0x5d   : > { %6220 = vmatpush.bf16.msra.mxu3 %v6509_v11 }
  0x61   : > { %6221 = vmatpush.bf16.msra.mxu3 %v6524_v19 }
  0x65   : > { %6222 = vmatpush.bf16.msra.mxu3 %v6534_v22 }
  0x69   : > { %6223 = vmatpush.bf16.msra.mxu3 %v6545_v28 }
  0x6c   : > { %729 = vmatmul.bf16.gmra.mxu0 %v5838_v13  ;;  %v5858_v13 = vld [vmem:[%s8589_s2] sm:$0xff] }
  0x6d   : > { %6209 = vmatpush.bf16.msra.mxu1 %v5858_v13  ;;  %2136 = vmatpush.bf16.msrb.mxu0 %v5858_v13 }
  0x6e   : > { %6224 = vmatpush.bf16.msra.mxu3 %v6555_v34 }
  0x71   : > { %2218 = vmatpush.bf16.msra.mxu0 %v5873_v2  ;;  %2396 = vmatpush.bf16.msrb.mxu1 %v5889_v63 }
  0x75   : > { %2219 = vmatpush.bf16.msra.mxu0 %v5872_v8 }
  0x79   : > { %2220 = vmatpush.bf16.msra.mxu0 %v5871_v17 }
  0x7c   : > { %734 = vmatmul.bf16.gmra.mxu0 %v5839_v20 }
  0x7d   : > { %2221 = vmatpush.bf16.msra.mxu0 %v5870_v21 }
  0x81   : > { %2222 = vmatpush.bf16.msra.mxu0 %v5869_v26 }
  0x85   : > { %2223 = vmatpush.bf16.msra.mxu0 %v5868_v31 }
  0x89   : > { %2224 = vmatpush.bf16.msra.mxu0 %v5867_v41 }
  0x8c   : > { %739 = vmatmul.bf16.gmra.mxu0 %v5840_v24 }
  0x9c   : > { %744 = vmatmul.bf16.gmra.mxu0 %v5841_v29 }
  0xa9   : > { %v710_v38 = vpop.f32.mrf.mxu0 }
  0xaa   : > { %v807_v39 = vmul.f32 %v6450_v36, %v710_v38 }
  0xac   : > { %749 = vmatmul.bf16.gmra.mxu0 %v5842_v37  ;;  %v847_v42 = vadd.f32 %v6454_v40, %v807_v39 }
  0xae   : > { %v884_v45 = vmax.f32 %v847_v42, 0.0 }
  0xb0   : > { %v921_v49 = vpack.c.bf16 %v884_v45, %v884_v45  ;;  %v5866_v45 = vld [vmem:[%s8589_s2 + $0x40] sm:$0xff] }
  0xb1   : > { %v712_v43 = vpop.f32.mrf.mxu0  ;;  %6217 = vmatpush.bf16.msra.mxu2 %v5866_v45  ;;  %2225 = vmatpush.bf16.msra.mxu0 %v5866_v45  ;;  %v5848_v45 = vld [vmem:[%s6428_s27 + $0x70] sm:$0xff] }
  0xb2   : > { %v808_v46 = vmul.f32 %v6450_v36, %v712_v43  ;;  %v990_v55 = vunpack.c.l.b16 %v921_v49  ;;  %v6567_v43 = vld [vmem:[%s8589_s2 + $0x80] sm:$0xff] }
  0xb3   : > { %6225 = vmatpush.bf16.msra.mxu3 %v6567_v43 }
  0xb4   : > { %v848_v47 = vadd.f32 %v6454_v40, %v808_v46 }
  0xb6   : > { %v885_v50 = vmax.f32 %v848_v47, 0.0 }
  0xb8   : > { %v922_v51 = vpack.c.bf16 %v885_v50, %v885_v50 }
  0xb9   : > { %v715_v53 = vpop.f32.mrf.mxu0 }
  0xba   : > { %v991_v56 = vunpack.c.l.b16 %v922_v51  ;;  %v809_v57 = vmul.f32 %v6450_v36, %v715_v53  ;;  %v5846_v53 = vld [vmem:[%s6428_s27 + $0x60] sm:$0xff] }
  0xbc   : > { %v6473_v58 = vpack.c.b16 %v991_v56, %v990_v55  ;;  %754 = vmatmul.bf16.gmra.mxu0 %v5843_v52  ;;  %v849_v60 = vadd.f32 %v6454_v40, %v809_v57 }
  0xbe   : > { %v886_v0 = vmax.f32 %v849_v60, 0.0  ;;  %v5897_v60 = vld [vmem:[%s8589_s2 + $0x138] sm:$0xff] }
  0xbf   : > { %2485 = vmatpush.bf16.msrb.mxu2 %v5897_v60 }
  0xc0   : > { %v923_v6 = vpack.c.bf16 %v886_v0, %v886_v0 }
  0xc1   : > { %v717_v62 = vpop.f32.mrf.mxu0 }
  0xc2   : > { %v810_v1 = vmul.f32 %v6450_v36, %v717_v62  ;;  %v992_v14 = vunpack.c.l.b16 %v923_v6  ;;  %v5905_v62 = vld [vmem:[%s8589_s2 + $0x178] sm:$0xff] }
  0xc3   : > { %2574 = vmatpush.bf16.msrb.mxu3 %v5905_v62 }
  0xc4   : > { %v850_v3 = vadd.f32 %v6454_v40, %v810_v1 }
  0xc6   : > { %v887_v7 = vmax.f32 %v850_v3, 0.0 }
  0xc8   : > { %v924_v9 = vpack.c.bf16 %v887_v7, %v887_v7 }
  0xc9   : > { %v720_v12 = vpop.f32.mrf.mxu0 }
  0xca   : > { %v993_v15 = vunpack.c.l.b16 %v924_v9  ;;  %v811_v16 = vmul.f32 %v6450_v36, %v720_v12  ;;  %v5847_v9 = vld [vmem:[%s6428_s27 + $0x68] sm:$0xff] }
  0xcc   : > { %v6519_v18 = vpack.c.b16 %v993_v15, %v992_v14  ;;  %759 = vmatmul.bf16.gmra.mxu0 %v5844_v10  ;;  %v851_v20 = vadd.f32 %v6454_v40, %v811_v16 }
  0xce   : > { %v888_v24 = vmax.f32 %v851_v20, 0.0 }
  0xd0   : > { %v925_v29 = vpack.c.bf16 %v888_v24, %v888_v24 }
  0xd1   : > { %v722_v23 = vpop.f32.mrf.mxu0 }
  0xd2   : > { %v812_v25 = vmul.f32 %v6450_v36, %v722_v23  ;;  %v994_v37 = vunpack.c.l.b16 %v925_v29 }
  0xd4   : > { %v852_v27 = vadd.f32 %v6454_v40, %v812_v25 }
  0xd6   : > { %v889_v30 = vmax.f32 %v852_v27, 0.0 }
  0xd8   : > { %v926_v32 = vpack.c.bf16 %v889_v30, %v889_v30 }
  0xd9   : > { %v725_v35 = vpop.f32.mrf.mxu0 }
  0xda   : > { %v995_v38 = vunpack.c.l.b16 %v926_v32  ;;  %v813_v39 = vmul.f32 %v6450_v36, %v725_v35  ;;  %v5896_v35 = vld [vmem:[%s8589_s2 + $0x130] sm:$0xff] }
  0xdb   : > { %2486 = vmatpush.bf16.msrb.mxu2 %v5896_v35 }
  0xdc   : > { %v6562_v42 = vpack.c.b16 %v995_v38, %v994_v37  ;;  %764 = vmatmul.bf16.gmra.mxu0 %v5845_v33  ;;  %v853_v44 = vadd.f32 %v6454_v40, %v813_v39  ;;  %v5904_v37 = vld [vmem:[%s8589_s2 + $0x170] sm:$0xff] }
  0xdd   : > { %2575 = vmatpush.bf16.msrb.mxu3 %v5904_v37  ;;  %v5903_v37 = vld [vmem:[%s8589_s2 + $0x168] sm:$0xff] }
  0xde   : > { %v890_v47 = vmax.f32 %v853_v44, 0.0 }
  0xe0   : > { %v927_v50 = vpack.c.bf16 %v890_v47, %v890_v47 }
  0xe1   : > { %v727_v46 = vpop.f32.mrf.mxu0  ;;  %2576 = vmatpush.bf16.msrb.mxu3 %v5903_v37 }
  0xe2   : > { %v814_v48 = vmul.f32 %v6450_v36, %v727_v46  ;;  %v996_v55 = vunpack.c.l.b16 %v927_v50 }
  0xe4   : > { %v854_v49 = vadd.f32 %v6454_v40, %v814_v48 }
  0xe6   : > { %v891_v51 = vmax.f32 %v854_v49, 0.0 }
  0xe8   : > { %v928_v52 = vpack.c.bf16 %v891_v51, %v891_v51  ;;  %v5888_v51 = vld [vmem:[%s8589_s2 + $0xf0] sm:$0xff] }
  0xe9   : > { %v730_v54 = vpop.f32.mrf.mxu0  ;;  %2397 = vmatpush.bf16.msrb.mxu1 %v5888_v51 }
  0xea   : > { %v997_v56 = vunpack.c.l.b16 %v928_v52  ;;  %v815_v57 = vmul.f32 %v6450_v36, %v730_v54 }
  0xec   : > { %v6578_v59 = vpack.c.b16 %v997_v56, %v996_v55  ;;  %769 = vmatmul.bf16.gmra.mxu0 %v5846_v53  ;;  %v855_v0 = vadd.f32 %v6454_v40, %v815_v57 }
  0xee   : > { %2152 = vmatmul.bf16.vlgmr.msra.gmra.mxu1 %v6578_v59  ;;  %v892_v2 = vmax.f32 %v855_v0, 0.0  ;;  %v1082_v10 = vshll.u32 %v6578_v59, 16  ;;  %v8599_v20 = vrot.slane %v6578_v59, 1  ;;  %v1086_v24 = vshrl.u32 %v6578_v59, 16 }
  0xf0   : > { %v929_v6 = vpack.c.bf16 %v892_v2, %v892_v2  ;;  %v6598_v17 = vrot.slane %v1082_v10, 1 }
  0xf1   : > { %v732_v1 = vpop.f32.mrf.mxu0 }
  0xf2   : > { %v816_v3 = vmul.f32 %v6450_v36, %v732_v1  ;;  %v998_v13 = vunpack.c.l.b16 %v929_v6  ;;  %v1088_v27 = vor.u32 %v1086_v24, %v6598_v17 }
  0xf4   : > { %v856_v5 = vadd.f32 %v6454_v40, %v816_v3 }
  0xf6   : > { %v893_v7 = vmax.f32 %v856_v5, 0.0 }
  0xf8   : > { %v930_v8 = vpack.c.bf16 %v893_v7, %v893_v7  ;;  %v5849_v7 = vld [vmem:[%s6428_s27 + $0x78] sm:$0xff] }
  0xf9   : > { %v735_v12 = vpop.f32.mrf.mxu0 }
  0xfa   : > { %v999_v14 = vunpack.c.l.b16 %v930_v8  ;;  %v817_v15 = vmul.f32 %v6450_v36, %v735_v12 }
  0xfc   : > { %v6596_v16 = vpack.c.b16 %v999_v14, %v998_v13  ;;  %774 = vmatmul.bf16.gmra.mxu0 %v5847_v9  ;;  %v857_v21 = vadd.f32 %v6454_v40, %v817_v15  ;;  %v5895_v14 = vld [vmem:[%s8589_s2 + $0x128] sm:$0xff] }
  0xfd   : > { %2487 = vmatpush.bf16.msrb.mxu2 %v5895_v14 }
  0xfe   : > { %2157 = vmatmul.bf16.gmra.mxu1 %v6596_v16  ;;  %v1214_v23 = vrot.slane %v6596_v16, 1  ;;  %v1090_v25 = vshll.u32 %v6596_v16, 16  ;;  %v894_v31 = vmax.f32 %v857_v21, 0.0  ;;  %v1094_v54 = vshrl.u32 %v6596_v16, 16 }
 0x100   : > { %v6609_v26 = vsel %vm1206_vm3, %v8599_v20, %v1214_v23  ;;  %v1092_v29 = vrot.slane %v1090_v25, 1  ;;  %v931_v39 = vpack.c.bf16 %v894_v31, %v894_v31 }
 0x101   : > { %8694 = vst [vmem:[#allocation4_spill] sm:$0xff] %v6609_v26  ;;  %v737_v30 = vpop.f32.mrf.mxu0  ;;  %2330 = vmatmul.bf16.vlgmr.msra.gmra.mxu3 %v6609_v26 }
 0x102   : > { %v818_v32 = vmul.f32 %v6450_v36, %v737_v30  ;;  %v6615_v33 = vsel %vm1057_vm4, %v1088_v27, %v1092_v29  ;;  %v1000_v47 = vunpack.c.l.b16 %v931_v39  ;;  %v1096_v57 = vor.u32 %v1094_v54, %v1092_v29 }
 0x103   : > { %8695 = vst [vmem:[#allocation5_spill] sm:$0xff] %v6615_v33  ;;  %2241 = vmatmul.bf16.vlgmr.msra.gmra.mxu2 %v6615_v33 }
 0x104   : > { %v858_v38 = vadd.f32 %v6454_v40, %v818_v32 }
 0x106   : > { %v895_v41 = vmax.f32 %v858_v38, 0.0  ;;  %v5887_v38 = vld [vmem:[%s8589_s2 + $0xe8] sm:$0xff] }
 0x107   : > { %2398 = vmatpush.bf16.msrb.mxu1 %v5887_v38 }
 0x108   : > { %v932_v44 = vpack.c.bf16 %v895_v41, %v895_v41 }
 0x109   : > { %v740_v46 = vpop.f32.mrf.mxu0 }
 0x10a   : > { %v1001_v48 = vunpack.c.l.b16 %v932_v44  ;;  %v819_v49 = vmul.f32 %v6450_v36, %v740_v46 }
 0x10c   : > { %v6627_v50 = vpack.c.b16 %v1001_v48, %v1000_v47  ;;  %779 = vmatmul.bf16.gmra.mxu0 %v5848_v45  ;;  %v859_v52 = vadd.f32 %v6454_v40, %v819_v49  ;;  %v6170_v47 = vld [vmem:[%s6428_s27 + $0x80] sm:$0xff]  }
 0x10e   : > { %2162 = vmatmul.bf16.gmra.mxu1 %v6627_v50  ;;  %v1216_v53 = vrot.slane %v6627_v50, 1  ;;  %v1098_v55 = vshll.u32 %v6627_v50, 16  ;;  %v896_v63 = vmax.f32 %v859_v52, 0.0 }
 0x110   : > { %v6638_v56 = vsel %vm1206_vm3, %v1214_v23, %v1216_v53  ;;  %v1100_v60 = vrot.slane %v1098_v55, 1  ;;  %v933_v3 = vpack.c.bf16 %v896_v63, %v896_v63  ;;  %v1102_v23 = vshrl.u32 %v6627_v50, 16 }
 0x111   : > { %8696 = vst [vmem:[#allocation6_spill] sm:$0xff] %v6638_v56  ;;  %v742_v62 = vpop.f32.mrf.mxu0  ;;  %2335 = vmatmul.bf16.gmra.mxu3 %v6638_v56 }
 0x112   : > { %v820_v0 = vmul.f32 %v6450_v36, %v742_v62  ;;  %v6643_v1 = vsel %vm1057_vm4, %v1096_v57, %v1100_v60  ;;  %v1002_v9 = vunpack.c.l.b16 %v933_v3  ;;  %v1104_v27 = vor.u32 %v1102_v23, %v1100_v60 }
 0x113   : > { %2246 = vmatmul.bf16.gmra.mxu2 %v6643_v1 }
 0x114   : > { %v860_v2 = vadd.f32 %v6454_v40, %v820_v0 }
 0x116   : > { %v897_v5 = vmax.f32 %v860_v2, 0.0 }
 0x118   : > { %v934_v6 = vpack.c.bf16 %v897_v5, %v897_v5 }
 0x119   : > { %v745_v8 = vpop.f32.mrf.mxu0 }
 0x11a   : > { %v1003_v10 = vunpack.c.l.b16 %v934_v6  ;;  %v821_v12 = vmul.f32 %v6450_v36, %v745_v8 }
 0x11c   : > { %v6649_v13 = vpack.c.b16 %v1003_v10, %v1002_v9  ;;  %784 = vmatmul.bf16.gmra.mxu0 %v5849_v7  ;;  %v861_v15 = vadd.f32 %v6454_v40, %v821_v12  ;;  %v6171_v12 = vld [vmem:[%s6428_s27 + $0x88] sm:$0xff]  }
 0x11e   : > { %2167 = vmatmul.bf16.gmra.mxu1 %v6649_v13  ;;  %v1218_v21 = vrot.slane %v6649_v13, 1  ;;  %v1106_v24 = vshll.u32 %v6649_v13, 16  ;;  %v898_v31 = vmax.f32 %v861_v15, 0.0  ;;  %v1110_v55 = vshrl.u32 %v6649_v13, 16 }
 0x120   : > { %v6660_v25 = vsel %vm1206_vm3, %v1216_v53, %v1218_v21  ;;  %v1108_v29 = vrot.slane %v1106_v24, 1  ;;  %v935_v41 = vpack.c.bf16 %v898_v31, %v898_v31  ;;  %v5894_v24 = vld [vmem:[%s8589_s2 + $0x120] sm:$0xff] }
 0x121   : > { %8697 = vst [vmem:[#allocation7_spill] sm:$0xff] %v6660_v25  ;;  %v747_v30 = vpop.f32.mrf.mxu0  ;;  %2340 = vmatmul.bf16.gmra.mxu3 %v6660_v25  ;;  %2488 = vmatpush.bf16.msrb.mxu2 %v5894_v24 }
 0x122   : > { %v822_v32 = vmul.f32 %v6450_v36, %v747_v30  ;;  %v6665_v35 = vsel %vm1057_vm4, %v1104_v27, %v1108_v29  ;;  %v1004_v48 = vunpack.c.l.b16 %v935_v41  ;;  %v1112_v62 = vor.u32 %v1110_v55, %v1108_v29  ;;  %v5902_v27 = vld [vmem:[%s8589_s2 + $0x160] sm:$0xff] }
 0x123   : > { %2251 = vmatmul.bf16.gmra.mxu2 %v6665_v35  ;;  %v5886_v29 = vld [vmem:[%s8589_s2 + $0xe0] sm:$0xff]  ;;  %2577 = vmatpush.bf16.msrb.mxu3 %v5902_v27 }
 0x124   : > { %v862_v39 = vadd.f32 %v6454_v40, %v822_v32  ;;  %2399 = vmatpush.bf16.msrb.mxu1 %v5886_v29  ;;  %v5893_v29 = vld [vmem:[%s8589_s2 + $0x118] sm:$0xff] }
 0x125   : > { %2489 = vmatpush.bf16.msrb.mxu2 %v5893_v29 }
 0x126   : > { %v899_v44 = vmax.f32 %v862_v39, 0.0 }
 0x128   : > { %v936_v45 = vpack.c.bf16 %v899_v44, %v899_v44 }
 0x129   : > { %v750_v46 = vpop.f32.mrf.mxu0 }
 0x12a   : > { %v1005_v49 = vunpack.c.l.b16 %v936_v45  ;;  %v823_v51 = vmul.f32 %v6450_v36, %v750_v46  ;;  %v524_v45 = vld [vmem:[%s6428_s27 + $0x90] sm:$0xf] }
 0x12c   : > { %v6677_v52 = vpack.c.b16 %v1005_v49, %v1004_v48  ;;  %789 = vmatmul.bf16.gmra.mxu0 %v6170_v47  ;;  %v863_v53 = vadd.f32 %v6454_v40, %v823_v51  ;;  %v614_v51 = vunpack.c.l.b16 %v524_v45 }
 0x12e   : > { %2172 = vmatmul.bf16.gmra.mxu1 %v6677_v52  ;;  %v1220_v54 = vrot.slane %v6677_v52, 1  ;;  %v1114_v57 = vshll.u32 %v6677_v52, 16  ;;  %v900_v2 = vmax.f32 %v863_v53, 0.0  ;;  %v1118_v32 = vshrl.u32 %v6677_v52, 16 }
 0x130   : > { %v6685_v60 = vsel %vm1206_vm3, %v1218_v21, %v1220_v54  ;;  %v1116_v63 = vrot.slane %v1114_v57, 1  ;;  %v937_v7 = vpack.c.bf16 %v900_v2, %v900_v2  ;;  %v6723_v57 = vpack.c.b16 %v614_v51, %v614_v51 }
 0x131   : > { %8698 = vst [vmem:[#allocation8_spill] sm:$0xff] %v6685_v60  ;;  %v752_v0 = vpop.f32.mrf.mxu0  ;;  %2345 = vmatmul.bf16.gmra.mxu3 %v6685_v60 }
 0x132   : > { %v824_v3 = vmul.f32 %v6450_v36, %v752_v0  ;;  %v6690_v5 = vsel %vm1057_vm4, %v1112_v62, %v1116_v63  ;;  %v1006_v14 = vunpack.c.l.b16 %v937_v7  ;;  %v1120_v39 = vor.u32 %v1118_v32, %v1116_v63  ;;  %8700 = vst [vmem:[#allocation10_spill] sm:$0xff] %v6723_v57 }
 0x133   : > { %2256 = vmatmul.bf16.gmra.mxu2 %v6690_v5 }
 0x134   : > { %v864_v6 = vadd.f32 %v6454_v40, %v824_v3 }
 0x136   : > { %v901_v8 = vmax.f32 %v864_v6, 0.0 }
 0x138   : > { %v938_v9 = vpack.c.bf16 %v901_v8, %v901_v8 }
 0x139   : > { %v755_v10 = vpop.f32.mrf.mxu0 }
 0x13a   : > { %v1007_v15 = vunpack.c.l.b16 %v938_v9  ;;  %v825_v21 = vmul.f32 %v6450_v36, %v755_v10 }
 0x13c   : > { %v6696_v23 = vpack.c.b16 %v1007_v15, %v1006_v14  ;;  %794 = vmatmul.bf16.gmra.mxu0 %v6171_v12  ;;  %v865_v30 = vadd.f32 %v6454_v40, %v825_v21 }
 0x13e   : > { %2177 = vmatmul.bf16.gmra.mxu1 %v6696_v23  ;;  %v1222_v31 = vrot.slane %v6696_v23, 1  ;;  %v1122_v37 = vshll.u32 %v6696_v23, 16  ;;  %v902_v46 = vmax.f32 %v865_v30, 0.0  ;;  %v1126_v8 = vshrl.u32 %v6696_v23, 16  ;;  %v5901_v30 = vld [vmem:[%s8589_s2 + $0x158] sm:$0xff] }
 0x13f   : > { %2578 = vmatpush.bf16.msrb.mxu3 %v5901_v30 }
 0x140   : > { %v6713_v38 = vsel %vm1206_vm3, %v1220_v54, %v1222_v31  ;;  %v1124_v41 = vrot.slane %v1122_v37, 1  ;;  %v939_v53 = vpack.c.bf16 %v902_v46, %v902_v46 }
 0x141   : > { %8699 = vst [vmem:[#allocation9_spill] sm:$0xff] %v6713_v38  ;;  %v757_v44 = vpop.f32.mrf.mxu0  ;;  %2350 = vmatmul.bf16.gmra.mxu3 %v6713_v38 }
 0x142   : > { %v826_v47 = vmul.f32 %v6450_v36, %v757_v44  ;;  %v6719_v48 = vsel %vm1057_vm4, %v1120_v39, %v1124_v41  ;;  %v1008_v63 = vunpack.c.l.b16 %v939_v53  ;;  %v1128_v12 = vor.u32 %v1126_v8, %v1124_v41 }
 0x143   : > { %2261 = vmatmul.bf16.gmra.mxu2 %v6719_v48 }
 0x144   : > { %v866_v49 = vadd.f32 %v6454_v40, %v826_v47 }
 0x146   : > { %v903_v54 = vmax.f32 %v866_v49, 0.0 }
 0x148   : > { %v940_v55 = vpack.c.bf16 %v903_v54, %v903_v54 }
 0x149   : > { %v760_v62 = vpop.f32.mrf.mxu0 }
 0x14a   : > { %v1009_v0 = vunpack.c.l.b16 %v940_v55  ;;  %v827_v2 = vmul.f32 %v6450_v36, %v760_v62 }
 0x14c   : > { %v6726_v3 = vpack.c.b16 %v1009_v0, %v1008_v63  ;;  %799 = vmatmul.bf16.gmra.mxu0 %v6723_v57  ;;  %v867_v6 = vadd.f32 %v6454_v40, %v827_v2 }
 0x14e   : > { %2182 = vmatmul.bf16.gmra.mxu1 %v6726_v3  ;;  %v1224_v7 = vrot.slane %v6726_v3, 1  ;;  %v1130_v9 = vshll.u32 %v6726_v3, 16  ;;  %v904_v21 = vmax.f32 %v867_v6, 0.0  ;;  %v1134_v54 = vshrl.u32 %v6726_v3, 16 }
 0x150   : > { %v6735_v10 = vsel %vm1206_vm3, %v1222_v31, %v1224_v7  ;;  %v1132_v14 = vrot.slane %v1130_v9, 1  ;;  %v5885_v31 = vld [vmem:[%s8589_s2 + $0xd8] sm:$0xff]  ;;  %v941_v37 = vpack.c.bf16 %v904_v21, %v904_v21 }
 0x151   : > { %v762_v15 = vpop.f32.mrf.mxu0  ;;  %2355 = vmatmul.bf16.gmra.mxu3 %v6735_v10  ;;  %2400 = vmatpush.bf16.msrb.mxu1 %v5885_v31  ;;  %v5900_v31 = vld [vmem:[%s8589_s2 + $0x150] sm:$0xff] }
 0x152   : > { %v828_v24 = vmul.f32 %v6450_v36, %v762_v15  ;;  %v6740_v27 = vsel %vm1057_vm4, %v1128_v12, %v1132_v14  ;;  %v1010_v45 = vunpack.c.l.b16 %v941_v37  ;;  %v1136_v63 = vor.u32 %v1134_v54, %v1132_v14  ;;  %2579 = vmatpush.bf16.msrb.mxu3 %v5900_v31  ;;  %v5884_v54 = vld [vmem:[%s8589_s2 + $0xd0] sm:$0xff] }
 0x153   : > { %2266 = vmatmul.bf16.gmra.mxu2 %v6740_v27  ;;  %v1061_v31 = vshll.u32 %v6473_v58, 16 }
 0x154   : > { %v868_v32 = vadd.f32 %v6454_v40, %v828_v24 }
 0x155   : > { %2401 = vmatpush.bf16.msrb.mxu1 %v5884_v54 }
 0x156   : > { %v905_v39 = vmax.f32 %v868_v32, 0.0 }
 0x158   : > { %v942_v41 = vpack.c.bf16 %v905_v39, %v905_v39 }
 0x159   : > { %v765_v44 = vpop.f32.mrf.mxu0 }
 0x15a   : > { %v1011_v46 = vunpack.c.l.b16 %v942_v41  ;;  %v829_v47 = vmul.f32 %v6450_v36, %v765_v44 }
 0x15c   : > { %v6754_v49 = vpack.c.b16 %v1011_v46, %v1010_v45  ;;  %2137 = vmatmul.bf16.vlgmr.msrb.gmra.mxu0 %v6473_v58  ;;  %v869_v51 = vadd.f32 %v6454_v40, %v829_v47 }
 0x15d   : > { %2307 = vmatpush.bf16.msrb.mxu0 %v6482_v61 }
 0x15e   : > { %2187 = vmatmul.bf16.gmra.mxu1 %v6754_v49  ;;  %v1226_v53 = vrot.slane %v6754_v49, 1  ;;  %v1138_v55 = vshll.u32 %v6754_v49, 16  ;;  %v906_v61 = vmax.f32 %v869_v51, 0.0  ;;  %v1142_v37 = vshrl.u32 %v6754_v49, 16 }
 0x160   : > { %v6764_v62 = vsel %vm1206_vm3, %v1224_v7, %v1226_v53  ;;  %v1140_v0 = vrot.slane %v1138_v55, 1  ;;  %v943_v7 = vpack.c.bf16 %v906_v61, %v906_v61 }
 0x161   : > { %v767_v2 = vpop.f32.mrf.mxu0  ;;  %2360 = vmatmul.bf16.gmra.mxu3 %v6764_v62  ;;  %2308 = vmatpush.bf16.msrb.mxu0 %v6496_v4 }
 0x162   : > { %v830_v6 = vmul.f32 %v6450_v36, %v767_v2  ;;  %v6770_v8 = vsel %vm1057_vm4, %v1136_v63, %v1140_v0  ;;  %v1012_v21 = vunpack.c.l.b16 %v943_v7  ;;  %v1144_v44 = vor.u32 %v1142_v37, %v1140_v0 }
 0x163   : > { %2271 = vmatmul.bf16.gmra.mxu2 %v6770_v8 }
 0x164   : > { %v870_v9 = vadd.f32 %v6454_v40, %v830_v6 }
 0x165   : > { %2309 = vmatpush.bf16.msrb.mxu0 %v6509_v11  ;;  %v5892_v11 = vld [vmem:[%s8589_s2 + $0x110] sm:$0xff] }
 0x166   : > { %v907_v12 = vmax.f32 %v870_v9, 0.0  ;;  %2490 = vmatpush.bf16.msrb.mxu2 %v5892_v11 }
 0x168   : > { %v944_v14 = vpack.c.bf16 %v907_v12, %v907_v12 }
 0x169   : > { %v770_v15 = vpop.f32.mrf.mxu0  ;;  %2310 = vmatpush.bf16.msrb.mxu0 %v6524_v19 }
 0x16a   : > { %v1013_v4 = vunpack.c.l.b16 %v944_v14  ;;  %v831_v24 = vmul.f32 %v6450_v36, %v770_v15 }
 0x16b   : > { %v6777_v29 = vpop.f32.mrf.mxu1 }
 0x16c   : > { %v6779_v30 = vpack.c.b16 %v1013_v4, %v1012_v21  ;;  %2142 = vmatmul.bf16.gmra.mxu0 %v6519_v18  ;;  %v871_v19 = vadd.f32 %v6454_v40, %v831_v24 }
 0x16d   : > { %2311 = vmatpush.bf16.msrb.mxu0 %v6534_v22 }
 0x16e   : > { %2192 = vmatmul.bf16.gmra.mxu1 %v6779_v30  ;;  %v1228_v32 = vrot.slane %v6779_v30, 1  ;;  %v1146_v39 = vshll.u32 %v6779_v30, 16  ;;  %v908_v22 = vmax.f32 %v871_v19, 0.0  ;;  %v1150_v15 = vshrl.u32 %v6779_v30, 16 }
 0x170   : > { %v6795_v41 = vsel %vm1206_vm3, %v1226_v53, %v1228_v32  ;;  %v1148_v45 = vrot.slane %v1146_v39, 1 }
 0x171   : > { %v772_v46 = vpop.f32.mrf.mxu0  ;;  %2365 = vmatmul.bf16.gmra.mxu3 %v6795_v41  ;;  %2312 = vmatpush.bf16.msrb.mxu0 %v6545_v28  ;;  %v945_v28 = vpack.c.bf16 %v908_v22, %v908_v22 }
 0x172   : > { %v832_v47 = vmul.f32 %v6450_v36, %v772_v46  ;;  %v6801_v51 = vsel %vm1057_vm4, %v1144_v44, %v1148_v45  ;;  %v1152_v4 = vor.u32 %v1150_v15, %v1148_v45  ;;  %v5891_v44 = vld [vmem:[%s8589_s2 + $0x108] sm:$0xff] }
 0x173   : > { %v6806_v55 = vpop.f32.mrf.mxu1  ;;  %2276 = vmatmul.bf16.gmra.mxu2 %v6801_v51  ;;  %v1014_v61 = vunpack.c.l.b16 %v945_v28 }
 0x174   : > { %v872_v53 = vadd.f32 %v6454_v40, %v832_v47  ;;  %2491 = vmatpush.bf16.msrb.mxu2 %v5891_v44  ;;  %v1063_v47 = vrot.slane %v1061_v31, 1  ;;  %v5883_v44 = vld [vmem:[%s8589_s2 + $0xc8] sm:$0xff] }
 0x175   : > { %2313 = vmatpush.bf16.msrb.mxu0 %v6555_v34  ;;  %2402 = vmatpush.bf16.msrb.mxu1 %v5883_v44 }
 0x176   : > { %v909_v63 = vmax.f32 %v872_v53, 0.0 }
 0x178   : > { %v946_v0 = vpack.c.bf16 %v909_v63, %v909_v63 }
 0x179   : > { %v775_v2 = vpop.f32.mrf.mxu0  ;;  %2314 = vmatpush.bf16.msrb.mxu0 %v6567_v43 }
 0x17a   : > { %v1015_v6 = vunpack.c.l.b16 %v946_v0  ;;  %v833_v9 = vmul.f32 %v6450_v36, %v775_v2  ;;  %v1059_v0 = vshrl.u32 %v6473_v58, 16 }
 0x17b   : > { %v6813_v7 = vpop.f32.mrf.mxu1 }
 0x17c   : > { %v6815_v12 = vpack.c.b16 %v1015_v6, %v1014_v61  ;;  %2147 = vmatmul.bf16.gmra.mxu0 %v6562_v42  ;;  %v873_v14 = vadd.f32 %v6454_v40, %v833_v9  ;;  %v1064_v9 = vor.u32 %v1063_v47, %v1059_v0 }
 0x17e   : > { %2197 = vmatmul.bf16.gmra.mxu1 %v6815_v12  ;;  %v1230_v34 = vrot.slane %v6815_v12, 1  ;;  %v1154_v43 = vshll.u32 %v6815_v12, 16  ;;  %v910_v19 = vmax.f32 %v873_v14, 0.0  ;;  %v1158_v47 = vshrl.u32 %v6815_v12, 16 }
 0x180   : > { %v6824_v21 = vsel %vm1206_vm3, %v1228_v32, %v1230_v34  ;;  %v1156_v24 = vrot.slane %v1154_v43, 1  ;;  %v1066_v32 = vshll.u32 %v6519_v18, 16  ;;  %v947_v54 = vpack.c.bf16 %v910_v19, %v910_v19 }
 0x181   : > { %v777_v11 = vpop.f32.mrf.mxu0  ;;  %2370 = vmatmul.bf16.gmra.mxu3 %v6824_v21 }
 0x182   : > { %v834_v37 = vmul.f32 %v6450_v36, %v777_v11  ;;  %v6830_v39 = vsel %vm1057_vm4, %v1152_v4, %v1156_v24  ;;  %v1068_v2 = vrot.slane %v1066_v32, 1  ;;  %v1016_v15 = vunpack.c.l.b16 %v947_v54 }
 0x183   : > { %v6835_v46 = vpop.f32.mrf.mxu1  ;;  %2281 = vmatmul.bf16.gmra.mxu2 %v6830_v39 }
 0x184   : > { %v874_v45 = vadd.f32 %v6454_v40, %v834_v37  ;;  %v2331_v22 = vpop.f32.mrf.mxu3  ;;  %v1069_v31 = vsel %vm1057_vm4, %v1064_v9, %v1068_v2  ;;  %v5899_v37 = vld [vmem:[%s8589_s2 + $0x148] sm:$0xff] }
 0x185   : > { %2580 = vmatpush.bf16.msrb.mxu3 %v5899_v37 }
 0x186   : > { %v911_v53 = vmax.f32 %v874_v45, 0.0  ;;  %v2242_v28 = vpop.f32.mrf.mxu2 }
 0x187   : > { %v2243_v63 = vadd.f32 %v2242_v28, %v6777_v29 }
 0x188   : > { %v948_v61 = vpack.c.bf16 %v911_v53, %v911_v53 }
 0x189   : > { %v780_v6 = vpop.f32.mrf.mxu0  ;;  %v6842_v14 = vadd.f32 %v2331_v22, %v2243_v63  ;;  %v1160_v63 = vor.u32 %v1158_v47, %v1156_v24 }
 0x18a   : > { %v1017_v43 = vunpack.c.l.b16 %v948_v61  ;;  %v835_v4 = vmul.f32 %v6450_v36, %v780_v6 }
 0x18b   : > { %v6845_v11 = vpop.f32.mrf.mxu1 }
 0x18c   : > { %v6848_v19 = vpack.c.b16 %v1017_v43, %v1016_v15  ;;  %2226 = vmatmul.bf16.vlgmr.msra.gmra.mxu0 %v1069_v31  ;;  %v2333_v29 = vpop.f32.mrf.mxu3  ;;  %v875_v32 = vadd.f32 %v6454_v40, %v835_v4 }
 0x18e   : > { %8701 = vst [vmem:[#allocation11_spill] sm:$0xff] %v6848_v19  ;;  %2202 = vmatmul.bf16.gmra.mxu1 %v6848_v19  ;;  %v2244_v45 = vpop.f32.mrf.mxu2  ;;  %v1232_v22 = vrot.slane %v6848_v19, 1  ;;  %v1162_v54 = vshll.u32 %v6848_v19, 16  ;;  %v912_v9 = vmax.f32 %v875_v32, 0.0  ;;  %v1070_v32 = vshrl.u32 %v6519_v18, 16 }
 0x18f   : > { %v2245_v53 = vadd.f32 %v2244_v45, %v6806_v55  ;;  %v1074_v55 = vshll.u32 %v6562_v42, 16 }
 0x190   : > { %v6863_v28 = vsel %vm1206_vm3, %v1230_v34, %v1232_v22  ;;  %v1164_v0 = vrot.slane %v1162_v54, 1  ;;  %v949_v31 = vpack.c.bf16 %v912_v9, %v912_v9 }
 0x191   : > { %8702 = vst [vmem:[#allocation12_spill] sm:$0xff] %v6863_v28  ;;  %v782_v61 = vpop.f32.mrf.mxu0  ;;  %2375 = vmatmul.bf16.gmra.mxu3 %v6863_v28  ;;  %v6866_v6 = vadd.f32 %v2333_v29, %v2245_v53  ;;  %v1076_v45 = vrot.slane %v1074_v55, 1  ;;  %v1072_v53 = vor.u32 %v1070_v32, %v1068_v2 }
 0x192   : > { %v836_v15 = vmul.f32 %v6450_v36, %v782_v61  ;;  %v6870_v43 = vsel %vm1057_vm4, %v1160_v63, %v1164_v0  ;;  %v5882_v63 = vld [vmem:[%s8589_s2 + $0xc0] sm:$0xff]  ;;  %v1018_v20 = vunpack.c.l.b16 %v949_v31 }
 0x193   : > { %8703 = vst [vmem:[#allocation13_spill] sm:$0xff] %v6870_v43  ;;  %v6872_v4 = vpop.f32.mrf.mxu1  ;;  %2286 = vmatmul.bf16.gmra.mxu2 %v6870_v43  ;;  %2403 = vmatpush.bf16.msrb.mxu1 %v5882_v63 }
 0x194   : > { %v876_v34 = vadd.f32 %v6454_v40, %v836_v15  ;;  %v2336_v24 = vpop.f32.mrf.mxu3 }
 0x196   : > { %v913_v37 = vmax.f32 %v876_v34, 0.0  ;;  %v2247_v44 = vpop.f32.mrf.mxu2 }
 0x197   : > { %v2248_v29 = vadd.f32 %v2247_v44, %v6813_v7  ;;  %v6888_v7 = vsel %vm1057_vm4, %v1072_v53, %v1076_v45  ;;  %v1166_v44 = vshrl.u32 %v6848_v19, 16 }
 0x198   : > { %v950_v47 = vpack.c.bf16 %v913_v37, %v913_v37 }
 0x199   : > { %v785_v54 = vpop.f32.mrf.mxu0  ;;  %v6882_v61 = vadd.f32 %v2336_v24, %v2248_v29 }
 0x19a   : > { %v1019_v15 = vunpack.c.l.b16 %v950_v47  ;;  %v837_v9 = vmul.f32 %v6450_v36, %v785_v54 }
 0x19b   : > { %v6885_v34 = vpop.f32.mrf.mxu1 }
 0x19c   : > { %v6890_v55 = vpack.c.b16 %v1019_v15, %v1018_v20  ;;  %2231 = vmatmul.bf16.gmra.mxu0 %v6888_v7  ;;  %v2338_v2 = vpop.f32.mrf.mxu3  ;;  %v877_v37 = vadd.f32 %v6454_v40, %v837_v9  ;;  %v1168_v20 = vor.u32 %v1166_v44, %v1164_v0  ;;  %v5890_v0 = vld [vmem:[%s8589_s2 + $0x100] sm:$0xff] }
 0x19d   : > { %2492 = vmatpush.bf16.msrb.mxu2 %v5890_v0 }
 0x19e   : > { %8704 = vst [vmem:[#allocation14_spill] sm:$0xff] %v6890_v55  ;;  %2207 = vmatmul.bf16.gmra.mxu1 %v6890_v55  ;;  %v2249_v24 = vpop.f32.mrf.mxu2  ;;  %v1234_v31 = vrot.slane %v6890_v55, 1  ;;  %v1170_v29 = vshll.u32 %v6890_v55, 16  ;;  %v914_v15 = vmax.f32 %v877_v37, 0.0 }
 0x19f   : > { %v2250_v32 = vadd.f32 %v2249_v24, %v6835_v46 }
 0x1a0   : > { %v6900_v47 = vsel %vm1206_vm3, %v1232_v22, %v1234_v31  ;;  %v1172_v54 = vrot.slane %v1170_v29, 1  ;;  %v951_v37 = vpack.c.bf16 %v914_v15, %v914_v15 }
 0x1a1   : > { %8705 = vst [vmem:[#allocation15_spill] sm:$0xff] %v6900_v47  ;;  %v787_v53 = vpop.f32.mrf.mxu0  ;;  %2380 = vmatmul.bf16.gmra.mxu3 %v6900_v47  ;;  %v6903_v63 = vadd.f32 %v2338_v2, %v2250_v32  ;;  %v5898_v2 = vld [vmem:[%s8589_s2 + $0x140] sm:$0xff]  ;;  %v1078_v32 = vshrl.u32 %v6562_v42, 16 }
 0x1a2   : > { %v838_v9 = vmul.f32 %v6450_v36, %v787_v53  ;;  %v6907_v57 = vsel %vm1057_vm4, %v1168_v20, %v1172_v54  ;;  %2581 = vmatpush.bf16.msrb.mxu3 %v5898_v2  ;;  %v1020_v47 = vunpack.c.l.b16 %v951_v37 }
 0x1a3   : > { %8706 = vst [vmem:[#allocation16_spill] sm:$0xff] %v6903_v63  ;;  %v6909_v43 = vpop.f32.mrf.mxu1  ;;  %2291 = vmatmul.bf16.gmra.mxu2 %v6907_v57 }
 0x1a4   : > { %8707 = vst [vmem:[#allocation17_spill] sm:$0xff] %v6907_v57  ;;  %v878_v46 = vadd.f32 %v6454_v40, %v838_v9  ;;  %v2341_v22 = vpop.f32.mrf.mxu3  ;;  %v1080_v9 = vor.u32 %v1078_v32, %v1076_v45 }
 0x1a6   : > { %v915_v24 = vmax.f32 %v878_v46, 0.0  ;;  %v2252_v44 = vpop.f32.mrf.mxu2  ;;  %v6928_v15 = vsel %vm1057_vm4, %v1080_v9, %v6598_v17  ;;  %v1174_v17 = vshrl.u32 %v6890_v55, 16 }
 0x1a7   : > { %v2253_v29 = vadd.f32 %v2252_v44, %v6845_v11  ;;  %v5913_v11 = vld [vmem:[%s8589_s2 + $0x1b8] sm:$0xff] }
 0x1a8   : > { %v952_v20 = vpack.c.bf16 %v915_v24, %v915_v24  ;;  %2663 = vmatpush.bf16.msra.mxu0 %v5913_v11 }
 0x1a9   : > { %v790_v53 = vpop.f32.mrf.mxu0  ;;  %v6921_v57 = vadd.f32 %v2341_v22, %v2253_v29  ;;  %v1176_v29 = vor.u32 %v1174_v17, %v1172_v54 }
 0x1aa   : > { %v1021_v63 = vunpack.c.l.b16 %v952_v20  ;;  %v839_v28 = vmul.f32 %v6450_v36, %v790_v53 }
 0x1ab   : > { %v6924_v19 = vpop.f32.mrf.mxu1 }
 0x1ac   : > { %v6933_v46 = vpack.c.b16 %v1021_v63, %v1020_v47  ;;  %v879_v45 = vadd.f32 %v6454_v40, %v839_v28  ;;  %2236 = vmatmul.bf16.gmra.mxu0 %v6928_v15  ;;  %v2343_v22 = vpop.f32.mrf.mxu3  ;;  %v5912_v28 = vld [vmem:[%s8589_s2 + $0x1b0] sm:$0xff] }
 0x1ad   : > { %2664 = vmatpush.bf16.msra.mxu0 %v5912_v28 }
 0x1ae   : > { %v916_v0 = vmax.f32 %v879_v45, 0.0  ;;  %2212 = vmatmul.bf16.gmra.mxu1 %v6933_v46  ;;  %v2254_v2 = vpop.f32.mrf.mxu2  ;;  %v6939_v37 = vrot.slane %v6933_v46, 1  ;;  %v1178_v24 = vshll.u32 %v6933_v46, 16 }
 0x1af   : > { %v2255_v47 = vadd.f32 %v2254_v2, %v6872_v4 }
 0x1b0   : > { %v953_v63 = vpack.c.bf16 %v916_v0, %v916_v0  ;;  %v6949_v44 = vsel %vm1206_vm3, %v1234_v31, %v6939_v37  ;;  %v1180_v32 = vrot.slane %v1178_v24, 1  ;;  %v5911_v31 = vld [vmem:[%s8589_s2 + $0x1a8] sm:$0xff]  ;;  %v5929_v24 = vld [vmem:[%s8589_s2 + $0x238] sm:$0xff] }
 0x1b1   : > { %8708 = vst [vmem:[#allocation18_spill] sm:$0xff] %v6949_v44  ;;  %v792_v20 = vpop.f32.mrf.mxu0  ;;  %2385 = vmatmul.bf16.gmra.mxu3 %v6949_v44  ;;  %v6952_v53 = vadd.f32 %v2343_v22, %v2255_v47  ;;  %2665 = vmatpush.bf16.msra.mxu0 %v5911_v31  ;;  %v5937_v47 = vld [vmem:[%s8590_s3 + $0x38] sm:$0xff] }
 0x1b2   : > { %v1055_v9 = vunpack.c.l.b16 %v953_v63  ;;  %v840_v4 = vmul.f32 %v6450_v36, %v792_v20  ;;  %v6956_v11 = vsel %vm1057_vm4, %v1176_v29, %v1180_v32  ;;  %v5921_v29 = vld [vmem:[%s8589_s2 + $0x1f8] sm:$0xff]  ;;  %v5910_v20 = vld [vmem:[%s8589_s2 + $0x1a0] sm:$0xff]  ;;  %2841 = vmatpush.bf16.msra.mxu2 %v5929_v24  ;;  %3506 = vmatpush.bf16.msra.mxu3 %v5937_v47 }
 0x1b3   : > { %8709 = vst [vmem:[#allocation19_spill] sm:$0xff] %v6952_v53  ;;  %v6958_v45 = vpop.f32.mrf.mxu1  ;;  %2296 = vmatmul.bf16.gmra.mxu2 %v6956_v11  ;;  %2752 = vmatpush.bf16.msra.mxu1 %v5921_v29  ;;  %v8711_v53 = vrot.slane %v6519_v18, 1 }
 0x1b4   : > { %8710 = vst [vmem:[#allocation20_spill] sm:$0xff] %v6956_v11  ;;  %v880_v54 = vadd.f32 %v6454_v40, %v840_v4  ;;  %v2346_v0 = vpop.f32.mrf.mxu3  ;;  %v1056_v22 = vpack.c.b16 %v1055_v9, %v1055_v9 }
 0x1b5   : > { %2666 = vmatpush.bf16.msra.mxu0 %v5910_v20 }
 0x1b6   : > { %v917_v2 = vmax.f32 %v880_v54, 0.0  ;;  %v2257_v17 = vpop.f32.mrf.mxu2  ;;  %v1207_v54 = vrot.slane %v6473_v58, 1  ;;  %v1186_v63 = vshll.u32 %v1056_v22, 16  ;;  %v1238_v47 = vrot.slane %v1056_v22, 1 }
 0x1b7   : > { %v2258_v28 = vadd.f32 %v2257_v17, %v6885_v34 }
 0x1b8   : > { %v954_v4 = vpack.c.bf16 %v917_v2, %v917_v2  ;;  %v1209_v55 = vsel %vm1206_vm3, %v1207_v54, %v8711_v53  ;;  %v5909_v2 = vld [vmem:[%s8589_s2 + $0x198] sm:$0xff] }
 0x1b9   : > { %v795_v31 = vpop.f32.mrf.mxu0  ;;  %v6980_v11 = vadd.f32 %v2346_v0, %v2258_v28  ;;  %v1182_v28 = vshrl.u32 %v6933_v46, 16  ;;  %2667 = vmatpush.bf16.msra.mxu0 %v5909_v2 }
 0x1ba   : > { %v1257_v34 = vunpack.c.l.b16 %v954_v4  ;;  %v841_v17 = vmul.f32 %v6450_v36, %v795_v31  ;;  %v1188_v4 = vrot.slane %v1186_v63, 1 }
 0x1bb   : > { %v6983_v44 = vpop.f32.mrf.mxu1  ;;  %v1184_v54 = vor.u32 %v1182_v28, %v1180_v32 }
 0x1bc   : > { %v6991_v24 = vpack.c.b16 %v1257_v34, %v1055_v9  ;;  %v881_v58 = vadd.f32 %v6454_v40, %v841_v17  ;;  %2315 = vmatmul.bf16.vlgmr.msrb.gmra.mxu0 %v1209_v55  ;;  %v2348_v0 = vpop.f32.mrf.mxu3  ;;  %v5908_v55 = vld [vmem:[%s8589_s2 + $0x190] sm:$0xff]  ;;  %v1239_v34 = vsel %vm1206_vm3, %v6939_v37, %v1238_v47 }
 0x1bd   : > { %2668 = vmatpush.bf16.msra.mxu0 %v5908_v55  ;;  %v1189_v28 = vsel %vm1057_vm4, %v1184_v54, %v1188_v4 }
 0x1be   : > { %v918_v29 = vmax.f32 %v881_v58, 0.0  ;;  %v2259_v20 = vpop.f32.mrf.mxu2  ;;  %2404 = vmatmul.bf16.vlgmr.msrb.gmra.mxu1 %v6519_v18  ;;  %v6997_v53 = vrot.slane %v6991_v24, 1  ;;  %v1264_v31 = vshll.u32 %v6991_v24, 16 }
 0x1bf   : > { %v2260_v9 = vadd.f32 %v2259_v20, %v6909_v43 }
 0x1c0   : > { %8712 = vst [vmem:[#allocation21_spill] sm:$0xff] %v6997_v53  ;;  %v955_v22 = vpack.c.bf16 %v918_v29, %v918_v29  ;;  %v7009_v63 = vsel %vm1206_vm3, %v6939_v37, %v6997_v53  ;;  %v1266_v17 = vrot.slane %v1264_v31, 1  ;;  %v5907_v37 = vld [vmem:[%s8589_s2 + $0x188] sm:$0xff] }
 0x1c1   : > { %8713 = vst [vmem:[#allocation22_spill] sm:$0xff] %v7009_v63  ;;  %v797_v2 = vpop.f32.mrf.mxu0  ;;  %2390 = vmatmul.bf16.gmra.mxu3 %v1239_v34  ;;  %v7011_v58 = vadd.f32 %v2348_v0, %v2260_v9  ;;  %2669 = vmatpush.bf16.msra.mxu0 %v5907_v37  ;;  %v1268_v34 = vshrl.u32 %v6991_v24, 16 }
 0x1c2   : > { %v1261_v43 = vunpack.c.l.b16 %v955_v22  ;;  %v842_v32 = vmul.f32 %v6450_v36, %v797_v2  ;;  %v7016_v29 = vsel %vm1057_vm4, %v1184_v54, %v1266_v17  ;;  %v1210_v2 = vrot.slane %v6562_v42, 1 }
 0x1c3   : > { %8714 = vst [vmem:[#allocation23_spill] sm:$0xff] %v7016_v29  ;;  %v2180_v47 = vpop.f32.mrf.mxu1  ;;  %2301 = vmatmul.bf16.gmra.mxu2 %v1189_v28  ;;  %v5906_v28 = vld [vmem:[%s8589_s2 + $0x180] sm:$0xff]  ;;  %v7032_v37 = vor.u32 %v1268_v34, %v1266_v17 }
 0x1c4   : > { %v1262_v20 = vpack.c.b16 %v1261_v43, %v1261_v43  ;;  %v882_v31 = vadd.f32 %v6454_v40, %v842_v32  ;;  %v2351_v55 = vpop.f32.mrf.mxu3 }
 0x1c5   : > { %8715 = vst [vmem:[#allocation24_spill] sm:$0xff] %v7032_v37  ;;  %2670 = vmatpush.bf16.msra.mxu0 %v5906_v28  ;;  %v5936_v28 = vld [vmem:[%s8590_s3 + $0x30] sm:$0xff] }
 0x1c6   : > { %v919_v0 = vmax.f32 %v882_v31, 0.0  ;;  %v2262_v9 = vpop.f32.mrf.mxu2  ;;  %v1280_v22 = vrot.slane %v1262_v20, 1  ;;  %v1272_v4 = vshll.u32 %v1262_v20, 16  ;;  %3507 = vmatpush.bf16.msra.mxu3 %v5936_v28 }
 0x1c7   : > { %v2263_v54 = vadd.f32 %v2262_v9, %v6924_v19 }
 0x1c8   : > { %v956_v36 = vpack.c.bf16 %v919_v0, %v919_v0  ;;  %v7030_v32 = vsel %vm1206_vm3, %v6997_v53, %v1280_v22  ;;  %v1274_v31 = vrot.slane %v1272_v4, 1  ;;  %v8717_v0 = vrot.slane %v6519_v18, 1  ;;  %v5928_v18 = vld [vmem:[%s8589_s2 + $0x230] sm:$0xff] }
 0x1c9   : > { %v7034_v40 = vpop.f32.mrf.mxu0  ;;  %v7036_v20 = vadd.f32 %v2351_v55, %v2263_v54  ;;  %2842 = vmatpush.bf16.msra.mxu2 %v5928_v18 }
 0x1ca   : > { %8716 = vst [vmem:[#allocation25_spill] sm:$0xff] %v7034_v40  ;;  %v1285_v19 = vunpack.c.l.b16 %v956_v36  ;;  %v7040_v9 = vsel %vm1057_vm4, %v7032_v37, %v1274_v31  ;;  %v1211_v63 = vsel %vm1206_vm3, %v8717_v0, %v1210_v2 }
 0x1cb   : > { %v2183_v29 = vpop.f32.mrf.mxu1 }
 0x1cc   : > { %v7045_v22 = vpack.c.b16 %v1285_v19, %v1261_v43  ;;  %2320 = vmatmul.bf16.gmra.mxu0 %v1211_v63  ;;  %v2353_v17 = vpop.f32.mrf.mxu3 }
 0x1ce   : > { %8718 = vst [vmem:[#allocation26_spill] sm:$0xff] %v7045_v22  ;;  %v2264_v34 = vpop.f32.mrf.mxu2  ;;  %2409 = vmatmul.bf16.gmra.mxu1 %v6562_v42 }
 0x1cf   : > { %v2265_v55 = vadd.f32 %v2264_v34, %v6958_v45 }
 0x1d1   : > { %v802_v4 = vpop.f32.mrf.mxu0  ;;  %2582 = vmatmul.bf16.vlgmr.msrb.gmra.mxu3 %v1211_v63  ;;  %v7049_v36 = vadd.f32 %v2353_v17, %v2265_v55  ;;  %v5920_v63 = vld [vmem:[%s8589_s2 + $0x1f0] sm:$0xff]  ;;  %v8719_v17 = vrot.slane %v6578_v59, 1 }
 0x1d2   : > { %2753 = vmatpush.bf16.msra.mxu1 %v5920_v63 }
 0x1d3   : > { %v2185_v54 = vpop.f32.mrf.mxu1  ;;  %2493 = vmatmul.bf16.vlgmr.msrb.gmra.mxu2 %v6888_v7  ;;  %v7067_v34 = vsel %vm1206_vm3, %v1210_v2, %v8719_v17 }
 0x1d4   : > { %v2356_v43 = vpop.f32.mrf.mxu3  ;;  %8720 = vst [vmem:[#allocation27_spill] sm:$0xff] %v7067_v34 }
 0x1d6   : > { %v2267_v31 = vpop.f32.mrf.mxu2 }
 0x1d7   : > { %v2268_v45 = vadd.f32 %v2267_v31, %v6983_v44 }
 0x1d9   : > { %v2138_v19 = vpop.f32.mrf.mxu0  ;;  %v7062_v7 = vadd.f32 %v2356_v43, %v2268_v45 }
 0x1db   : > { %v2188_v0 = vpop.f32.mrf.mxu1 }
 0x1dc   : > { %2325 = vmatmul.bf16.gmra.mxu0 %v7067_v34  ;;  %v2358_v55 = vpop.f32.mrf.mxu3 }
 0x1de   : > { %v2269_v4 = vpop.f32.mrf.mxu2  ;;  %2414 = vmatmul.bf16.gmra.mxu1 %v6578_v59 }
 0x1df   : > { %v2270_v44 = vadd.f32 %v2269_v4, %v2180_v47 }
 0x1e1   : > { %v2140_v18 = vpop.f32.mrf.mxu0  ;;  %2587 = vmatmul.bf16.gmra.mxu3 %v7067_v34  ;;  %v7072_v28 = vadd.f32 %v2358_v55, %v2270_v44 }
 0x1e3   : > { %v2190_v43 = vpop.f32.mrf.mxu1  ;;  %2498 = vmatmul.bf16.gmra.mxu2 %v6928_v15 }
 0x1e4   : > { %v2361_v31 = vpop.f32.mrf.mxu3 }
 0x1e6   : > { %v2272_v45 = vpop.f32.mrf.mxu2 }
 0x1e7   : > { %v2273_v63 = vadd.f32 %v2272_v45, %v2183_v29  ;;  %v5927_v29 = vld [vmem:[%s8589_s2 + $0x228] sm:$0xff] }
 0x1e8   : > { %2843 = vmatpush.bf16.msra.mxu2 %v5927_v29 }
 0x1e9   : > { %v7075_v2 = vpop.f32.mrf.mxu0  ;;  %v7077_v17 = vadd.f32 %v2361_v31, %v2273_v63 }
 0x1eb   : > { %v2193_v53 = vpop.f32.mrf.mxu1 }
 0x1ec   : > { %v2363_v37 = vpop.f32.mrf.mxu3  ;;  %2671 = vmatmul.bf16.vlgmr.msra.gmra.mxu0 %v6562_v42  ;;  %v5935_v42 = vld [vmem:[%s8590_s3 + $0x28] sm:$0xff] }
 0x1ed   : > { %3508 = vmatpush.bf16.msra.mxu3 %v5935_v42 }
 0x1ee   : > { %v2274_v47 = vpop.f32.mrf.mxu2  ;;  %2419 = vmatmul.bf16.gmra.mxu1 %v6596_v16 }
 0x1ef   : > { %v2275_v4 = vadd.f32 %v2274_v47, %v2185_v54 }
 0x1f1   : > { %v7081_v55 = vpop.f32.mrf.mxu0  ;;  %2592 = vmatmul.bf16.gmra.mxu3 %v6609_v26  ;;  %v7084_v44 = vadd.f32 %v2363_v37, %v2275_v4  ;;  %v5919_v37 = vld [vmem:[%s8589_s2 + $0x1e8] sm:$0xff] }
 0x1f2   : > { %2754 = vmatpush.bf16.msra.mxu1 %v5919_v37 }
 0x1f3   : > { %8721 = vst [vmem:[#allocation28_spill] sm:$0xff] %v7084_v44  ;;  %v2195_v40 = vpop.f32.mrf.mxu1  ;;  %2503 = vmatmul.bf16.gmra.mxu2 %v6615_v33 }
 0x1f4   : > { %v2366_v31 = vpop.f32.mrf.mxu3 }
 0x1f6   : > { %v2277_v54 = vpop.f32.mrf.mxu2 }
 0x1f7   : > { %v2278_v45 = vadd.f32 %v2277_v54, %v2188_v0 }
 0x1f9   : > { %v2148_v63 = vpop.f32.mrf.mxu0  ;;  %v7096_v47 = vadd.f32 %v2366_v31, %v2278_v45 }
 0x1fb   : > { %8722 = vst [vmem:[#allocation29_spill] sm:$0xff] %v7096_v47  ;;  %v2198_v4 = vpop.f32.mrf.mxu1 }
 0x1fc   : > { %v2368_v26 = vpop.f32.mrf.mxu3  ;;  %2676 = vmatmul.bf16.gmra.mxu0 %v6578_v59 }
 0x1fe   : > { %v2279_v22 = vpop.f32.mrf.mxu2  ;;  %2424 = vmatmul.bf16.gmra.mxu1 %v6627_v50 }
 0x1ff   : > { %v2280_v44 = vadd.f32 %v2279_v22, %v2190_v43 }
 0x201   : > { %v2150_v29 = vpop.f32.mrf.mxu0  ;;  %2597 = vmatmul.bf16.gmra.mxu3 %v6638_v56  ;;  %v7101_v0 = vadd.f32 %v2368_v26, %v2280_v44 }
 0x203   : > { %v2200_v42 = vpop.f32.mrf.mxu1  ;;  %2508 = vmatmul.bf16.gmra.mxu2 %v6643_v1 }
 0x204   : > { %v2371_v54 = vpop.f32.mrf.mxu3 }
 0x206   : > { %v2282_v37 = vpop.f32.mrf.mxu2 }
 0x207   : > { %v2283_v31 = vadd.f32 %v2282_v37, %v2193_v53 }
 0x209   : > { %v2227_v45 = vpop.f32.mrf.mxu0  ;;  %v7104_v47 = vadd.f32 %v2371_v54, %v2283_v31 }
 0x20a   : > { %v7106_v34 = vadd.f32 %v2227_v45, %v2138_v19  ;;  %v5926_v19 = vld [vmem:[%s8589_s2 + $0x220] sm:$0xff] }
 0x20b   : > { %v2203_v59 = vpop.f32.mrf.mxu1  ;;  %2844 = vmatpush.bf16.msra.mxu2 %v5926_v19 }
 0x20c   : > { %v2373_v33 = vpop.f32.mrf.mxu3  ;;  %2681 = vmatmul.bf16.gmra.mxu0 %v6596_v16  ;;  %v5934_v16 = vld [vmem:[%s8590_s3 + $0x20] sm:$0xff] }
 0x20d   : > { %3509 = vmatpush.bf16.msra.mxu3 %v5934_v16 }
 0x20e   : > { %v2284_v22 = vpop.f32.mrf.mxu2  ;;  %2429 = vmatmul.bf16.gmra.mxu1 %v6649_v13 }
 0x20f   : > { %v2285_v26 = vadd.f32 %v2284_v22, %v2195_v40 }
 0x211   : > { %v2229_v43 = vpop.f32.mrf.mxu0  ;;  %2602 = vmatmul.bf16.gmra.mxu3 %v6660_v25  ;;  %v7111_v44 = vadd.f32 %v2373_v33, %v2285_v26  ;;  %v5918_v33 = vld [vmem:[%s8589_s2 + $0x1e0] sm:$0xff] }
 0x212   : > { %v7113_v56 = vadd.f32 %v2229_v43, %v2140_v18  ;;  %2755 = vmatpush.bf16.msra.mxu1 %v5918_v33 }
 0x213   : > { %v2205_v53 = vpop.f32.mrf.mxu1  ;;  %2513 = vmatmul.bf16.gmra.mxu2 %v6665_v35 }
 0x214   : > { %v2376_v54 = vpop.f32.mrf.mxu3 }
 0x216   : > { %v2287_v40 = vpop.f32.mrf.mxu2 }
 0x217   : > { %v2288_v37 = vadd.f32 %v2287_v40, %v2198_v4 }
 0x219   : > { %v2232_v18 = vpop.f32.mrf.mxu0  ;;  %v7125_v31 = vadd.f32 %v2376_v54, %v2288_v37 }
 0x21a   : > { %v2233_v45 = vadd.f32 %v2232_v18, %v7075_v2 }
 0x21b   : > { %v2208_v22 = vpop.f32.mrf.mxu1 }
 0x21c   : > { %v2378_v26 = vpop.f32.mrf.mxu3  ;;  %2686 = vmatmul.bf16.gmra.mxu0 %v6627_v50 }
 0x21e   : > { %v2289_v43 = vpop.f32.mrf.mxu2  ;;  %2434 = vmatmul.bf16.gmra.mxu1 %v6677_v52 }
 0x21f   : > { %v2290_v19 = vadd.f32 %v2289_v43, %v2200_v42 }
 0x221   : > { %v2234_v16 = vpop.f32.mrf.mxu0  ;;  %2607 = vmatmul.bf16.gmra.mxu3 %v6685_v60  ;;  %v7131_v4 = vadd.f32 %v2378_v26, %v2290_v19 }
 0x222   : > { %v7134_v40 = vadd.f32 %v2234_v16, %v7081_v55 }
 0x223   : > { %v2210_v54 = vpop.f32.mrf.mxu1  ;;  %2518 = vmatmul.bf16.gmra.mxu2 %v6690_v5 }
 0x224   : > { %v2381_v2 = vpop.f32.mrf.mxu3 }
 0x226   : > { %v2292_v37 = vpop.f32.mrf.mxu2 }
 0x227   : > { %v2293_v33 = vadd.f32 %v2292_v37, %v2203_v59 }
 0x229   : > { %v2237_v18 = vpop.f32.mrf.mxu0  ;;  %v7137_v50 = vadd.f32 %v2381_v2, %v2293_v33  ;;  %v5925_v2 = vld [vmem:[%s8589_s2 + $0x218] sm:$0xff] }
 0x22a   : > { %v7139_v25 = vadd.f32 %v2237_v18, %v2148_v63  ;;  %2845 = vmatpush.bf16.msra.mxu2 %v5925_v2 }
 0x22b   : > { %v2213_v42 = vpop.f32.mrf.mxu1 }
 0x22c   : > { %v2383_v43 = vpop.f32.mrf.mxu3  ;;  %2691 = vmatmul.bf16.gmra.mxu0 %v6649_v13  ;;  %v5933_v13 = vld [vmem:[%s8590_s3 + $0x18] sm:$0xff] }
 0x22d   : > { %3510 = vmatpush.bf16.msra.mxu3 %v5933_v13 }
 0x22e   : > { %v2294_v26 = vpop.f32.mrf.mxu2  ;;  %2439 = vmatmul.bf16.gmra.mxu1 %v6696_v23 }
 0x22f   : > { %v2295_v55 = vadd.f32 %v2294_v26, %v2205_v53 }
 0x231   : > { %v2239_v19 = vpop.f32.mrf.mxu0  ;;  %2612 = vmatmul.bf16.gmra.mxu3 %v6713_v38  ;;  %v7144_v16 = vadd.f32 %v2383_v43, %v2295_v55 }
 0x232   : > { %v7146_v60 = vadd.f32 %v2239_v19, %v2150_v29  ;;  %v5917_v29 = vld [vmem:[%s8589_s2 + $0x1d8] sm:$0xff] }
 0x233   : > { %v2215_v59 = vpop.f32.mrf.mxu1  ;;  %2523 = vmatmul.bf16.gmra.mxu2 %v6719_v48  ;;  %2756 = vmatpush.bf16.msra.mxu1 %v5917_v29 }
 0x234   : > { %v2386_v63 = vpop.f32.mrf.mxu3 }
 0x236   : > { %v2297_v53 = vpop.f32.mrf.mxu2 }
 0x237   : > { %v2298_v37 = vadd.f32 %v2297_v53, %v2208_v22 }
 0x239   : > { %v2316_v33 = vpop.f32.mrf.mxu0  ;;  %v7158_v18 = vadd.f32 %v2386_v63, %v2298_v37 }
 0x23a   : > { %v2317_v43 = vadd.f32 %v2316_v33, %v7106_v34 }
 0x23b   : > { %8723 = vst [vmem:[#allocation30_spill] sm:$0xff] %v7158_v18  ;;  %v2405_v26 = vpop.f32.mrf.mxu1 }
 0x23c   : > { %v2406_v55 = vadd.f32 %v2405_v26, %v2317_v43  ;;  %v2388_v19 = vpop.f32.mrf.mxu3  ;;  %2696 = vmatmul.bf16.gmra.mxu0 %v6677_v52 }
 0x23e   : > { %v2299_v38 = vpop.f32.mrf.mxu2  ;;  %2444 = vmatmul.bf16.gmra.mxu1 %v6726_v3 }
 0x23f   : > { %v2300_v2 = vadd.f32 %v2299_v38, %v2210_v54 }
 0x241   : > { %v2318_v22 = vpop.f32.mrf.mxu0  ;;  %2617 = vmatmul.bf16.gmra.mxu3 %v6735_v10  ;;  %v7164_v13 = vadd.f32 %v2388_v19, %v2300_v2 }
 0x242   : > { %v2319_v53 = vadd.f32 %v2318_v22, %v7113_v56 }
 0x243   : > { %v2407_v63 = vpop.f32.mrf.mxu1  ;;  %2528 = vmatmul.bf16.gmra.mxu2 %v6740_v27 }
 0x244   : > { %v2408_v34 = vadd.f32 %v2407_v63, %v2319_v53  ;;  %v2391_v37 = vpop.f32.mrf.mxu3 }
 0x246   : > { %v2302_v29 = vpop.f32.mrf.mxu2 }
 0x247   : > { %v2303_v33 = vadd.f32 %v2302_v29, %v2213_v42 }
 0x249   : > { %v2321_v43 = vpop.f32.mrf.mxu0  ;;  %v7168_v52 = vadd.f32 %v2391_v37, %v2303_v33 }
 0x24a   : > { %v2322_v26 = vadd.f32 %v2321_v43, %v2233_v45 }
 0x24b   : > { %v2410_v18 = vpop.f32.mrf.mxu1 }
 0x24c   : > { %v2411_v38 = vadd.f32 %v2410_v18, %v2322_v26  ;;  %v2393_v54 = vpop.f32.mrf.mxu3  ;;  %2701 = vmatmul.bf16.gmra.mxu0 %v6696_v23  ;;  %v5924_v23 = vld [vmem:[%s8589_s2 + $0x210] sm:$0xff] }
 0x24d   : > { %2846 = vmatpush.bf16.msra.mxu2 %v5924_v23 }
 0x24e   : > { %v2304_v19 = vpop.f32.mrf.mxu2  ;;  %2449 = vmatmul.bf16.gmra.mxu1 %v6754_v49 }
 0x24f   : > { %v2305_v56 = vadd.f32 %v2304_v19, %v2215_v59  ;;  %v5932_v59 = vld [vmem:[%s8590_s3 + $0x10] sm:$0xff] }
 0x250   : > { %3511 = vmatpush.bf16.msra.mxu3 %v5932_v59 }
 0x251   : > { %v2323_v2 = vpop.f32.mrf.mxu0  ;;  %2622 = vmatmul.bf16.gmra.mxu3 %v6764_v62  ;;  %v7173_v22 = vadd.f32 %v2393_v54, %v2305_v56 }
 0x252   : > { %v2324_v42 = vadd.f32 %v2323_v2, %v7134_v40  ;;  %v5916_v40 = vld [vmem:[%s8589_s2 + $0x1d0] sm:$0xff] }
 0x253   : > { %v2412_v53 = vpop.f32.mrf.mxu1  ;;  %2533 = vmatmul.bf16.gmra.mxu2 %v6770_v8  ;;  %2757 = vmatpush.bf16.msra.mxu1 %v5916_v40 }
 0x254   : > { %v2413_v45 = vadd.f32 %v2412_v53, %v2324_v42  ;;  %v2583_v63 = vpop.f32.mrf.mxu3 }
 0x256   : > { %v2494_v18 = vpop.f32.mrf.mxu2 }
 0x257   : > { %v2495_v37 = vadd.f32 %v2494_v18, %v2406_v55 }
 0x259   : > { %v2326_v29 = vpop.f32.mrf.mxu0  ;;  %v2584_v33 = vadd.f32 %v2583_v63, %v2495_v37 }
 0x25a   : > { %v2327_v43 = vadd.f32 %v2326_v29, %v7139_v25 }
 0x25b   : > { %v2415_v26 = vpop.f32.mrf.mxu1 }
 0x25c   : > { %v2416_v54 = vadd.f32 %v2415_v26, %v2327_v43  ;;  %v2585_v19 = vpop.f32.mrf.mxu3  ;;  %2706 = vmatmul.bf16.gmra.mxu0 %v6726_v3 }
 0x25e   : > { %2454 = vmatmul.bf16.gmra.mxu1 %v6779_v30  ;;  %v2496_v56 = vpop.f32.mrf.mxu2 }
 0x25f   : > { %v2497_v2 = vadd.f32 %v2496_v56, %v2408_v34 }
 0x261   : > { %v2328_v42 = vpop.f32.mrf.mxu0  ;;  %2627 = vmatmul.bf16.gmra.mxu3 %v6795_v41  ;;  %v2586_v55 = vadd.f32 %v2585_v19, %v2497_v2 }
 0x262   : > { %v2329_v53 = vadd.f32 %v2328_v42, %v7146_v60 }
 0x263   : > { %v2417_v23 = vpop.f32.mrf.mxu1  ;;  %2538 = vmatmul.bf16.gmra.mxu2 %v6801_v51 }
 0x264   : > { %v2418_v63 = vadd.f32 %v2417_v23, %v2329_v53  ;;  %v2588_v25 = vpop.f32.mrf.mxu3 }
 0x266   : > { %v2499_v59 = vpop.f32.mrf.mxu2 }
 0x267   : > { %v2500_v18 = vadd.f32 %v2499_v59, %v2411_v38 }
 0x269   : > { %v2672_v37 = vpop.f32.mrf.mxu0  ;;  %v2589_v40 = vadd.f32 %v2588_v25, %v2500_v18 }
 0x26a   : > { %v7192_v3 = vadd.f32 %v2672_v37, %v2584_v33 }
 0x26b   : > { %v2420_v29 = vpop.f32.mrf.mxu1 }
 0x26c   : > { %v2421_v34 = vadd.f32 %v2420_v29, %v6842_v14  ;;  %v2590_v43 = vpop.f32.mrf.mxu3  ;;  %2711 = vmatmul.bf16.gmra.mxu0 %v6754_v49  ;;  %v5923_v49 = vld [vmem:[%s8589_s2 + $0x208] sm:$0xff] }
 0x26d   : > { %v5931_v14 = vld [vmem:[%s8590_s3 + $0x8] sm:$0xff]  ;;  %2847 = vmatpush.bf16.msra.mxu2 %v5923_v49  ;;  %v8726_v49 = vld [vmem:[#allocation13_spill] sm:$0xff] }
 0x26e   : > { %2459 = vmatmul.bf16.gmra.mxu1 %v6815_v12  ;;  %v2501_v60 = vpop.f32.mrf.mxu2  ;;  %3512 = vmatpush.bf16.msra.mxu3 %v5931_v14  ;;  %v8724_v29 = vld [vmem:[#allocation11_spill] sm:$0xff] }
 0x26f   : > { %v2502_v26 = vadd.f32 %v2501_v60, %v2413_v45 }
 0x271   : > { %2632 = vmatmul.bf16.gmra.mxu3 %v6824_v21  ;;  %v2674_v19 = vpop.f32.mrf.mxu0  ;;  %v2591_v56 = vadd.f32 %v2590_v43, %v2502_v26 }
 0x272   : > { %v7198_v2 = vadd.f32 %v2674_v19, %v2586_v55  ;;  %v5915_v55 = vld [vmem:[%s8589_s2 + $0x1c8] sm:$0xff] }
 0x273   : > { %v2422_v38 = vpop.f32.mrf.mxu1  ;;  %2543 = vmatmul.bf16.gmra.mxu2 %v6830_v39  ;;  %2758 = vmatpush.bf16.msra.mxu1 %v5915_v55 }
 0x274   : > { %v2423_v33 = vadd.f32 %v2422_v38, %v6866_v6  ;;  %v2593_v42 = vpop.f32.mrf.mxu3 }
 0x276   : > { %v2504_v45 = vpop.f32.mrf.mxu2 }
 0x277   : > { %v2505_v53 = vadd.f32 %v2504_v45, %v2416_v54  ;;  %v8725_v54 = vld [vmem:[#allocation12_spill] sm:$0xff] }
 0x279   : > { %v2677_v23 = vpop.f32.mrf.mxu0  ;;  %v2594_v25 = vadd.f32 %v2593_v42, %v2505_v53 }
 0x27a   : > { %v7211_v6 = vadd.f32 %v2677_v23, %v2589_v40  ;;  %v8727_v40 = vld [vmem:[#allocation16_spill] sm:$0xff] }
 0x27b   : > { %v2425_v59 = vpop.f32.mrf.mxu1 }
 0x27c   : > { %v2426_v18 = vadd.f32 %v2425_v59, %v6882_v61  ;;  %v2595_v37 = vpop.f32.mrf.mxu3  ;;  %2716 = vmatmul.bf16.gmra.mxu0 %v6779_v30 }
 0x27e   : > { %2464 = vmatmul.bf16.gmra.mxu1 %v8724_v29  ;;  %v2506_v43 = vpop.f32.mrf.mxu2 }
 0x27f   : > { %v2507_v60 = vadd.f32 %v2506_v43, %v2418_v63 }
 0x281   : > { %2637 = vmatmul.bf16.gmra.mxu3 %v8725_v54  ;;  %v2679_v26 = vpop.f32.mrf.mxu0  ;;  %v2596_v19 = vadd.f32 %v2595_v37, %v2507_v60 }
 0x282   : > { %v7217_v38 = vadd.f32 %v2679_v26, %v2591_v56  ;;  %v8728_v56 = vld [vmem:[#allocation14_spill] sm:$0xff]  ;;  %v8729_v26 = vld [vmem:[#allocation15_spill] sm:$0xff] }
 0x283   : > { %v2427_v42 = vpop.f32.mrf.mxu1  ;;  %2548 = vmatmul.bf16.gmra.mxu2 %v8726_v49 }
 0x284   : > { %v2428_v14 = vadd.f32 %v2427_v42, %v8727_v40  ;;  %v2598_v45 = vpop.f32.mrf.mxu3 }
 0x286   : > { %v2509_v61 = vpop.f32.mrf.mxu2 }
 0x287   : > { %v2510_v53 = vadd.f32 %v2509_v61, %v2421_v34 }
 0x289   : > { %v2682_v55 = vpop.f32.mrf.mxu0  ;;  %v2599_v30 = vadd.f32 %v2598_v45, %v2510_v53  ;;  %v8731_v45 = vld [vmem:[#allocation17_spill] sm:$0xff] }
 0x28a   : > { %v7221_v23 = vadd.f32 %v2682_v55, %v2594_v25  ;;  %v8732_v25 = vld [vmem:[#allocation19_spill] sm:$0xff] }
 0x28b   : > { %v2430_v59 = vpop.f32.mrf.mxu1 }
 0x28c   : > { %v2431_v63 = vadd.f32 %v2430_v59, %v6921_v57  ;;  %v2600_v43 = vpop.f32.mrf.mxu3  ;;  %2721 = vmatmul.bf16.gmra.mxu0 %v6815_v12  ;;  %v5922_v57 = vld [vmem:[%s8589_s2 + $0x200] sm:$0xff] }
 0x28d   : > { %v5930_v12 = vld [vmem:[%s8590_s3] sm:$0xff]  ;;  %2848 = vmatpush.bf16.msra.mxu2 %v5922_v57 }
 0x28e   : > { %2469 = vmatmul.bf16.gmra.mxu1 %v8728_v56  ;;  %v2511_v37 = vpop.f32.mrf.mxu2  ;;  %3513 = vmatpush.bf16.msra.mxu3 %v5930_v12 }
 0x28f   : > { %v2512_v60 = vadd.f32 %v2511_v37, %v2423_v33 }
 0x291   : > { %2642 = vmatmul.bf16.gmra.mxu3 %v8729_v26  ;;  %v2684_v42 = vpop.f32.mrf.mxu0  ;;  %v2601_v40 = vadd.f32 %v2600_v43, %v2512_v60 }
 0x292   : > { %v7227_v54 = vadd.f32 %v2684_v42, %v2596_v19  ;;  %v5914_v19 = vld [vmem:[%s8589_s2 + $0x1c0] sm:$0xff] }
 0x293   : > { %v2432_v34 = vpop.f32.mrf.mxu1  ;;  %2553 = vmatmul.bf16.gmra.mxu2 %v8731_v45  ;;  %2759 = vmatpush.bf16.msra.mxu1 %v5914_v19 }
 0x294   : > { %8730 = vst [vmem:[#allocation11_spill] sm:$0xff] %v7227_v54  ;;  %v2433_v61 = vadd.f32 %v2432_v34, %v8732_v25  ;;  %v2603_v53 = vpop.f32.mrf.mxu3 }
 0x296   : > { %v2514_v33 = vpop.f32.mrf.mxu2 }
 0x297   : > { %v2515_v55 = vadd.f32 %v2514_v33, %v2426_v18  ;;  %v8734_v18 = vld [vmem:[#allocation18_spill] sm:$0xff] }
 0x299   : > { %v2687_v59 = vpop.f32.mrf.mxu0  ;;  %v2604_v43 = vadd.f32 %v2603_v53, %v2515_v55  ;;  %v8735_v55 = vld [vmem:[#allocation20_spill] sm:$0xff] }
 0x29a   : > { %v7240_v37 = vadd.f32 %v2687_v59, %v2599_v30 }
 0x29b   : > { %v2435_v60 = vpop.f32.mrf.mxu1 }
 0x29c   : > { %8733 = vst [vmem:[#allocation13_spill] sm:$0xff] %v7240_v37  ;;  %v2436_v42 = vadd.f32 %v2435_v60, %v6980_v11  ;;  %v2605_v34 = vpop.f32.mrf.mxu3  ;;  %2726 = vmatmul.bf16.gmra.mxu0 %v8724_v29 }
 0x29e   : > { %2474 = vmatmul.bf16.gmra.mxu1 %v6933_v46  ;;  %v2516_v25 = vpop.f32.mrf.mxu2 }
 0x29f   : > { %v2517_v57 = vadd.f32 %v2516_v25, %v2428_v14  ;;  %v5945_v14 = vld [vmem:[%s8590_s3 + $0x78] sm:$0xff] }
 0x2a0   : > { %3595 = vmatpush.bf16.msrb.mxu0 %v5945_v14  ;;  %v5953_v14 = vld [vmem:[%s8590_s3 + $0xb8] sm:$0xff] }
 0x2a1   : > { %2647 = vmatmul.bf16.gmra.mxu3 %v8734_v18  ;;  %v2689_v12 = vpop.f32.mrf.mxu0  ;;  %v2606_v33 = vadd.f32 %v2605_v34, %v2517_v57  ;;  %3684 = vmatpush.bf16.msrb.mxu1 %v5953_v14 }
 0x2a2   : > { %v7246_v26 = vadd.f32 %v2689_v12, %v2601_v40 }
 0x2a3   : > { %v2437_v53 = vpop.f32.mrf.mxu1  ;;  %2558 = vmatmul.bf16.gmra.mxu2 %v8735_v55 }
 0x2a4   : > { %v2438_v30 = vadd.f32 %v2437_v53, %v7011_v58  ;;  %v2608_v19 = vpop.f32.mrf.mxu3 }
 0x2a6   : > { %v2519_v11 = vpop.f32.mrf.mxu2 }
 0x2a7   : > { %v2520_v59 = vadd.f32 %v2519_v11, %v2431_v63  ;;  %v5944_v63 = vld [vmem:[%s8590_s3 + $0x70] sm:$0xff]  ;;  %v5961_v11 = vld [vmem:[%s8590_s3 + $0xf8] sm:$0xff] }
 0x2a8   : > { %3596 = vmatpush.bf16.msrb.mxu0 %v5944_v63  ;;  %3773 = vmatpush.bf16.msrb.mxu2 %v5961_v11 }
 0x2a9   : > { %v2692_v60 = vpop.f32.mrf.mxu0  ;;  %v2609_v29 = vadd.f32 %v2608_v19, %v2520_v59  ;;  %v5969_v59 = vld [vmem:[%s8590_s3 + $0x138] sm:$0xff] }
 0x2aa   : > { %v7250_v37 = vadd.f32 %v2692_v60, %v2604_v43  ;;  %v8736_v43 = vld [vmem:[#allocation22_spill] sm:$0xff]  ;;  %3862 = vmatpush.bf16.msrb.mxu3 %v5969_v59 }
 0x2ab   : > { %v2440_v54 = vpop.f32.mrf.mxu1 }
 0x2ac   : > { %v2441_v40 = vadd.f32 %v2440_v54, %v7036_v20  ;;  %v2610_v34 = vpop.f32.mrf.mxu3  ;;  %2731 = vmatmul.bf16.gmra.mxu0 %v8728_v56  ;;  %v8737_v54 = vld [vmem:[#allocation23_spill] sm:$0xff] }
 0x2ad   : > { %v5943_v56 = vld [vmem:[%s8590_s3 + $0x68] sm:$0xff] }
 0x2ae   : > { %2479 = vmatmul.bf16.gmra.mxu1 %v6991_v24  ;;  %v2521_v58 = vpop.f32.mrf.mxu2  ;;  %3597 = vmatpush.bf16.msrb.mxu0 %v5943_v56 }
 0x2af   : > { %v2522_v25 = vadd.f32 %v2521_v58, %v2433_v61 }
 0x2b1   : > { %2652 = vmatmul.bf16.gmra.mxu3 %v8736_v43  ;;  %v2694_v57 = vpop.f32.mrf.mxu0  ;;  %v2611_v12 = vadd.f32 %v2610_v34, %v2522_v25 }
 0x2b2   : > { %v7262_v53 = vadd.f32 %v2694_v57, %v2606_v33 }
 0x2b3   : > { %v2442_v20 = vpop.f32.mrf.mxu1  ;;  %2563 = vmatmul.bf16.gmra.mxu2 %v8737_v54 }
 0x2b4   : > { %v2443_v61 = vadd.f32 %v2442_v20, %v7049_v36  ;;  %v2613_v19 = vpop.f32.mrf.mxu3  ;;  %v5942_v36 = vld [vmem:[%s8590_s3 + $0x60] sm:$0xff] }
 0x2b5   : > { %3598 = vmatpush.bf16.msrb.mxu0 %v5942_v36  ;;  %v4435_v36 = vld [vmem:[%s7307_s23] sm:$0xff] }
 0x2b6   : > { %v2524_v33 = vpop.f32.mrf.mxu2 }
 0x2b7   : > { %v2525_v60 = vadd.f32 %v2524_v33, %v2436_v42  ;;  %v5941_v42 = vld [vmem:[%s8590_s3 + $0x58] sm:$0xff] }
 0x2b9   : > { %v2697_v34 = vpop.f32.mrf.mxu0  ;;  %v2614_v58 = vadd.f32 %v2613_v19, %v2525_v60  ;;  %3599 = vmatpush.bf16.msrb.mxu0 %v5941_v42 }
 0x2ba   : > { %v7282_v25 = vadd.f32 %v2697_v34, %v2609_v29  ;;  %v5940_v29 = vld [vmem:[%s8590_s3 + $0x50] sm:$0xff] }
 0x2bb   : > { %v2445_v63 = vpop.f32.mrf.mxu1 }
 0x2bc   : > { %v2446_v57 = vadd.f32 %v2445_v63, %v7062_v7  ;;  %v2615_v20 = vpop.f32.mrf.mxu3  ;;  %2736 = vmatmul.bf16.gmra.mxu0 %v6933_v46 }
 0x2bd   : > { %3600 = vmatpush.bf16.msrb.mxu0 %v5940_v29 }
 0x2be   : > { %v2526_v56 = vpop.f32.mrf.mxu2  ;;  %2760 = vmatmul.bf16.vlgmr.msra.gmra.mxu1 %v6928_v15  ;;  %v5939_v15 = vld [vmem:[%s8590_s3 + $0x48] sm:$0xff] }
 0x2bf   : > { %v2527_v19 = vadd.f32 %v2526_v56, %v2438_v30  ;;  %v8739_v56 = vld [vmem:[#allocation5_spill] sm:$0xff] }
 0x2c1   : > { %2657 = vmatmul.bf16.gmra.mxu3 %v7030_v32  ;;  %v2699_v11 = vpop.f32.mrf.mxu0  ;;  %v2616_v59 = vadd.f32 %v2615_v20, %v2527_v19  ;;  %3601 = vmatpush.bf16.msrb.mxu0 %v5939_v15  ;;  %v4436_v15 = vld [vmem:[%s7307_s23 + $0x8] sm:$0xff] }
 0x2c2   : > { %v7296_v7 = vadd.f32 %v2699_v11, %v2611_v12  ;;  %v6318_v12 = vmov 0   ;;  %v6257_v11 = vld [vmem:[%s6428_s27] sm:$0xff] }
 0x2c3   : > { %v2447_v46 = vpop.f32.mrf.mxu1  ;;  %2568 = vmatmul.bf16.gmra.mxu2 %v7040_v9  ;;  %v5938_v9 = vld [vmem:[%s8590_s3 + $0x40] sm:$0xff]  ;;  %6252 = vset.pattern.permute.xlu0 %v6318_v12 }
 0x2c4   : > { %v2448_v30 = vadd.f32 %v2447_v46, %v7072_v28  ;;  %v2618_v33 = vpop.f32.mrf.mxu3  ;;  %6253 = vset.pattern.permute.xlu1 %v6318_v12  ;;  %6254 = vset.pattern.permute.xlu2 %v6318_v12 }
 0x2c5   : > { %3602 = vmatpush.bf16.msrb.mxu0 %v5938_v9  ;;  %4533 = vperm.xlu0 %6252, %v4435_v36  }
 0x2c6   : > { %v2529_v60 = vpop.f32.mrf.mxu2 }
 0x2c7   : > { %v2530_v32 = vadd.f32 %v2529_v60, %v2441_v40  ;;  %v8741_v60 = vld [vmem:[#allocation27_spill] sm:$0xff] }
 0x2c9   : > { %v2702_v14 = vpop.f32.mrf.mxu0  ;;  %v2619_v28 = vadd.f32 %v2618_v33, %v2530_v32 }
 0x2ca   : > { %v7313_v34 = vadd.f32 %v2702_v14, %v2614_v58  ;;  %v5952_v14 = vld [vmem:[%s8590_s3 + $0xb0] sm:$0xff] }
 0x2cb   : > { %v2450_v63 = vpop.f32.mrf.mxu1  ;;  %3685 = vmatpush.bf16.msrb.mxu1 %v5952_v14  ;;  %v4438_v14 = vld [vmem:[%s7307_s23 + $0x18] sm:$0xff] }
 0x2cc   : > { %8738 = vst [vmem:[#allocation16_spill] sm:$0xff] %v7313_v34  ;;  %v2451_v40 = vadd.f32 %v2450_v63, %v7077_v17  ;;  %v2620_v42 = vpop.f32.mrf.mxu3  ;;  %2741 = vmatmul.bf16.gmra.mxu0 %v6991_v24  ;;  %v8742_v17 = vld [vmem:[#allocation28_spill] sm:$0xff] }
 0x2cd   : > { %4538 = vperm.xlu0 %6252, %v4436_v15   ;;  %v5960_v24 = vld [vmem:[%s8590_s3 + $0xf0] sm:$0xff] }
 0x2ce   : > { %v2531_v20 = vpop.f32.mrf.mxu2  ;;  %2765 = vmatmul.bf16.gmra.mxu1 %v8739_v56  ;;  %3774 = vmatpush.bf16.msrb.mxu2 %v5960_v24 }
 0x2cf   : > { %v2532_v19 = vadd.f32 %v2531_v20, %v2443_v61  ;;  %v5968_v61 = vld [vmem:[%s8590_s3 + $0x130] sm:$0xff] }
 0x2d0   : > { %3863 = vmatpush.bf16.msrb.mxu3 %v5968_v61  ;;  %v6258_v61 = vld [vmem:[%s6428_s27 + $0x8] sm:$0xff] }
 0x2d1   : > { %v2704_v29 = vpop.f32.mrf.mxu0  ;;  %3514 = vmatmul.bf16.vlgmr.msra.gmra.mxu3 %v6257_v11  ;;  %v2621_v46 = vadd.f32 %v2620_v42, %v2532_v19  ;;  %v4437_v42 = vld [vmem:[%s7307_s23 + $0x10] sm:$0xff]  ;;  %v8744_v19 = vld [vmem:[#allocation29_spill] sm:$0xff] }
 0x2d2   : > { %v7320_v33 = vadd.f32 %v2704_v29, %v2616_v59  ;;  %4543 = vperm.xlu1 %6253, %v4437_v42  }
 0x2d3   : > { %v2452_v58 = vpop.f32.mrf.mxu1  ;;  %2849 = vmatmul.bf16.vlgmr.msra.gmra.mxu2 %v8741_v60 }
 0x2d4   : > { %8740 = vst [vmem:[#allocation14_spill] sm:$0xff] %v7320_v33  ;;  %v2453_v32 = vadd.f32 %v2452_v58, %v8742_v17  ;;  %v2623_v9 = vpop.f32.mrf.mxu3  ;;  %v8745_v58 = vld [vmem:[#allocation26_spill] sm:$0xff] }
 0x2d6   : > { %v2534_v12 = vpop.f32.mrf.mxu2 }
 0x2d7   : > { %v2535_v59 = vadd.f32 %v2534_v12, %v2446_v57  ;;  %v1316_v57 = vshll.u32 %v6257_v11, 16 }
 0x2d9   : > { %v2707_v36 = vpop.f32.mrf.mxu0  ;;  %v2624_v63 = vadd.f32 %v2623_v9, %v2535_v59  ;;  %v1314_v9 = vshrl.u32 %v6257_v11, 16  ;;  %v1318_v12 = vrot.slane %v1316_v57, 1 }
 0x2da   : > { %v7334_v20 = vadd.f32 %v2707_v36, %v2619_v28  ;;  %v1321_v28 = vshll.u32 %v6258_v61, 16  ;;  %4548 = vperm.xlu1 %6253, %v4438_v14  }
 0x2db   : > { %v2455_v56 = vpop.f32.mrf.mxu1  ;;  %v1319_v33 = vor.u32 %v1318_v12, %v1314_v9  ;;  %v6259_v12 = vld [vmem:[%s6428_s27 + $0x10] sm:$0xff] }
 0x2dc   : > { %8743 = vst [vmem:[#allocation17_spill] sm:$0xff] %v7334_v20  ;;  %v2456_v29 = vadd.f32 %v2455_v56, %v8744_v19  ;;  %v2625_v15 = vpop.f32.mrf.mxu3  ;;  %2746 = vmatmul.bf16.gmra.mxu0 %v8745_v58  ;;  %v8746_v56 = vld [vmem:[#allocation4_spill] sm:$0xff] }
 0x2de   : > { %v2536_v60 = vpop.f32.mrf.mxu2  ;;  %2770 = vmatmul.bf16.gmra.mxu1 %v6643_v1  ;;  %v1323_v1 = vrot.slane %v1321_v28, 1  ;;  %v1325_v28 = vshrl.u32 %v6258_v61, 16 }
 0x2df   : > { %v2537_v17 = vadd.f32 %v2536_v60, %v2448_v30 }
 0x2e0   : > { %v1324_v11 = vsel %vm1057_vm4, %v1319_v33, %v1323_v1 }
 0x2e1   : > { %v2709_v24 = vpop.f32.mrf.mxu0  ;;  %3519 = vmatmul.bf16.gmra.mxu3 %v6258_v61  ;;  %v2626_v59 = vadd.f32 %v2625_v15, %v2537_v17 }
 0x2e2   : > { %v7341_v36 = vadd.f32 %v2709_v24, %v2621_v46 }
 0x2e3   : > { %v2457_v42 = vpop.f32.mrf.mxu1  ;;  %2854 = vmatmul.bf16.gmra.mxu2 %v8746_v56 }
 0x2e4   : > { %v2458_v19 = vadd.f32 %v2457_v42, %v7101_v0  ;;  %v2628_v20 = vpop.f32.mrf.mxu3 }
 0x2e6   : > { %v2539_v30 = vpop.f32.mrf.mxu2 }
 0x2e7   : > { %v2540_v60 = vadd.f32 %v2539_v30, %v2451_v40  ;;  %v1329_v40 = vshll.u32 %v6259_v12, 16 }
 0x2e9   : > { %v2712_v34 = vpop.f32.mrf.mxu0  ;;  %v2629_v57 = vadd.f32 %v2628_v20, %v2540_v60  ;;  %v1327_v20 = vor.u32 %v1325_v28, %v1323_v1  ;;  %v1331_v61 = vrot.slane %v1329_v40, 1  ;;  %v5951_v60 = vld [vmem:[%s8590_s3 + $0xa8] sm:$0xff] }
 0x2ea   : > { %v7346_v15 = vadd.f32 %v2712_v34, %v2624_v63  ;;  %v8747_v34 = vld [vmem:[#allocation6_spill] sm:$0xff]  ;;  %3686 = vmatpush.bf16.msrb.mxu1 %v5951_v60 }
 0x2eb   : > { %v2460_v46 = vpop.f32.mrf.mxu1 }
 0x2ec   : > { %v2461_v17 = vadd.f32 %v2460_v46, %v7104_v47  ;;  %v2630_v24 = vpop.f32.mrf.mxu3  ;;  %3603 = vmatmul.bf16.vlgmr.msrb.gmra.mxu0 %v1324_v11  ;;  %v7365_v11 = vsel %vm1057_vm4, %v1327_v20, %v1331_v61 }
 0x2ee   : > { %v2541_v14 = vpop.f32.mrf.mxu2  ;;  %2775 = vmatmul.bf16.gmra.mxu1 %v6665_v35  ;;  %v5959_v35 = vld [vmem:[%s8590_s3 + $0xe8] sm:$0xff] }
 0x2ef   : > { %v2542_v0 = vadd.f32 %v2541_v14, %v2453_v32  ;;  %v5967_v32 = vld [vmem:[%s8590_s3 + $0x128] sm:$0xff]  ;;  %3775 = vmatpush.bf16.msrb.mxu2 %v5959_v35 }
 0x2f0   : > { %3864 = vmatpush.bf16.msrb.mxu3 %v5967_v32  ;;  %v4442_v32 = vld [vmem:[%s7307_s23 + $0x38] sm:$0xff] }
 0x2f1   : > { %v2714_v9 = vpop.f32.mrf.mxu0  ;;  %3524 = vmatmul.bf16.gmra.mxu3 %v6259_v12  ;;  %v2631_v42 = vadd.f32 %v2630_v24, %v2542_v0  ;;  %v4441_v24 = vld [vmem:[%s7307_s23 + $0x30] sm:$0xff]  ;;  %4568 = vperm.xlu1 %6253, %v4442_v32  }
 0x2f2   : > { %v7351_v56 = vadd.f32 %v2714_v9, %v2626_v59  ;;  %4563 = vperm.xlu0 %6252, %v4441_v24  }
 0x2f3   : > { %v2462_v33 = vpop.f32.mrf.mxu1  ;;  %2859 = vmatmul.bf16.gmra.mxu2 %v8747_v34  ;;  %v1333_v34 = vshrl.u32 %v6259_v12, 16 }
 0x2f4   : > { %v2463_v47 = vadd.f32 %v2462_v33, %v7111_v44  ;;  %v2633_v63 = vpop.f32.mrf.mxu3  ;;  %v6260_v33 = vld [vmem:[%s6428_s27 + $0x18] sm:$0xff] }
 0x2f6   : > { %v2544_v30 = vpop.f32.mrf.mxu2 }
 0x2f7   : > { %v2545_v59 = vadd.f32 %v2544_v30, %v2456_v29  ;;  %v8748_v30 = vld [vmem:[#allocation7_spill] sm:$0xff] }
 0x2f9   : > { %v2717_v44 = vpop.f32.mrf.mxu0  ;;  %v2634_v46 = vadd.f32 %v2633_v63, %v2545_v59  ;;  %v1337_v63 = vshll.u32 %v6260_v33, 16 }
 0x2fa   : > { %v7368_v14 = vadd.f32 %v2717_v44, %v2629_v57  ;;  %v4439_v57 = vld [vmem:[%s7307_s23 + $0x20] sm:$0xff] }
 0x2fb   : > { %v2465_v1 = vpop.f32.mrf.mxu1  ;;  %4553 = vperm.xlu2 %6254, %v4439_v57   ;;  %v1339_v60 = vrot.slane %v1337_v63, 1  ;;  %v6261_v63 = vld [vmem:[%s6428_s27 + $0x20] sm:$0xff]  ;;  %v1341_v57 = vshrl.u32 %v6260_v33, 16 }
 0x2fc   : > { %v2466_v29 = vadd.f32 %v2465_v1, %v7125_v31  ;;  %v2635_v0 = vpop.f32.mrf.mxu3  ;;  %3608 = vmatmul.bf16.gmra.mxu0 %v7365_v11  ;;  %v1345_v32 = vshll.u32 %v6261_v63, 16 }
 0x2fe   : > { %v2546_v9 = vpop.f32.mrf.mxu2  ;;  %2780 = vmatmul.bf16.gmra.mxu1 %v6690_v5 }
 0x2ff   : > { %v2547_v28 = vadd.f32 %v2546_v9, %v2458_v19  ;;  %v1335_v19 = vor.u32 %v1333_v34, %v1331_v61 }
 0x301   : > { %v2719_v40 = vpop.f32.mrf.mxu0  ;;  %3529 = vmatmul.bf16.gmra.mxu3 %v6260_v33  ;;  %v2636_v35 = vadd.f32 %v2635_v0, %v2547_v28  ;;  %v7381_v1 = vsel %vm1057_vm4, %v1335_v19, %v1339_v60  ;;  %v8749_v19 = vld [vmem:[#allocation8_spill] sm:$0xff]  ;;  %v1343_v33 = vor.u32 %v1341_v57, %v1339_v60 }
 0x302   : > { %v7376_v20 = vadd.f32 %v2719_v40, %v2631_v42  ;;  %v4440_v42 = vld [vmem:[%s7307_s23 + $0x28] sm:$0xff] }
 0x303   : > { %v2467_v31 = vpop.f32.mrf.mxu1  ;;  %2864 = vmatmul.bf16.gmra.mxu2 %v8748_v30  ;;  %4558 = vperm.xlu2 %6254, %v4440_v42   ;;  %v4444_v30 = vld [vmem:[%s7307_s23 + $0x48] sm:$0xff]  ;;  %v5950_v42 = vld [vmem:[%s8590_s3 + $0xa0] sm:$0xff] }
 0x304   : > { %v2468_v59 = vadd.f32 %v2467_v31, %v7131_v4  ;;  %v2638_v5 = vpop.f32.mrf.mxu3  ;;  %4578 = vperm.xlu0 %6252, %v4444_v30   ;;  %3687 = vmatpush.bf16.msrb.mxu1 %v5950_v42 }
 0x306   : > { %v2549_v44 = vpop.f32.mrf.mxu2 }
 0x307   : > { %v2550_v12 = vadd.f32 %v2549_v44, %v2461_v17 }
 0x309   : > { %v2722_v24 = vpop.f32.mrf.mxu0  ;;  %v2639_v0 = vadd.f32 %v2638_v5, %v2550_v12  ;;  %v1347_v12 = vrot.slane %v1345_v32, 1 }
 0x30a   : > { %v7384_v9 = vadd.f32 %v2722_v24, %v2634_v46 }
 0x30b   : > { %v2470_v28 = vpop.f32.mrf.mxu1 }
 0x30c   : > { %v2471_v40 = vadd.f32 %v2470_v28, %v7137_v50  ;;  %v2640_v4 = vpop.f32.mrf.mxu3  ;;  %3613 = vmatmul.bf16.gmra.mxu0 %v7381_v1  ;;  %v7405_v28 = vsel %vm1057_vm4, %v1343_v33, %v1347_v12 }
 0x30d   : > { %8750 = vst [vmem:[#allocation19_spill] sm:$0xff] %v7405_v28 }
 0x30e   : > { %v2551_v61 = vpop.f32.mrf.mxu2  ;;  %2785 = vmatmul.bf16.gmra.mxu1 %v6719_v48  ;;  %v5958_v48 = vld [vmem:[%s8590_s3 + $0xe0] sm:$0xff] }
 0x30f   : > { %v2552_v17 = vadd.f32 %v2551_v61, %v2463_v47  ;;  %v5966_v47 = vld [vmem:[%s8590_s3 + $0x120] sm:$0xff]  ;;  %3776 = vmatpush.bf16.msrb.mxu2 %v5958_v48  ;;  %v4445_v61 = vld [vmem:[%s7307_s23 + $0x50] sm:$0xff] }
 0x310   : > { %3865 = vmatpush.bf16.msrb.mxu3 %v5966_v47  ;;  %4583 = vperm.xlu1 %6253, %v4445_v61  }
 0x311   : > { %v2724_v34 = vpop.f32.mrf.mxu0  ;;  %3534 = vmatmul.bf16.gmra.mxu3 %v6261_v63  ;;  %v2641_v31 = vadd.f32 %v2640_v4, %v2552_v17 }
 0x312   : > { %v7391_v46 = vadd.f32 %v2724_v34, %v2636_v35  ;;  %v8751_v34 = vld [vmem:[#allocation30_spill] sm:$0xff] }
 0x313   : > { %v2472_v5 = vpop.f32.mrf.mxu1  ;;  %2869 = vmatmul.bf16.gmra.mxu2 %v8749_v19  ;;  %v6262_v19 = vld [vmem:[%s6428_s27 + $0x28] sm:$0xff] }
 0x314   : > { %v2473_v50 = vadd.f32 %v2472_v5, %v7144_v16  ;;  %v2643_v44 = vpop.f32.mrf.mxu3  ;;  %v1353_v48 = vshll.u32 %v6262_v19, 16 }
 0x316   : > { %v2554_v35 = vpop.f32.mrf.mxu2 }
 0x317   : > { %v2555_v24 = vadd.f32 %v2554_v35, %v2466_v29 }
 0x319   : > { %v2727_v16 = vpop.f32.mrf.mxu0  ;;  %v2644_v4 = vadd.f32 %v2643_v44, %v2555_v24  ;;  %v1349_v44 = vshrl.u32 %v6261_v63, 16  ;;  %v8752_v24 = vld [vmem:[#allocation9_spill] sm:$0xff] }
 0x31a   : > { %v7408_v17 = vadd.f32 %v2727_v16, %v2639_v0  ;;  %v4443_v0 = vld [vmem:[%s7307_s23 + $0x40] sm:$0xff] }
 0x31b   : > { %v2475_v60 = vpop.f32.mrf.mxu1  ;;  %4573 = vperm.xlu2 %6254, %v4443_v0   ;;  %v1351_v61 = vor.u32 %v1349_v44, %v1347_v12  ;;  %v1357_v0 = vshrl.u32 %v6262_v19, 16 }
 0x31c   : > { %v2476_v57 = vadd.f32 %v2475_v60, %v8751_v34  ;;  %v2645_v29 = vpop.f32.mrf.mxu3  ;;  %3618 = vmatmul.bf16.gmra.mxu0 %v7405_v28 }
 0x31e   : > { %v2556_v32 = vpop.f32.mrf.mxu2  ;;  %2790 = vmatmul.bf16.gmra.mxu1 %v6740_v27  ;;  %v1355_v27 = vrot.slane %v1353_v48, 1  ;;  %v6263_v48 = vld [vmem:[%s6428_s27 + $0x30] sm:$0xff] }
 0x31f   : > { %v2557_v30 = vadd.f32 %v2556_v32, %v2468_v59  ;;  %v4447_v32 = vld [vmem:[%s7307_s23 + $0x60] sm:$0xff] }
 0x320   : > { %v7420_v63 = vsel %vm1057_vm4, %v1351_v61, %v1355_v27  ;;  %4593 = vperm.xlu0 %6252, %v4447_v32  }
 0x321   : > { %v2729_v5 = vpop.f32.mrf.mxu0  ;;  %3539 = vmatmul.bf16.gmra.mxu3 %v6262_v19  ;;  %v2646_v47 = vadd.f32 %v2645_v29, %v2557_v30  ;;  %8753 = vst [vmem:[#allocation18_spill] sm:$0xff] %v7420_v63  ;;  %v1359_v19 = vor.u32 %v1357_v0, %v1355_v27  ;;  %v5949_v27 = vld [vmem:[%s8590_s3 + $0x98] sm:$0xff] }
 0x322   : > { %v7415_v33 = vadd.f32 %v2729_v5, %v2641_v31  ;;  %3688 = vmatpush.bf16.msrb.mxu1 %v5949_v27  ;;  %v4451_v27 = vld [vmem:[%s7307_s23 + $0x80] sm:$0xff] }
 0x323   : > { %v2477_v35 = vpop.f32.mrf.mxu1  ;;  %2874 = vmatmul.bf16.gmra.mxu2 %v8752_v24 }
 0x324   : > { %v2478_v42 = vadd.f32 %v2477_v35, %v7164_v13  ;;  %v2648_v16 = vpop.f32.mrf.mxu3  ;;  %v1361_v35 = vshll.u32 %v6263_v48, 16 }
 0x326   : > { %v2559_v59 = vpop.f32.mrf.mxu2 }
 0x327   : > { %v2560_v60 = vadd.f32 %v2559_v59, %v2471_v40 }
 0x329   : > { %v2732_v34 = vpop.f32.mrf.mxu0  ;;  %v2649_v29 = vadd.f32 %v2648_v16, %v2560_v60  ;;  %v4448_v16 = vld [vmem:[%s7307_s23 + $0x68] sm:$0xff]  ;;  %v1363_v60 = vrot.slane %v1361_v35, 1  ;;  %v6264_v35 = vld [vmem:[%s6428_s27 + $0x38] sm:$0xff] }
 0x32a   : > { %v7423_v31 = vadd.f32 %v2732_v34, %v2644_v4  ;;  %4598 = vperm.xlu1 %6253, %v4448_v16   ;;  %v1369_v16 = vshll.u32 %v6264_v35, 16 }
 0x32b   : > { %v2480_v30 = vpop.f32.mrf.mxu1 }
 0x32c   : > { %v2481_v5 = vadd.f32 %v2480_v30, %v7168_v52  ;;  %v2650_v13 = vpop.f32.mrf.mxu3  ;;  %3623 = vmatmul.bf16.gmra.mxu0 %v7420_v63  ;;  %v4446_v30 = vld [vmem:[%s7307_s23 + $0x58] sm:$0xff] }
 0x32d   : > { %4588 = vperm.xlu2 %6254, %v4446_v30  }
 0x32e   : > { %v2561_v12 = vpop.f32.mrf.mxu2  ;;  %2795 = vmatmul.bf16.gmra.mxu1 %v6770_v8  ;;  %v5957_v8 = vld [vmem:[%s8590_s3 + $0xd8] sm:$0xff] }
 0x32f   : > { %v2562_v40 = vadd.f32 %v2561_v12, %v2473_v50  ;;  %v5965_v50 = vld [vmem:[%s8590_s3 + $0x118] sm:$0xff]  ;;  %3777 = vmatpush.bf16.msrb.mxu2 %v5957_v8 }
 0x330   : > { %3866 = vmatpush.bf16.msrb.mxu3 %v5965_v50 }
 0x331   : > { %v2734_v44 = vpop.f32.mrf.mxu0  ;;  %3544 = vmatmul.bf16.gmra.mxu3 %v6263_v48  ;;  %v2651_v24 = vadd.f32 %v2650_v13, %v2562_v40 }
 0x332   : > { %v7430_v4 = vadd.f32 %v2734_v44, %v2646_v47  ;;  %4613 = vperm.xlu1 %6253, %v4451_v27  }
 0x333   : > { %v2482_v61 = vpop.f32.mrf.mxu1  ;;  %2879 = vmatmul.bf16.gmra.mxu2 %v6735_v10  ;;  %v7441_v10 = vsel %vm1057_vm4, %v1359_v19, %v1363_v60 }
 0x334   : > { %v2483_v52 = vadd.f32 %v2482_v61, %v7173_v22  ;;  %v2653_v59 = vpop.f32.mrf.mxu3  ;;  %8754 = vst [vmem:[#allocation20_spill] sm:$0xff] %v7441_v10 }
 0x336   : > { %v2564_v47 = vpop.f32.mrf.mxu2 }
 0x337   : > { %v2565_v34 = vadd.f32 %v2564_v47, %v2476_v57 }
 0x339   : > { %v2737_v32 = vpop.f32.mrf.mxu0  ;;  %v2654_v22 = vadd.f32 %v2653_v59, %v2565_v34  ;;  %v4450_v59 = vld [vmem:[%s7307_s23 + $0x78] sm:$0xff]  ;;  %v1371_v34 = vrot.slane %v1369_v16, 1 }
 0x33a   : > { %v7444_v13 = vadd.f32 %v2737_v32, %v2649_v29  ;;  %v1365_v29 = vshrl.u32 %v6263_v48, 16  ;;  %4608 = vperm.xlu0 %6252, %v4450_v59   ;;  %v4449_v59 = vld [vmem:[%s7307_s23 + $0x70] sm:$0xff] }
 0x33b   : > { %v2761_v12 = vpop.f32.mrf.mxu1  ;;  %4603 = vperm.xlu2 %6254, %v4449_v59  }
 0x33c   : > { %v2655_v40 = vpop.f32.mrf.mxu3  ;;  %3628 = vmatmul.bf16.gmra.mxu0 %v7441_v10  ;;  %v1367_v47 = vor.u32 %v1365_v29, %v1363_v60 }
 0x33e   : > { %v2566_v57 = vpop.f32.mrf.mxu2  ;;  %2800 = vmatmul.bf16.gmra.mxu1 %v6801_v51  ;;  %v7457_v30 = vsel %vm1057_vm4, %v1367_v47, %v1371_v34 }
 0x33f   : > { %v2567_v44 = vadd.f32 %v2566_v57, %v2478_v42  ;;  %8755 = vst [vmem:[#allocation22_spill] sm:$0xff] %v7457_v30 }
 0x341   : > { %v2739_v0 = vpop.f32.mrf.mxu0  ;;  %3549 = vmatmul.bf16.gmra.mxu3 %v6264_v35  ;;  %v2656_v61 = vadd.f32 %v2655_v40, %v2567_v44  ;;  %v6265_v44 = vld [vmem:[%s6428_s27 + $0x40] sm:$0xff] }
 0x342   : > { %v7453_v8 = vadd.f32 %v2739_v0, %v2651_v24  ;;  %v1373_v0 = vshrl.u32 %v6264_v35, 16  ;;  %v1377_v29 = vshll.u32 %v6265_v44, 16 }
 0x343   : > { %v2763_v50 = vpop.f32.mrf.mxu1  ;;  %2884 = vmatmul.bf16.gmra.mxu2 %v6764_v62 }
 0x344   : > { %v2658_v19 = vpop.f32.mrf.mxu3  ;;  %v1379_v35 = vrot.slane %v1377_v29, 1 }
 0x346   : > { %v2569_v51 = vpop.f32.mrf.mxu2 }
 0x347   : > { %v2570_v42 = vadd.f32 %v2569_v51, %v2481_v5  ;;  %v1375_v51 = vor.u32 %v1373_v0, %v1371_v34  ;;  %v5948_v34 = vld [vmem:[%s8590_s3 + $0x90] sm:$0xff]  ;;  %v2764_v0 = vadd.f32 %v2763_v50, %v7198_v2  ;;  %v1381_v2 = vshrl.u32 %v6265_v44, 16  ;;  %v4454_v50 = vld [vmem:[%s7307_s23 + $0x98] sm:$0xff] }
 0x348   : > { %3689 = vmatpush.bf16.msrb.mxu1 %v5948_v34  ;;  %4628 = vperm.xlu1 %6253, %v4454_v50  }
 0x349   : > { %v2742_v32 = vpop.f32.mrf.mxu0  ;;  %v2659_v48 = vadd.f32 %v2658_v19, %v2570_v42 }
 0x34a   : > { %v7460_v40 = vadd.f32 %v2742_v32, %v2654_v22  ;;  %v7477_v32 = vpop.permute.xlu0 %4533 }
 0x34b   : > { %v7462_v24 = vpop.f32.mrf.mxu1  ;;  %8758 = vst [vmem:[#allocation27_spill] sm:$0xff] %v7477_v32 }
 0x34c   : > { %8756 = vst [vmem:[#allocation23_spill] sm:$0xff] %v7460_v40  ;;  %v2660_v57 = vpop.f32.mrf.mxu3  ;;  %3633 = vmatmul.bf16.gmra.mxu0 %v7457_v30  ;;  %v4452_v40 = vld [vmem:[%s7307_s23 + $0x88] sm:$0xff] }
 0x34d   : > { %4618 = vperm.xlu2 %6254, %v4452_v40  }
 0x34e   : > { %v2571_v62 = vpop.f32.mrf.mxu2  ;;  %2805 = vmatmul.bf16.gmra.mxu1 %v6830_v39  ;;  %v5956_v39 = vld [vmem:[%s8590_s3 + $0xd0] sm:$0xff] }
 0x34f   : > { %v2572_v60 = vadd.f32 %v2571_v62, %v2483_v52  ;;  %v2762_v52 = vadd.f32 %v2761_v12, %v7192_v3  ;;  %3778 = vmatpush.bf16.msrb.mxu2 %v5956_v39  ;;  %v4453_v62 = vld [vmem:[%s7307_s23 + $0x90] sm:$0xff] }
 0x350   : > { %4623 = vperm.xlu0 %6252, %v4453_v62  }
 0x351   : > { %v2744_v5 = vpop.f32.mrf.mxu0  ;;  %3554 = vmatmul.bf16.gmra.mxu3 %v6265_v44  ;;  %v2661_v16 = vadd.f32 %v2660_v57, %v2572_v60  ;;  %v7480_v57 = vsel %vm1057_vm4, %v1375_v51, %v1379_v35  ;;  %v2767_v44 = vadd.f32 %v7462_v24, %v7211_v6 }
 0x352   : > { %v7468_v19 = vadd.f32 %v2744_v5, %v2656_v61  ;;  %8759 = vst [vmem:[#allocation28_spill] sm:$0xff] %v7480_v57 }
 0x353   : > { %v7470_v22 = vpop.f32.mrf.mxu1  ;;  %2889 = vmatmul.bf16.gmra.mxu2 %v6795_v41  ;;  %v5964_v41 = vld [vmem:[%s8590_s3 + $0x110] sm:$0xff] }
 0x354   : > { %8757 = vst [vmem:[#allocation5_spill] sm:$0xff] %v7468_v19  ;;  %v3515_v47 = vpop.f32.mrf.mxu3  ;;  %3867 = vmatpush.bf16.msrb.mxu3 %v5964_v41  ;;  %v7514_v41 = vpop.permute.xlu0 %4538 }
 0x355   : > { %8762 = vst [vmem:[#allocation4_spill] sm:$0xff] %v7514_v41 }
 0x356   : > { %v2850_v42 = vpop.f32.mrf.mxu2 }
 0x357   : > { %v2851_v61 = vadd.f32 %v2850_v42, %v2762_v52  ;;  %v7507_v42 = vld [vmem:[%s6428_s27 + $0x48] sm:$0xff] }
 0x359   : > { %v2747_v27 = vpop.f32.mrf.mxu0  ;;  %v4307_v3 = vpack.c.bf16 %v2851_v61, %v2851_v61 }
 0x35a   : > { %v7486_v60 = vadd.f32 %v2747_v27, %v2659_v48 }
 0x35b   : > { %v7488_v12 = vpop.f32.mrf.mxu1  ;;  %v4467_v29 = vunpack.c.l.bf16 %v4307_v3 }
 0x35c   : > { %8760 = vst [vmem:[#allocation29_spill] sm:$0xff] %v7486_v60  ;;  %v7493_v5 = vpop.f32.mrf.mxu3  ;;  %3638 = vmatmul.bf16.gmra.mxu0 %v7480_v57 }
 0x35d   : > { %v4691_v62 = vmul.f32 %v7477_v32, %v4467_v29 }
 0x35e   : > { %2810 = vmatmul.bf16.gmra.mxu1 %v8726_v49  ;;  %v2852_v48 = vpop.f32.mrf.mxu2  ;;  %v1385_v49 = vshll.u32 %v7507_v42, 16 }
 0x35f   : > { %v2853_v59 = vadd.f32 %v2852_v48, %v2764_v0  ;;  %v1383_v0 = vor.u32 %v1381_v2, %v1379_v35 }
 0x360   : > { %v1387_v48 = vrot.slane %v1385_v49, 1 }
 0x361   : > { %v4308_v39 = vpack.c.bf16 %v2853_v59, %v2853_v59  ;;  %v6013_v52 = vpack.c.bf16 %v2853_v59, %v2851_v61  ;;  %v2749_v51 = vpop.f32.mrf.mxu0  ;;  %3559 = vmatmul.bf16.gmra.mxu3 %v7507_v42 }
 0x362   : > { %v7512_v27 = vadd.f32 %v2749_v51, %v2661_v16  ;;  %v4793_v51 = vmul.f32 %v4691_v62, %v4467_v29  ;;  %v7529_v19 = vsel %vm1057_vm4, %v1383_v0, %v1387_v48  ;;  %v7545_v0 = vld [vmem:[%s6428_s27 + $0x50] sm:$0xff] }
 0x363   : > { %6014 = vst [vmem:[%s7504_s22] sm:$0xff] %v6013_v52   ;;  %v7518_v3 = vpop.f32.mrf.mxu1  ;;  %2894 = vmatmul.bf16.gmra.mxu2 %v6824_v21  ;;  %v4468_v61 = vunpack.c.l.bf16 %v4308_v39 }
 0x364   : > { %8761 = vst [vmem:[#allocation26_spill] sm:$0xff] %v7512_v27  ;;  %v7521_v34 = vpop.f32.mrf.mxu3  ;;  %v7526_v27 = vpop.permute.xlu1 %4543 }
 0x365   : > { %v4692_v16 = vmul.f32 %v7514_v41, %v4468_v61  ;;  %8763 = vst [vmem:[#allocation6_spill] sm:$0xff] %v7526_v27 }
 0x366   : > { %v2855_v59 = vpop.f32.mrf.mxu2  ;;  %8764 = vst [vmem:[#allocation7_spill] sm:$0xff] %v7529_v19 }
 0x367   : > { %v4756_v50 = vadd.f32 %v4692_v16, %v4691_v62  ;;  %v4794_v32 = vmul.f32 %v4692_v16, %v4468_v61  ;;  %v2856_v52 = vadd.f32 %v2855_v59, %v2767_v44  ;;  %v1389_v62 = vshrl.u32 %v7507_v42, 16 }
 0x369   : > { %v4825_v60 = vadd.f32 %v4794_v32, %v4793_v51  ;;  %v4309_v21 = vpack.c.bf16 %v2856_v52, %v2856_v52  ;;  %v3604_v39 = vpop.f32.mrf.mxu0  ;;  %v2769_v32 = vadd.f32 %v7470_v22, %v7217_v38  ;;  %v1393_v38 = vshll.u32 %v7545_v0, 16  ;;  %v4456_v22 = vld [vmem:[%s7307_s23 + $0xa8] sm:$0xff] }
 0x36a   : > { %v7532_v57 = vadd.f32 %v3604_v39, %v3515_v47  ;;  %4638 = vperm.xlu0 %6252, %v4456_v22  }
 0x36b   : > { %v4469_v6 = vunpack.c.l.bf16 %v4309_v21  ;;  %v7534_v24 = vpop.f32.mrf.mxu1  ;;  %v5955_v21 = vld [vmem:[%s8590_s3 + $0xc8] sm:$0xff] }
 0x36c   : > { %v7536_v35 = vpop.f32.mrf.mxu3  ;;  %3643 = vmatmul.bf16.gmra.mxu0 %v7529_v19  ;;  %v7553_v51 = vpop.permute.xlu1 %4548  ;;  %3779 = vmatpush.bf16.msrb.mxu2 %v5955_v21 }
 0x36d   : > { %v4693_v29 = vmul.f32 %v7526_v27, %v4469_v6  ;;  %8765 = vst [vmem:[#allocation8_spill] sm:$0xff] %v7553_v51 }
 0x36e   : > { %2815 = vmatmul.bf16.gmra.mxu1 %v8731_v45  ;;  %v2857_v2 = vpop.f32.mrf.mxu2 }
 0x36f   : > { %v4757_v47 = vadd.f32 %v4756_v50, %v4693_v29  ;;  %v4795_v40 = vmul.f32 %v4693_v29, %v4469_v6  ;;  %v2858_v49 = vadd.f32 %v2857_v2, %v2769_v32  ;;  %v1391_v6 = vor.u32 %v1389_v62, %v1387_v48 }
 0x370   : > { %v1395_v32 = vrot.slane %v1393_v38, 1 }
 0x371   : > { %v4826_v61 = vadd.f32 %v4825_v60, %v4795_v40  ;;  %v4310_v44 = vpack.c.bf16 %v2858_v49, %v2858_v49  ;;  %v6018_v16 = vpack.c.bf16 %v2858_v49, %v2856_v52  ;;  %3564 = vmatmul.bf16.gmra.mxu3 %v7545_v0  ;;  %v3606_v59 = vpop.f32.mrf.mxu0  ;;  %v8766_v60 = vld [vmem:[#allocation12_spill] sm:$0xff] }
 0x372   : > { %v7551_v45 = vadd.f32 %v3606_v59, %v7493_v5  ;;  %v2772_v5 = vadd.f32 %v7488_v12, %v7221_v23  ;;  %v5963_v23 = vld [vmem:[%s8590_s3 + $0x108] sm:$0xff]  ;;  %v4457_v12 = vld [vmem:[%s7307_s23 + $0xb0] sm:$0xff] }
 0x373   : > { %6172 = vst [vmem:[%s7504_s22 + $0x8] sm:$0xff] %v6018_v16   ;;  %v7556_v50 = vpop.f32.mrf.mxu1  ;;  %2899 = vmatmul.bf16.gmra.mxu2 %v8766_v60  ;;  %v4470_v42 = vunpack.c.l.bf16 %v4310_v44  ;;  %v7567_v44 = vpop.permute.xlu2 %4553  ;;  %v7570_v60 = vsel %vm1057_vm4, %v1391_v6, %v1395_v32  ;;  %4643 = vperm.xlu1 %6253, %v4457_v12   ;;  %v7593_v12 = vld [vmem:[%s6428_s27 + $0x58] sm:$0xff] }
 0x374   : > { %v7559_v52 = vpop.f32.mrf.mxu3  ;;  %8767 = vst [vmem:[#allocation30_spill] sm:$0xff] %v7567_v44  ;;  %3868 = vmatpush.bf16.msrb.mxu3 %v5963_v23 }
 0x375   : > { %v4694_v39 = vmul.f32 %v7553_v51, %v4470_v42  ;;  %8768 = vst [vmem:[#allocation9_spill] sm:$0xff] %v7570_v60 }
 0x376   : > { %v2860_v29 = vpop.f32.mrf.mxu2 }
 0x377   : > { %v4758_v2 = vadd.f32 %v4757_v47, %v4694_v39  ;;  %v4796_v40 = vmul.f32 %v4694_v39, %v4470_v42  ;;  %v2861_v49 = vadd.f32 %v2860_v29, %v2772_v5  ;;  %v8769_v42 = vld [vmem:[#allocation11_spill] sm:$0xff] }
 0x378   : > { %v2774_v21 = vadd.f32 %v7518_v3, %v8769_v42  ;;  %v1401_v42 = vshll.u32 %v7593_v12, 16 }
 0x379   : > { %v4827_v16 = vadd.f32 %v4826_v61, %v4796_v40  ;;  %v4311_v59 = vpack.c.bf16 %v2861_v49, %v2861_v49  ;;  %v3609_v22 = vpop.f32.mrf.mxu0  ;;  %v5947_v61 = vld [vmem:[%s8590_s3 + $0x88] sm:$0xff]  ;;  %v1397_v40 = vshrl.u32 %v7545_v0, 16 }
 0x37a   : > { %v7577_v48 = vadd.f32 %v3609_v22, %v7521_v34  ;;  %3690 = vmatpush.bf16.msrb.mxu1 %v5947_v61  ;;  %v4455_v61 = vld [vmem:[%s7307_s23 + $0xa0] sm:$0xff]  ;;  %v8772_v0 = vld [vmem:[#allocation15_spill] sm:$0xff] }
 0x37b   : > { %v4471_v47 = vunpack.c.l.bf16 %v4311_v59  ;;  %v7579_v62 = vpop.f32.mrf.mxu1  ;;  %4633 = vperm.xlu2 %6254, %v4455_v61  }
 0x37c   : > { %v7584_v38 = vpop.f32.mrf.mxu3  ;;  %3648 = vmatmul.bf16.gmra.mxu0 %v7570_v60 }
 0x37d   : > { %v4695_v34 = vmul.f32 %v7567_v44, %v4471_v47  ;;  %v7601_v44 = vpop.permute.xlu2 %4558 }
 0x37e   : > { %2820 = vmatmul.bf16.gmra.mxu1 %v8735_v55  ;;  %v2862_v5 = vpop.f32.mrf.mxu2  ;;  %8771 = vst [vmem:[#allocation11_spill] sm:$0xff] %v7601_v44 }
 0x37f   : > { %v4759_v39 = vadd.f32 %v4758_v2, %v4695_v34  ;;  %v4797_v6 = vmul.f32 %v4695_v34, %v4471_v47  ;;  %v2863_v29 = vadd.f32 %v2862_v5, %v2774_v21  ;;  %v8773_v47 = vld [vmem:[#allocation13_spill] sm:$0xff]  ;;  %v1399_v5 = vor.u32 %v1397_v40, %v1395_v32 }
 0x380   : > { %v2777_v21 = vadd.f32 %v7534_v24, %v8773_v47  ;;  %v8776_v40 = vld [vmem:[#allocation25_spill] sm:$0xff] }
 0x381   : > { %v4828_v59 = vadd.f32 %v4827_v16, %v4797_v6  ;;  %v4312_v22 = vpack.c.bf16 %v2863_v29, %v2863_v29  ;;  %v6023_v23 = vpack.c.bf16 %v2863_v29, %v2861_v49  ;;  %3569 = vmatmul.bf16.gmra.mxu3 %v7593_v12  ;;  %v3611_v3 = vpop.f32.mrf.mxu0 }
 0x382   : > { %v7599_v55 = vadd.f32 %v3611_v3, %v7536_v35  ;;  %v1403_v35 = vrot.slane %v1401_v42, 1 }
 0x383   : > { %6173 = vst [vmem:[%s7504_s22 + $0x10] sm:$0xff] %v6023_v23   ;;  %v7604_v2 = vpop.f32.mrf.mxu1  ;;  %2904 = vmatmul.bf16.gmra.mxu2 %v8772_v0  ;;  %v4472_v49 = vunpack.c.l.bf16 %v4312_v22  ;;  %v4459_v22 = vld [vmem:[%s7307_s23 + $0xc0] sm:$0xff] }
 0x384   : > { %8770 = vst [vmem:[#allocation12_spill] sm:$0xff] %v7599_v55  ;;  %v7607_v16 = vpop.f32.mrf.mxu3  ;;  %v7613_v41 = vsel %vm1057_vm4, %v1399_v5, %v1403_v35  ;;  %v7619_v55 = vpop.permute.xlu0 %4563  ;;  %4653 = vperm.xlu0 %6252, %v4459_v22  }
 0x385   : > { %v4696_v34 = vmul.f32 %v7601_v44, %v4472_v49  ;;  %8774 = vst [vmem:[#allocation15_spill] sm:$0xff] %v7613_v41 }
 0x386   : > { %v2865_v6 = vpop.f32.mrf.mxu2  ;;  %8775 = vst [vmem:[#allocation13_spill] sm:$0xff] %v7619_v55 }
 0x387   : > { %v4760_v29 = vadd.f32 %v4759_v39, %v4696_v34  ;;  %v4798_v3 = vmul.f32 %v4696_v34, %v4472_v49  ;;  %v2866_v61 = vadd.f32 %v2865_v6, %v2777_v21  ;;  %v8777_v39 = vld [vmem:[#allocation2_spill] sm:$0xff]  ;;  %v2779_v49 = vadd.f32 %v7556_v50, %v7246_v26  ;;  %v8778_v34 = vld [vmem:[#allocation3_spill] sm:$0xff] }
 0x388   : > { %v843_v42 = vmul.f32 %v8777_v39, %v8776_v40  ;;  %v1405_v6 = vshrl.u32 %v7593_v12, 16  ;;  %v7635_v39 = vld [vmem:[%s6428_s27 + $0x60] sm:$0xff] }
 0x389   : > { %v4829_v23 = vadd.f32 %v4828_v59, %v4798_v3  ;;  %v4313_v51 = vpack.c.bf16 %v2866_v61, %v2866_v61  ;;  %v3614_v27 = vpop.f32.mrf.mxu0  ;;  %v1409_v50 = vshll.u32 %v7635_v39, 16 }
 0x38a   : > { %v7617_v0 = vadd.f32 %v3614_v27, %v7559_v52  ;;  %v883_v5 = vadd.f32 %v8778_v34, %v843_v42 }
 0x38b   : > { %v4473_v24 = vunpack.c.l.bf16 %v4313_v51  ;;  %v7621_v32 = vpop.f32.mrf.mxu1 }
 0x38c   : > { %v7625_v59 = vpop.f32.mrf.mxu3  ;;  %3653 = vmatmul.bf16.gmra.mxu0 %v7613_v41 }
 0x38d   : > { %v4697_v27 = vmul.f32 %v7619_v55, %v4473_v24 }
 0x38e   : > { %2825 = vmatmul.bf16.gmra.mxu1 %v8737_v54  ;;  %v2867_v52 = vpop.f32.mrf.mxu2  ;;  %v4460_v54 = vld [vmem:[%s7307_s23 + $0xc8] sm:$0xff] }
 0x38f   : > { %v4761_v51 = vadd.f32 %v4760_v29, %v4697_v27  ;;  %v4799_v47 = vmul.f32 %v4697_v27, %v4473_v24  ;;  %v2868_v21 = vadd.f32 %v2867_v52, %v2779_v49  ;;  %v7643_v24 = vpop.permute.xlu1 %4568  ;;  %4658 = vperm.xlu1 %6253, %v4460_v54   ;;  %v1292_v49 = vshll.u32 %v8745_v58, 16  ;;  %v5954_v27 = vld [vmem:[%s8590_s3 + $0xc0] sm:$0xff] }
 0x390   : > { %8780 = vst [vmem:[#allocation2_spill] sm:$0xff] %v7643_v24  ;;  %3780 = vmatpush.bf16.msrb.mxu2 %v5954_v27 }
 0x391   : > { %v4830_v3 = vadd.f32 %v4829_v23, %v4799_v47  ;;  %v4314_v22 = vpack.c.bf16 %v2868_v21, %v2868_v21  ;;  %v6028_v40 = vpack.c.bf16 %v2868_v21, %v2866_v61  ;;  %3574 = vmatmul.bf16.gmra.mxu3 %v7635_v39  ;;  %v3616_v26 = vpop.f32.mrf.mxu0  ;;  %v920_v61 = vmax.f32 %v883_v5, 0.0 }
 0x392   : > { %v7641_v29 = vadd.f32 %v3616_v26, %v7584_v38  ;;  %v2782_v38 = vadd.f32 %v7579_v62, %v7250_v37  ;;  %v1407_v47 = vor.u32 %v1405_v6, %v1403_v35  ;;  %v1411_v21 = vrot.slane %v1409_v50, 1  ;;  %v5962_v37 = vld [vmem:[%s8590_s3 + $0x100] sm:$0xff]  ;;  %v4458_v35 = vld [vmem:[%s7307_s23 + $0xb8] sm:$0xff]  ;;  %v7671_v6 = vpop.permute.xlu2 %4573 }
 0x393   : > { %6174 = vst [vmem:[%s7504_s22 + $0x18] sm:$0xff] %v6028_v40   ;;  %v7646_v42 = vpop.f32.mrf.mxu1  ;;  %2909 = vmatmul.bf16.gmra.mxu2 %v8734_v18  ;;  %v4474_v12 = vunpack.c.l.bf16 %v4314_v22  ;;  %v957_v40 = vpack.c.bf16 %v920_v61, %v920_v61  ;;  %v5946_v62 = vld [vmem:[%s8590_s3 + $0x80] sm:$0xff]  ;;  %4648 = vperm.xlu2 %6254, %v4458_v35  }
 0x394   : > { %8779 = vst [vmem:[#allocation25_spill] sm:$0xff] %v7641_v29  ;;  %v7649_v23 = vpop.f32.mrf.mxu3  ;;  %v7659_v44 = vsel %vm1057_vm4, %v1407_v47, %v1411_v21  ;;  %v1294_v29 = vrot.slane %v1292_v49, 1  ;;  %3869 = vmatpush.bf16.msrb.mxu3 %v5962_v37  ;;  %3691 = vmatpush.bf16.msrb.mxu1 %v5946_v62  ;;  %v2784_v49 = vadd.f32 %v7604_v2, %v7262_v53  ;;  %v7687_v53 = vld [vmem:[%s6428_s27 + $0x68] sm:$0xff] }
 0x395   : > { %v4698_v52 = vmul.f32 %v7643_v24, %v4474_v12  ;;  %8781 = vst [vmem:[#allocation3_spill] sm:$0xff] %v7659_v44  ;;  %v1417_v35 = vshll.u32 %v7687_v53, 16 }
 0x396   : > { %v2870_v34 = vpop.f32.mrf.mxu2  ;;  %8783 = vst [vmem:[#allocation32_spill] sm:$0xff] %v7671_v6 }
 0x397   : > { %v4762_v18 = vadd.f32 %v4761_v51, %v4698_v52  ;;  %v4800_v5 = vmul.f32 %v4698_v52, %v4474_v12  ;;  %v2871_v22 = vadd.f32 %v2870_v34, %v2782_v38  ;;  %v1289_v12 = vunpack.c.l.b16 %v957_v40 }
 0x398   : > { %v1413_v40 = vshrl.u32 %v7635_v39, 16 }
 0x399   : > { %v4831_v26 = vadd.f32 %v4830_v3, %v4800_v5  ;;  %v4315_v54 = vpack.c.bf16 %v2871_v22, %v2871_v22  ;;  %v3619_v55 = vpop.f32.mrf.mxu0  ;;  %v7683_v5 = vpack.c.b16 %v1289_v12, %v1289_v12 }
 0x39a   : > { %v7669_v51 = vadd.f32 %v3619_v55, %v7607_v16  ;;  %v8784_v16 = vld [vmem:[#allocation24_spill] sm:$0xff] }
 0x39b   : > { %v4475_v3 = vunpack.c.l.bf16 %v4315_v54  ;;  %v7673_v50 = vpop.f32.mrf.mxu1  ;;  %v1295_v27 = vsel %vm1057_vm4, %v8784_v16, %v1294_v29  ;;  %v4462_v16 = vld [vmem:[%s7307_s23 + $0xd8] sm:$0xff] }
 0x39c   : > { %8782 = vst [vmem:[#allocation31_spill] sm:$0xff] %v7669_v51  ;;  %v7675_v61 = vpop.f32.mrf.mxu3  ;;  %3658 = vmatmul.bf16.gmra.mxu0 %v7659_v44  ;;  %4668 = vperm.xlu0 %6252, %v4462_v16   ;;  %v4463_v44 = vld [vmem:[%s7307_s23 + $0xe0] sm:$0xff] }
 0x39d   : > { %v4699_v55 = vmul.f32 %v7671_v6, %v4475_v3  ;;  %4673 = vperm.xlu1 %6253, %v4463_v44  }
 0x39e   : > { %2830 = vmatmul.bf16.gmra.mxu1 %v1295_v27  ;;  %v2872_v38 = vpop.f32.mrf.mxu2  ;;  %v1415_v27 = vor.u32 %v1413_v40, %v1411_v21  ;;  %v2789_v40 = vadd.f32 %v7646_v42, %v7296_v7  ;;  %v1421_v7 = vshrl.u32 %v7687_v53, 16 }
 0x39f   : > { %v4763_v52 = vadd.f32 %v4762_v18, %v4699_v55  ;;  %v4801_v47 = vmul.f32 %v4699_v55, %v4475_v3  ;;  %v2873_v34 = vadd.f32 %v2872_v38, %v2784_v49  ;;  %v7695_v3 = vpop.permute.xlu0 %4578  ;;  %v1296_v49 = vshrl.u32 %v8745_v58, 16 }
 0x3a0   : > { %8786 = vst [vmem:[#allocation33_spill] sm:$0xff] %v7695_v3  ;;  %v1419_v38 = vrot.slane %v1417_v35, 1 }
 0x3a1   : > { %v4832_v54 = vadd.f32 %v4831_v26, %v4801_v47  ;;  %v4316_v37 = vpack.c.bf16 %v2873_v34, %v2873_v34  ;;  %v6033_v62 = vpack.c.bf16 %v2873_v34, %v2871_v22  ;;  %3579 = vmatmul.bf16.gmra.mxu3 %v7687_v53  ;;  %v3621_v2 = vpop.f32.mrf.mxu0  ;;  %v1300_v22 = vshll.u32 %v7683_v5, 16 }
 0x3a2   : > { %v7693_v18 = vadd.f32 %v3621_v2, %v7625_v59  ;;  %v2787_v59 = vadd.f32 %v7621_v32, %v7282_v25  ;;  %v7709_v24 = vsel %vm1057_vm4, %v1415_v27, %v1419_v38  ;;  %v7715_v25 = vpop.permute.xlu1 %4583 }
 0x3a3   : > { %6175 = vst [vmem:[%s7504_s22 + $0x20] sm:$0xff] %v6033_v62   ;;  %v7698_v12 = vpop.f32.mrf.mxu1  ;;  %2914 = vmatmul.bf16.gmra.mxu2 %v8736_v43  ;;  %v4476_v39 = vunpack.c.l.bf16 %v4316_v37  ;;  %v1298_v43 = vor.u32 %v1296_v49, %v1294_v29  ;;  %v5977_v29 = vld [vmem:[%s8590_s3 + $0x178] sm:$0xff]  ;;  %v5976_v49 = vld [vmem:[%s8590_s3 + $0x170] sm:$0xff] }
 0x3a4   : > { %8785 = vst [vmem:[#allocation24_spill] sm:$0xff] %v7693_v18  ;;  %v7702_v26 = vpop.f32.mrf.mxu3  ;;  %v1302_v18 = vrot.slane %v1300_v22, 1  ;;  %3951 = vmatpush.bf16.msra.mxu0 %v5977_v29  ;;  %v5993_v29 = vld [vmem:[%s8590_s3 + $0x1f8] sm:$0xff] }
 0x3a5   : > { %v4700_v55 = vmul.f32 %v7695_v3, %v4476_v39  ;;  %8787 = vst [vmem:[#allocation34_spill] sm:$0xff] %v7709_v24  ;;  %4129 = vmatpush.bf16.msra.mxu2 %v5993_v29 }
 0x3a6   : > { %v2875_v47 = vpop.f32.mrf.mxu2  ;;  %8788 = vst [vmem:[#allocation35_spill] sm:$0xff] %v7715_v25 }
 0x3a7   : > { %v4764_v34 = vadd.f32 %v4763_v52, %v4700_v55  ;;  %v4802_v62 = vmul.f32 %v4700_v55, %v4476_v39  ;;  %v2876_v2 = vadd.f32 %v2875_v47, %v2787_v59 }
 0x3a8   : > { %3952 = vmatpush.bf16.msra.mxu0 %v5976_v49  ;;  %v6272_v49 = vld [vmem:[%s6428_s27] sm:$0xff] }
 0x3a9   : > { %v4833_v37 = vadd.f32 %v4832_v54, %v4802_v62  ;;  %v4317_v16 = vpack.c.bf16 %v2876_v2, %v2876_v2  ;;  %v3624_v6 = vpop.f32.mrf.mxu0  ;;  %v8646_v54 = vrot.slane %v8745_v58, 1 }
 0x3aa   : > { %v7713_v51 = vadd.f32 %v3624_v6, %v7649_v23  ;;  %v1303_v6 = vsel %vm1057_vm4, %v1298_v43, %v1302_v18  ;;  %v7735_v18 = vld [vmem:[%s6428_s27 + $0x70] sm:$0xff]  ;;  %v8789_v43 = vld [vmem:[#allocation21_spill] sm:$0xff] }
 0x3ab   : > { %v4477_v32 = vunpack.c.l.bf16 %v4317_v16  ;;  %v7717_v21 = vpop.f32.mrf.mxu1  ;;  %v1425_v47 = vshll.u32 %v7735_v18, 16  ;;  %v1307_v53 = vsel %vm1206_vm3, %v8789_v43, %v8646_v54  ;;  %v7767_v43 = vld [vmem:[%s6428_s27 + $0x8] sm:$0xff]  ;;  %v1429_v54 = vshrl.u32 %v7735_v18, 16 }
 0x3ac   : > { %v7722_v52 = vpop.f32.mrf.mxu3  ;;  %3663 = vmatmul.bf16.gmra.mxu0 %v7709_v24 }
 0x3ad   : > { %v4701_v23 = vmul.f32 %v7715_v25, %v4477_v32 }
 0x3ae   : > { %2835 = vmatmul.bf16.gmra.mxu1 %v1303_v6  ;;  %v2877_v44 = vpop.f32.mrf.mxu2 }
 0x3af   : > { %v4765_v35 = vadd.f32 %v4764_v34, %v4701_v23  ;;  %v4803_v39 = vmul.f32 %v4701_v23, %v4477_v32  ;;  %v2878_v22 = vadd.f32 %v2877_v44, %v2789_v40  ;;  %v4461_v34 = vld [vmem:[%s7307_s23 + $0xd0] sm:$0xff]  ;;  %v1423_v44 = vor.u32 %v1421_v7, %v1419_v38 }
 0x3b0   : > { %4663 = vperm.xlu2 %6254, %v4461_v34   ;;  %v8791_v40 = vld [vmem:[#allocation16_spill] sm:$0xff] }
 0x3b1   : > { %v4834_v42 = vadd.f32 %v4833_v37, %v4803_v39  ;;  %v4318_v59 = vpack.c.bf16 %v2878_v22, %v2878_v22  ;;  %v6038_v55 = vpack.c.bf16 %v2878_v22, %v2876_v2  ;;  %3584 = vmatmul.bf16.gmra.mxu3 %v7735_v18  ;;  %v3626_v27 = vpop.f32.mrf.mxu0  ;;  %v7747_v37 = vpop.permute.xlu2 %4588  ;;  %v2792_v23 = vadd.f32 %v7673_v50, %v8791_v40  ;;  %v5974_v50 = vld [vmem:[%s8590_s3 + $0x160] sm:$0xff] }
 0x3b2   : > { %v7741_v62 = vadd.f32 %v3626_v27, %v7675_v61  ;;  %8790 = vst [vmem:[#allocation21_spill] sm:$0xff] %v7747_v37  ;;  %v5975_v61 = vld [vmem:[%s8590_s3 + $0x168] sm:$0xff]  ;;  %v7763_v39 = vrot.slane %v1425_v47, 1  ;;  %v7784_v40 = vpop.permute.xlu0 %4593  ;;  %v7820_v18 = vpop.permute.xlu1 %4598 }
 0x3b3   : > { %6176 = vst [vmem:[%s7504_s22 + $0x28] sm:$0xff] %v6038_v55   ;;  %v7750_v2 = vpop.f32.mrf.mxu1  ;;  %2919 = vmatmul.bf16.gmra.mxu2 %v1307_v53  ;;  %v4478_v16 = vunpack.c.l.bf16 %v4318_v59  ;;  %3953 = vmatpush.bf16.msra.mxu0 %v5975_v61  ;;  %v1461_v59 = vrot.slane %v6272_v49, 1  ;;  %v8645_v53 = vrot.slane %v7767_v43, 1  ;;  %v8794_v49 = vld [vmem:[#allocation14_spill] sm:$0xff] }
 0x3b4   : > { %v7755_v32 = vpop.f32.mrf.mxu3  ;;  %v7775_v61 = vsel %vm1057_vm4, %v1423_v44, %v7763_v39  ;;  %8793 = vst [vmem:[#allocation36_spill] sm:$0xff] %v7784_v40  ;;  %v5985_v44 = vld [vmem:[%s8590_s3 + $0x1b8] sm:$0xff] }
 0x3b5   : > { %v4702_v6 = vmul.f32 %v7747_v37, %v4478_v16  ;;  %8792 = vst [vmem:[#allocation16_spill] sm:$0xff] %v7775_v61  ;;  %4040 = vmatpush.bf16.msra.mxu1 %v5985_v44  ;;  %v7809_v44 = vld [vmem:[%s6428_s27 + $0x78] sm:$0xff] }
 0x3b6   : > { %v2880_v22 = vpop.f32.mrf.mxu2  ;;  %8796 = vst [vmem:[#allocation14_spill] sm:$0xff] %v7820_v18 }
 0x3b7   : > { %v4766_v55 = vadd.f32 %v4765_v35, %v4702_v6  ;;  %v4804_v27 = vmul.f32 %v4702_v6, %v4478_v16  ;;  %v2881_v34 = vadd.f32 %v2880_v22, %v2792_v23  ;;  %v6001_v35 = vld [vmem:[%s8590_s3 + $0x238] sm:$0xff]  ;;  %3954 = vmatpush.bf16.msra.mxu0 %v5974_v50  ;;  %v4465_v16 = vld [vmem:[%s7307_s23 + $0xf0] sm:$0xff]  ;;  %v1463_v6 = vsel %vm1206_vm3, %v1461_v59, %v8645_v53 }
 0x3b8   : > { %4683 = vperm.xlu0 %6252, %v4465_v16   ;;  %4218 = vmatpush.bf16.msra.mxu3 %v6001_v35  ;;  %v5972_v53 = vld [vmem:[%s8590_s3 + $0x150] sm:$0xff] }
 0x3b9   : > { %v4835_v38 = vadd.f32 %v4834_v42, %v4804_v27  ;;  %v4319_v7 = vpack.c.bf16 %v2881_v34, %v2881_v34  ;;  %v3629_v47 = vpop.f32.mrf.mxu0  ;;  %v2794_v27 = vadd.f32 %v7698_v12, %v8794_v49 }
 0x3ba   : > { %v7782_v29 = vadd.f32 %v3629_v47, %v7702_v26  ;;  %v5973_v26 = vld [vmem:[%s8590_s3 + $0x158] sm:$0xff] }
 0x3bb   : > { %v4479_v23 = vunpack.c.l.bf16 %v4319_v7  ;;  %v7786_v42 = vpop.f32.mrf.mxu1  ;;  %3955 = vmatpush.bf16.msra.mxu0 %v5973_v26  ;;  %v1308_v7 = vrot.slane %v7683_v5, 1  ;;  %v1433_v5 = vshll.u32 %v7809_v44, 16  ;;  %v8795_v26 = vrot.slane %v8745_v58, 1 }
 0x3bc   : > { %v7797_v22 = vpop.f32.mrf.mxu3  ;;  %3668 = vmatmul.bf16.gmra.mxu0 %v7775_v61 }
 0x3bd   : > { %v4703_v50 = vmul.f32 %v7784_v40, %v4479_v23 }
 0x3be   : > { %v2882_v59 = vpop.f32.mrf.mxu2  ;;  %3692 = vmatmul.bf16.vlgmr.msrb.gmra.mxu1 %v1463_v6 }
 0x3bf   : > { %v4767_v47 = vadd.f32 %v4766_v55, %v4703_v50  ;;  %v4805_v35 = vmul.f32 %v4703_v50, %v4479_v23  ;;  %v2883_v16 = vadd.f32 %v2882_v59, %v2794_v27  ;;  %3956 = vmatpush.bf16.msra.mxu0 %v5972_v53  ;;  %v4466_v55 = vld [vmem:[%s7307_s23 + $0xf8] sm:$0xff]  ;;  %v1309_v27 = vsel %vm1206_vm3, %v8795_v26, %v1308_v7  ;;  %v5971_v53 = vld [vmem:[%s8590_s3 + $0x148] sm:$0xff] }
 0x3c0   : > { %4688 = vperm.xlu1 %6253, %v4466_v55   ;;  %v1431_v7 = vor.u32 %v1429_v54, %v7763_v39  ;;  %v7835_v55 = vld [vmem:[%s6428_s27 + $0x10] sm:$0xff]  ;;  %v7845_v39 = vld [vmem:[%s6428_s27 + $0x80] sm:$0xff]  }
 0x3c1   : > { %v4836_v12 = vadd.f32 %v4835_v38, %v4805_v35  ;;  %v4320_v49 = vpack.c.bf16 %v2883_v16, %v2883_v16  ;;  %v6043_v40 = vpack.c.bf16 %v2883_v16, %v2881_v34  ;;  %3589 = vmatmul.bf16.gmra.mxu3 %v7809_v44  ;;  %v3631_v6 = vpop.f32.mrf.mxu0  ;;  %v1435_v35 = vrot.slane %v1433_v5, 1  ;;  %8799 = vst [vmem:[#allocation37_spill] sm:$0xff] %v7845_v39  ;;  %v4464_v5 = vld [vmem:[%s7307_s23 + $0xe8] sm:$0xff] }
 0x3c2   : > { %v7815_v23 = vadd.f32 %v3631_v6, %v7722_v52  ;;  %v8797_v52 = vld [vmem:[#allocation17_spill] sm:$0xff]  ;;  %v1464_v26 = vrot.slane %v7835_v55, 1  ;;  %4678 = vperm.xlu2 %6254, %v4464_v5  }
 0x3c3   : > { %6177 = vst [vmem:[%s7504_s22 + $0x30] sm:$0xff] %v6043_v40   ;;  %v7823_v34 = vpop.f32.mrf.mxu1  ;;  %2924 = vmatmul.bf16.gmra.mxu2 %v1309_v27  ;;  %v4480_v38 = vunpack.c.l.bf16 %v4320_v49  ;;  %v2797_v58 = vadd.f32 %v7717_v21, %v8797_v52  ;;  %3957 = vmatpush.bf16.msra.mxu0 %v5971_v53  ;;  %v5970_v21 = vld [vmem:[%s8590_s3 + $0x140] sm:$0xff]  ;;  %v7842_v54 = vsel %vm1057_vm4, %v1431_v7, %v1435_v35  ;;  %v7852_v53 = vpop.permute.xlu2 %4603 }
 0x3c4   : > { %v7828_v50 = vpop.f32.mrf.mxu3  ;;  %8798 = vst [vmem:[#allocation17_spill] sm:$0xff] %v7842_v54 }
 0x3c5   : > { %v4704_v59 = vmul.f32 %v7820_v18, %v4480_v38  ;;  %8800 = vst [vmem:[#allocation38_spill] sm:$0xff] %v7852_v53 }
 0x3c6   : > { %v2885_v40 = vpop.f32.mrf.mxu2 }
 0x3c7   : > { %v4768_v16 = vadd.f32 %v4767_v47, %v4704_v59  ;;  %v4806_v49 = vmul.f32 %v4704_v59, %v4480_v38  ;;  %v2886_v6 = vadd.f32 %v2885_v40, %v2797_v58  ;;  %v6004_v47 = vunpack.c.l.b16 %v7845_v39  ;;  %3958 = vmatpush.bf16.msra.mxu0 %v5970_v21 }
 0x3c9   : > { %v4837_v27 = vadd.f32 %v4836_v12, %v4806_v49  ;;  %v4321_v52 = vpack.c.bf16 %v2886_v6, %v2886_v6  ;;  %v3634_v18 = vpop.f32.mrf.mxu0  ;;  %v8801_v12 = vrot.slane %v7767_v43, 1  ;;  %v2799_v49 = vadd.f32 %v7750_v2, %v7341_v36 }
 0x3ca   : > { %v7850_v38 = vadd.f32 %v3634_v18, %v7755_v32  ;;  %v7867_v18 = vpack.c.b16 %v6004_v47, %v6004_v47  ;;  %v7876_v47 = vpop.permute.xlu0 %4608 }
 0x3cb   : > { %v4481_v58 = vunpack.c.l.bf16 %v4321_v52  ;;  %v7854_v59 = vpop.f32.mrf.mxu1  ;;  %v7859_v7 = vsel %vm1206_vm3, %v8801_v12, %v1464_v26  ;;  %v1437_v12 = vshrl.u32 %v7809_v44, 16  ;;  %8802 = vst [vmem:[#allocation39_spill] sm:$0xff] %v7876_v47 }
 0x3cc   : > { %v7861_v40 = vpop.f32.mrf.mxu3  ;;  %3673 = vmatmul.bf16.gmra.mxu0 %v7842_v54  ;;  %v1441_v36 = vshll.u32 %v7867_v18, 16 }
 0x3cd   : > { %v4705_v32 = vmul.f32 %v7852_v53, %v4481_v58 }
 0x3ce   : > { %v2887_v21 = vpop.f32.mrf.mxu2  ;;  %3697 = vmatmul.bf16.gmra.mxu1 %v7859_v7 }
 0x3cf   : > { %v4769_v52 = vadd.f32 %v4768_v16, %v4705_v32  ;;  %v4807_v5 = vmul.f32 %v4705_v32, %v4481_v58  ;;  %v2888_v37 = vadd.f32 %v2887_v21, %v2799_v49 }
 0x3d1   : > { %v4838_v25 = vadd.f32 %v4837_v27, %v4807_v5  ;;  %v4322_v3 = vpack.c.bf16 %v2888_v37, %v2888_v37  ;;  %v6048_v39 = vpack.c.bf16 %v2888_v37, %v2886_v6  ;;  %v3636_v54 = vpop.f32.mrf.mxu0  ;;  %3870 = vmatmul.bf16.vlgmr.msrb.gmra.mxu3 %v7365_v11  ;;  %v5992_v37 = vld [vmem:[%s8590_s3 + $0x1f0] sm:$0xff]  ;;  %v2802_v11 = vadd.f32 %v7786_v42, %v7346_v15 }
 0x3d2   : > { %v7874_v2 = vadd.f32 %v3636_v54, %v7797_v22  ;;  %v7888_v6 = vor.u32 %v1437_v12, %v1435_v35  ;;  %v1443_v54 = vrot.slane %v1441_v36, 1  ;;  %4130 = vmatpush.bf16.msra.mxu2 %v5992_v37  ;;  %v6000_v42 = vld [vmem:[%s8590_s3 + $0x230] sm:$0xff] }
 0x3d3   : > { %6178 = vst [vmem:[%s7504_s22 + $0x38] sm:$0xff] %v6048_v39   ;;  %v7879_v16 = vpop.f32.mrf.mxu1  ;;  %3781 = vmatmul.bf16.vlgmr.msrb.gmra.mxu2 %v7767_v43  ;;  %v4482_v44 = vunpack.c.l.bf16 %v4322_v3  ;;  %v7891_v43 = vld [vmem:[%s6428_s27 + $0x18] sm:$0xff]  ;;  %4219 = vmatpush.bf16.msra.mxu3 %v6000_v42 }
 0x3d4   : > { %v3555_v27 = vpop.f32.mrf.mxu3  ;;  %v1466_v3 = vrot.slane %v7891_v43, 1  ;;  %v1444_v15 = vsel %vm1057_vm4, %v7888_v6, %v1443_v54 }
 0x3d5   : > { %v4706_v22 = vmul.f32 %v7876_v47, %v4482_v44 }
 0x3d6   : > { %v2890_v58 = vpop.f32.mrf.mxu2 }
 0x3d7   : > { %v4770_v39 = vadd.f32 %v4769_v52, %v4706_v22  ;;  %v4808_v49 = vmul.f32 %v4706_v22, %v4482_v44  ;;  %v2891_v32 = vadd.f32 %v2890_v58, %v2802_v11  ;;  %v7902_v52 = vpop.permute.xlu1 %4613  ;;  %v7907_v44 = vsel %vm1206_vm3, %v1464_v26, %v1466_v3 }
 0x3d8   : > { %8803 = vst [vmem:[#allocation40_spill] sm:$0xff] %v7902_v52 }
 0x3d9   : > { %v4839_v21 = vadd.f32 %v4838_v25, %v4808_v49  ;;  %v4323_v5 = vpack.c.bf16 %v2891_v32, %v2891_v32  ;;  %v3639_v53 = vpop.f32.mrf.mxu0  ;;  %v5984_v25 = vld [vmem:[%s8590_s3 + $0x1b0] sm:$0xff] }
 0x3da   : > { %v7900_v35 = vadd.f32 %v3639_v53, %v7828_v50  ;;  %v2804_v50 = vadd.f32 %v7823_v34, %v7351_v56  ;;  %4041 = vmatpush.bf16.msra.mxu1 %v5984_v25  ;;  %v7920_v56 = vpop.permute.xlu2 %4618 }
 0x3db   : > { %v4483_v12 = vunpack.c.l.bf16 %v4323_v5  ;;  %v7904_v36 = vpop.f32.mrf.mxu1  ;;  %8804 = vst [vmem:[#allocation41_spill] sm:$0xff] %v7920_v56 }
 0x3dc   : > { %v3557_v37 = vpop.f32.mrf.mxu3  ;;  %3678 = vmatmul.bf16.gmra.mxu0 %v1444_v15 }
 0x3dd   : > { %v4707_v53 = vmul.f32 %v7902_v52, %v4483_v12 }
 0x3de   : > { %v2892_v11 = vpop.f32.mrf.mxu2  ;;  %3702 = vmatmul.bf16.gmra.mxu1 %v7907_v44 }
 0x3df   : > { %v4771_v22 = vadd.f32 %v4770_v39, %v4707_v53  ;;  %v4809_v26 = vmul.f32 %v4707_v53, %v4483_v12  ;;  %v2893_v54 = vadd.f32 %v2892_v11, %v2804_v50 }
 0x3e1   : > { %v4840_v58 = vadd.f32 %v4839_v21, %v4809_v26  ;;  %v4324_v49 = vpack.c.bf16 %v2893_v54, %v2893_v54  ;;  %v6053_v5 = vpack.c.bf16 %v2893_v54, %v2891_v32  ;;  %v3641_v42 = vpop.f32.mrf.mxu0  ;;  %3875 = vmatmul.bf16.gmra.mxu3 %v7381_v1  ;;  %v2807_v21 = vadd.f32 %v7854_v59, %v7368_v14 }
 0x3e2   : > { %v7918_v15 = vadd.f32 %v3641_v42, %v7861_v40  ;;  %v7930_v40 = vld [vmem:[%s6428_s27 + $0x20] sm:$0xff] }
 0x3e3   : > { %6179 = vst [vmem:[%s7504_s22 + $0x40] sm:$0xff] %v6053_v5   ;;  %v7923_v34 = vpop.f32.mrf.mxu1  ;;  %3786 = vmatmul.bf16.gmra.mxu2 %v7835_v55  ;;  %v4484_v39 = vunpack.c.l.bf16 %v4324_v49  ;;  %v1468_v26 = vrot.slane %v7930_v40, 1  ;;  %v7935_v55 = vpop.permute.xlu0 %4623 }
 0x3e4   : > { %v3560_v12 = vpop.f32.mrf.mxu3  ;;  %8805 = vst [vmem:[#allocation42_spill] sm:$0xff] %v7935_v55 }
 0x3e5   : > { %v4708_v32 = vmul.f32 %v7920_v56, %v4484_v39  ;;  %v7940_v14 = vsel %vm1206_vm3, %v1466_v3, %v1468_v26 }
 0x3e6   : > { %v2895_v25 = vpop.f32.mrf.mxu2 }
 0x3e7   : > { %v4772_v50 = vadd.f32 %v4771_v22, %v4708_v32  ;;  %v4810_v53 = vmul.f32 %v4708_v32, %v4484_v39  ;;  %v2896_v11 = vadd.f32 %v2895_v25, %v2807_v21  ;;  %v2809_v22 = vadd.f32 %v7879_v16, %v7376_v20 }
 0x3e9   : > { %v4841_v54 = vadd.f32 %v4840_v58, %v4810_v53  ;;  %v4325_v5 = vpack.c.bf16 %v2896_v11, %v2896_v11  ;;  %v3644_v42 = vpop.f32.mrf.mxu0 }
 0x3ea   : > { %v7933_v52 = vadd.f32 %v3644_v42, %v3555_v27 }
 0x3eb   : > { %v4485_v49 = vunpack.c.l.bf16 %v4325_v5  ;;  %v7937_v47 = vpop.f32.mrf.mxu1 }
 0x3ec   : > { %v3562_v59 = vpop.f32.mrf.mxu3  ;;  %3959 = vmatmul.bf16.vlgmr.msra.gmra.mxu0 %v7859_v7  ;;  %v7950_v7 = vpop.permute.xlu1 %4628 }
 0x3ed   : > { %v4709_v58 = vmul.f32 %v7935_v55, %v4485_v49  ;;  %8806 = vst [vmem:[#allocation43_spill] sm:$0xff] %v7950_v7 }
 0x3ee   : > { %v2897_v39 = vpop.f32.mrf.mxu2  ;;  %3707 = vmatmul.bf16.gmra.mxu1 %v7940_v14 }
 0x3ef   : > { %v4773_v27 = vadd.f32 %v4772_v50, %v4709_v58  ;;  %v4811_v21 = vmul.f32 %v4709_v58, %v4485_v49  ;;  %v2898_v32 = vadd.f32 %v2897_v39, %v2809_v22 }
 0x3f1   : > { %v4842_v25 = vadd.f32 %v4841_v54, %v4811_v21  ;;  %v4326_v53 = vpack.c.bf16 %v2898_v32, %v2898_v32  ;;  %v6058_v5 = vpack.c.bf16 %v2898_v32, %v2896_v11  ;;  %v3646_v3 = vpop.f32.mrf.mxu0  ;;  %3880 = vmatmul.bf16.gmra.mxu3 %v7405_v28  ;;  %v5991_v54 = vld [vmem:[%s8590_s3 + $0x1e8] sm:$0xff]  ;;  %v2812_v11 = vadd.f32 %v7904_v36, %v7384_v9  ;;  %v7971_v9 = vpop.permute.xlu2 %4633 }
 0x3f2   : > { %v7948_v42 = vadd.f32 %v3646_v3, %v3557_v37  ;;  %4131 = vmatpush.bf16.msra.mxu2 %v5991_v54  ;;  %v7963_v21 = vld [vmem:[%s6428_s27 + $0x28] sm:$0xff]  ;;  %8807 = vst [vmem:[#allocation44_spill] sm:$0xff] %v7971_v9  ;;  %v7989_v28 = vpop.permute.xlu0 %4638 }
 0x3f3   : > { %6180 = vst [vmem:[%s7504_s22 + $0x48] sm:$0xff] %v6058_v5   ;;  %v7953_v20 = vpop.f32.mrf.mxu1  ;;  %3791 = vmatmul.bf16.gmra.mxu2 %v7891_v43  ;;  %v4486_v16 = vunpack.c.l.bf16 %v4326_v53  ;;  %v1470_v43 = vrot.slane %v7963_v21, 1  ;;  %v5999_v3 = vld [vmem:[%s8590_s3 + $0x228] sm:$0xff] }
 0x3f4   : > { %v3565_v50 = vpop.f32.mrf.mxu3  ;;  %4220 = vmatpush.bf16.msra.mxu3 %v5999_v3  ;;  %8809 = vst [vmem:[#allocation46_spill] sm:$0xff] %v7989_v28 }
 0x3f5   : > { %v4710_v49 = vmul.f32 %v7950_v7, %v4486_v16 }
 0x3f6   : > { %v2900_v37 = vpop.f32.mrf.mxu2 }
 0x3f7   : > { %v4774_v22 = vadd.f32 %v4773_v27, %v4710_v49  ;;  %v4812_v58 = vmul.f32 %v4710_v49, %v4486_v16  ;;  %v2901_v39 = vadd.f32 %v2900_v37, %v2812_v11  ;;  %v7976_v27 = vsel %vm1206_vm3, %v1468_v26, %v1470_v43 }
 0x3f8   : > { %8808 = vst [vmem:[#allocation45_spill] sm:$0xff] %v7976_v27 }
 0x3f9   : > { %v4843_v32 = vadd.f32 %v4842_v25, %v4812_v58  ;;  %v4327_v53 = vpack.c.bf16 %v2901_v39, %v2901_v39  ;;  %v3649_v5 = vpop.f32.mrf.mxu0  ;;  %v5983_v25 = vld [vmem:[%s8590_s3 + $0x1a8] sm:$0xff] }
 0x3fa   : > { %v7969_v55 = vadd.f32 %v3649_v5, %v3560_v12  ;;  %v2814_v12 = vadd.f32 %v7923_v34, %v7391_v46  ;;  %4042 = vmatpush.bf16.msra.mxu1 %v5983_v25 }
 0x3fb   : > { %v4487_v36 = vunpack.c.l.bf16 %v4327_v53  ;;  %v7973_v54 = vpop.f32.mrf.mxu1 }
 0x3fc   : > { %v3567_v16 = vpop.f32.mrf.mxu3  ;;  %3964 = vmatmul.bf16.gmra.mxu0 %v7907_v44 }
 0x3fd   : > { %v4711_v11 = vmul.f32 %v7971_v9, %v4487_v36 }
 0x3fe   : > { %v2902_v49 = vpop.f32.mrf.mxu2  ;;  %3712 = vmatmul.bf16.gmra.mxu1 %v7976_v27 }
 0x3ff   : > { %v4775_v26 = vadd.f32 %v4774_v22, %v4711_v11  ;;  %v4813_v37 = vmul.f32 %v4711_v11, %v4487_v36  ;;  %v2903_v58 = vadd.f32 %v2902_v49, %v2814_v12 }
 0x401   : > { %v4844_v53 = vadd.f32 %v4843_v32, %v4813_v37  ;;  %v4328_v5 = vpack.c.bf16 %v2903_v58, %v2903_v58  ;;  %v6063_v3 = vpack.c.bf16 %v2903_v58, %v2901_v39  ;;  %v3651_v7 = vpop.f32.mrf.mxu0  ;;  %3885 = vmatmul.bf16.gmra.mxu3 %v7420_v63  ;;  %v2817_v32 = vadd.f32 %v7937_v47, %v7408_v17 }
 0x402   : > { %v7987_v56 = vadd.f32 %v3651_v7, %v3562_v59  ;;  %v7999_v59 = vld [vmem:[%s6428_s27 + $0x30] sm:$0xff] }
 0x403   : > { %6181 = vst [vmem:[%s7504_s22 + $0x50] sm:$0xff] %v6063_v3   ;;  %v7992_v46 = vpop.f32.mrf.mxu1  ;;  %3796 = vmatmul.bf16.gmra.mxu2 %v7930_v40  ;;  %v4488_v34 = vunpack.c.l.bf16 %v4328_v5  ;;  %v1472_v7 = vrot.slane %v7999_v59, 1  ;;  %v8004_v5 = vpop.permute.xlu1 %4643 }
 0x404   : > { %v3570_v22 = vpop.f32.mrf.mxu3  ;;  %8810 = vst [vmem:[#allocation47_spill] sm:$0xff] %v7999_v59 }
 0x405   : > { %v4712_v39 = vmul.f32 %v7989_v28, %v4488_v34  ;;  %8811 = vst [vmem:[#allocation48_spill] sm:$0xff] %v8004_v5  ;;  %v8009_v17 = vsel %vm1206_vm3, %v1470_v43, %v1472_v7  ;;  %v8019_v28 = vpop.permute.xlu2 %4648 }
 0x406   : > { %v2905_v36 = vpop.f32.mrf.mxu2  ;;  %8812 = vst [vmem:[#allocation49_spill] sm:$0xff] %v8009_v17 }
 0x407   : > { %v4776_v25 = vadd.f32 %v4775_v26, %v4712_v39  ;;  %v4814_v12 = vmul.f32 %v4712_v39, %v4488_v34  ;;  %v2906_v11 = vadd.f32 %v2905_v36, %v2817_v32  ;;  %v2819_v26 = vadd.f32 %v7953_v20, %v7415_v33  ;;  %8813 = vst [vmem:[#allocation50_spill] sm:$0xff] %v8019_v28 }
 0x409   : > { %v4845_v49 = vadd.f32 %v4844_v53, %v4814_v12  ;;  %v4329_v37 = vpack.c.bf16 %v2906_v11, %v2906_v11  ;;  %v3654_v58 = vpop.f32.mrf.mxu0 }
 0x40a   : > { %v8002_v3 = vadd.f32 %v3654_v58, %v3565_v50 }
 0x40b   : > { %v4489_v9 = vunpack.c.l.bf16 %v4329_v37  ;;  %v8006_v63 = vpop.f32.mrf.mxu1 }
 0x40c   : > { %v3572_v47 = vpop.f32.mrf.mxu3  ;;  %3969 = vmatmul.bf16.gmra.mxu0 %v7940_v14 }
 0x40d   : > { %v4713_v53 = vmul.f32 %v8004_v5, %v4489_v9  ;;  %v5998_v5 = vld [vmem:[%s8590_s3 + $0x220] sm:$0xff] }
 0x40e   : > { %v2907_v34 = vpop.f32.mrf.mxu2  ;;  %3717 = vmatmul.bf16.gmra.mxu1 %v8009_v17  ;;  %4221 = vmatpush.bf16.msra.mxu3 %v5998_v5 }
 0x40f   : > { %v4777_v50 = vadd.f32 %v4776_v25, %v4713_v53  ;;  %v4815_v32 = vmul.f32 %v4713_v53, %v4489_v9  ;;  %v2908_v39 = vadd.f32 %v2907_v34, %v2819_v26  ;;  %v5990_v9 = vld [vmem:[%s8590_s3 + $0x1e0] sm:$0xff] }
 0x410   : > { %4132 = vmatpush.bf16.msra.mxu2 %v5990_v9 }
 0x411   : > { %v4846_v36 = vadd.f32 %v4845_v49, %v4815_v32  ;;  %v4330_v12 = vpack.c.bf16 %v2908_v39, %v2908_v39  ;;  %v6068_v37 = vpack.c.bf16 %v2908_v39, %v2906_v11  ;;  %v3656_v43 = vpop.f32.mrf.mxu0  ;;  %3890 = vmatmul.bf16.gmra.mxu3 %v7441_v10  ;;  %v2822_v11 = vadd.f32 %v7973_v54, %v7423_v31  ;;  %v8032_v32 = vld [vmem:[%s6428_s27 + $0x38] sm:$0xff]  ;;  %v8040_v31 = vpop.permute.xlu0 %4653 }
 0x412   : > { %v8017_v58 = vadd.f32 %v3656_v43, %v3567_v16  ;;  %8814 = vst [vmem:[#allocation51_spill] sm:$0xff] %v8032_v32  ;;  %v1474_v39 = vrot.slane %v8032_v32, 1 }
 0x413   : > { %6182 = vst [vmem:[%s7504_s22 + $0x58] sm:$0xff] %v6068_v37   ;;  %v8022_v33 = vpop.f32.mrf.mxu1  ;;  %3801 = vmatmul.bf16.gmra.mxu2 %v7963_v21  ;;  %v4490_v20 = vunpack.c.l.bf16 %v4330_v12 }
 0x414   : > { %v3575_v25 = vpop.f32.mrf.mxu3  ;;  %8815 = vst [vmem:[#allocation52_spill] sm:$0xff] %v8040_v31 }
 0x415   : > { %v4714_v49 = vmul.f32 %v8019_v28, %v4490_v20 }
 0x416   : > { %v2910_v16 = vpop.f32.mrf.mxu2 }
 0x417   : > { %v4778_v26 = vadd.f32 %v4777_v50, %v4714_v49  ;;  %v4816_v53 = vmul.f32 %v4714_v49, %v4490_v20  ;;  %v2911_v34 = vadd.f32 %v2910_v16, %v2822_v11  ;;  %v8045_v50 = vsel %vm1206_vm3, %v1472_v7, %v1474_v39 }
 0x419   : > { %v4847_v12 = vadd.f32 %v4846_v36, %v4816_v53  ;;  %v4331_v37 = vpack.c.bf16 %v2911_v34, %v2911_v34  ;;  %v3659_v43 = vpop.f32.mrf.mxu0  ;;  %v5982_v36 = vld [vmem:[%s8590_s3 + $0x1a0] sm:$0xff] }
 0x41a   : > { %v8038_v10 = vadd.f32 %v3659_v43, %v3570_v22  ;;  %v2824_v22 = vadd.f32 %v7992_v46, %v7430_v4  ;;  %4043 = vmatpush.bf16.msra.mxu1 %v5982_v36  ;;  %v8058_v4 = vpop.permute.xlu1 %4658 }
 0x41b   : > { %v4491_v54 = vunpack.c.l.bf16 %v4331_v37  ;;  %v8042_v9 = vpop.f32.mrf.mxu1  ;;  %8816 = vst [vmem:[#allocation53_spill] sm:$0xff] %v8058_v4 }
 0x41c   : > { %v3577_v20 = vpop.f32.mrf.mxu3  ;;  %3974 = vmatmul.bf16.gmra.mxu0 %v7976_v27 }
 0x41d   : > { %v4715_v11 = vmul.f32 %v8040_v31, %v4491_v54  ;;  %v8074_v31 = vpop.permute.xlu2 %4663 }
 0x41e   : > { %v2912_v49 = vpop.f32.mrf.mxu2  ;;  %3722 = vmatmul.bf16.gmra.mxu1 %v8045_v50  ;;  %8818 = vst [vmem:[#allocation55_spill] sm:$0xff] %v8074_v31 }
 0x41f   : > { %v4779_v7 = vadd.f32 %v4778_v26, %v4715_v11  ;;  %v4817_v16 = vmul.f32 %v4715_v11, %v4491_v54  ;;  %v2913_v5 = vadd.f32 %v2912_v49, %v2824_v22 }
 0x421   : > { %v4848_v53 = vadd.f32 %v4847_v12, %v4817_v16  ;;  %v4332_v37 = vpack.c.bf16 %v2913_v5, %v2913_v5  ;;  %v6073_v43 = vpack.c.bf16 %v2913_v5, %v2911_v34  ;;  %v3661_v28 = vpop.f32.mrf.mxu0  ;;  %3895 = vmatmul.bf16.gmra.mxu3 %v7457_v30  ;;  %v2827_v12 = vadd.f32 %v8006_v63, %v7444_v13  ;;  %v8820_v30 = vld [vmem:[#allocation28_spill] sm:$0xff] }
 0x422   : > { %v8056_v27 = vadd.f32 %v3661_v28, %v3572_v47  ;;  %v8068_v47 = vld [vmem:[%s6428_s27 + $0x40] sm:$0xff] }
 0x423   : > { %6183 = vst [vmem:[%s7504_s22 + $0x60] sm:$0xff] %v6073_v43   ;;  %v8061_v46 = vpop.f32.mrf.mxu1  ;;  %3806 = vmatmul.bf16.gmra.mxu2 %v7999_v59  ;;  %v4492_v26 = vunpack.c.l.bf16 %v4332_v37  ;;  %v1476_v49 = vrot.slane %v8068_v47, 1  ;;  %v8090_v59 = vpop.permute.xlu0 %4668 }
 0x424   : > { %v3580_v54 = vpop.f32.mrf.mxu3  ;;  %8817 = vst [vmem:[#allocation54_spill] sm:$0xff] %v8068_v47 }
 0x425   : > { %v4716_v34 = vmul.f32 %v8058_v4, %v4492_v26  ;;  %v8079_v4 = vsel %vm1206_vm3, %v1474_v39, %v1476_v49  ;;  %8822 = vst [vmem:[#allocation58_spill] sm:$0xff] %v8090_v59 }
 0x426   : > { %v2915_v36 = vpop.f32.mrf.mxu2  ;;  %8819 = vst [vmem:[#allocation56_spill] sm:$0xff] %v8079_v4 }
 0x427   : > { %v4780_v22 = vadd.f32 %v4779_v7, %v4716_v34  ;;  %v4818_v11 = vmul.f32 %v4716_v34, %v4492_v26  ;;  %v2916_v28 = vadd.f32 %v2915_v36, %v2827_v12  ;;  %v2829_v26 = vadd.f32 %v8022_v33, %v7453_v8 }
 0x429   : > { %v4849_v16 = vadd.f32 %v4848_v53, %v4818_v11  ;;  %v4333_v5 = vpack.c.bf16 %v2916_v28, %v2916_v28  ;;  %v3664_v43 = vpop.f32.mrf.mxu0 }
 0x42a   : > { %v8072_v37 = vadd.f32 %v3664_v43, %v3575_v25 }
 0x42b   : > { %v4493_v63 = vunpack.c.l.bf16 %v4333_v5  ;;  %v8076_v13 = vpop.f32.mrf.mxu1 }
 0x42c   : > { %v3582_v7 = vpop.f32.mrf.mxu3  ;;  %3979 = vmatmul.bf16.gmra.mxu0 %v8009_v17 }
 0x42d   : > { %v4717_v53 = vmul.f32 %v8074_v31, %v4493_v63 }
 0x42e   : > { %v2917_v25 = vpop.f32.mrf.mxu2  ;;  %3727 = vmatmul.bf16.gmra.mxu1 %v8079_v4 }
 0x42f   : > { %v4781_v12 = vadd.f32 %v4780_v22, %v4717_v53  ;;  %v4819_v34 = vmul.f32 %v4717_v53, %v4493_v63  ;;  %v2918_v36 = vadd.f32 %v2917_v25, %v2829_v26  ;;  %v5989_v22 = vld [vmem:[%s8590_s3 + $0x1d8] sm:$0xff]  ;;  %v6319_v26 = vmov 0.0  }
 0x430   : > { %457 = vst [vmem:[%s8095_s29] sm:$0x3] %v6319_v26  ;;  %4133 = vmatpush.bf16.msra.mxu2 %v5989_v22  ;;  %v8825_v22 = vld [vmem:[#allocation5_spill] sm:$0xff] }
 0x431   : > { %v4850_v11 = vadd.f32 %v4849_v16, %v4819_v34  ;;  %v4334_v39 = vpack.c.bf16 %v2918_v36, %v2918_v36  ;;  %v6078_v5 = vpack.c.bf16 %v2918_v36, %v2916_v28  ;;  %v3666_v43 = vpop.f32.mrf.mxu0  ;;  %3900 = vmatmul.bf16.gmra.mxu3 %v8820_v30  ;;  %v8823_v28 = vld [vmem:[#allocation23_spill] sm:$0xff]  ;;  %458 = vst [vmem:[%s8104_s30] sm:$0x3] %v6319_v26 }
 0x432   : > { %v8088_v17 = vadd.f32 %v3666_v43, %v3577_v20  ;;  %v2832_v16 = vadd.f32 %v8042_v9, %v8823_v28  ;;  %v8120_v9 = vpop.permute.xlu1 %4673 }
 0x433   : > { %6184 = vst [vmem:[%s7504_s22 + $0x68] sm:$0xff] %v6078_v5   ;;  %v8098_v8 = vpop.f32.mrf.mxu1  ;;  %3811 = vmatmul.bf16.gmra.mxu2 %v8032_v32  ;;  %v4494_v33 = vunpack.c.l.bf16 %v4334_v39  ;;  %v8115_v39 = vld [vmem:[%s6428_s27 + $0x48] sm:$0xff] }
 0x434   : > { %8821 = vst [vmem:[#allocation57_spill] sm:$0xff] %v8088_v17  ;;  %v3585_v20 = vpop.f32.mrf.mxu3  ;;  %v1478_v5 = vrot.slane %v8115_v39, 1 }
 0x435   : > { %v4718_v63 = vmul.f32 %v8090_v59, %v4494_v33  ;;  %8824 = vst [vmem:[#allocation23_spill] sm:$0xff] %v8120_v9 }
 0x436   : > { %v2920_v53 = vpop.f32.mrf.mxu2  ;;  %v8123_v17 = vsel %vm1206_vm3, %v1476_v49, %v1478_v5 }
 0x437   : > { %v4782_v25 = vadd.f32 %v4781_v12, %v4718_v63  ;;  %v4820_v34 = vmul.f32 %v4718_v63, %v4494_v33  ;;  %v2921_v36 = vadd.f32 %v2920_v53, %v2832_v16 }
 0x439   : > { %v4851_v43 = vadd.f32 %v4850_v11, %v4820_v34  ;;  %v4335_v31 = vpack.c.bf16 %v2921_v36, %v2921_v36  ;;  %v3669_v30 = vpop.f32.mrf.mxu0  ;;  %v2834_v11 = vadd.f32 %v8061_v46, %v8825_v22  ;;  %v8136_v34 = vpop.permute.xlu2 %4678 }
 0x43a   : > { %v8118_v32 = vadd.f32 %v3669_v30, %v3580_v54  ;;  %8826 = vst [vmem:[#allocation5_spill] sm:$0xff] %v8136_v34 }
 0x43b   : > { %v4495_v28 = vunpack.c.l.bf16 %v4335_v31  ;;  %v3693_v59 = vpop.f32.mrf.mxu1 }
 0x43c   : > { %v8126_v12 = vadd.f32 %v3693_v59, %v7532_v57  ;;  %v3587_v33 = vpop.f32.mrf.mxu3  ;;  %3984 = vmatmul.bf16.gmra.mxu0 %v8045_v50 }
 0x43d   : > { %v4719_v30 = vmul.f32 %v8120_v9, %v4495_v28 }
 0x43e   : > { %v2922_v54 = vpop.f32.mrf.mxu2  ;;  %3732 = vmatmul.bf16.gmra.mxu1 %v8123_v17 }
 0x43f   : > { %v4783_v31 = vadd.f32 %v4782_v25, %v4719_v30  ;;  %v4821_v16 = vmul.f32 %v4719_v30, %v4495_v28  ;;  %v2923_v63 = vadd.f32 %v2922_v54, %v2834_v11 }
 0x441   : > { %v4852_v49 = vadd.f32 %v4851_v43, %v4821_v16  ;;  %v6083_v26 = vpack.c.bf16 %v2923_v63, %v2921_v36  ;;  %v3671_v53 = vpop.f32.mrf.mxu0  ;;  %3905 = vmatmul.bf16.gmra.mxu3 %v7529_v19  ;;  %v4336_v57 = vpack.c.bf16 %v2923_v63, %v2923_v63  ;;  %v8827_v43 = vld [vmem:[#allocation29_spill] sm:$0xff]  ;;  %v8147_v63 = vld [vmem:[%s6428_s27 + $0x50] sm:$0xff] }
 0x442   : > { %v8134_v59 = vadd.f32 %v3671_v53, %v3582_v7  ;;  %v2837_v36 = vadd.f32 %v8076_v13, %v8827_v43  ;;  %8828 = vst [vmem:[#allocation29_spill] sm:$0xff] %v8147_v63  ;;  %v5997_v13 = vld [vmem:[%s8590_s3 + $0x218] sm:$0xff] }
 0x443   : > { %6185 = vst [vmem:[%s7504_s22 + $0x70] sm:$0xff] %v6083_v26   ;;  %v3695_v46 = vpop.f32.mrf.mxu1  ;;  %3816 = vmatmul.bf16.gmra.mxu2 %v8068_v47  ;;  %v4496_v22 = vunpack.c.l.bf16 %v4336_v57  ;;  %v1480_v26 = vrot.slane %v8147_v63, 1  ;;  %4222 = vmatpush.bf16.msra.mxu3 %v5997_v13  ;;  %v8174_v47 = vpop.permute.xlu1 %4688 }
 0x444   : > { %v8141_v25 = vadd.f32 %v3695_v46, %v7551_v45  ;;  %v3590_v28 = vpop.f32.mrf.mxu3  ;;  %v8152_v45 = vpop.permute.xlu0 %4683 }
 0x445   : > { %v4720_v11 = vmul.f32 %v8136_v34, %v4496_v22  ;;  %8829 = vst [vmem:[#allocation59_spill] sm:$0xff] %v8152_v45  ;;  %v8161_v43 = vsel %vm1206_vm3, %v1478_v5, %v1480_v26 }
 0x446   : > { %v2925_v30 = vpop.f32.mrf.mxu2 }
 0x447   : > { %v4784_v54 = vadd.f32 %v4783_v31, %v4720_v11  ;;  %v4822_v7 = vmul.f32 %v4720_v11, %v4496_v22  ;;  %v2926_v16 = vadd.f32 %v2925_v30, %v2837_v36  ;;  %v5981_v31 = vld [vmem:[%s8590_s3 + $0x198] sm:$0xff]  ;;  %v8830_v36 = vld [vmem:[#allocation26_spill] sm:$0xff] }
 0x448   : > { %v2839_v11 = vadd.f32 %v8098_v8, %v8830_v36  ;;  %4044 = vmatpush.bf16.msra.mxu1 %v5981_v31  ;;  %8831 = vst [vmem:[#allocation26_spill] sm:$0xff] %v8174_v47  ;;  %v8832_v36 = vld [vmem:[#allocation12_spill] sm:$0xff] }
 0x449   : > { %v4853_v53 = vadd.f32 %v4852_v49, %v4822_v7  ;;  %v4337_v9 = vpack.c.bf16 %v2926_v16, %v2926_v16  ;;  %v3674_v57 = vpop.f32.mrf.mxu0 }
 0x44a   : > { %v8150_v19 = vadd.f32 %v3674_v57, %v3585_v20 }
 0x44b   : > { %v3698_v46 = vpop.f32.mrf.mxu1  ;;  %v4497_v22 = vunpack.c.l.bf16 %v4337_v9 }
 0x44c   : > { %v8164_v49 = vadd.f32 %v3698_v46, %v7577_v48  ;;  %v3592_v20 = vpop.f32.mrf.mxu3  ;;  %3989 = vmatmul.bf16.gmra.mxu0 %v8079_v4 }
 0x44d   : > { %v4721_v30 = vmul.f32 %v8152_v45, %v4497_v22 }
 0x44e   : > { %v2927_v7 = vpop.f32.mrf.mxu2  ;;  %3737 = vmatmul.bf16.gmra.mxu1 %v8161_v43 }
 0x44f   : > { %v4785_v9 = vadd.f32 %v4784_v54, %v4721_v30  ;;  %v4823_v5 = vmul.f32 %v4721_v30, %v4497_v22  ;;  %v2928_v57 = vadd.f32 %v2927_v7, %v2839_v11 }
 0x451   : > { %v4854_v34 = vadd.f32 %v4853_v53, %v4823_v5  ;;  %v6088_v48 = vpack.c.bf16 %v2928_v57, %v2926_v16  ;;  %v3676_v46 = vpop.f32.mrf.mxu0  ;;  %3910 = vmatmul.bf16.gmra.mxu3 %v7570_v60  ;;  %v4338_v4 = vpack.c.bf16 %v2928_v57, %v2928_v57  ;;  %v5988_v16 = vld [vmem:[%s8590_s3 + $0x1d0] sm:$0xff]  ;;  %v8190_v5 = vld [vmem:[%s6428_s27 + $0x58] sm:$0xff] }
 0x452   : > { %v8172_v13 = vadd.f32 %v3676_v46, %v3587_v33  ;;  %v5996_v33 = vld [vmem:[%s8590_s3 + $0x210] sm:$0xff]  ;;  %4134 = vmatpush.bf16.msra.mxu2 %v5988_v16  ;;  %v1482_v57 = vrot.slane %v8190_v5, 1 }
 0x453   : > { %6186 = vst [vmem:[%s7504_s22 + $0x78] sm:$0xff] %v6088_v48   ;;  %v3700_v8 = vpop.f32.mrf.mxu1  ;;  %3821 = vmatmul.bf16.gmra.mxu2 %v8115_v39  ;;  %v4498_v31 = vunpack.c.l.bf16 %v4338_v4  ;;  %4223 = vmatpush.bf16.msra.mxu3 %v5996_v33  ;;  %v5980_v48 = vld [vmem:[%s8590_s3 + $0x190] sm:$0xff] }
 0x454   : > { %v8179_v54 = vadd.f32 %v3700_v8, %v8832_v36  ;;  %v3871_v22 = vpop.f32.mrf.mxu3  ;;  %4045 = vmatpush.bf16.msra.mxu1 %v5980_v48 }
 0x455   : > { %v4722_v53 = vmul.f32 %v8174_v47, %v4498_v31 }
 0x456   : > { %v3782_v11 = vpop.f32.mrf.mxu2 }
 0x457   : > { %v4786_v30 = vadd.f32 %v4785_v9, %v4722_v53  ;;  %v4824_v7 = vmul.f32 %v4722_v53, %v4498_v31  ;;  %v3783_v4 = vadd.f32 %v3782_v11, %v8126_v12  ;;  %v8199_v12 = vsel %vm1206_vm3, %v1480_v26, %v1482_v57 }
 0x459   : > { %v4787_v46 = vrot.slane %v4786_v30, 4  ;;  %v4855_v8 = vadd.f32 %v4854_v34, %v4824_v7  ;;  %v3679_v36 = vpop.f32.mrf.mxu0  ;;  %v3872_v45 = vadd.f32 %v3871_v22, %v3783_v4 }
 0x45a   : > { %v8196_v47 = vadd.f32 %v3679_v36, %v3590_v28 }
 0x45b   : > { %v4788_v16 = vadd.f32 %v4787_v46, %v4786_v30  ;;  %v4856_v9 = vrot.slane %v4855_v8, 4  ;;  %v3703_v31 = vpop.f32.mrf.mxu1 }
 0x45c   : > { %v3704_v33 = vadd.f32 %v3703_v31, %v7617_v0  ;;  %v3873_v53 = vpop.f32.mrf.mxu3  ;;  %3994 = vmatmul.bf16.gmra.mxu0 %v8123_v17  ;;  %v4755_v31 = vld [vmem:[%s8095_s29] sm:$0x3] }
 0x45d   : > { %v4789_v11 = vrot.slane %v4788_v16, 2  ;;  %v4857_v60 = vadd.f32 %v4856_v9, %v4855_v8  ;;  %v8833_v8 = vld [vmem:[#allocation25_spill] sm:$0xff] }
 0x45e   : > { %3742 = vmatmul.bf16.gmra.mxu1 %v8199_v12  ;;  %v3784_v34 = vpop.f32.mrf.mxu2 }
 0x45f   : > { %v4790_v22 = vadd.f32 %v4789_v11, %v4788_v16  ;;  %v4858_v28 = vrot.slane %v4857_v60, 2  ;;  %v3785_v30 = vadd.f32 %v3784_v34, %v8141_v25 }
 0x461   : > { %v4791_v7 = vrot.slane %v4790_v22, 1  ;;  %v4859_v4 = vadd.f32 %v4858_v28, %v4857_v60  ;;  %v3681_v48 = vpop.f32.mrf.mxu0  ;;  %3915 = vmatmul.bf16.gmra.mxu3 %v7613_v41  ;;  %v3874_v0 = vadd.f32 %v3873_v53, %v3785_v30  ;;  %v8214_v53 = vld [vmem:[%s6428_s27 + $0x60] sm:$0xff] }
 0x462   : > { %v8206_v26 = vadd.f32 %v3681_v48, %v3592_v20  ;;  %v1484_v20 = vrot.slane %v8214_v53, 1 }
 0x463   : > { %v4860_v46 = vrot.slane %v4859_v4, 1  ;;  %v3705_v36 = vpop.f32.mrf.mxu1  ;;  %3826 = vmatmul.bf16.gmra.mxu2 %v8147_v63  ;;  %v4792_v25 = vadd.f32 %v4791_v7, %v4790_v22  ;;  %v8834_v22 = vld [vmem:[#allocation31_spill] sm:$0xff] }
 0x464   : > { %v3706_v16 = vadd.f32 %v3705_v36, %v8833_v8  ;;  %v3876_v9 = vpop.f32.mrf.mxu3  ;;  %v8221_v8 = vsel %vm1206_vm3, %v1482_v57, %v1484_v20  ;;  %v8836_v57 = vld [vmem:[#allocation24_spill] sm:$0xff] }
 0x465   : > { %v4861_v11 = vadd.f32 %v4860_v46, %v4859_v4 }
 0x466   : > { %v3787_v60 = vpop.f32.mrf.mxu2 }
 0x467   : > { %v4863_v34 = vsel %vm4862_vm5, %v4792_v25, %v4861_v11  ;;  %v3788_v28 = vadd.f32 %v3787_v60, %v8164_v49 }
 0x468   : > { %v4864_v30 = vadd.f32 %v4863_v34, %v4755_v31  ;;  %v8835_v31 = vld [vmem:[#allocation3_spill] sm:$0xff] }
 0x469   : > { %v3960_v48 = vpop.f32.mrf.mxu0  ;;  %v3877_v41 = vadd.f32 %v3876_v9, %v3788_v28  ;;  %v5987_v28 = vld [vmem:[%s8590_s3 + $0x1c8] sm:$0xff] }
 0x46a   : > { %4865 = vst [vmem:[%s8095_s29] sm:$0x3] %v4864_v30  ;;  %v8218_v63 = vadd.f32 %v3960_v48, %v3872_v45  ;;  %4135 = vmatpush.bf16.msra.mxu2 %v5987_v28 }
 0x46b   : > { %v3708_v36 = vpop.f32.mrf.mxu1 }
 0x46c   : > { %v3709_v7 = vadd.f32 %v3708_v36, %v8834_v22  ;;  %v3878_v4 = vpop.f32.mrf.mxu3  ;;  %3999 = vmatmul.bf16.gmra.mxu0 %v8161_v43  ;;  %v5979_v22 = vld [vmem:[%s8590_s3 + $0x188] sm:$0xff] }
 0x46d   : > { %4046 = vmatpush.bf16.msra.mxu1 %v5979_v22 }
 0x46e   : > { %3747 = vmatmul.bf16.gmra.mxu1 %v8221_v8  ;;  %v3789_v49 = vpop.f32.mrf.mxu2 }
 0x46f   : > { %v3790_v46 = vadd.f32 %v3789_v49, %v8179_v54  ;;  %v5995_v54 = vld [vmem:[%s8590_s3 + $0x208] sm:$0xff] }
 0x470   : > { %4224 = vmatpush.bf16.msra.mxu3 %v5995_v54 }
 0x471   : > { %3920 = vmatmul.bf16.gmra.mxu3 %v8835_v31  ;;  %v3962_v9 = vpop.f32.mrf.mxu0  ;;  %v3879_v45 = vadd.f32 %v3878_v4, %v3790_v46 }
 0x472   : > { %v8228_v25 = vadd.f32 %v3962_v9, %v3874_v0  ;;  %v8239_v0 = vld [vmem:[%s6428_s27 + $0x68] sm:$0xff] }
 0x473   : > { %v3710_v11 = vpop.f32.mrf.mxu1  ;;  %3831 = vmatmul.bf16.gmra.mxu2 %v8190_v5  ;;  %v1486_v36 = vrot.slane %v8239_v0, 1 }
 0x474   : > { %v3711_v60 = vadd.f32 %v3710_v11, %v8836_v57  ;;  %v3881_v34 = vpop.f32.mrf.mxu3 }
 0x475   : > { %v8248_v11 = vsel %vm1206_vm3, %v1484_v20, %v1486_v36 }
 0x476   : > { %v3792_v30 = vpop.f32.mrf.mxu2 }
 0x477   : > { %v3793_v48 = vadd.f32 %v3792_v30, %v3704_v33 }
 0x479   : > { %v3965_v4 = vpop.f32.mrf.mxu0  ;;  %v3882_v49 = vadd.f32 %v3881_v34, %v3793_v48 }
 0x47a   : > { %v8245_v46 = vadd.f32 %v3965_v4, %v3877_v41 }
 0x47b   : > { %v3713_v9 = vpop.f32.mrf.mxu1 }
 0x47c   : > { %8837 = vst [vmem:[#allocation12_spill] sm:$0xff] %v8245_v46  ;;  %v3714_v57 = vadd.f32 %v3713_v9, %v7713_v51  ;;  %v3883_v33 = vpop.f32.mrf.mxu3  ;;  %4004 = vmatmul.bf16.gmra.mxu0 %v8199_v12  ;;  %v8259_v9 = vld [vmem:[%s6428_s27 + $0x70] sm:$0xff] }
 0x47d   : > { %v1488_v46 = vrot.slane %v8259_v9, 1 }
 0x47e   : > { %3752 = vmatmul.bf16.gmra.mxu1 %v8248_v11  ;;  %v3794_v28 = vpop.f32.mrf.mxu2 }
 0x47f   : > { %v3795_v54 = vadd.f32 %v3794_v28, %v3706_v16 }
 0x481   : > { %3925 = vmatmul.bf16.gmra.mxu3 %v7709_v24  ;;  %v3967_v34 = vpop.f32.mrf.mxu0  ;;  %v3884_v30 = vadd.f32 %v3883_v33, %v3795_v54 }
 0x482   : > { %v8254_v41 = vadd.f32 %v3967_v34, %v3879_v45  ;;  %v8265_v45 = vsel %vm1206_vm3, %v1486_v36, %v1488_v46 }
 0x483   : > { %v3715_v48 = vpop.f32.mrf.mxu1  ;;  %3836 = vmatmul.bf16.gmra.mxu2 %v8214_v53 }
 0x484   : > { %v3716_v20 = vadd.f32 %v3715_v48, %v7741_v62  ;;  %v3886_v51 = vpop.f32.mrf.mxu3 }
 0x486   : > { %v3797_v22 = vpop.f32.mrf.mxu2 }
 0x487   : > { %v3798_v4 = vadd.f32 %v3797_v22, %v3709_v7 }
 0x489   : > { %v3970_v31 = vpop.f32.mrf.mxu0  ;;  %v3887_v16 = vadd.f32 %v3886_v51, %v3798_v4 }
 0x48a   : > { %v8262_v28 = vadd.f32 %v3970_v31, %v3882_v49 }
 0x48b   : > { %v3718_v24 = vpop.f32.mrf.mxu1 }
 0x48c   : > { %v3719_v33 = vadd.f32 %v3718_v24, %v7782_v29  ;;  %v3888_v54 = vpop.f32.mrf.mxu3  ;;  %4009 = vmatmul.bf16.gmra.mxu0 %v8221_v8  ;;  %v5986_v29 = vld [vmem:[%s8590_s3 + $0x1c0] sm:$0xff] }
 0x48d   : > { %4136 = vmatpush.bf16.msra.mxu2 %v5986_v29 }
 0x48e   : > { %3757 = vmatmul.bf16.gmra.mxu1 %v8265_v45  ;;  %v3799_v62 = vpop.f32.mrf.mxu2 }
 0x48f   : > { %v3800_v7 = vadd.f32 %v3799_v62, %v3711_v60  ;;  %v5994_v60 = vld [vmem:[%s8590_s3 + $0x200] sm:$0xff] }
 0x490   : > { %4225 = vmatpush.bf16.msra.mxu3 %v5994_v60 }
 0x491   : > { %3930 = vmatmul.bf16.gmra.mxu3 %v7775_v61  ;;  %v3972_v34 = vpop.f32.mrf.mxu0  ;;  %v3889_v48 = vadd.f32 %v3888_v54, %v3800_v7  ;;  %v8840_v61 = vld [vmem:[#allocation17_spill] sm:$0xff] }
 0x492   : > { %v8271_v31 = vadd.f32 %v3972_v34, %v3884_v30  ;;  %v8282_v30 = vld [vmem:[%s6428_s27 + $0x78] sm:$0xff] }
 0x493   : > { %v3720_v49 = vpop.f32.mrf.mxu1  ;;  %3841 = vmatmul.bf16.gmra.mxu2 %v8239_v0  ;;  %v8285_v4 = vrot.slane %v8282_v30, 1 }
 0x494   : > { %v3721_v36 = vadd.f32 %v3720_v49, %v7815_v23  ;;  %v3891_v24 = vpop.f32.mrf.mxu3  ;;  %v5978_v23 = vld [vmem:[%s8590_s3 + $0x180] sm:$0xff] }
 0x495   : > { %4047 = vmatpush.bf16.msra.mxu1 %v5978_v23  ;;  %v8296_v49 = vsel %vm1206_vm3, %v1488_v46, %v8285_v4 }
 0x496   : > { %v3802_v51 = vpop.f32.mrf.mxu2 }
 0x497   : > { %v3803_v22 = vadd.f32 %v3802_v51, %v3714_v57 }
 0x499   : > { %v3975_v54 = vpop.f32.mrf.mxu0  ;;  %v8290_v62 = vadd.f32 %v3891_v24, %v3803_v22 }
 0x49a   : > { %v8292_v7 = vadd.f32 %v3975_v54, %v3887_v16 }
 0x49b   : > { %8838 = vst [vmem:[#allocation25_spill] sm:$0xff] %v8290_v62  ;;  %v3723_v34 = vpop.f32.mrf.mxu1 }
 0x49c   : > { %8839 = vst [vmem:[#allocation31_spill] sm:$0xff] %v8292_v7  ;;  %v3724_v57 = vadd.f32 %v3723_v34, %v7850_v38  ;;  %v3893_v29 = vpop.f32.mrf.mxu3  ;;  %4014 = vmatmul.bf16.gmra.mxu0 %v8248_v11  ;;  %v8841_v34 = vld [vmem:[#allocation37_spill] sm:$0xff] }
 0x49d   : > { %v1512_v62 = vshll.u32 %v8841_v34, 16 }
 0x49e   : > { %3762 = vmatmul.bf16.gmra.mxu1 %v8296_v49  ;;  %v3804_v60 = vpop.f32.mrf.mxu2 }
 0x49f   : > { %v3805_v51 = vadd.f32 %v3804_v60, %v3716_v20  ;;  %v1492_v20 = vrot.slane %v7867_v18, 1  ;;  %v8321_v18 = vld [vmem:[%s6428_s27 + $0x88] sm:$0xff]  }
 0x4a0   : > { %8844 = vst [vmem:[#allocation60_spill] sm:$0xff] %v8321_v18 }
 0x4a1   : > { %3935 = vmatmul.bf16.gmra.mxu3 %v8840_v61  ;;  %v3977_v24 = vpop.f32.mrf.mxu0  ;;  %v8302_v22 = vadd.f32 %v3893_v29, %v3805_v51  ;;  %v1514_v61 = vrot.slane %v1512_v62, 1  ;;  %v6008_v62 = vunpack.c.l.b16 %v8321_v18 }
 0x4a2   : > { %v8304_v16 = vadd.f32 %v3977_v24, %v3889_v48  ;;  %v1493_v48 = vsel %vm1206_vm3, %v8285_v4, %v1492_v20 }
 0x4a3   : > { %v3725_v23 = vpop.f32.mrf.mxu1  ;;  %3846 = vmatmul.bf16.gmra.mxu2 %v8259_v9 }
 0x4a4   : > { %v3726_v46 = vadd.f32 %v3725_v23, %v7874_v2  ;;  %v3896_v38 = vpop.f32.mrf.mxu3 }
 0x4a6   : > { %v3807_v54 = vpop.f32.mrf.mxu2 }
 0x4a7   : > { %v3808_v7 = vadd.f32 %v3807_v54, %v3719_v33  ;;  %v8318_v33 = vsel %vm1057_vm4, %v7888_v6, %v1514_v61  ;;  %v8330_v6 = vld [vmem:[%s6428_s27 + $0x80] sm:$0xff]  }
 0x4a8   : > { %8843 = vst [vmem:[#allocation37_spill] sm:$0xff] %v8318_v33 }
 0x4a9   : > { %v8310_v60 = vadd.f32 %v3896_v38, %v3808_v7 }
 0x4ab   : > { %8842 = vst [vmem:[#allocation24_spill] sm:$0xff] %v8310_v60  ;;  %v3728_v29 = vpop.f32.mrf.mxu1 }
 0x4ac   : > { %v3729_v51 = vadd.f32 %v3728_v29, %v7900_v35  ;;  %v3898_v24 = vpop.f32.mrf.mxu3  ;;  %4019 = vmatmul.bf16.gmra.mxu0 %v8265_v45  ;;  %v1510_v35 = vpack.c.b16 %v6008_v62, %v6008_v62  ;;  %v1516_v29 = vshrl.u32 %v8330_v6, 16 }
 0x4ae   : > { %3767 = vmatmul.bf16.gmra.mxu1 %v1493_v48  ;;  %v3809_v2 = vpop.f32.mrf.mxu2  ;;  %v1520_v48 = vshll.u32 %v1510_v35, 16 }
 0x4af   : > { %v3810_v7 = vadd.f32 %v3809_v2, %v3721_v36  ;;  %v8335_v2 = vor.u32 %v1516_v29, %v1514_v61 }
 0x4b1   : > { %3940 = vmatmul.bf16.gmra.mxu3 %v8318_v33  ;;  %v8325_v23 = vadd.f32 %v3898_v24, %v3810_v7  ;;  %v1522_v24 = vrot.slane %v1520_v48, 1 }
 0x4b3   : > { %8845 = vst [vmem:[#allocation61_spill] sm:$0xff] %v8325_v23  ;;  %v3730_v38 = vpop.f32.mrf.mxu1  ;;  %3851 = vmatmul.bf16.gmra.mxu2 %v8282_v30  ;;  %v1523_v33 = vsel %vm1057_vm4, %v8335_v2, %v1522_v24  ;;  %v6293_v24 = vld [vmem:[%s6428_s27 + $0x18] sm:$0xff] }
 0x4b4   : > { %v3731_v54 = vadd.f32 %v3730_v38, %v7918_v15  ;;  %v3901_v34 = vpop.f32.mrf.mxu3  ;;  %v6292_v38 = vld [vmem:[%s6428_s27 + $0x10] sm:$0xff] }
 0x4b6   : > { %v3812_v20 = vpop.f32.mrf.mxu2 }
 0x4b7   : > { %v3813_v18 = vadd.f32 %v3812_v20, %v3724_v57 }
 0x4b9   : > { %v8333_v36 = vadd.f32 %v3901_v34, %v3813_v18  ;;  %v8347_v34 = vrot.slane %v8330_v6, 1 }
 0x4bb   : > { %v3733_v62 = vpop.f32.mrf.mxu1  ;;  %v8352_v48 = vsel %vm1206_vm3, %v8285_v4, %v8347_v34 }
 0x4bc   : > { %v3734_v7 = vadd.f32 %v3733_v62, %v7933_v52  ;;  %v3903_v23 = vpop.f32.mrf.mxu3  ;;  %4024 = vmatmul.bf16.gmra.mxu0 %v8296_v49 }
 0x4be   : > { %v3814_v15 = vpop.f32.mrf.mxu2  ;;  %4048 = vmatmul.bf16.vlgmr.msra.gmra.mxu1 %v6292_v38 }
 0x4bf   : > { %v3815_v60 = vadd.f32 %v3814_v15, %v3726_v46 }
 0x4c1   : > { %3945 = vmatmul.bf16.gmra.mxu3 %v1523_v33  ;;  %v8342_v57 = vadd.f32 %v3903_v23, %v3815_v60 }
 0x4c3   : > { %v3735_v61 = vpop.f32.mrf.mxu1  ;;  %3856 = vmatmul.bf16.gmra.mxu2 %v8330_v6 }
 0x4c4   : > { %v3736_v18 = vadd.f32 %v3735_v61, %v7948_v42  ;;  %v3906_v52 = vpop.f32.mrf.mxu3  ;;  %v1528_v61 = vrot.slane %v1510_v35, 1 }
 0x4c6   : > { %v3817_v20 = vpop.f32.mrf.mxu2 }
 0x4c7   : > { %v3818_v29 = vadd.f32 %v3817_v20, %v3729_v51  ;;  %v1529_v20 = vsel %vm1206_vm3, %v8347_v34, %v1528_v61 }
 0x4c9   : > { %v8354_v46 = vadd.f32 %v3906_v52, %v3818_v29 }
 0x4cb   : > { %v3738_v60 = vpop.f32.mrf.mxu1 }
 0x4cc   : > { %v3739_v33 = vadd.f32 %v3738_v60, %v7969_v55  ;;  %v3908_v23 = vpop.f32.mrf.mxu3  ;;  %4029 = vmatmul.bf16.gmra.mxu0 %v8352_v48 }
 0x4ce   : > { %v3819_v42 = vpop.f32.mrf.mxu2  ;;  %4053 = vmatmul.bf16.gmra.mxu1 %v6293_v24 }
 0x4cf   : > { %v3820_v62 = vadd.f32 %v3819_v42, %v3731_v54 }
 0x4d1   : > { %4226 = vmatmul.bf16.vlgmr.msra.gmra.mxu3 %v7907_v44  ;;  %v8360_v51 = vadd.f32 %v3908_v23, %v3820_v62 }
 0x4d3   : > { %v3740_v15 = vpop.f32.mrf.mxu1  ;;  %4137 = vmatmul.bf16.vlgmr.msra.gmra.mxu2 %v7381_v1 }
 0x4d4   : > { %v3741_v4 = vadd.f32 %v3740_v15, %v7987_v56  ;;  %v3911_v38 = vpop.f32.mrf.mxu3 }
 0x4d6   : > { %v3822_v52 = vpop.f32.mrf.mxu2 }
 0x4d7   : > { %v3823_v55 = vadd.f32 %v3822_v52, %v3734_v7  ;;  %v8846_v7 = vld [vmem:[#allocation19_spill] sm:$0xff] }
 0x4d9   : > { %v8366_v29 = vadd.f32 %v3911_v38, %v3823_v55 }
 0x4db   : > { %v3743_v60 = vpop.f32.mrf.mxu1 }
 0x4dc   : > { %v3744_v54 = vadd.f32 %v3743_v60, %v8002_v3  ;;  %v3913_v44 = vpop.f32.mrf.mxu3  ;;  %4034 = vmatmul.bf16.gmra.mxu0 %v1529_v20  ;;  %v8848_v60 = vld [vmem:[#allocation18_spill] sm:$0xff] }
 0x4de   : > { %v3824_v23 = vpop.f32.mrf.mxu2  ;;  %4058 = vmatmul.bf16.gmra.mxu1 %v7930_v40 }
 0x4df   : > { %v3825_v1 = vadd.f32 %v3824_v23, %v3736_v18  ;;  %v8847_v18 = vld [vmem:[#allocation45_spill] sm:$0xff] }
 0x4e1   : > { %4231 = vmatmul.bf16.gmra.mxu3 %v7940_v14  ;;  %v8371_v56 = vadd.f32 %v3913_v44, %v3825_v1 }
 0x4e3   : > { %v3745_v35 = vpop.f32.mrf.mxu1  ;;  %4142 = vmatmul.bf16.gmra.mxu2 %v8846_v7 }
 0x4e4   : > { %v3746_v42 = vadd.f32 %v3745_v35, %v8017_v58  ;;  %v3916_v24 = vpop.f32.mrf.mxu3 }
 0x4e6   : > { %v3827_v62 = vpop.f32.mrf.mxu2 }
 0x4e7   : > { %v3828_v15 = vadd.f32 %v3827_v62, %v3739_v33  ;;  %v8850_v62 = vld [vmem:[#allocation49_spill] sm:$0xff] }
 0x4e9   : > { %v8375_v38 = vadd.f32 %v3916_v24, %v3828_v15 }
 0x4eb   : > { %v3748_v3 = vpop.f32.mrf.mxu1 }
 0x4ec   : > { %v3749_v61 = vadd.f32 %v3748_v3, %v8038_v10  ;;  %v3918_v52 = vpop.f32.mrf.mxu3 }
 0x4ee   : > { %v3829_v40 = vpop.f32.mrf.mxu2  ;;  %4063 = vmatmul.bf16.gmra.mxu1 %v7963_v21 }
 0x4ef   : > { %v3830_v14 = vadd.f32 %v3829_v40, %v3741_v4  ;;  %v8849_v4 = vld [vmem:[#allocation47_spill] sm:$0xff] }
 0x4f1   : > { %4236 = vmatmul.bf16.gmra.mxu3 %v8847_v18  ;;  %v8380_v55 = vadd.f32 %v3918_v52, %v3830_v14  ;;  %v8851_v52 = vld [vmem:[#allocation20_spill] sm:$0xff] }
 0x4f3   : > { %v3750_v20 = vpop.f32.mrf.mxu1  ;;  %4147 = vmatmul.bf16.gmra.mxu2 %v8848_v60 }
 0x4f4   : > { %v3751_v58 = vadd.f32 %v3750_v20, %v8056_v27  ;;  %v3921_v33 = vpop.f32.mrf.mxu3  ;;  %v8852_v27 = vld [vmem:[#allocation57_spill] sm:$0xff] }
 0x4f6   : > { %v3832_v44 = vpop.f32.mrf.mxu2 }
 0x4f7   : > { %v3833_v23 = vadd.f32 %v3832_v44, %v3744_v54 }
 0x4f9   : > { %v8384_v1 = vadd.f32 %v3921_v33, %v3833_v23 }
 0x4fb   : > { %v3753_v10 = vpop.f32.mrf.mxu1 }
 0x4fc   : > { %v3754_v35 = vadd.f32 %v3753_v10, %v8072_v37  ;;  %v3923_v7 = vpop.f32.mrf.mxu3 }
 0x4fe   : > { %v3834_v21 = vpop.f32.mrf.mxu2  ;;  %4068 = vmatmul.bf16.gmra.mxu1 %v8849_v4 }
 0x4ff   : > { %v3835_v24 = vadd.f32 %v3834_v21, %v3746_v42  ;;  %v8853_v42 = vld [vmem:[#allocation51_spill] sm:$0xff]  ;;  %v8854_v21 = vld [vmem:[#allocation22_spill] sm:$0xff] }
 0x501   : > { %4241 = vmatmul.bf16.gmra.mxu3 %v8850_v62  ;;  %v8389_v15 = vadd.f32 %v3923_v7, %v3835_v24 }
 0x503   : > { %v3755_v3 = vpop.f32.mrf.mxu1  ;;  %4152 = vmatmul.bf16.gmra.mxu2 %v8851_v52 }
 0x504   : > { %v3756_v40 = vadd.f32 %v3755_v3, %v8852_v27  ;;  %v3926_v54 = vpop.f32.mrf.mxu3 }
 0x506   : > { %v3837_v14 = vpop.f32.mrf.mxu2 }
 0x507   : > { %v3838_v18 = vadd.f32 %v3837_v14, %v3749_v61  ;;  %v8856_v14 = vld [vmem:[#allocation56_spill] sm:$0xff] }
 0x509   : > { %v8393_v20 = vadd.f32 %v3926_v54, %v3838_v18 }
 0x50b   : > { %v3758_v37 = vpop.f32.mrf.mxu1 }
 0x50c   : > { %v3759_v60 = vadd.f32 %v3758_v37, %v8118_v32  ;;  %v3928_v33 = vpop.f32.mrf.mxu3 }
 0x50e   : > { %v3839_v44 = vpop.f32.mrf.mxu2  ;;  %4073 = vmatmul.bf16.gmra.mxu1 %v8853_v42 }
 0x50f   : > { %v3840_v23 = vadd.f32 %v3839_v44, %v3751_v58  ;;  %v8855_v58 = vld [vmem:[#allocation54_spill] sm:$0xff] }
 0x511   : > { %4246 = vmatmul.bf16.gmra.mxu3 %v8045_v50  ;;  %v8398_v10 = vadd.f32 %v3928_v33, %v3840_v23  ;;  %v8857_v33 = vld [vmem:[#allocation28_spill] sm:$0xff] }
 0x513   : > { %v3760_v7 = vpop.f32.mrf.mxu1  ;;  %4157 = vmatmul.bf16.gmra.mxu2 %v8854_v21 }
 0x514   : > { %v3761_v4 = vadd.f32 %v3760_v7, %v8134_v59  ;;  %v3931_v61 = vpop.f32.mrf.mxu3 }
 0x516   : > { %v3842_v24 = vpop.f32.mrf.mxu2 }
 0x517   : > { %v3843_v62 = vadd.f32 %v3842_v24, %v3754_v35 }
 0x519   : > { %v8402_v3 = vadd.f32 %v3931_v61, %v3843_v62 }
 0x51b   : > { %v3763_v32 = vpop.f32.mrf.mxu1 }
 0x51c   : > { %v3764_v52 = vadd.f32 %v3763_v32, %v8150_v19  ;;  %v3933_v27 = vpop.f32.mrf.mxu3  ;;  %v8858_v32 = vld [vmem:[#allocation7_spill] sm:$0xff] }
 0x51e   : > { %v3844_v54 = vpop.f32.mrf.mxu2  ;;  %4078 = vmatmul.bf16.gmra.mxu1 %v8855_v58 }
 0x51f   : > { %v3845_v50 = vadd.f32 %v3844_v54, %v3756_v40 }
 0x521   : > { %4251 = vmatmul.bf16.gmra.mxu3 %v8856_v14  ;;  %v8407_v18 = vadd.f32 %v3933_v27, %v3845_v50 }
 0x523   : > { %v3765_v37 = vpop.f32.mrf.mxu1  ;;  %4162 = vmatmul.bf16.gmra.mxu2 %v8857_v33  ;;  %v8860_v33 = vld [vmem:[#allocation9_spill] sm:$0xff] }
 0x524   : > { %v3766_v59 = vadd.f32 %v3765_v37, %v8172_v13  ;;  %v3936_v35 = vpop.f32.mrf.mxu3  ;;  %v8859_v37 = vld [vmem:[#allocation29_spill] sm:$0xff] }
 0x526   : > { %v3847_v44 = vpop.f32.mrf.mxu2 }
 0x527   : > { %v3848_v42 = vadd.f32 %v3847_v44, %v3759_v60 }
 0x529   : > { %v8411_v23 = vadd.f32 %v3936_v35, %v3848_v42 }
 0x52b   : > { %v3768_v19 = vpop.f32.mrf.mxu1 }
 0x52c   : > { %v3769_v7 = vadd.f32 %v3768_v19, %v8196_v47  ;;  %v3938_v21 = vpop.f32.mrf.mxu3 }
 0x52e   : > { %v3849_v61 = vpop.f32.mrf.mxu2  ;;  %4083 = vmatmul.bf16.gmra.mxu1 %v8115_v39 }
 0x52f   : > { %v3850_v40 = vadd.f32 %v3849_v61, %v3761_v4 }
 0x531   : > { %4256 = vmatmul.bf16.gmra.mxu3 %v8123_v17  ;;  %v8416_v24 = vadd.f32 %v3938_v21, %v3850_v40  ;;  %v8861_v40 = vld [vmem:[#allocation15_spill] sm:$0xff] }
 0x533   : > { %v3770_v62 = vpop.f32.mrf.mxu1  ;;  %4167 = vmatmul.bf16.gmra.mxu2 %v8858_v32 }
 0x534   : > { %v3771_v13 = vadd.f32 %v3770_v62, %v8206_v26  ;;  %v3941_v60 = vpop.f32.mrf.mxu3 }
 0x536   : > { %v3852_v27 = vpop.f32.mrf.mxu2 }
 0x537   : > { %v3853_v54 = vadd.f32 %v3852_v27, %v3764_v52 }
 0x539   : > { %v8420_v58 = vadd.f32 %v3941_v60, %v3853_v54 }
 0x53b   : > { %v4049_v47 = vpop.f32.mrf.mxu1 }
 0x53c   : > { %v3943_v50 = vpop.f32.mrf.mxu3  ;;  %v4050_v32 = vadd.f32 %v4049_v47, %v8218_v63 }
 0x53e   : > { %v3854_v14 = vpop.f32.mrf.mxu2  ;;  %4088 = vmatmul.bf16.gmra.mxu1 %v8859_v37 }
 0x53f   : > { %v3855_v39 = vadd.f32 %v3854_v14, %v3766_v59 }
 0x541   : > { %4261 = vmatmul.bf16.gmra.mxu3 %v8161_v43  ;;  %v8424_v17 = vadd.f32 %v3943_v50, %v3855_v39 }
 0x543   : > { %v4051_v4 = vpop.f32.mrf.mxu1  ;;  %4172 = vmatmul.bf16.gmra.mxu2 %v8860_v33  ;;  %v8438_v33 = vpop.f32.mrf.mxu0 }
 0x544   : > { %v3946_v35 = vpop.f32.mrf.mxu3  ;;  %v4052_v14 = vadd.f32 %v4051_v4, %v8228_v25  ;;  %v8862_v4 = vld [vmem:[#allocation3_spill] sm:$0xff] }
 0x546   : > { %v3857_v26 = vpop.f32.mrf.mxu2 }
 0x547   : > { %v3858_v44 = vadd.f32 %v3857_v26, %v3769_v7 }
 0x549   : > { %v8427_v42 = vadd.f32 %v3946_v35, %v3858_v44  ;;  %v8863_v35 = vld [vmem:[#allocation12_spill] sm:$0xff]  ;;  %v8864_v44 = vld [vmem:[#allocation27_spill] sm:$0xff] }
 0x54b   : > { %v4054_v52 = vpop.f32.mrf.mxu1 }
 0x54c   : > { %v3948_v19 = vpop.f32.mrf.mxu3  ;;  %v4055_v26 = vadd.f32 %v4054_v52, %v8863_v35 }
 0x54e   : > { %v3859_v21 = vpop.f32.mrf.mxu2  ;;  %4093 = vmatmul.bf16.gmra.mxu1 %v8190_v5 }
 0x54f   : > { %v3860_v61 = vadd.f32 %v3859_v21, %v3771_v13 }
 0x551   : > { %4266 = vmatmul.bf16.gmra.mxu3 %v8199_v12  ;;  %v8431_v59 = vadd.f32 %v3948_v19, %v3860_v61  ;;  %v8865_v61 = vld [vmem:[#allocation4_spill] sm:$0xff] }
 0x553   : > { %v4056_v43 = vpop.f32.mrf.mxu1  ;;  %4177 = vmatmul.bf16.gmra.mxu2 %v8861_v40 }
 0x554   : > { %v4227_v62 = vpop.f32.mrf.mxu3  ;;  %v4057_v52 = vadd.f32 %v4056_v43, %v8254_v41 }
 0x556   : > { %v4138_v7 = vpop.f32.mrf.mxu2 }
 0x557   : > { %v4139_v60 = vadd.f32 %v4138_v7, %v4050_v32 }
 0x559   : > { %v4228_v27 = vadd.f32 %v4227_v62, %v4139_v60 }
 0x55b   : > { %v4059_v54 = vpop.f32.mrf.mxu1  ;;  %v4339_v5 = vpack.c.bf16 %v4228_v27, %v4228_v27 }
 0x55c   : > { %v4229_v50 = vpop.f32.mrf.mxu3  ;;  %v4060_v43 = vadd.f32 %v4059_v54, %v8262_v28  ;;  %v8869_v54 = vld [vmem:[#allocation30_spill] sm:$0xff] }
 0x55d   : > { %v4499_v37 = vunpack.c.l.bf16 %v4339_v5 }
 0x55e   : > { %4098 = vmatmul.bf16.gmra.mxu1 %v8214_v53  ;;  %v4140_v12 = vpop.f32.mrf.mxu2 }
 0x55f   : > { %v4141_v13 = vadd.f32 %v4140_v12, %v4052_v14  ;;  %v4723_v19 = vmul.f32 %v8864_v44, %v4499_v37  ;;  %v8452_v12 = vpop.f32.mrf.mxu0 }
 0x561   : > { %v4230_v39 = vadd.f32 %v4229_v50, %v4141_v13  ;;  %4271 = vmatmul.bf16.gmra.mxu3 %v8221_v8  ;;  %v4904_v32 = vmul.f32 %v4723_v19, %v4499_v37 }
 0x563   : > { %v4340_v63 = vpack.c.bf16 %v4230_v39, %v4230_v39  ;;  %v6093_v25 = vpack.c.bf16 %v4230_v39, %v4228_v27  ;;  %v4061_v47 = vpop.f32.mrf.mxu1  ;;  %4182 = vmatmul.bf16.gmra.mxu2 %v8862_v4 }
 0x564   : > { %v4232_v53 = vpop.f32.mrf.mxu3 }
 0x565   : > { %6094 = vst [vmem:[%s8445_s13] sm:$0xff] %v6093_v25   ;;  %v4500_v8 = vunpack.c.l.bf16 %v4340_v63  ;;  %v8866_v25 = vld [vmem:[#allocation6_spill] sm:$0xff] }
 0x566   : > { %v4143_v21 = vpop.f32.mrf.mxu2 }
 0x567   : > { %v4724_v40 = vmul.f32 %v8865_v61, %v4500_v8  ;;  %v4144_v62 = vadd.f32 %v4143_v21, %v4055_v26  ;;  %v8867_v61 = vld [vmem:[#allocation34_spill] sm:$0xff] }
 0x569   : > { %v4867_v7 = vadd.f32 %v4724_v40, %v4723_v19  ;;  %v4905_v60 = vmul.f32 %v4724_v40, %v4500_v8  ;;  %v4233_v50 = vadd.f32 %v4232_v53, %v4144_v62  ;;  %v8461_v40 = vpop.f32.mrf.mxu0 }
 0x56b   : > { %v4936_v14 = vadd.f32 %v4905_v60, %v4904_v32  ;;  %v4341_v27 = vpack.c.bf16 %v4233_v50, %v4233_v50  ;;  %v4064_v5 = vpop.f32.mrf.mxu1  ;;  %v8868_v32 = vld [vmem:[#allocation8_spill] sm:$0xff] }
 0x56c   : > { %v4234_v13 = vpop.f32.mrf.mxu3 }
 0x56d   : > { %v4501_v39 = vunpack.c.l.bf16 %v4341_v27 }
 0x56e   : > { %4103 = vmatmul.bf16.gmra.mxu1 %v8239_v0  ;;  %v4145_v63 = vpop.f32.mrf.mxu2 }
 0x56f   : > { %v4725_v4 = vmul.f32 %v8866_v25, %v4501_v39  ;;  %v4146_v35 = vadd.f32 %v4145_v63, %v4057_v52  ;;  %v4062_v63 = vadd.f32 %v4061_v47, %v8271_v31  ;;  %v8870_v31 = vld [vmem:[#allocation16_spill] sm:$0xff] }
 0x571   : > { %v4868_v37 = vadd.f32 %v4867_v7, %v4725_v4  ;;  %v4906_v26 = vmul.f32 %v4725_v4, %v4501_v39  ;;  %v4235_v44 = vadd.f32 %v4234_v13, %v4146_v35  ;;  %4276 = vmatmul.bf16.gmra.mxu3 %v8248_v11 }
 0x573   : > { %v4937_v53 = vadd.f32 %v4936_v14, %v4906_v26  ;;  %v4342_v19 = vpack.c.bf16 %v4235_v44, %v4235_v44  ;;  %v6098_v8 = vpack.c.bf16 %v4235_v44, %v4233_v50  ;;  %v4066_v21 = vpop.f32.mrf.mxu1  ;;  %4187 = vmatmul.bf16.gmra.mxu2 %v8867_v61  ;;  %v8467_v26 = vpop.f32.mrf.mxu0 }
 0x574   : > { %v4237_v41 = vpop.f32.mrf.mxu3 }
 0x575   : > { %6187 = vst [vmem:[%s8445_s13 + $0x8] sm:$0xff] %v6098_v8   ;;  %v4502_v0 = vunpack.c.l.bf16 %v4342_v19 }
 0x576   : > { %v4148_v62 = vpop.f32.mrf.mxu2 }
 0x577   : > { %v4726_v7 = vmul.f32 %v8868_v32, %v4502_v0  ;;  %v4149_v60 = vadd.f32 %v4148_v62, %v4060_v43  ;;  %v8872_v32 = vld [vmem:[#allocation11_spill] sm:$0xff] }
 0x579   : > { %v4869_v27 = vadd.f32 %v4868_v37, %v4726_v7  ;;  %v4907_v13 = vmul.f32 %v4726_v7, %v4502_v0  ;;  %v4238_v11 = vadd.f32 %v4237_v41, %v4149_v60 }
 0x57b   : > { %v4938_v14 = vadd.f32 %v4937_v53, %v4907_v13  ;;  %v4343_v52 = vpack.c.bf16 %v4238_v11, %v4238_v11  ;;  %v4069_v50 = vpop.f32.mrf.mxu1 }
 0x57c   : > { %v4239_v39 = vpop.f32.mrf.mxu3 }
 0x57d   : > { %v4503_v25 = vunpack.c.l.bf16 %v4343_v52 }
 0x57e   : > { %4108 = vmatmul.bf16.gmra.mxu1 %v8259_v9  ;;  %v4150_v28 = vpop.f32.mrf.mxu2  ;;  %v8871_v9 = vld [vmem:[#allocation31_spill] sm:$0xff] }
 0x57f   : > { %v4727_v4 = vmul.f32 %v8869_v54, %v4503_v25  ;;  %v4151_v35 = vadd.f32 %v4150_v28, %v4062_v63  ;;  %v4065_v43 = vadd.f32 %v4064_v5, %v8871_v9  ;;  %v8873_v54 = vld [vmem:[#allocation13_spill] sm:$0xff] }
 0x581   : > { %v4870_v44 = vadd.f32 %v4869_v27, %v4727_v4  ;;  %v4908_v37 = vmul.f32 %v4727_v4, %v4503_v25  ;;  %v4240_v19 = vadd.f32 %v4239_v39, %v4151_v35  ;;  %4281 = vmatmul.bf16.gmra.mxu3 %v8265_v45  ;;  %v8474_v39 = vpop.f32.mrf.mxu0  ;;  %v4067_v25 = vadd.f32 %v4066_v21, %v8304_v16  ;;  %v8875_v21 = vld [vmem:[#allocation17_spill] sm:$0xff] }
 0x583   : > { %v4939_v53 = vadd.f32 %v4938_v14, %v4908_v37  ;;  %v4344_v8 = vpack.c.bf16 %v4240_v19, %v4240_v19  ;;  %v6103_v61 = vpack.c.bf16 %v4240_v19, %v4238_v11  ;;  %v4071_v41 = vpop.f32.mrf.mxu1  ;;  %4192 = vmatmul.bf16.gmra.mxu2 %v8870_v31 }
 0x584   : > { %v4242_v47 = vpop.f32.mrf.mxu3 }
 0x585   : > { %6188 = vst [vmem:[%s8445_s13 + $0x10] sm:$0xff] %v6103_v61   ;;  %v4504_v0 = vunpack.c.l.bf16 %v4344_v8  ;;  %v8874_v8 = vld [vmem:[#allocation25_spill] sm:$0xff] }
 0x586   : > { %v4153_v62 = vpop.f32.mrf.mxu2 }
 0x587   : > { %v4728_v7 = vmul.f32 %v8872_v32, %v4504_v0  ;;  %v4154_v60 = vadd.f32 %v4153_v62, %v4065_v43  ;;  %v8876_v32 = vld [vmem:[#allocation2_spill] sm:$0xff] }
 0x589   : > { %v4871_v27 = vadd.f32 %v4870_v44, %v4728_v7  ;;  %v4909_v13 = vmul.f32 %v4728_v7, %v4504_v0  ;;  %v4243_v52 = vadd.f32 %v4242_v47, %v4154_v60 }
 0x58b   : > { %v4940_v45 = vadd.f32 %v4939_v53, %v4909_v13  ;;  %v4345_v14 = vpack.c.bf16 %v4243_v52, %v4243_v52  ;;  %v4074_v11 = vpop.f32.mrf.mxu1  ;;  %v3981_v53 = vadd.f32 %v8438_v33, %v8874_v8  ;;  %v3983_v33 = vadd.f32 %v8452_v12, %v8302_v22  ;;  %v8878_v22 = vld [vmem:[#allocation24_spill] sm:$0xff] }
 0x58c   : > { %v4244_v63 = vpop.f32.mrf.mxu3  ;;  %v3986_v12 = vadd.f32 %v8461_v40, %v8878_v22 }
 0x58d   : > { %v4505_v28 = vunpack.c.l.bf16 %v4345_v14  ;;  %v4070_v43 = vadd.f32 %v4069_v50, %v3981_v53 }
 0x58e   : > { %4113 = vmatmul.bf16.gmra.mxu1 %v8282_v30  ;;  %v4155_v5 = vpop.f32.mrf.mxu2  ;;  %v8483_v30 = vpop.f32.mrf.mxu0 }
 0x58f   : > { %v4729_v4 = vmul.f32 %v8873_v54, %v4505_v28  ;;  %v4156_v35 = vadd.f32 %v4155_v5, %v4067_v25  ;;  %v4072_v25 = vadd.f32 %v4071_v41, %v3983_v33  ;;  %v8877_v54 = vld [vmem:[#allocation32_spill] sm:$0xff] }
 0x591   : > { %v4872_v37 = vadd.f32 %v4871_v27, %v4729_v4  ;;  %v4910_v44 = vmul.f32 %v4729_v4, %v4505_v28  ;;  %v4245_v19 = vadd.f32 %v4244_v63, %v4156_v35  ;;  %4286 = vmatmul.bf16.gmra.mxu3 %v8296_v49 }
 0x593   : > { %v4941_v61 = vadd.f32 %v4940_v45, %v4910_v44  ;;  %v4346_v31 = vpack.c.bf16 %v4245_v19, %v4245_v19  ;;  %v6108_v47 = vpack.c.bf16 %v4245_v19, %v4243_v52  ;;  %v4076_v16 = vpop.f32.mrf.mxu1  ;;  %4197 = vmatmul.bf16.gmra.mxu2 %v8875_v21 }
 0x594   : > { %v4247_v9 = vpop.f32.mrf.mxu3 }
 0x595   : > { %6189 = vst [vmem:[%s8445_s13 + $0x18] sm:$0xff] %v6108_v47   ;;  %v4506_v0 = vunpack.c.l.bf16 %v4346_v31  ;;  %v8879_v31 = vld [vmem:[#allocation37_spill] sm:$0xff]  ;;  %v4075_v47 = vadd.f32 %v4074_v11, %v3986_v12 }
 0x596   : > { %v4158_v62 = vpop.f32.mrf.mxu2  ;;  %v8489_v5 = vpop.f32.mrf.mxu0 }
 0x597   : > { %v4730_v7 = vmul.f32 %v8876_v32, %v4506_v0  ;;  %v4159_v60 = vadd.f32 %v4158_v62, %v4070_v43  ;;  %v8880_v43 = vld [vmem:[#allocation33_spill] sm:$0xff] }
 0x599   : > { %v4873_v49 = vadd.f32 %v4872_v37, %v4730_v7  ;;  %v4911_v27 = vmul.f32 %v4730_v7, %v4506_v0  ;;  %v4248_v13 = vadd.f32 %v4247_v9, %v4159_v60 }
 0x59b   : > { %v4942_v52 = vadd.f32 %v4941_v61, %v4911_v27  ;;  %v4347_v45 = vpack.c.bf16 %v4248_v13, %v4248_v13  ;;  %v4079_v14 = vpop.f32.mrf.mxu1 }
 0x59c   : > { %v4249_v63 = vpop.f32.mrf.mxu3 }
 0x59d   : > { %v4507_v28 = vunpack.c.l.bf16 %v4347_v45 }
 0x59e   : > { %4118 = vmatmul.bf16.gmra.mxu1 %v8330_v6  ;;  %v4160_v50 = vpop.f32.mrf.mxu2  ;;  %v8499_v32 = vpop.f32.mrf.mxu0 }
 0x59f   : > { %v4731_v4 = vmul.f32 %v8877_v54, %v4507_v28  ;;  %v4161_v35 = vadd.f32 %v4160_v50, %v4072_v25 }
 0x5a1   : > { %v4874_v37 = vadd.f32 %v4873_v49, %v4731_v4  ;;  %v4912_v44 = vmul.f32 %v4731_v4, %v4507_v28  ;;  %v4250_v19 = vadd.f32 %v4249_v63, %v4161_v35  ;;  %4291 = vmatmul.bf16.gmra.mxu3 %v8352_v48  ;;  %v8881_v48 = vld [vmem:[#allocation60_spill] sm:$0xff]  ;;  %v8883_v35 = vld [vmem:[#allocation35_spill] sm:$0xff] }
 0x5a2   : > { %v1533_v7 = vshll.u32 %v8881_v48, 16  ;;  %v1547_v27 = vrot.slane %v8881_v48, 1 }
 0x5a3   : > { %v4943_v8 = vadd.f32 %v4942_v52, %v4912_v44  ;;  %v4348_v41 = vpack.c.bf16 %v4250_v19, %v4250_v19  ;;  %v6113_v53 = vpack.c.bf16 %v4250_v19, %v4248_v13  ;;  %v4081_v61 = vpop.f32.mrf.mxu1  ;;  %4202 = vmatmul.bf16.gmra.mxu2 %v8879_v31  ;;  %v8882_v13 = vld [vmem:[#allocation61_spill] sm:$0xff] }
 0x5a4   : > { %v4252_v6 = vpop.f32.mrf.mxu3  ;;  %v3988_v33 = vadd.f32 %v8467_v26, %v8882_v13  ;;  %v1535_v25 = vrot.slane %v1533_v7, 1  ;;  %v1548_v4 = vsel %vm1206_vm3, %v8347_v34, %v1547_v27  ;;  %v8885_v7 = vld [vmem:[#allocation10_spill] sm:$0xff] }
 0x5a5   : > { %6190 = vst [vmem:[%s8445_s13 + $0x20] sm:$0xff] %v6113_v53   ;;  %v4508_v21 = vunpack.c.l.bf16 %v4348_v41 }
 0x5a6   : > { %v4163_v9 = vpop.f32.mrf.mxu2  ;;  %v4077_v28 = vadd.f32 %v4076_v16, %v3988_v33  ;;  %v1536_v26 = vsel %vm1057_vm4, %v8335_v2, %v1535_v25  ;;  %v3991_v16 = vadd.f32 %v8474_v39, %v8333_v36  ;;  %v8884_v2 = vld [vmem:[#allocation21_spill] sm:$0xff]  ;;  %v1549_v39 = vrot.slane %v8885_v7, 1 }
 0x5a7   : > { %v4732_v0 = vmul.f32 %v8880_v43, %v4508_v21  ;;  %v4164_v62 = vadd.f32 %v4163_v9, %v4075_v47 }
 0x5a8   : > { %v4080_v47 = vadd.f32 %v4079_v14, %v3991_v16 }
 0x5a9   : > { %v4875_v60 = vadd.f32 %v4874_v37, %v4732_v0  ;;  %v4913_v40 = vmul.f32 %v4732_v0, %v4508_v21  ;;  %v4253_v49 = vadd.f32 %v4252_v6, %v4164_v62  ;;  %v1537_v62 = vshrl.u32 %v8881_v48, 16 }
 0x5ab   : > { %v4944_v52 = vadd.f32 %v4943_v8, %v4913_v40  ;;  %v4349_v11 = vpack.c.bf16 %v4253_v49, %v4253_v49  ;;  %v4084_v45 = vpop.f32.mrf.mxu1  ;;  %v8511_v8 = vpop.f32.mrf.mxu0 }
 0x5ac   : > { %v4254_v63 = vpop.f32.mrf.mxu3 }
 0x5ad   : > { %v4509_v50 = vunpack.c.l.bf16 %v4349_v11 }
 0x5ae   : > { %4123 = vmatmul.bf16.gmra.mxu1 %v8881_v48  ;;  %v4165_v54 = vpop.f32.mrf.mxu2 }
 0x5af   : > { %v4733_v37 = vmul.f32 %v8883_v35, %v4509_v50  ;;  %v4166_v44 = vadd.f32 %v4165_v54, %v4077_v28  ;;  %v1539_v28 = vor.u32 %v1537_v62, %v1535_v25  ;;  %v1550_v35 = vsel %vm1206_vm3, %v1547_v27, %v1549_v39  ;;  %v8888_v39 = vld [vmem:[#allocation38_spill] sm:$0xff] }
 0x5b1   : > { %v4876_v19 = vadd.f32 %v4875_v60, %v4733_v37  ;;  %v4914_v22 = vmul.f32 %v4733_v37, %v4509_v50  ;;  %v4255_v12 = vadd.f32 %v4254_v63, %v4166_v44  ;;  %4296 = vmatmul.bf16.gmra.mxu3 %v1548_v4  ;;  %v1541_v60 = vshll.u32 %v8885_v7, 16  ;;  %v8886_v37 = vld [vmem:[#allocation36_spill] sm:$0xff] }
 0x5b3   : > { %v4945_v41 = vadd.f32 %v4944_v52, %v4914_v22  ;;  %v4350_v53 = vpack.c.bf16 %v4255_v12, %v4255_v12  ;;  %v6118_v31 = vpack.c.bf16 %v4255_v12, %v4253_v49  ;;  %v4086_v34 = vpop.f32.mrf.mxu1  ;;  %4207 = vmatmul.bf16.gmra.mxu2 %v1536_v26  ;;  %v3993_v49 = vadd.f32 %v8483_v30, %v8342_v57  ;;  %v4002_v11 = vpop.f32.mrf.mxu0 }
 0x5b4   : > { %v4257_v6 = vpop.f32.mrf.mxu3  ;;  %v1543_v50 = vrot.slane %v1541_v60, 1  ;;  %v3996_v12 = vadd.f32 %v8489_v5, %v8354_v46  ;;  %v3998_v46 = vadd.f32 %v8499_v32, %v8360_v51 }
 0x5b5   : > { %6191 = vst [vmem:[%s8445_s13 + $0x28] sm:$0xff] %v6118_v31   ;;  %v4510_v21 = vunpack.c.l.bf16 %v4350_v53  ;;  %v4082_v54 = vadd.f32 %v4081_v61, %v3993_v49 }
 0x5b6   : > { %v4168_v9 = vpop.f32.mrf.mxu2  ;;  %v4085_v27 = vadd.f32 %v4084_v45, %v3996_v12 }
 0x5b7   : > { %v4734_v43 = vmul.f32 %v8884_v2, %v4510_v21  ;;  %v4169_v0 = vadd.f32 %v4168_v9, %v4080_v47 }
 0x5b9   : > { %v4877_v40 = vadd.f32 %v4876_v19, %v4734_v43  ;;  %v4915_v13 = vmul.f32 %v4734_v43, %v4510_v21  ;;  %v4258_v36 = vadd.f32 %v4257_v6, %v4169_v0  ;;  %v1544_v19 = vsel %vm1057_vm4, %v1539_v28, %v1543_v50  ;;  %v8887_v21 = vld [vmem:[#allocation14_spill] sm:$0xff] }
 0x5bb   : > { %v4946_v33 = vadd.f32 %v4945_v41, %v4915_v13  ;;  %v4351_v14 = vpack.c.bf16 %v4258_v36, %v4258_v36  ;;  %v4089_v52 = vpop.f32.mrf.mxu1  ;;  %v4005_v6 = vpop.f32.mrf.mxu0  ;;  %v4087_v13 = vadd.f32 %v4086_v34, %v3998_v46 }
 0x5bc   : > { %v4259_v63 = vpop.f32.mrf.mxu3 }
 0x5bd   : > { %v4511_v4 = vunpack.c.l.bf16 %v4351_v14 }
 0x5be   : > { %v4170_v48 = vpop.f32.mrf.mxu2 }
 0x5bf   : > { %v4735_v44 = vmul.f32 %v8886_v37, %v4511_v4  ;;  %v4171_v26 = vadd.f32 %v4170_v48, %v4082_v54  ;;  %v4001_v54 = vadd.f32 %v8511_v8, %v8366_v29 }
 0x5c1   : > { %v4878_v22 = vadd.f32 %v4877_v40, %v4735_v44  ;;  %v4916_v57 = vmul.f32 %v4735_v44, %v4511_v4  ;;  %v4260_v30 = vadd.f32 %v4259_v63, %v4171_v26  ;;  %4301 = vmatmul.bf16.gmra.mxu3 %v1550_v35  ;;  %v4090_v37 = vadd.f32 %v4089_v52, %v4001_v54  ;;  %v8889_v26 = vld [vmem:[#allocation39_spill] sm:$0xff] }
 0x5c3   : > { %v4947_v25 = vadd.f32 %v4946_v33, %v4916_v57  ;;  %v4352_v16 = vpack.c.bf16 %v4260_v30, %v4260_v30  ;;  %v6123_v61 = vpack.c.bf16 %v4260_v30, %v4258_v36  ;;  %v4091_v41 = vpop.f32.mrf.mxu1  ;;  %4212 = vmatmul.bf16.gmra.mxu2 %v1544_v19  ;;  %v4007_v14 = vpop.f32.mrf.mxu0 }
 0x5c4   : > { %v4262_v53 = vpop.f32.mrf.mxu3 }
 0x5c5   : > { %6192 = vst [vmem:[%s8445_s13 + $0x30] sm:$0xff] %v6123_v61   ;;  %v4512_v31 = vunpack.c.l.bf16 %v4352_v16  ;;  %v4003_v16 = vadd.f32 %v4002_v11, %v8371_v56 }
 0x5c6   : > { %v4173_v47 = vpop.f32.mrf.mxu2 }
 0x5c7   : > { %v4736_v9 = vmul.f32 %v8887_v21, %v4512_v31  ;;  %v4174_v2 = vadd.f32 %v4173_v47, %v4085_v27  ;;  %v4092_v27 = vadd.f32 %v4091_v41, %v4003_v16  ;;  %v8890_v47 = vld [vmem:[#allocation40_spill] sm:$0xff] }
 0x5c9   : > { %v4879_v43 = vadd.f32 %v4878_v22, %v4736_v9  ;;  %v4917_v0 = vmul.f32 %v4736_v9, %v4512_v31  ;;  %v4263_v62 = vadd.f32 %v4262_v53, %v4174_v2 }
 0x5cb   : > { %v4948_v5 = vadd.f32 %v4947_v25, %v4917_v0  ;;  %v4353_v7 = vpack.c.bf16 %v4263_v62, %v4263_v62  ;;  %v4094_v60 = vpop.f32.mrf.mxu1  ;;  %v4010_v25 = vpop.f32.mrf.mxu0 }
 0x5cc   : > { %v4264_v40 = vpop.f32.mrf.mxu3 }
 0x5cd   : > { %v4513_v45 = vunpack.c.l.bf16 %v4353_v7 }
 0x5ce   : > { %v4175_v36 = vpop.f32.mrf.mxu2 }
 0x5cf   : > { %v4737_v49 = vmul.f32 %v8888_v39, %v4513_v45  ;;  %v4176_v33 = vadd.f32 %v4175_v36, %v4087_v13  ;;  %v8891_v36 = vld [vmem:[#allocation41_spill] sm:$0xff] }
 0x5d1   : > { %v4880_v63 = vadd.f32 %v4879_v43, %v4737_v49  ;;  %v4918_v28 = vmul.f32 %v4737_v49, %v4513_v45  ;;  %v4265_v50 = vadd.f32 %v4264_v40, %v4176_v33 }
 0x5d3   : > { %v4949_v4 = vadd.f32 %v4948_v5, %v4918_v28  ;;  %v4354_v51 = vpack.c.bf16 %v4265_v50, %v4265_v50  ;;  %v6128_v32 = vpack.c.bf16 %v4265_v50, %v4263_v62  ;;  %v4096_v48 = vpop.f32.mrf.mxu1  ;;  %v4006_v62 = vadd.f32 %v4005_v6, %v8375_v38  ;;  %v4012_v56 = vpop.f32.mrf.mxu0 }
 0x5d4   : > { %v4267_v35 = vpop.f32.mrf.mxu3  ;;  %v4008_v50 = vadd.f32 %v4007_v14, %v8380_v55 }
 0x5d5   : > { %6193 = vst [vmem:[%s8445_s13 + $0x38] sm:$0xff] %v6128_v32   ;;  %v4514_v34 = vunpack.c.l.bf16 %v4354_v51  ;;  %v4095_v40 = vadd.f32 %v4094_v60, %v4006_v62 }
 0x5d6   : > { %v4178_v44 = vpop.f32.mrf.mxu2 }
 0x5d7   : > { %v4738_v19 = vmul.f32 %v8889_v26, %v4514_v34  ;;  %v4179_v22 = vadd.f32 %v4178_v44, %v4090_v37 }
 0x5d9   : > { %v4881_v57 = vadd.f32 %v4880_v63, %v4738_v19  ;;  %v4919_v30 = vmul.f32 %v4738_v19, %v4514_v34  ;;  %v4268_v12 = vadd.f32 %v4267_v35, %v4179_v22  ;;  %v8892_v35 = vld [vmem:[#allocation42_spill] sm:$0xff] }
 0x5db   : > { %v4950_v61 = vadd.f32 %v4949_v4, %v4919_v30  ;;  %v4355_v29 = vpack.c.bf16 %v4268_v12, %v4268_v12  ;;  %v4099_v8 = vpop.f32.mrf.mxu1  ;;  %v4097_v4 = vadd.f32 %v4096_v48, %v4008_v50  ;;  %v4015_v32 = vpop.f32.mrf.mxu0  ;;  %v8895_v50 = vld [vmem:[#allocation46_spill] sm:$0xff] }
 0x5dc   : > { %v4269_v53 = vpop.f32.mrf.mxu3 }
 0x5dd   : > { %v4515_v31 = vunpack.c.l.bf16 %v4355_v29  ;;  %v8893_v29 = vld [vmem:[#allocation43_spill] sm:$0xff] }
 0x5de   : > { %v4180_v52 = vpop.f32.mrf.mxu2 }
 0x5df   : > { %v4739_v21 = vmul.f32 %v8890_v47, %v4515_v31  ;;  %v4181_v9 = vadd.f32 %v4180_v52, %v4092_v27 }
 0x5e1   : > { %v4882_v2 = vadd.f32 %v4881_v57, %v4739_v21  ;;  %v4920_v43 = vmul.f32 %v4739_v21, %v4515_v31  ;;  %v4270_v0 = vadd.f32 %v4269_v53, %v4181_v9  ;;  %v4011_v57 = vadd.f32 %v4010_v25, %v8384_v1 }
 0x5e3   : > { %v4951_v46 = vadd.f32 %v4950_v61, %v4920_v43  ;;  %v4356_v5 = vpack.c.bf16 %v4270_v0, %v4270_v0  ;;  %v6133_v7 = vpack.c.bf16 %v4270_v0, %v4268_v12  ;;  %v4101_v45 = vpop.f32.mrf.mxu1  ;;  %v4100_v16 = vadd.f32 %v4099_v8, %v4011_v57  ;;  %v4017_v31 = vpop.f32.mrf.mxu0 }
 0x5e4   : > { %v4272_v11 = vpop.f32.mrf.mxu3 }
 0x5e5   : > { %6194 = vst [vmem:[%s8445_s13 + $0x40] sm:$0xff] %v6133_v7   ;;  %v4516_v13 = vunpack.c.l.bf16 %v4356_v5 }
 0x5e6   : > { %v4183_v41 = vpop.f32.mrf.mxu2 }
 0x5e7   : > { %v4740_v39 = vmul.f32 %v8891_v36, %v4516_v13  ;;  %v4184_v49 = vadd.f32 %v4183_v41, %v4095_v40  ;;  %v4016_v36 = vadd.f32 %v4015_v32, %v8393_v20 }
 0x5e9   : > { %v4883_v33 = vadd.f32 %v4882_v2, %v4740_v39  ;;  %v4921_v63 = vmul.f32 %v4740_v39, %v4516_v13  ;;  %v4273_v28 = vadd.f32 %v4272_v11, %v4184_v49  ;;  %v4013_v2 = vadd.f32 %v4012_v56, %v8389_v15 }
 0x5eb   : > { %v4952_v54 = vadd.f32 %v4951_v46, %v4921_v63  ;;  %v4357_v38 = vpack.c.bf16 %v4273_v28, %v4273_v28  ;;  %v4104_v44 = vpop.f32.mrf.mxu1  ;;  %v4102_v0 = vadd.f32 %v4101_v45, %v4013_v2  ;;  %v8894_v46 = vld [vmem:[#allocation44_spill] sm:$0xff]  ;;  %v4020_v41 = vpop.f32.mrf.mxu0 }
 0x5ec   : > { %v4274_v6 = vpop.f32.mrf.mxu3  ;;  %v4105_v63 = vadd.f32 %v4104_v44, %v4016_v36 }
 0x5ed   : > { %v4517_v51 = vunpack.c.l.bf16 %v4357_v38 }
 0x5ee   : > { %v4185_v60 = vpop.f32.mrf.mxu2 }
 0x5ef   : > { %v4741_v37 = vmul.f32 %v8892_v35, %v4517_v51  ;;  %v4186_v34 = vadd.f32 %v4185_v60, %v4097_v4  ;;  %v4018_v60 = vadd.f32 %v4017_v31, %v8398_v10 }
 0x5f1   : > { %v4884_v26 = vadd.f32 %v4883_v33, %v4741_v37  ;;  %v4922_v19 = vmul.f32 %v4741_v37, %v4517_v51  ;;  %v4275_v22 = vadd.f32 %v4274_v6, %v4186_v34 }
 0x5f3   : > { %v4953_v30 = vadd.f32 %v4952_v54, %v4922_v19  ;;  %v4358_v12 = vpack.c.bf16 %v4275_v22, %v4275_v22  ;;  %v6138_v55 = vpack.c.bf16 %v4275_v22, %v4273_v28  ;;  %v4106_v9 = vpop.f32.mrf.mxu1  ;;  %v4022_v20 = vpop.f32.mrf.mxu0  ;;  %v8896_v22 = vld [vmem:[#allocation48_spill] sm:$0xff] }
 0x5f4   : > { %v4277_v14 = vpop.f32.mrf.mxu3  ;;  %v4107_v34 = vadd.f32 %v4106_v9, %v4018_v60 }
 0x5f5   : > { %6195 = vst [vmem:[%s8445_s13 + $0x48] sm:$0xff] %v6138_v55   ;;  %v4518_v48 = vunpack.c.l.bf16 %v4358_v12 }
 0x5f6   : > { %v4188_v61 = vpop.f32.mrf.mxu2 }
 0x5f7   : > { %v4742_v53 = vmul.f32 %v8893_v29, %v4518_v48  ;;  %v4189_v27 = vadd.f32 %v4188_v61, %v4100_v16  ;;  %v4021_v16 = vadd.f32 %v4020_v41, %v8402_v3 }
 0x5f9   : > { %v4885_v52 = vadd.f32 %v4884_v26, %v4742_v53  ;;  %v4923_v47 = vmul.f32 %v4742_v53, %v4518_v48  ;;  %v4278_v21 = vadd.f32 %v4277_v14, %v4189_v27 }
 0x5fb   : > { %v4954_v43 = vadd.f32 %v4953_v30, %v4923_v47  ;;  %v4359_v1 = vpack.c.bf16 %v4278_v21, %v4278_v21  ;;  %v4109_v15 = vpop.f32.mrf.mxu1  ;;  %v4025_v31 = vpop.f32.mrf.mxu0  ;;  %v8897_v47 = vld [vmem:[#allocation50_spill] sm:$0xff] }
 0x5fc   : > { %v4279_v25 = vpop.f32.mrf.mxu3  ;;  %v4110_v53 = vadd.f32 %v4109_v15, %v4021_v16  ;;  %v4026_v15 = vadd.f32 %v4025_v31, %v8411_v23 }
 0x5fd   : > { %v4519_v62 = vunpack.c.l.bf16 %v4359_v1 }
 0x5fe   : > { %v4190_v8 = vpop.f32.mrf.mxu2 }
 0x5ff   : > { %v4743_v5 = vmul.f32 %v8894_v46, %v4519_v62  ;;  %v4191_v7 = vadd.f32 %v4190_v8, %v4102_v0  ;;  %v4023_v0 = vadd.f32 %v4022_v20, %v8407_v18 }
 0x601   : > { %v4886_v11 = vadd.f32 %v4885_v52, %v4743_v5  ;;  %v4924_v40 = vmul.f32 %v4743_v5, %v4519_v62  ;;  %v4280_v13 = vadd.f32 %v4279_v25, %v4191_v7 }
 0x603   : > { %v4955_v39 = vadd.f32 %v4954_v43, %v4924_v40  ;;  %v4360_v49 = vpack.c.bf16 %v4280_v13, %v4280_v13  ;;  %v6143_v33 = vpack.c.bf16 %v4280_v13, %v4278_v21  ;;  %v4111_v19 = vpop.f32.mrf.mxu1  ;;  %v4027_v41 = vpop.f32.mrf.mxu0 }
 0x604   : > { %v4282_v56 = vpop.f32.mrf.mxu3  ;;  %v4112_v46 = vadd.f32 %v4111_v19, %v4023_v0  ;;  %v4028_v20 = vadd.f32 %v4027_v41, %v8416_v24 }
 0x605   : > { %6196 = vst [vmem:[%s8445_s13 + $0x50] sm:$0xff] %v6143_v33   ;;  %v4520_v45 = vunpack.c.l.bf16 %v4360_v49 }
 0x606   : > { %v4193_v28 = vpop.f32.mrf.mxu2 }
 0x607   : > { %v4744_v54 = vmul.f32 %v8895_v50, %v4520_v45  ;;  %v4194_v38 = vadd.f32 %v4193_v28, %v4105_v63 }
 0x609   : > { %v4887_v6 = vadd.f32 %v4886_v11, %v4744_v54  ;;  %v4925_v4 = vmul.f32 %v4744_v54, %v4520_v45  ;;  %v4283_v51 = vadd.f32 %v4282_v56, %v4194_v38  ;;  %v8898_v11 = vld [vmem:[#allocation52_spill] sm:$0xff]  ;;  %v8899_v38 = vld [vmem:[#allocation53_spill] sm:$0xff] }
 0x60b   : > { %v4956_v35 = vadd.f32 %v4955_v39, %v4925_v4  ;;  %v4361_v37 = vpack.c.bf16 %v4283_v51, %v4283_v51  ;;  %v4114_v2 = vpop.f32.mrf.mxu1 }
 0x60c   : > { %v4284_v32 = vpop.f32.mrf.mxu3  ;;  %v4115_v28 = vadd.f32 %v4114_v2, %v4026_v15 }
 0x60d   : > { %v4521_v26 = vunpack.c.l.bf16 %v4361_v37  ;;  %v4030_v37 = vpop.f32.mrf.mxu0 }
 0x60e   : > { %v4195_v44 = vpop.f32.mrf.mxu2 }
 0x60f   : > { %v4745_v57 = vmul.f32 %v8896_v22, %v4521_v26  ;;  %v4196_v30 = vadd.f32 %v4195_v44, %v4107_v34 }
 0x611   : > { %v4888_v12 = vadd.f32 %v4887_v6, %v4745_v57  ;;  %v4926_v55 = vmul.f32 %v4745_v57, %v4521_v26  ;;  %v4285_v14 = vadd.f32 %v4284_v32, %v4196_v30  ;;  %v8900_v57 = vld [vmem:[#allocation55_spill] sm:$0xff] }
 0x613   : > { %v4957_v48 = vadd.f32 %v4956_v35, %v4926_v55  ;;  %v4362_v61 = vpack.c.bf16 %v4285_v14, %v4285_v14  ;;  %v6148_v10 = vpack.c.bf16 %v4285_v14, %v4283_v51  ;;  %v4116_v33 = vpop.f32.mrf.mxu1 }
 0x614   : > { %v4287_v29 = vpop.f32.mrf.mxu3  ;;  %v4117_v19 = vadd.f32 %v4116_v33, %v4028_v20 }
 0x615   : > { %6197 = vst [vmem:[%s8445_s13 + $0x58] sm:$0xff] %v6148_v10   ;;  %v4522_v27 = vunpack.c.l.bf16 %v4362_v61  ;;  %v4032_v24 = vpop.f32.mrf.mxu0 }
 0x616   : > { %v4198_v52 = vpop.f32.mrf.mxu2  ;;  %v4033_v0 = vadd.f32 %v4032_v24, %v8424_v17 }
 0x617   : > { %v4746_v21 = vmul.f32 %v8897_v47, %v4522_v27  ;;  %v4199_v9 = vadd.f32 %v4198_v52, %v4110_v53 }
 0x619   : > { %v4889_v43 = vadd.f32 %v4888_v12, %v4746_v21  ;;  %v4927_v1 = vmul.f32 %v4746_v21, %v4522_v27  ;;  %v4288_v25 = vadd.f32 %v4287_v29, %v4199_v9  ;;  %v8901_v21 = vld [vmem:[#allocation58_spill] sm:$0xff] }
 0x61b   : > { %v4958_v62 = vadd.f32 %v4957_v48, %v4927_v1  ;;  %v4363_v3 = vpack.c.bf16 %v4288_v25, %v4288_v25  ;;  %v4119_v23 = vpop.f32.mrf.mxu1  ;;  %v4031_v48 = vadd.f32 %v4030_v37, %v8420_v58 }
 0x61c   : > { %v4289_v8 = vpop.f32.mrf.mxu3 }
 0x61d   : > { %v4523_v5 = vunpack.c.l.bf16 %v4363_v3  ;;  %v4120_v27 = vadd.f32 %v4119_v23, %v4031_v48 }
 0x61e   : > { %v4200_v7 = vpop.f32.mrf.mxu2 }
 0x61f   : > { %v4747_v40 = vmul.f32 %v8898_v11, %v4523_v5  ;;  %v4201_v13 = vadd.f32 %v4200_v7, %v4112_v46  ;;  %v8902_v11 = vld [vmem:[#allocation23_spill] sm:$0xff] }
 0x621   : > { %v4890_v36 = vadd.f32 %v4889_v43, %v4747_v40  ;;  %v4928_v39 = vmul.f32 %v4747_v40, %v4523_v5  ;;  %v4290_v49 = vadd.f32 %v4289_v8, %v4201_v13  ;;  %v4035_v5 = vpop.f32.mrf.mxu0 }
 0x622   : > { %v4036_v33 = vadd.f32 %v4035_v5, %v8427_v42 }
 0x623   : > { %v4959_v56 = vadd.f32 %v4958_v62, %v4928_v39  ;;  %v4364_v63 = vpack.c.bf16 %v4290_v49, %v4290_v49  ;;  %v6153_v18 = vpack.c.bf16 %v4290_v49, %v4288_v25  ;;  %v4121_v52 = vpop.f32.mrf.mxu1 }
 0x624   : > { %v4292_v45 = vpop.f32.mrf.mxu3  ;;  %v4122_v8 = vadd.f32 %v4121_v52, %v4033_v0 }
 0x625   : > { %6198 = vst [vmem:[%s8445_s13 + $0x60] sm:$0xff] %v6153_v18   ;;  %v4524_v50 = vunpack.c.l.bf16 %v4364_v63 }
 0x626   : > { %v4203_v54 = vpop.f32.mrf.mxu2 }
 0x627   : > { %v4748_v6 = vmul.f32 %v8899_v38, %v4524_v50  ;;  %v4204_v4 = vadd.f32 %v4203_v54, %v4115_v28 }
 0x629   : > { %v4891_v51 = vadd.f32 %v4890_v36, %v4748_v6  ;;  %v4929_v60 = vmul.f32 %v4748_v6, %v4524_v50  ;;  %v4293_v35 = vadd.f32 %v4292_v45, %v4204_v4  ;;  %v8903_v50 = vld [vmem:[#allocation5_spill] sm:$0xff]  ;;  %v4037_v6 = vpop.f32.mrf.mxu0 }
 0x62a   : > { %v4038_v37 = vadd.f32 %v4037_v6, %v8431_v59 }
 0x62b   : > { %v4960_v32 = vadd.f32 %v4959_v56, %v4929_v60  ;;  %v4365_v34 = vpack.c.bf16 %v4293_v35, %v4293_v35  ;;  %v4124_v41 = vpop.f32.mrf.mxu1 }
 0x62c   : > { %v4294_v26 = vpop.f32.mrf.mxu3  ;;  %v4125_v63 = vadd.f32 %v4124_v41, %v4036_v33 }
 0x62d   : > { %v4525_v44 = vunpack.c.l.bf16 %v4365_v34 }
 0x62e   : > { %v4205_v22 = vpop.f32.mrf.mxu2 }
 0x62f   : > { %v4749_v30 = vmul.f32 %v8900_v57, %v4525_v44  ;;  %v4206_v12 = vadd.f32 %v4205_v22, %v4117_v19 }
 0x631   : > { %v4892_v55 = vadd.f32 %v4891_v51, %v4749_v30  ;;  %v4930_v14 = vmul.f32 %v4749_v30, %v4525_v44  ;;  %v4295_v16 = vadd.f32 %v4294_v26, %v4206_v12  ;;  %v8904_v26 = vld [vmem:[#allocation59_spill] sm:$0xff] }
 0x633   : > { %v4961_v61 = vadd.f32 %v4960_v32, %v4930_v14  ;;  %v4366_v10 = vpack.c.bf16 %v4295_v16, %v4295_v16  ;;  %v6158_v29 = vpack.c.bf16 %v4295_v16, %v4293_v35  ;;  %v4126_v35 = vpop.f32.mrf.mxu1 }
 0x634   : > { %v4297_v53 = vpop.f32.mrf.mxu3  ;;  %v4127_v32 = vadd.f32 %v4126_v35, %v4038_v37 }
 0x635   : > { %6199 = vst [vmem:[%s8445_s13 + $0x68] sm:$0xff] %v6158_v29   ;;  %v4526_v31 = vunpack.c.l.bf16 %v4366_v10 }
 0x636   : > { %v4208_v47 = vpop.f32.mrf.mxu2 }
 0x637   : > { %v4750_v9 = vmul.f32 %v8901_v21, %v4526_v31  ;;  %v4209_v2 = vadd.f32 %v4208_v47, %v4120_v27 }
 0x639   : > { %v4893_v43 = vadd.f32 %v4892_v55, %v4750_v9  ;;  %v4931_v1 = vmul.f32 %v4750_v9, %v4526_v31  ;;  %v4298_v25 = vadd.f32 %v4297_v53, %v4209_v2 }
 0x63b   : > { %v4962_v62 = vadd.f32 %v4961_v61, %v4931_v1  ;;  %v4367_v58 = vpack.c.bf16 %v4298_v25, %v4298_v25  ;;  %v8905_v61 = vld [vmem:[#allocation26_spill] sm:$0xff] }
 0x63c   : > { %v4299_v3 = vpop.f32.mrf.mxu3 }
 0x63d   : > { %v4527_v46 = vunpack.c.l.bf16 %v4367_v58 }
 0x63e   : > { %v4210_v7 = vpop.f32.mrf.mxu2 }
 0x63f   : > { %v4751_v40 = vmul.f32 %v8902_v11, %v4527_v46  ;;  %v4211_v13 = vadd.f32 %v4210_v7, %v4122_v8 }
 0x641   : > { %v4894_v36 = vadd.f32 %v4893_v43, %v4751_v40  ;;  %v4932_v39 = vmul.f32 %v4751_v40, %v4527_v46  ;;  %v4300_v49 = vadd.f32 %v4299_v3, %v4211_v13 }
 0x643   : > { %v4963_v15 = vadd.f32 %v4962_v62, %v4932_v39  ;;  %v4368_v56 = vpack.c.bf16 %v4300_v49, %v4300_v49  ;;  %v6163_v17 = vpack.c.bf16 %v4300_v49, %v4298_v25  ;;  %v4866_v25 = vld [vmem:[%s8104_s30] sm:$0x3] }
 0x644   : > { %v4302_v45 = vpop.f32.mrf.mxu3 }
 0x645   : > { %6200 = vst [vmem:[%s8445_s13 + $0x70] sm:$0xff] %v6163_v17   ;;  %v4528_v18 = vunpack.c.l.bf16 %v4368_v56 }
 0x646   : > { %v4213_v28 = vpop.f32.mrf.mxu2 }
 0x647   : > { %v4752_v54 = vmul.f32 %v8903_v50, %v4528_v18  ;;  %v4214_v38 = vadd.f32 %v4213_v28, %v4125_v63 }
 0x649   : > { %v4895_v4 = vadd.f32 %v4894_v36, %v4752_v54  ;;  %v4933_v51 = vmul.f32 %v4752_v54, %v4528_v18  ;;  %v4303_v60 = vadd.f32 %v4302_v45, %v4214_v38 }
 0x64b   : > { %v4964_v42 = vadd.f32 %v4963_v15, %v4933_v51  ;;  %v4369_v20 = vpack.c.bf16 %v4303_v60, %v4303_v60 }
 0x64c   : > { %v4304_v22 = vpop.f32.mrf.mxu3 }
 0x64d   : > { %v4529_v34 = vunpack.c.l.bf16 %v4369_v20 }
 0x64e   : > { %v4215_v23 = vpop.f32.mrf.mxu2 }
 0x64f   : > { %v4753_v19 = vmul.f32 %v8904_v26, %v4529_v34  ;;  %v4216_v44 = vadd.f32 %v4215_v23, %v4127_v32 }
 0x651   : > { %v4896_v57 = vadd.f32 %v4895_v4, %v4753_v19  ;;  %v4934_v30 = vmul.f32 %v4753_v19, %v4529_v34  ;;  %v4305_v12 = vadd.f32 %v4304_v22, %v4216_v44 }
 0x653   : > { %v4965_v55 = vadd.f32 %v4964_v42, %v4934_v30  ;;  %v4370_v14 = vpack.c.bf16 %v4305_v12, %v4305_v12  ;;  %v6168_v16 = vpack.c.bf16 %v4305_v12, %v4303_v60 }
 0x655   : > { %6201 = vst [vmem:[%s8445_s13 + $0x78] sm:$0xff] %v6168_v16   ;;  %v4530_v48 = vunpack.c.l.bf16 %v4370_v14 }
 0x657   : > { %v4754_v59 = vmul.f32 %v8905_v61, %v4530_v48 }
 0x659   : > { %v4897_v10 = vadd.f32 %v4896_v57, %v4754_v59  ;;  %v4935_v29 = vmul.f32 %v4754_v59, %v4530_v48 }
 0x65b   : > { %v4898_v24 = vrot.slane %v4897_v10, 4  ;;  %v4966_v53 = vadd.f32 %v4965_v55, %v4935_v29 }
 0x65d   : > { %v4899_v27 = vadd.f32 %v4898_v24, %v4897_v10  ;;  %v4967_v31 = vrot.slane %v4966_v53, 4 }
 0x65f   : > { %v4900_v52 = vrot.slane %v4899_v27, 2  ;;  %v4968_v47 = vadd.f32 %v4967_v31, %v4966_v53 }
 0x661   : > { %v4901_v21 = vadd.f32 %v4900_v52, %v4899_v27  ;;  %v4969_v9 = vrot.slane %v4968_v47, 2 }
 0x663   : > { %v4902_v2 = vrot.slane %v4901_v21, 1  ;;  %v4970_v43 = vadd.f32 %v4969_v9, %v4968_v47 }
 0x665   : > { %v4971_v1 = vrot.slane %v4970_v43, 1  ;;  %v4903_v0 = vadd.f32 %v4902_v2, %v4901_v21 }
 0x667   : > { %v4972_v62 = vadd.f32 %v4971_v1, %v4970_v43 }
 0x669   : > { %v4973_v58 = vsel %vm4862_vm5, %v4903_v0, %v4972_v62 }
 0x66a   : > { %v4974_v3 = vadd.f32 %v4973_v58, %v4866_v25 }
 0x66c   : > { %4975 = vst [vmem:[%s8104_s30] sm:$0x3] %v4974_v3 }
 0x66d PF: > { %s22_s19 = sadd.s32 1, %s6316_s19   ;;  %s8906_s17 = smov %s6312_s18 }
 0x66e   : > { %p19_p6 = scmp.ge.s32.totalorder %s22_s19, 4   ;;  %s8907_s18 = smov %s8909_s20 }
 0x670   :  { %21 = sbr.rel (!%p19_p6) target bundleno = 2 (0x2), region = 123 }

</bundles_post_ra>
